<compile_context>
chip_gen: v7x
topology: tpu7x:2x2x1
jax: 0.10.0
libtpu: 0.0.40
codegen_flags: <defaults>
</compile_context>

<pallas_src>
import functools

import numpy as np
import jax
import jax.numpy as jnp
from jax.experimental import pallas as pl
from jax.experimental.pallas import tpu as pltpu

KSIZE = 5        # conv kernel size
LANES = 128      # padded input-lane width of the conv kernels
OUT_LANES = 256  # padded output-lane width of the conv kernels


# ----------------------------------------------------------------------------
# Conv kernel: conv + bias + relu as a sum of 5 row-shifted matmuls (no im2col)
# ----------------------------------------------------------------------------
def _conv_rowmm_kernel(x_ref, w_ref, b_ref, o_ref):
    # x_ref: (R, 128) bf16   rows = (image, padded_row), lanes = (cin, padded_col)
    # w_ref: (5, 128, 256) bf16  per-kh band matrices (cin,col) -> (cout,out_col)
    # b_ref: (1, 256) f32
    # o_ref: (R, 256) bf16   lanes = (cout, out_col); relu applied
    x = x_ref[...]
    nout = o_ref.shape[1]
    acc = jnp.dot(x, w_ref[0], preferred_element_type=jnp.float32)
    for kh in range(1, KSIZE):
        part = jnp.dot(x, w_ref[kh], preferred_element_type=jnp.float32)
        # output row i2 needs input row i2 + kh -> shift rows up by kh.
        # (shifted-in garbage only lands on invalid output rows, sliced off outside)
        shifted = jnp.concatenate(
            [part[kh:, :], jnp.zeros((kh, nout), jnp.float32)], axis=0)
        acc = acc + shifted
    o_ref[...] = jnp.maximum(acc + b_ref[...], 0.0).astype(o_ref.dtype)


def conv_rowmm(x_rows, w_k, b_lane, *, rows_per_block):
    total_rows = x_rows.shape[0]
    grid = (total_rows // rows_per_block,)
    return pl.pallas_call(
        _conv_rowmm_kernel,
        out_shape=jax.ShapeDtypeStruct((total_rows, OUT_LANES), jnp.bfloat16),
        grid_spec=pltpu.PrefetchScalarGridSpec(
            num_scalar_prefetch=0,
            grid=grid,
            in_specs=[
                pl.BlockSpec((rows_per_block, LANES), lambda i: (i, 0)),
                # weights / bias: constant block index -> DMA'd once, stay in VMEM
                pl.BlockSpec((KSIZE, LANES, OUT_LANES), lambda i: (0, 0, 0)),
                pl.BlockSpec((1, OUT_LANES), lambda i: (0, 0)),
            ],
            out_specs=pl.BlockSpec((rows_per_block, OUT_LANES), lambda i: (i, 0)),
        ),
        compiler_params=pltpu.CompilerParams(
            dimension_semantics=("parallel",)),
    )(x_rows, w_k, b_lane)


# ----------------------------------------------------------------------------
# Fused linear0 + relu + linear1 + T-step recurrence + classifier kernel
# ----------------------------------------------------------------------------
def _dense_rnn_kernel(f_ref, wl0_ref, bl0_ref, wl1_ref, bl1_ref,
                      wfh_ref, brec_ref, whh_ref, wcls_ref, bcls_ref,
                      out_ref, *, n_steps):
    wl0 = wl0_ref[...]; bl0 = bl0_ref[...]
    wl1 = wl1_ref[...]; bl1 = bl1_ref[...]
    wfh = wfh_ref[...]; brec = brec_ref[...]
    whh = whh_ref[...]
    wcls = wcls_ref[...]; bcls = bcls_ref[...]

    nc = f_ref.shape[1]
    nh = whh.shape[0]
    h = jnp.zeros((nc, nh), jnp.float32)      # hidden state stays in registers
    outs = []
    # T=8: static unroll is fine.  TODO(synk): switch to lax.fori_loop(unroll=True)
    # with pl.ds indexing if T grows large (vreg pressure / compile time).
    for t in range(n_steps):
        x_t = f_ref[t]                                           # (Nc, 784) bf16
        z0 = jnp.dot(x_t, wl0, preferred_element_type=jnp.float32) + bl0
        z0 = jnp.maximum(z0, 0.0)
        f_t = jnp.dot(z0.astype(jnp.bfloat16), wl1,
                      preferred_element_type=jnp.float32) + bl1
        pre = jnp.dot(f_t.astype(jnp.bfloat16), wfh,
                      preferred_element_type=jnp.float32) + brec
        h = jnp.tanh(pre + jnp.dot(h.astype(jnp.bfloat16), whh,
                                   preferred_element_type=jnp.float32))
        outs.append(jnp.dot(h.astype(jnp.bfloat16), wcls,
                            preferred_element_type=jnp.float32) + bcls)
    # single aligned, lane-dense store of all per-step classifier outputs
    out_ref[...] = jnp.stack(outs, axis=0)


def dense_rnn(f3d, p, *, n_chunk):
    t, n, feat = f3d.shape
    c_pad = p["w_cls"].shape[1]
    grid = (n // n_chunk,)
    kernel = functools.partial(_dense_rnn_kernel, n_steps=t)
    return pl.pallas_call(
        kernel,
        out_shape=jax.ShapeDtypeStruct((t, n, c_pad), jnp.float32),
        grid_spec=pltpu.PrefetchScalarGridSpec(
            num_scalar_prefetch=0,
            grid=grid,
            in_specs=[
                pl.BlockSpec((t, n_chunk, feat), lambda i: (0, i, 0)),
                pl.BlockSpec(p["w_l0"].shape, lambda i: (0, 0)),
                pl.BlockSpec(p["b_l0"].shape, lambda i: (0, 0)),
                pl.BlockSpec(p["w_l1"].shape, lambda i: (0, 0)),
                pl.BlockSpec(p["b_l1"].shape, lambda i: (0, 0)),
                pl.BlockSpec(p["w_fh"].shape, lambda i: (0, 0)),
                pl.BlockSpec(p["b_rec"].shape, lambda i: (0, 0)),
                pl.BlockSpec(p["w_hh"].shape, lambda i: (0, 0)),
                pl.BlockSpec(p["w_cls"].shape, lambda i: (0, 0)),
                pl.BlockSpec(p["b_cls"].shape, lambda i: (0, 0)),
            ],
            out_specs=pl.BlockSpec((t, n_chunk, c_pad), lambda i: (0, i, 0)),
        ),
        compiler_params=pltpu.CompilerParams(
            dimension_semantics=("parallel",)),
    )(f3d, p["w_l0"], p["b_l0"], p["w_l1"], p["b_l1"],
      p["w_fh"], p["b_rec"], p["w_hh"], p["w_cls"], p["b_cls"])


# ----------------------------------------------------------------------------
# Cheap XLA glue (pool / pad / relayout on <= 32 KB-per-image tensors)
# ----------------------------------------------------------------------------
def maxpool2x2(x):
    a = jnp.maximum(x[..., 0::2, 0::2], x[..., 0::2, 1::2])
    b = jnp.maximum(x[..., 1::2, 0::2], x[..., 1::2, 1::2])
    return jnp.maximum(a, b)


def rnn_forward(data, params, n_units, n_classes, *, imgs_per_block=8):
    """PyTorch RNN.forward.  data: (N, T, 784) -> (N, T, n_classes)."""
    n, t, _ = data.shape
    tn = t * n
    # (t, n) image order so the RNN stage consumes a (T, N, feat) layout.
    imgs = data.transpose(1, 0, 2).reshape(tn, 28, 28)
    tn_pad = -(-tn // imgs_per_block) * imgs_per_block
    if tn_pad != tn:
        imgs = jnp.pad(imgs, ((0, tn_pad - tn), (0, 0), (0, 0)))

    # ---- conv0 + relu (Pallas): rows = (image, padded row), lanes = padded col
    x0 = jnp.pad(imgs, ((0, 0), (2, 2), (2, 2)))                   # (TNp, 32, 32)
    x0 = x0.reshape(tn_pad * 32, 32)
    x0 = jnp.pad(x0, ((0, 0), (0, LANES - 32))).astype(jnp.bfloat16)
    y0 = conv_rowmm(x0, params["w0_k"], params["b0_lane"],
                    rows_per_block=imgs_per_block * 32)            # (TNp*32, 256)

    # ---- pool0 + relayout for conv1 (tiny; left to XLA)
    y0 = y0.reshape(tn_pad, 32, OUT_LANES)[:, :28, :6 * 28]
    y0 = y0.reshape(tn_pad, 28, 6, 28).transpose(0, 2, 1, 3)       # (TNp, 6, 28, 28)
    y0 = maxpool2x2(y0)                                            # (TNp, 6, 14, 14)
    x1 = jnp.pad(y0, ((0, 0), (0, 0), (2, 2), (2, 2)))             # (TNp, 6, 18, 18)
    x1 = x1.transpose(0, 2, 1, 3).reshape(tn_pad * 18, 6 * 18)     # lanes = (c, j)
    x1 = jnp.pad(x1, ((0, 0), (0, LANES - 6 * 18))).astype(jnp.bfloat16)

    # ---- conv1 + relu (Pallas)
    y1 = conv_rowmm(x1, params["w1_k"], params["b1_lane"],
                    rows_per_block=imgs_per_block * 18)            # (TNp*18, 256)

    # ---- pool1 + NCHW flatten (matches torch .view(N, -1))
    y1 = y1.reshape(tn_pad, 18, OUT_LANES)[:, :14, :16 * 14]
    y1 = y1.reshape(tn_pad, 14, 16, 14).transpose(0, 2, 1, 3)      # (TNp, 16, 14, 14)
    y1 = maxpool2x2(y1)                                            # (TNp, 16, 7, 7)
    flat = y1.reshape(tn_pad, 16 * 7 * 7)[:tn]                     # (TN, 784) bf16

    # TODO(synk): the n_units == 0 branch of RNN.forward (output = raw CNN logits)
    # is not wired up; this script always runs with n_units > 0.
    f3d = flat.reshape(t, n, 16 * 7 * 7)
    n_chunk = 8 if n % 8 == 0 else n          # N-chunk grid once batch grows
    out = dense_rnn(f3d, params, n_chunk=n_chunk)                  # (T, N, 128)
    return out[:, :, :n_classes].transpose(1, 0, 2)                # (N, T, n_classes)


# ----------------------------------------------------------------------------
# Parameter construction (PyTorch layouts, repacked for the kernels)
# ----------------------------------------------------------------------------
def _build_conv_row_matrices(w, b, *, w_in_pad, w_out, n_cin):
    """Pack a (cout, cin, 5, 5) conv weight into 5 per-kh band matrices.

    wk[kh, cin*w_in_pad + j, cout*w_out + j2] = w[cout, cin, kh, j - j2]
    so that  out[(m,i2), (cout,j2)] = sum_kh (x @ wk[kh])[(m, i2+kh), (cout,j2)].
    """
    w_np = np.asarray(w, np.float32)
    b_np = np.asarray(b, np.float32)
    cout = w_np.shape[0]
    wk = np.zeros((KSIZE, LANES, OUT_LANES), np.float32)
    for kh in range(KSIZE):
        for c in range(n_cin):
            for kw in range(KSIZE):
                for j2 in range(w_out):
                    j = j2 + kw
                    wk[kh, c * w_in_pad + j,
                       np.arange(cout) * w_out + j2] = w_np[:, c, kh, kw]
    b_lane = np.zeros((1, OUT_LANES), np.float32)
    for co in range(cout):
        b_lane[0, co * w_out:(co + 1) * w_out] = b_np[co]
    return jnp.asarray(wk, jnp.bfloat16), jnp.asarray(b_lane, jnp.float32)


def init_params(key, n_units, n_classes):
    """Deterministic synthetic parameters (PyTorch default-init style)."""
    ks = jax.random.split(key, 14)

    def u(k, shape, fan_in):
        bound = 1.0 / np.sqrt(float(fan_in))
        return jax.random.uniform(k, shape, jnp.float32, -bound, bound)

    w0 = u(ks[0], (6, 1, 5, 5), 25);     b0 = u(ks[1], (6,), 25)
    w1 = u(ks[2], (16, 6, 5, 5), 150);   b1 = u(ks[3], (16,), 150)
    wl0 = u(ks[4], (84, 784), 784);      bl0 = u(ks[5], (84,), 784)
    wl1 = u(ks[6], (10, 84), 84);        bl1 = u(ks[7], (10,), 84)
    wfh = u(ks[8], (n_units, 10), 10);   bfh = u(ks[9], (n_units,), 10)
    whh = u(ks[10], (n_units, n_units), n_units)
    bhh = u(ks[11], (n_units,), n_units)
    wc = u(ks[12], (n_classes, n_units), n_units)
    bc = u(ks[13], (n_classes,), n_units)

    w0_k, b0_lane = _build_conv_row_matrices(w0, b0, w_in_pad=32, w_out=28, n_cin=1)
    w1_k, b1_lane = _build_conv_row_matrices(w1, b1, w_in_pad=18, w_out=14, n_cin=6)

    h_pad = int(np.ceil(max(n_units, 1) / 128) * 128)
    c_pad = int(np.ceil(n_classes / 128) * 128)

    def pad2(a, r, c):
        out = np.zeros((r, c), np.float32)
        a = np.asarray(a, np.float32)
        out[:a.shape[0], :a.shape[1]] = a
        return out

    def pad_row(v, c):
        out = np.zeros((1, c), np.float32)
        v = np.asarray(v, np.float32)
        out[0, :v.shape[0]] = v
        return out

    # Linear/recurrent weights: PyTorch (out,in) -> (in,out), zero-padded to
    # 128-lane multiples so every matmul/store in the fused kernel is lane-dense
    # (exact: padded rows/cols are zero end-to-end).  b_fh + b_hh folded (exact).
    return {
        "w0_k": w0_k, "b0_lane": b0_lane,
        "w1_k": w1_k, "b1_lane": b1_lane,
        "w_l0": jnp.asarray(pad2(np.asarray(wl0).T, 784, 128), jnp.bfloat16),
        "b_l0": jnp.asarray(pad_row(bl0, 128), jnp.float32),
        "w_l1": jnp.asarray(pad2(np.asarray(wl1).T, 128, 128), jnp.bfloat16),
        "b_l1": jnp.asarray(pad_row(bl1, 128), jnp.float32),
        "w_fh": jnp.asarray(pad2(np.asarray(wfh).T, 128, h_pad), jnp.bfloat16),
        "b_rec": jnp.asarray(pad_row(np.asarray(bfh) + np.asarray(bhh), h_pad),
                             jnp.float32),
        "w_hh": jnp.asarray(pad2(np.asarray(whh).T, h_pad, h_pad), jnp.bfloat16),
        "w_cls": jnp.asarray(pad2(np.asarray(wc).T, h_pad, c_pad), jnp.bfloat16),
        "b_cls": jnp.asarray(pad_row(bc, c_pad), jnp.float32),
    }


if __name__ == "__main__":
    key = jax.random.PRNGKey(0)
    kp, kd = jax.random.split(key)

    n_units, n_classes = 32, 10   # RNN(n_units=32, n_classes=10, cnn_path=None, cuda=False)
    N, T = 2, 8
    params = init_params(kp, n_units, n_classes)
    data = jax.random.normal(kd, (N, T, 28 * 28), jnp.float32)

    fwd = jax.jit(functools.partial(rnn_forward, n_units=n_units,
                                    n_classes=n_classes))
    out = jax.block_until_ready(fwd(data, params))
    assert out.shape == (N, T, n_classes)
    assert out.dtype == jnp.float32
    print("KERNEL_OK")
</pallas_src>

<mosaic_0001>
module attributes {stable_mosaic.version = 11 : i64} {
  func.func @_conv_rowmm_kernel(%arg0: i32, %arg1: memref<256x128xbf16, #tpu.memory_space<vmem>>, %arg2: memref<5x128x256xbf16, #tpu.memory_space<vmem>>, %arg3: memref<1x256xf32, #tpu.memory_space<vmem>>, %arg4: memref<256x256xbf16, #tpu.memory_space<vmem>>) attributes {dimension_semantics = [#tpu.dimension_semantics<parallel>], iteration_bounds = array<i64: 2>, scalar_prefetch = 0 : i64, scratch_operands = 0 : i64, tpu.core_type = #tpu.core_type<tc>, window_params = [{transform_indices = @transform_0, window_bounds = array<i64: 256, 128>}, {pipeline_mode = #tpu.pipeline_mode<synchronous>, transform_indices = @transform_1, window_bounds = array<i64: 5, 128, 256>}, {pipeline_mode = #tpu.pipeline_mode<synchronous>, transform_indices = @transform_2, window_bounds = array<i64: 1, 256>}, {transform_indices = @transform_3, window_bounds = array<i64: 256, 256>}]} {
    %c0 = arith.constant 0 : index
    %c0_0 = arith.constant 0 : index
    %0 = vector.load %arg1[%c0, %c0_0] : memref<256x128xbf16, #tpu.memory_space<vmem>>, vector<256x128xbf16>
    %c0_1 = arith.constant 0 : index
    %c0_2 = arith.constant 0 : index
    %c0_3 = arith.constant 0 : index
    %1 = vector.load %arg2[%c0_1, %c0_2, %c0_3] : memref<5x128x256xbf16, #tpu.memory_space<vmem>>, vector<1x128x256xbf16>
    %2 = vector.shape_cast %1 : vector<1x128x256xbf16> to vector<128x256xbf16>
    %cst = arith.constant dense<0.000000e+00> : vector<256x256xf32>
    %3 = tpu.matmul %0, %2, %cst {dimension_numbers = #tpu.dot_dimension_numbers<[1], [0], [0], [1], [0, 0, 1, 1], [], []>} : vector<256x128xbf16>, vector<128x256xbf16>, vector<256x256xf32> -> vector<256x256xf32>
    %c1 = arith.constant 1 : index
    %c0_4 = arith.constant 0 : index
    %c0_5 = arith.constant 0 : index
    %4 = vector.load %arg2[%c1, %c0_4, %c0_5] : memref<5x128x256xbf16, #tpu.memory_space<vmem>>, vector<1x128x256xbf16>
    %5 = vector.shape_cast %4 : vector<1x128x256xbf16> to vector<128x256xbf16>
    %cst_6 = arith.constant dense<0.000000e+00> : vector<256x256xf32>
    %6 = tpu.matmul %0, %5, %cst_6 {dimension_numbers = #tpu.dot_dimension_numbers<[1], [0], [0], [1], [0, 0, 1, 1], [], []>} : vector<256x128xbf16>, vector<128x256xbf16>, vector<256x256xf32> -> vector<256x256xf32>
    %7 = vector.extract_strided_slice %6 {offsets = [1, 0], sizes = [255, 256], strides = [1, 1]} : vector<256x256xf32> to vector<255x256xf32>
    %cst_7 = arith.constant 0.000000e+00 : f32
    %8 = vector.broadcast %cst_7 : f32 to vector<1x256xf32>
    %9 = tpu.concatenate %7, %8 in 0 : vector<255x256xf32>, vector<1x256xf32> -> vector<256x256xf32>
    %10 = arith.addf %3, %9 : vector<256x256xf32>
    %c2 = arith.constant 2 : index
    %c0_8 = arith.constant 0 : index
    %c0_9 = arith.constant 0 : index
    %11 = vector.load %arg2[%c2, %c0_8, %c0_9] : memref<5x128x256xbf16, #tpu.memory_space<vmem>>, vector<1x128x256xbf16>
    %12 = vector.shape_cast %11 : vector<1x128x256xbf16> to vector<128x256xbf16>
    %cst_10 = arith.constant dense<0.000000e+00> : vector<256x256xf32>
    %13 = tpu.matmul %0, %12, %cst_10 {dimension_numbers = #tpu.dot_dimension_numbers<[1], [0], [0], [1], [0, 0, 1, 1], [], []>} : vector<256x128xbf16>, vector<128x256xbf16>, vector<256x256xf32> -> vector<256x256xf32>
    %14 = vector.extract_strided_slice %13 {offsets = [2, 0], sizes = [254, 256], strides = [1, 1]} : vector<256x256xf32> to vector<254x256xf32>
    %cst_11 = arith.constant 0.000000e+00 : f32
    %15 = vector.broadcast %cst_11 : f32 to vector<2x256xf32>
    %16 = tpu.concatenate %14, %15 in 0 : vector<254x256xf32>, vector<2x256xf32> -> vector<256x256xf32>
    %17 = arith.addf %10, %16 : vector<256x256xf32>
    %c3 = arith.constant 3 : index
    %c0_12 = arith.constant 0 : index
    %c0_13 = arith.constant 0 : index
    %18 = vector.load %arg2[%c3, %c0_12, %c0_13] : memref<5x128x256xbf16, #tpu.memory_space<vmem>>, vector<1x128x256xbf16>
    %19 = vector.shape_cast %18 : vector<1x128x256xbf16> to vector<128x256xbf16>
    %cst_14 = arith.constant dense<0.000000e+00> : vector<256x256xf32>
    %20 = tpu.matmul %0, %19, %cst_14 {dimension_numbers = #tpu.dot_dimension_numbers<[1], [0], [0], [1], [0, 0, 1, 1], [], []>} : vector<256x128xbf16>, vector<128x256xbf16>, vector<256x256xf32> -> vector<256x256xf32>
    %21 = vector.extract_strided_slice %20 {offsets = [3, 0], sizes = [253, 256], strides = [1, 1]} : vector<256x256xf32> to vector<253x256xf32>
    %cst_15 = arith.constant 0.000000e+00 : f32
    %22 = vector.broadcast %cst_15 : f32 to vector<3x256xf32>
    %23 = tpu.concatenate %21, %22 in 0 : vector<253x256xf32>, vector<3x256xf32> -> vector<256x256xf32>
    %24 = arith.addf %17, %23 : vector<256x256xf32>
    %c4 = arith.constant 4 : index
    %c0_16 = arith.constant 0 : index
    %c0_17 = arith.constant 0 : index
    %25 = vector.load %arg2[%c4, %c0_16, %c0_17] : memref<5x128x256xbf16, #tpu.memory_space<vmem>>, vector<1x128x256xbf16>
    %26 = vector.shape_cast %25 : vector<1x128x256xbf16> to vector<128x256xbf16>
    %cst_18 = arith.constant dense<0.000000e+00> : vector<256x256xf32>
    %27 = tpu.matmul %0, %26, %cst_18 {dimension_numbers = #tpu.dot_dimension_numbers<[1], [0], [0], [1], [0, 0, 1, 1], [], []>} : vector<256x128xbf16>, vector<128x256xbf16>, vector<256x256xf32> -> vector<256x256xf32>
    %28 = vector.extract_strided_slice %27 {offsets = [4, 0], sizes = [252, 256], strides = [1, 1]} : vector<256x256xf32> to vector<252x256xf32>
    %cst_19 = arith.constant 0.000000e+00 : f32
    %29 = vector.broadcast %cst_19 : f32 to vector<4x256xf32>
    %30 = tpu.concatenate %28, %29 in 0 : vector<252x256xf32>, vector<4x256xf32> -> vector<256x256xf32>
    %31 = arith.addf %24, %30 : vector<256x256xf32>
    %c0_20 = arith.constant 0 : index
    %c0_21 = arith.constant 0 : index
    %32 = vector.load %arg3[%c0_20, %c0_21] : memref<1x256xf32, #tpu.memory_space<vmem>>, vector<1x256xf32>
    %33 = vector.broadcast %32 : vector<1x256xf32> to vector<256x256xf32>
    %34 = arith.addf %31, %33 : vector<256x256xf32>
    %cst_22 = arith.constant 0.000000e+00 : f32
    %35 = vector.broadcast %cst_22 : f32 to vector<256x256xf32>
    %36 = arith.maximumf %34, %35 : vector<256x256xf32>
    %37 = arith.truncf %36 : vector<256x256xf32> to vector<256x256xbf16>
    %c0_23 = arith.constant 0 : index
    %c0_24 = arith.constant 0 : index
    %38 = vector.load %arg4[%c0_23, %c0_24] : memref<256x256xbf16, #tpu.memory_space<vmem>>, vector<256x256xbf16>
    tpu.vector_store %arg4[%c0_23, %c0_24], %37 {strides = array<i32>} : memref<256x256xbf16, #tpu.memory_space<vmem>>, vector<256x256xbf16>,
    return
  }
  func.func @transform_0(%arg0: i32) -> (i32, i32) {
    %c0_i32 = arith.constant 0 : i32
    %c0_i32_0 = arith.constant 0 : i32
    return %arg0, %c0_i32 : i32, i32
  }
  func.func @transform_1(%arg0: i32) -> (i32, i32, i32) {
    %c0_i32 = arith.constant 0 : i32
    %c0_i32_0 = arith.constant 0 : i32
    %c0_i32_1 = arith.constant 0 : i32
    %c0_i32_2 = arith.constant 0 : i32
    return %c0_i32, %c0_i32_0, %c0_i32_1 : i32, i32, i32
  }
  func.func @transform_2(%arg0: i32) -> (i32, i32) {
    %c0_i32 = arith.constant 0 : i32
    %c0_i32_0 = arith.constant 0 : i32
    %c0_i32_1 = arith.constant 0 : i32
    return %c0_i32, %c0_i32_0 : i32, i32
  }
  func.func @transform_3(%arg0: i32) -> (i32, i32) {
    %c0_i32 = arith.constant 0 : i32
    %c0_i32_0 = arith.constant 0 : i32
    return %arg0, %c0_i32 : i32, i32
  }
}

module attributes {stable_mosaic.version = 11 : i64} {
  func.func @_conv_rowmm_kernel(%arg0: i32, %arg1: memref<144x128xbf16, #tpu.memory_space<vmem>>, %arg2: memref<5x128x256xbf16, #tpu.memory_space<vmem>>, %arg3: memref<1x256xf32, #tpu.memory_space<vmem>>, %arg4: memref<144x256xbf16, #tpu.memory_space<vmem>>) attributes {dimension_semantics = [#tpu.dimension_semantics<parallel>], iteration_bounds = array<i64: 2>, scalar_prefetch = 0 : i64, scratch_operands = 0 : i64, tpu.core_type = #tpu.core_type<tc>, window_params = [{transform_indices = @transform_0, window_bounds = array<i64: 144, 128>}, {pipeline_mode = #tpu.pipeline_mode<synchronous>, transform_indices = @transform_1, window_bounds = array<i64: 5, 128, 256>}, {pipeline_mode = #tpu.pipeline_mode<synchronous>, transform_indices = @transform_2, window_bounds = array<i64: 1, 256>}, {transform_indices = @transform_3, window_bounds = array<i64: 144, 256>}]} {
    %c0 = arith.constant 0 : index
    %c0_0 = arith.constant 0 : index
    %0 = vector.load %arg1[%c0, %c0_0] : memref<144x128xbf16, #tpu.memory_space<vmem>>, vector<144x128xbf16>
    %c0_1 = arith.constant 0 : index
    %c0_2 = arith.constant 0 : index
    %c0_3 = arith.constant 0 : index
    %1 = vector.load %arg2[%c0_1, %c0_2, %c0_3] : memref<5x128x256xbf16, #tpu.memory_space<vmem>>, vector<1x128x256xbf16>
    %2 = vector.shape_cast %1 : vector<1x128x256xbf16> to vector<128x256xbf16>
    %cst = arith.constant dense<0.000000e+00> : vector<144x256xf32>
    %3 = tpu.matmul %0, %2, %cst {dimension_numbers = #tpu.dot_dimension_numbers<[1], [0], [0], [1], [0, 0, 1, 1], [], []>} : vector<144x128xbf16>, vector<128x256xbf16>, vector<144x256xf32> -> vector<144x256xf32>
    %c1 = arith.constant 1 : index
    %c0_4 = arith.constant 0 : index
    %c0_5 = arith.constant 0 : index
    %4 = vector.load %arg2[%c1, %c0_4, %c0_5] : memref<5x128x256xbf16, #tpu.memory_space<vmem>>, vector<1x128x256xbf16>
    %5 = vector.shape_cast %4 : vector<1x128x256xbf16> to vector<128x256xbf16>
    %cst_6 = arith.constant dense<0.000000e+00> : vector<144x256xf32>
    %6 = tpu.matmul %0, %5, %cst_6 {dimension_numbers = #tpu.dot_dimension_numbers<[1], [0], [0], [1], [0, 0, 1, 1], [], []>} : vector<144x128xbf16>, vector<128x256xbf16>, vector<144x256xf32> -> vector<144x256xf32>
    %7 = vector.extract_strided_slice %6 {offsets = [1, 0], sizes = [143, 256], strides = [1, 1]} : vector<144x256xf32> to vector<143x256xf32>
    %cst_7 = arith.constant 0.000000e+00 : f32
    %8 = vector.broadcast %cst_7 : f32 to vector<1x256xf32>
    %9 = tpu.concatenate %7, %8 in 0 : vector<143x256xf32>, vector<1x256xf32> -> vector<144x256xf32>
    %10 = arith.addf %3, %9 : vector<144x256xf32>
    %c2 = arith.constant 2 : index
    %c0_8 = arith.constant 0 : index
    %c0_9 = arith.constant 0 : index
    %11 = vector.load %arg2[%c2, %c0_8, %c0_9] : memref<5x128x256xbf16, #tpu.memory_space<vmem>>, vector<1x128x256xbf16>
    %12 = vector.shape_cast %11 : vector<1x128x256xbf16> to vector<128x256xbf16>
    %cst_10 = arith.constant dense<0.000000e+00> : vector<144x256xf32>
    %13 = tpu.matmul %0, %12, %cst_10 {dimension_numbers = #tpu.dot_dimension_numbers<[1], [0], [0], [1], [0, 0, 1, 1], [], []>} : vector<144x128xbf16>, vector<128x256xbf16>, vector<144x256xf32> -> vector<144x256xf32>
    %14 = vector.extract_strided_slice %13 {offsets = [2, 0], sizes = [142, 256], strides = [1, 1]} : vector<144x256xf32> to vector<142x256xf32>
    %cst_11 = arith.constant 0.000000e+00 : f32
    %15 = vector.broadcast %cst_11 : f32 to vector<2x256xf32>
    %16 = tpu.concatenate %14, %15 in 0 : vector<142x256xf32>, vector<2x256xf32> -> vector<144x256xf32>
    %17 = arith.addf %10, %16 : vector<144x256xf32>
    %c3 = arith.constant 3 : index
    %c0_12 = arith.constant 0 : index
    %c0_13 = arith.constant 0 : index
    %18 = vector.load %arg2[%c3, %c0_12, %c0_13] : memref<5x128x256xbf16, #tpu.memory_space<vmem>>, vector<1x128x256xbf16>
    %19 = vector.shape_cast %18 : vector<1x128x256xbf16> to vector<128x256xbf16>
    %cst_14 = arith.constant dense<0.000000e+00> : vector<144x256xf32>
    %20 = tpu.matmul %0, %19, %cst_14 {dimension_numbers = #tpu.dot_dimension_numbers<[1], [0], [0], [1], [0, 0, 1, 1], [], []>} : vector<144x128xbf16>, vector<128x256xbf16>, vector<144x256xf32> -> vector<144x256xf32>
    %21 = vector.extract_strided_slice %20 {offsets = [3, 0], sizes = [141, 256], strides = [1, 1]} : vector<144x256xf32> to vector<141x256xf32>
    %cst_15 = arith.constant 0.000000e+00 : f32
    %22 = vector.broadcast %cst_15 : f32 to vector<3x256xf32>
    %23 = tpu.concatenate %21, %22 in 0 : vector<141x256xf32>, vector<3x256xf32> -> vector<144x256xf32>
    %24 = arith.addf %17, %23 : vector<144x256xf32>
    %c4 = arith.constant 4 : index
    %c0_16 = arith.constant 0 : index
    %c0_17 = arith.constant 0 : index
    %25 = vector.load %arg2[%c4, %c0_16, %c0_17] : memref<5x128x256xbf16, #tpu.memory_space<vmem>>, vector<1x128x256xbf16>
    %26 = vector.shape_cast %25 : vector<1x128x256xbf16> to vector<128x256xbf16>
    %cst_18 = arith.constant dense<0.000000e+00> : vector<144x256xf32>
    %27 = tpu.matmul %0, %26, %cst_18 {dimension_numbers = #tpu.dot_dimension_numbers<[1], [0], [0], [1], [0, 0, 1, 1], [], []>} : vector<144x128xbf16>, vector<128x256xbf16>, vector<144x256xf32> -> vector<144x256xf32>
    %28 = vector.extract_strided_slice %27 {offsets = [4, 0], sizes = [140, 256], strides = [1, 1]} : vector<144x256xf32> to vector<140x256xf32>
    %cst_19 = arith.constant 0.000000e+00 : f32
    %29 = vector.broadcast %cst_19 : f32 to vector<4x256xf32>
    %30 = tpu.concatenate %28, %29 in 0 : vector<140x256xf32>, vector<4x256xf32> -> vector<144x256xf32>
    %31 = arith.addf %24, %30 : vector<144x256xf32>
    %c0_20 = arith.constant 0 : index
    %c0_21 = arith.constant 0 : index
    %32 = vector.load %arg3[%c0_20, %c0_21] : memref<1x256xf32, #tpu.memory_space<vmem>>, vector<1x256xf32>
    %33 = vector.broadcast %32 : vector<1x256xf32> to vector<144x256xf32>
    %34 = arith.addf %31, %33 : vector<144x256xf32>
    %cst_22 = arith.constant 0.000000e+00 : f32
    %35 = vector.broadcast %cst_22 : f32 to vector<144x256xf32>
    %36 = arith.maximumf %34, %35 : vector<144x256xf32>
    %37 = arith.truncf %36 : vector<144x256xf32> to vector<144x256xbf16>
    %c0_23 = arith.constant 0 : index
    %c0_24 = arith.constant 0 : index
    %38 = vector.load %arg4[%c0_23, %c0_24] : memref<144x256xbf16, #tpu.memory_space<vmem>>, vector<144x256xbf16>
    tpu.vector_store %arg4[%c0_23, %c0_24], %37 {strides = array<i32>} : memref<144x256xbf16, #tpu.memory_space<vmem>>, vector<144x256xbf16>,
    return
  }
  func.func @transform_0(%arg0: i32) -> (i32, i32) {
    %c0_i32 = arith.constant 0 : i32
    %c0_i32_0 = arith.constant 0 : i32
    return %arg0, %c0_i32 : i32, i32
  }
  func.func @transform_1(%arg0: i32) -> (i32, i32, i32) {
    %c0_i32 = arith.constant 0 : i32
    %c0_i32_0 = arith.constant 0 : i32
    %c0_i32_1 = arith.constant 0 : i32
    %c0_i32_2 = arith.constant 0 : i32
    return %c0_i32, %c0_i32_0, %c0_i32_1 : i32, i32, i32
  }
  func.func @transform_2(%arg0: i32) -> (i32, i32) {
    %c0_i32 = arith.constant 0 : i32
    %c0_i32_0 = arith.constant 0 : i32
    %c0_i32_1 = arith.constant 0 : i32
    return %c0_i32, %c0_i32_0 : i32, i32
  }
  func.func @transform_3(%arg0: i32) -> (i32, i32) {
    %c0_i32 = arith.constant 0 : i32
    %c0_i32_0 = arith.constant 0 : i32
    return %arg0, %c0_i32 : i32, i32
  }
}

module attributes {stable_mosaic.version = 11 : i64} {
  func.func @_dense_rnn_kernel(%arg0: i32, %arg1: memref<8x2x784xbf16, #tpu.memory_space<vmem>>, %arg2: memref<784x128xbf16, #tpu.memory_space<vmem>>, %arg3: memref<1x128xf32, #tpu.memory_space<vmem>>, %arg4: memref<128x128xbf16, #tpu.memory_space<vmem>>, %arg5: memref<1x128xf32, #tpu.memory_space<vmem>>, %arg6: memref<128x128xbf16, #tpu.memory_space<vmem>>, %arg7: memref<1x128xf32, #tpu.memory_space<vmem>>, %arg8: memref<128x128xbf16, #tpu.memory_space<vmem>>, %arg9: memref<128x128xbf16, #tpu.memory_space<vmem>>, %arg10: memref<1x128xf32, #tpu.memory_space<vmem>>, %arg11: memref<8x2x128xf32, #tpu.memory_space<vmem>>) attributes {dimension_semantics = [#tpu.dimension_semantics<parallel>], iteration_bounds = array<i64: 1>, scalar_prefetch = 0 : i64, scratch_operands = 0 : i64, tpu.core_type = #tpu.core_type<tc>, window_params = [{transform_indices = @transform_0, window_bounds = array<i64: 8, 2, 784>}, {pipeline_mode = #tpu.pipeline_mode<synchronous>, transform_indices = @transform_1, window_bounds = array<i64: 784, 128>}, {pipeline_mode = #tpu.pipeline_mode<synchronous>, transform_indices = @transform_2, window_bounds = array<i64: 1, 128>}, {pipeline_mode = #tpu.pipeline_mode<synchronous>, transform_indices = @transform_3, window_bounds = array<i64: 128, 128>}, {pipeline_mode = #tpu.pipeline_mode<synchronous>, transform_indices = @transform_4, window_bounds = array<i64: 1, 128>}, {pipeline_mode = #tpu.pipeline_mode<synchronous>, transform_indices = @transform_5, window_bounds = array<i64: 128, 128>}, {pipeline_mode = #tpu.pipeline_mode<synchronous>, transform_indices = @transform_6, window_bounds = array<i64: 1, 128>}, {pipeline_mode = #tpu.pipeline_mode<synchronous>, transform_indices = @transform_7, window_bounds = array<i64: 128, 128>}, {pipeline_mode = #tpu.pipeline_mode<synchronous>, transform_indices = @transform_8, window_bounds = array<i64: 128, 128>}, {pipeline_mode = #tpu.pipeline_mode<synchronous>, transform_indices = @transform_9, window_bounds = array<i64: 1, 128>}, {transform_indices = @transform_10, window_bounds = array<i64: 8, 2, 128>}]} {
    %c0 = arith.constant 0 : index
    %c0_0 = arith.constant 0 : index
    %0 = vector.load %arg2[%c0, %c0_0] : memref<784x128xbf16, #tpu.memory_space<vmem>>, vector<784x128xbf16>
    %c0_1 = arith.constant 0 : index
    %c0_2 = arith.constant 0 : index
    %1 = vector.load %arg3[%c0_1, %c0_2] : memref<1x128xf32, #tpu.memory_space<vmem>>, vector<1x128xf32>
    %c0_3 = arith.constant 0 : index
    %c0_4 = arith.constant 0 : index
    %2 = vector.load %arg4[%c0_3, %c0_4] : memref<128x128xbf16, #tpu.memory_space<vmem>>, vector<128x128xbf16>
    %c0_5 = arith.constant 0 : index
    %c0_6 = arith.constant 0 : index
    %3 = vector.load %arg5[%c0_5, %c0_6] : memref<1x128xf32, #tpu.memory_space<vmem>>, vector<1x128xf32>
    %c0_7 = arith.constant 0 : index
    %c0_8 = arith.constant 0 : index
    %4 = vector.load %arg6[%c0_7, %c0_8] : memref<128x128xbf16, #tpu.memory_space<vmem>>, vector<128x128xbf16>
    %c0_9 = arith.constant 0 : index
    %c0_10 = arith.constant 0 : index
    %5 = vector.load %arg7[%c0_9, %c0_10] : memref<1x128xf32, #tpu.memory_space<vmem>>, vector<1x128xf32>
    %c0_11 = arith.constant 0 : index
    %c0_12 = arith.constant 0 : index
    %6 = vector.load %arg8[%c0_11, %c0_12] : memref<128x128xbf16, #tpu.memory_space<vmem>>, vector<128x128xbf16>
    %c0_13 = arith.constant 0 : index
    %c0_14 = arith.constant 0 : index
    %7 = vector.load %arg9[%c0_13, %c0_14] : memref<128x128xbf16, #tpu.memory_space<vmem>>, vector<128x128xbf16>
    %c0_15 = arith.constant 0 : index
    %c0_16 = arith.constant 0 : index
    %8 = vector.load %arg10[%c0_15, %c0_16] : memref<1x128xf32, #tpu.memory_space<vmem>>, vector<1x128xf32>
    %cst = arith.constant 0.000000e+00 : f32
    %9 = vector.broadcast %cst : f32 to vector<2x128xf32>
    %c0_17 = arith.constant 0 : index
    %c0_18 = arith.constant 0 : index
    %c0_19 = arith.constant 0 : index
    %10 = vector.load %arg1[%c0_17, %c0_18, %c0_19] : memref<8x2x784xbf16, #tpu.memory_space<vmem>>, vector<1x2x784xbf16>
    %11 = vector.shape_cast %10 : vector<1x2x784xbf16> to vector<2x784xbf16>
    %cst_20 = arith.constant dense<0.000000e+00> : vector<2x128xf32>
    %12 = tpu.matmul %11, %0, %cst_20 {dimension_numbers = #tpu.dot_dimension_numbers<[1], [0], [0], [1], [0, 0, 1, 1], [], []>} : vector<2x784xbf16>, vector<784x128xbf16>, vector<2x128xf32> -> vector<2x128xf32>
    %13 = vector.broadcast %1 : vector<1x128xf32> to vector<2x128xf32>
    %14 = arith.addf %12, %13 : vector<2x128xf32>
    %cst_21 = arith.constant 0.000000e+00 : f32
    %15 = vector.broadcast %cst_21 : f32 to vector<2x128xf32>
    %16 = arith.maximumf %14, %15 : vector<2x128xf32>
    %17 = arith.truncf %16 : vector<2x128xf32> to vector<2x128xbf16>
    %cst_22 = arith.constant dense<0.000000e+00> : vector<2x128xf32>
    %18 = tpu.matmul %17, %2, %cst_22 {dimension_numbers = #tpu.dot_dimension_numbers<[1], [0], [0], [1], [0, 0, 1, 1], [], []>} : vector<2x128xbf16>, vector<128x128xbf16>, vector<2x128xf32> -> vector<2x128xf32>
    %19 = vector.broadcast %3 : vector<1x128xf32> to vector<2x128xf32>
    %20 = arith.addf %18, %19 : vector<2x128xf32>
    %21 = arith.truncf %20 : vector<2x128xf32> to vector<2x128xbf16>
    %cst_23 = arith.constant dense<0.000000e+00> : vector<2x128xf32>
    %22 = tpu.matmul %21, %4, %cst_23 {dimension_numbers = #tpu.dot_dimension_numbers<[1], [0], [0], [1], [0, 0, 1, 1], [], []>} : vector<2x128xbf16>, vector<128x128xbf16>, vector<2x128xf32> -> vector<2x128xf32>
    %23 = vector.broadcast %5 : vector<1x128xf32> to vector<2x128xf32>
    %24 = arith.addf %22, %23 : vector<2x128xf32>
    %25 = arith.truncf %9 : vector<2x128xf32> to vector<2x128xbf16>
    %cst_24 = arith.constant dense<0.000000e+00> : vector<2x128xf32>
    %26 = tpu.matmul %25, %6, %cst_24 {dimension_numbers = #tpu.dot_dimension_numbers<[1], [0], [0], [1], [0, 0, 1, 1], [], []>} : vector<2x128xbf16>, vector<128x128xbf16>, vector<2x128xf32> -> vector<2x128xf32>
    %27 = arith.addf %24, %26 : vector<2x128xf32>
    %28 = math.tanh %27 : vector<2x128xf32>
    %29 = arith.truncf %28 : vector<2x128xf32> to vector<2x128xbf16>
    %cst_25 = arith.constant dense<0.000000e+00> : vector<2x128xf32>
    %30 = tpu.matmul %29, %7, %cst_25 {dimension_numbers = #tpu.dot_dimension_numbers<[1], [0], [0], [1], [0, 0, 1, 1], [], []>} : vector<2x128xbf16>, vector<128x128xbf16>, vector<2x128xf32> -> vector<2x128xf32>
    %31 = vector.broadcast %8 : vector<1x128xf32> to vector<2x128xf32>
    %32 = arith.addf %30, %31 : vector<2x128xf32>
    %c1 = arith.constant 1 : index
    %c0_26 = arith.constant 0 : index
    %c0_27 = arith.constant 0 : index
    %33 = vector.load %arg1[%c1, %c0_26, %c0_27] : memref<8x2x784xbf16, #tpu.memory_space<vmem>>, vector<1x2x784xbf16>
    %34 = vector.shape_cast %33 : vector<1x2x784xbf16> to vector<2x784xbf16>
    %cst_28 = arith.constant dense<0.000000e+00> : vector<2x128xf32>
    %35 = tpu.matmul %34, %0, %cst_28 {dimension_numbers = #tpu.dot_dimension_numbers<[1], [0], [0], [1], [0, 0, 1, 1], [], []>} : vector<2x784xbf16>, vector<784x128xbf16>, vector<2x128xf32> -> vector<2x128xf32>
    %36 = vector.broadcast %1 : vector<1x128xf32> to vector<2x128xf32>
    %37 = arith.addf %35, %36 : vector<2x128xf32>
    %cst_29 = arith.constant 0.000000e+00 : f32
    %38 = vector.broadcast %cst_29 : f32 to vector<2x128xf32>
    %39 = arith.maximumf %37, %38 : vector<2x128xf32>
    %40 = arith.truncf %39 : vector<2x128xf32> to vector<2x128xbf16>
    %cst_30 = arith.constant dense<0.000000e+00> : vector<2x128xf32>
    %41 = tpu.matmul %40, %2, %cst_30 {dimension_numbers = #tpu.dot_dimension_numbers<[1], [0], [0], [1], [0, 0, 1, 1], [], []>} : vector<2x128xbf16>, vector<128x128xbf16>, vector<2x128xf32> -> vector<2x128xf32>
    %42 = vector.broadcast %3 : vector<1x128xf32> to vector<2x128xf32>
    %43 = arith.addf %41, %42 : vector<2x128xf32>
    %44 = arith.truncf %43 : vector<2x128xf32> to vector<2x128xbf16>
    %cst_31 = arith.constant dense<0.000000e+00> : vector<2x128xf32>
    %45 = tpu.matmul %44, %4, %cst_31 {dimension_numbers = #tpu.dot_dimension_numbers<[1], [0], [0], [1], [0, 0, 1, 1], [], []>} : vector<2x128xbf16>, vector<128x128xbf16>, vector<2x128xf32> -> vector<2x128xf32>
    %46 = vector.broadcast %5 : vector<1x128xf32> to vector<2x128xf32>
    %47 = arith.addf %45, %46 : vector<2x128xf32>
    %48 = arith.truncf %28 : vector<2x128xf32> to vector<2x128xbf16>
    %cst_32 = arith.constant dense<0.000000e+00> : vector<2x128xf32>
    %49 = tpu.matmul %48, %6, %cst_32 {dimension_numbers = #tpu.dot_dimension_numbers<[1], [0], [0], [1], [0, 0, 1, 1], [], []>} : vector<2x128xbf16>, vector<128x128xbf16>, vector<2x128xf32> -> vector<2x128xf32>
    %50 = arith.addf %47, %49 : vector<2x128xf32>
    %51 = math.tanh %50 : vector<2x128xf32>
    %52 = arith.truncf %51 : vector<2x128xf32> to vector<2x128xbf16>
    %cst_33 = arith.constant dense<0.000000e+00> : vector<2x128xf32>
    %53 = tpu.matmul %52, %7, %cst_33 {dimension_numbers = #tpu.dot_dimension_numbers<[1], [0], [0], [1], [0, 0, 1, 1], [], []>} : vector<2x128xbf16>, vector<128x128xbf16>, vector<2x128xf32> -> vector<2x128xf32>
    %54 = vector.broadcast %8 : vector<1x128xf32> to vector<2x128xf32>
    %55 = arith.addf %53, %54 : vector<2x128xf32>
    %c2 = arith.constant 2 : index
    %c0_34 = arith.constant 0 : index
    %c0_35 = arith.constant 0 : index
    %56 = vector.load %arg1[%c2, %c0_34, %c0_35] : memref<8x2x784xbf16, #tpu.memory_space<vmem>>, vector<1x2x784xbf16>
    %57 = vector.shape_cast %56 : vector<1x2x784xbf16> to vector<2x784xbf16>
    %cst_36 = arith.constant dense<0.000000e+00> : vector<2x128xf32>
    %58 = tpu.matmul %57, %0, %cst_36 {dimension_numbers = #tpu.dot_dimension_numbers<[1], [0], [0], [1], [0, 0, 1, 1], [], []>} : vector<2x784xbf16>, vector<784x128xbf16>, vector<2x128xf32> -> vector<2x128xf32>
    %59 = vector.broadcast %1 : vector<1x128xf32> to vector<2x128xf32>
    %60 = arith.addf %58, %59 : vector<2x128xf32>
    %cst_37 = arith.constant 0.000000e+00 : f32
    %61 = vector.broadcast %cst_37 : f32 to vector<2x128xf32>
    %62 = arith.maximumf %60, %61 : vector<2x128xf32>
    %63 = arith.truncf %62 : vector<2x128xf32> to vector<2x128xbf16>
    %cst_38 = arith.constant dense<0.000000e+00> : vector<2x128xf32>
    %64 = tpu.matmul %63, %2, %cst_38 {dimension_numbers = #tpu.dot_dimension_numbers<[1], [0], [0], [1], [0, 0, 1, 1], [], []>} : vector<2x128xbf16>, vector<128x128xbf16>, vector<2x128xf32> -> vector<2x128xf32>
    %65 = vector.broadcast %3 : vector<1x128xf32> to vector<2x128xf32>
    %66 = arith.addf %64, %65 : vector<2x128xf32>
    %67 = arith.truncf %66 : vector<2x128xf32> to vector<2x128xbf16>
    %cst_39 = arith.constant dense<0.000000e+00> : vector<2x128xf32>
    %68 = tpu.matmul %67, %4, %cst_39 {dimension_numbers = #tpu.dot_dimension_numbers<[1], [0], [0], [1], [0, 0, 1, 1], [], []>} : vector<2x128xbf16>, vector<128x128xbf16>, vector<2x128xf32> -> vector<2x128xf32>
    %69 = vector.broadcast %5 : vector<1x128xf32> to vector<2x128xf32>
    %70 = arith.addf %68, %69 : vector<2x128xf32>
    %71 = arith.truncf %51 : vector<2x128xf32> to vector<2x128xbf16>
    %cst_40 = arith.constant dense<0.000000e+00> : vector<2x128xf32>
    %72 = tpu.matmul %71, %6, %cst_40 {dimension_numbers = #tpu.dot_dimension_numbers<[1], [0], [0], [1], [0, 0, 1, 1], [], []>} : vector<2x128xbf16>, vector<128x128xbf16>, vector<2x128xf32> -> vector<2x128xf32>
    %73 = arith.addf %70, %72 : vector<2x128xf32>
    %74 = math.tanh %73 : vector<2x128xf32>
    %75 = arith.truncf %74 : vector<2x128xf32> to vector<2x128xbf16>
    %cst_41 = arith.constant dense<0.000000e+00> : vector<2x128xf32>
    %76 = tpu.matmul %75, %7, %cst_41 {dimension_numbers = #tpu.dot_dimension_numbers<[1], [0], [0], [1], [0, 0, 1, 1], [], []>} : vector<2x128xbf16>, vector<128x128xbf16>, vector<2x128xf32> -> vector<2x128xf32>
    %77 = vector.broadcast %8 : vector<1x128xf32> to vector<2x128xf32>
    %78 = arith.addf %76, %77 : vector<2x128xf32>
    %c3 = arith.constant 3 : index
    %c0_42 = arith.constant 0 : index
    %c0_43 = arith.constant 0 : index
    %79 = vector.load %arg1[%c3, %c0_42, %c0_43] : memref<8x2x784xbf16, #tpu.memory_space<vmem>>, vector<1x2x784xbf16>
    %80 = vector.shape_cast %79 : vector<1x2x784xbf16> to vector<2x784xbf16>
    %cst_44 = arith.constant dense<0.000000e+00> : vector<2x128xf32>
    %81 = tpu.matmul %80, %0, %cst_44 {dimension_numbers = #tpu.dot_dimension_numbers<[1], [0], [0], [1], [0, 0, 1, 1], [], []>} : vector<2x784xbf16>, vector<784x128xbf16>, vector<2x128xf32> -> vector<2x128xf32>
    %82 = vector.broadcast %1 : vector<1x128xf32> to vector<2x128xf32>
    %83 = arith.addf %81, %82 : vector<2x128xf32>
    %cst_45 = arith.constant 0.000000e+00 : f32
    %84 = vector.broadcast %cst_45 : f32 to vector<2x128xf32>
    %85 = arith.maximumf %83, %84 : vector<2x128xf32>
    %86 = arith.truncf %85 : vector<2x128xf32> to vector<2x128xbf16>
    %cst_46 = arith.constant dense<0.000000e+00> : vector<2x128xf32>
    %87 = tpu.matmul %86, %2, %cst_46 {dimension_numbers = #tpu.dot_dimension_numbers<[1], [0], [0], [1], [0, 0, 1, 1], [], []>} : vector<2x128xbf16>, vector<128x128xbf16>, vector<2x128xf32> -> vector<2x128xf32>
    %88 = vector.broadcast %3 : vector<1x128xf32> to vector<2x128xf32>
    %89 = arith.addf %87, %88 : vector<2x128xf32>
    %90 = arith.truncf %89 : vector<2x128xf32> to vector<2x128xbf16>
    %cst_47 = arith.constant dense<0.000000e+00> : vector<2x128xf32>
    %91 = tpu.matmul %90, %4, %cst_47 {dimension_numbers = #tpu.dot_dimension_numbers<[1], [0], [0], [1], [0, 0, 1, 1], [], []>} : vector<2x128xbf16>, vector<128x128xbf16>, vector<2x128xf32> -> vector<2x128xf32>
    %92 = vector.broadcast %5 : vector<1x128xf32> to vector<2x128xf32>
    %93 = arith.addf %91, %92 : vector<2x128xf32>
    %94 = arith.truncf %74 : vector<2x128xf32> to vector<2x128xbf16>
    %cst_48 = arith.constant dense<0.000000e+00> : vector<2x128xf32>
    %95 = tpu.matmul %94, %6, %cst_48 {dimension_numbers = #tpu.dot_dimension_numbers<[1], [0], [0], [1], [0, 0, 1, 1], [], []>} : vector<2x128xbf16>, vector<128x128xbf16>, vector<2x128xf32> -> vector<2x128xf32>
    %96 = arith.addf %93, %95 : vector<2x128xf32>
    %97 = math.tanh %96 : vector<2x128xf32>
    %98 = arith.truncf %97 : vector<2x128xf32> to vector<2x128xbf16>
    %cst_49 = arith.constant dense<0.000000e+00> : vector<2x128xf32>
    %99 = tpu.matmul %98, %7, %cst_49 {dimension_numbers = #tpu.dot_dimension_numbers<[1], [0], [0], [1], [0, 0, 1, 1], [], []>} : vector<2x128xbf16>, vector<128x128xbf16>, vector<2x128xf32> -> vector<2x128xf32>
    %100 = vector.broadcast %8 : vector<1x128xf32> to vector<2x128xf32>
    %101 = arith.addf %99, %100 : vector<2x128xf32>
    %c4 = arith.constant 4 : index
    %c0_50 = arith.constant 0 : index
    %c0_51 = arith.constant 0 : index
    %102 = vector.load %arg1[%c4, %c0_50, %c0_51] : memref<8x2x784xbf16, #tpu.memory_space<vmem>>, vector<1x2x784xbf16>
    %103 = vector.shape_cast %102 : vector<1x2x784xbf16> to vector<2x784xbf16>
    %cst_52 = arith.constant dense<0.000000e+00> : vector<2x128xf32>
    %104 = tpu.matmul %103, %0, %cst_52 {dimension_numbers = #tpu.dot_dimension_numbers<[1], [0], [0], [1], [0, 0, 1, 1], [], []>} : vector<2x784xbf16>, vector<784x128xbf16>, vector<2x128xf32> -> vector<2x128xf32>
    %105 = vector.broadcast %1 : vector<1x128xf32> to vector<2x128xf32>
    %106 = arith.addf %104, %105 : vector<2x128xf32>
    %cst_53 = arith.constant 0.000000e+00 : f32
    %107 = vector.broadcast %cst_53 : f32 to vector<2x128xf32>
    %108 = arith.maximumf %106, %107 : vector<2x128xf32>
    %109 = arith.truncf %108 : vector<2x128xf32> to vector<2x128xbf16>
    %cst_54 = arith.constant dense<0.000000e+00> : vector<2x128xf32>
    %110 = tpu.matmul %109, %2, %cst_54 {dimension_numbers = #tpu.dot_dimension_numbers<[1], [0], [0], [1], [0, 0, 1, 1], [], []>} : vector<2x128xbf16>, vector<128x128xbf16>, vector<2x128xf32> -> vector<2x128xf32>
    %111 = vector.broadcast %3 : vector<1x128xf32> to vector<2x128xf32>
    %112 = arith.addf %110, %111 : vector<2x128xf32>
    %113 = arith.truncf %112 : vector<2x128xf32> to vector<2x128xbf16>
    %cst_55 = arith.constant dense<0.000000e+00> : vector<2x128xf32>
    %114 = tpu.matmul %113, %4, %cst_55 {dimension_numbers = #tpu.dot_dimension_numbers<[1], [0], [0], [1], [0, 0, 1, 1], [], []>} : vector<2x128xbf16>, vector<128x128xbf16>, vector<2x128xf32> -> vector<2x128xf32>
    %115 = vector.broadcast %5 : vector<1x128xf32> to vector<2x128xf32>
    %116 = arith.addf %114, %115 : vector<2x128xf32>
    %117 = arith.truncf %97 : vector<2x128xf32> to vector<2x128xbf16>
    %cst_56 = arith.constant dense<0.000000e+00> : vector<2x128xf32>
    %118 = tpu.matmul %117, %6, %cst_56 {dimension_numbers = #tpu.dot_dimension_numbers<[1], [0], [0], [1], [0, 0, 1, 1], [], []>} : vector<2x128xbf16>, vector<128x128xbf16>, vector<2x128xf32> -> vector<2x128xf32>
    %119 = arith.addf %116, %118 : vector<2x128xf32>
    %120 = math.tanh %119 : vector<2x128xf32>
    %121 = arith.truncf %120 : vector<2x128xf32> to vector<2x128xbf16>
    %cst_57 = arith.constant dense<0.000000e+00> : vector<2x128xf32>
    %122 = tpu.matmul %121, %7, %cst_57 {dimension_numbers = #tpu.dot_dimension_numbers<[1], [0], [0], [1], [0, 0, 1, 1], [], []>} : vector<2x128xbf16>, vector<128x128xbf16>, vector<2x128xf32> -> vector<2x128xf32>
    %123 = vector.broadcast %8 : vector<1x128xf32> to vector<2x128xf32>
    %124 = arith.addf %122, %123 : vector<2x128xf32>
    %c5 = arith.constant 5 : index
    %c0_58 = arith.constant 0 : index
    %c0_59 = arith.constant 0 : index
    %125 = vector.load %arg1[%c5, %c0_58, %c0_59] : memref<8x2x784xbf16, #tpu.memory_space<vmem>>, vector<1x2x784xbf16>
    %126 = vector.shape_cast %125 : vector<1x2x784xbf16> to vector<2x784xbf16>
    %cst_60 = arith.constant dense<0.000000e+00> : vector<2x128xf32>
    %127 = tpu.matmul %126, %0, %cst_60 {dimension_numbers = #tpu.dot_dimension_numbers<[1], [0], [0], [1], [0, 0, 1, 1], [], []>} : vector<2x784xbf16>, vector<784x128xbf16>, vector<2x128xf32> -> vector<2x128xf32>
    %128 = vector.broadcast %1 : vector<1x128xf32> to vector<2x128xf32>
    %129 = arith.addf %127, %128 : vector<2x128xf32>
    %cst_61 = arith.constant 0.000000e+00 : f32
    %130 = vector.broadcast %cst_61 : f32 to vector<2x128xf32>
    %131 = arith.maximumf %129, %130 : vector<2x128xf32>
    %132 = arith.truncf %131 : vector<2x128xf32> to vector<2x128xbf16>
    %cst_62 = arith.constant dense<0.000000e+00> : vector<2x128xf32>
    %133 = tpu.matmul %132, %2, %cst_62 {dimension_numbers = #tpu.dot_dimension_numbers<[1], [0], [0], [1], [0, 0, 1, 1], [], []>} : vector<2x128xbf16>, vector<128x128xbf16>, vector<2x128xf32> -> vector<2x128xf32>
    %134 = vector.broadcast %3 : vector<1x128xf32> to vector<2x128xf32>
    %135 = arith.addf %133, %134 : vector<2x128xf32>
    %136 = arith.truncf %135 : vector<2x128xf32> to vector<2x128xbf16>
    %cst_63 = arith.constant dense<0.000000e+00> : vector<2x128xf32>
    %137 = tpu.matmul %136, %4, %cst_63 {dimension_numbers = #tpu.dot_dimension_numbers<[1], [0], [0], [1], [0, 0, 1, 1], [], []>} : vector<2x128xbf16>, vector<128x128xbf16>, vector<2x128xf32> -> vector<2x128xf32>
    %138 = vector.broadcast %5 : vector<1x128xf32> to vector<2x128xf32>
    %139 = arith.addf %137, %138 : vector<2x128xf32>
    %140 = arith.truncf %120 : vector<2x128xf32> to vector<2x128xbf16>
    %cst_64 = arith.constant dense<0.000000e+00> : vector<2x128xf32>
    %141 = tpu.matmul %140, %6, %cst_64 {dimension_numbers = #tpu.dot_dimension_numbers<[1], [0], [0], [1], [0, 0, 1, 1], [], []>} : vector<2x128xbf16>, vector<128x128xbf16>, vector<2x128xf32> -> vector<2x128xf32>
    %142 = arith.addf %139, %141 : vector<2x128xf32>
    %143 = math.tanh %142 : vector<2x128xf32>
    %144 = arith.truncf %143 : vector<2x128xf32> to vector<2x128xbf16>
    %cst_65 = arith.constant dense<0.000000e+00> : vector<2x128xf32>
    %145 = tpu.matmul %144, %7, %cst_65 {dimension_numbers = #tpu.dot_dimension_numbers<[1], [0], [0], [1], [0, 0, 1, 1], [], []>} : vector<2x128xbf16>, vector<128x128xbf16>, vector<2x128xf32> -> vector<2x128xf32>
    %146 = vector.broadcast %8 : vector<1x128xf32> to vector<2x128xf32>
    %147 = arith.addf %145, %146 : vector<2x128xf32>
    %c6 = arith.constant 6 : index
    %c0_66 = arith.constant 0 : index
    %c0_67 = arith.constant 0 : index
    %148 = vector.load %arg1[%c6, %c0_66, %c0_67] : memref<8x2x784xbf16, #tpu.memory_space<vmem>>, vector<1x2x784xbf16>
    %149 = vector.shape_cast %148 : vector<1x2x784xbf16> to vector<2x784xbf16>
    %cst_68 = arith.constant dense<0.000000e+00> : vector<2x128xf32>
    %150 = tpu.matmul %149, %0, %cst_68 {dimension_numbers = #tpu.dot_dimension_numbers<[1], [0], [0], [1], [0, 0, 1, 1], [], []>} : vector<2x784xbf16>, vector<784x128xbf16>, vector<2x128xf32> -> vector<2x128xf32>
    %151 = vector.broadcast %1 : vector<1x128xf32> to vector<2x128xf32>
    %152 = arith.addf %150, %151 : vector<2x128xf32>
    %cst_69 = arith.constant 0.000000e+00 : f32
    %153 = vector.broadcast %cst_69 : f32 to vector<2x128xf32>
    %154 = arith.maximumf %152, %153 : vector<2x128xf32>
    %155 = arith.truncf %154 : vector<2x128xf32> to vector<2x128xbf16>
    %cst_70 = arith.constant dense<0.000000e+00> : vector<2x128xf32>
    %156 = tpu.matmul %155, %2, %cst_70 {dimension_numbers = #tpu.dot_dimension_numbers<[1], [0], [0], [1], [0, 0, 1, 1], [], []>} : vector<2x128xbf16>, vector<128x128xbf16>, vector<2x128xf32> -> vector<2x128xf32>
    %157 = vector.broadcast %3 : vector<1x128xf32> to vector<2x128xf32>
    %158 = arith.addf %156, %157 : vector<2x128xf32>
    %159 = arith.truncf %158 : vector<2x128xf32> to vector<2x128xbf16>
    %cst_71 = arith.constant dense<0.000000e+00> : vector<2x128xf32>
    %160 = tpu.matmul %159, %4, %cst_71 {dimension_numbers = #tpu.dot_dimension_numbers<[1], [0], [0], [1], [0, 0, 1, 1], [], []>} : vector<2x128xbf16>, vector<128x128xbf16>, vector<2x128xf32> -> vector<2x128xf32>
    %161 = vector.broadcast %5 : vector<1x128xf32> to vector<2x128xf32>
    %162 = arith.addf %160, %161 : vector<2x128xf32>
    %163 = arith.truncf %143 : vector<2x128xf32> to vector<2x128xbf16>
    %cst_72 = arith.constant dense<0.000000e+00> : vector<2x128xf32>
    %164 = tpu.matmul %163, %6, %cst_72 {dimension_numbers = #tpu.dot_dimension_numbers<[1], [0], [0], [1], [0, 0, 1, 1], [], []>} : vector<2x128xbf16>, vector<128x128xbf16>, vector<2x128xf32> -> vector<2x128xf32>
    %165 = arith.addf %162, %164 : vector<2x128xf32>
    %166 = math.tanh %165 : vector<2x128xf32>
    %167 = arith.truncf %166 : vector<2x128xf32> to vector<2x128xbf16>
    %cst_73 = arith.constant dense<0.000000e+00> : vector<2x128xf32>
    %168 = tpu.matmul %167, %7, %cst_73 {dimension_numbers = #tpu.dot_dimension_numbers<[1], [0], [0], [1], [0, 0, 1, 1], [], []>} : vector<2x128xbf16>, vector<128x128xbf16>, vector<2x128xf32> -> vector<2x128xf32>
    %169 = vector.broadcast %8 : vector<1x128xf32> to vector<2x128xf32>
    %170 = arith.addf %168, %169 : vector<2x128xf32>
    %c7 = arith.constant 7 : index
    %c0_74 = arith.constant 0 : index
    %c0_75 = arith.constant 0 : index
    %171 = vector.load %arg1[%c7, %c0_74, %c0_75] : memref<8x2x784xbf16, #tpu.memory_space<vmem>>, vector<1x2x784xbf16>
    %172 = vector.shape_cast %171 : vector<1x2x784xbf16> to vector<2x784xbf16>
    %cst_76 = arith.constant dense<0.000000e+00> : vector<2x128xf32>
    %173 = tpu.matmul %172, %0, %cst_76 {dimension_numbers = #tpu.dot_dimension_numbers<[1], [0], [0], [1], [0, 0, 1, 1], [], []>} : vector<2x784xbf16>, vector<784x128xbf16>, vector<2x128xf32> -> vector<2x128xf32>
    %174 = vector.broadcast %1 : vector<1x128xf32> to vector<2x128xf32>
    %175 = arith.addf %173, %174 : vector<2x128xf32>
    %cst_77 = arith.constant 0.000000e+00 : f32
    %176 = vector.broadcast %cst_77 : f32 to vector<2x128xf32>
    %177 = arith.maximumf %175, %176 : vector<2x128xf32>
    %178 = arith.truncf %177 : vector<2x128xf32> to vector<2x128xbf16>
    %cst_78 = arith.constant dense<0.000000e+00> : vector<2x128xf32>
    %179 = tpu.matmul %178, %2, %cst_78 {dimension_numbers = #tpu.dot_dimension_numbers<[1], [0], [0], [1], [0, 0, 1, 1], [], []>} : vector<2x128xbf16>, vector<128x128xbf16>, vector<2x128xf32> -> vector<2x128xf32>
    %180 = vector.broadcast %3 : vector<1x128xf32> to vector<2x128xf32>
    %181 = arith.addf %179, %180 : vector<2x128xf32>
    %182 = arith.truncf %181 : vector<2x128xf32> to vector<2x128xbf16>
    %cst_79 = arith.constant dense<0.000000e+00> : vector<2x128xf32>
    %183 = tpu.matmul %182, %4, %cst_79 {dimension_numbers = #tpu.dot_dimension_numbers<[1], [0], [0], [1], [0, 0, 1, 1], [], []>} : vector<2x128xbf16>, vector<128x128xbf16>, vector<2x128xf32> -> vector<2x128xf32>
    %184 = vector.broadcast %5 : vector<1x128xf32> to vector<2x128xf32>
    %185 = arith.addf %183, %184 : vector<2x128xf32>
    %186 = arith.truncf %166 : vector<2x128xf32> to vector<2x128xbf16>
    %cst_80 = arith.constant dense<0.000000e+00> : vector<2x128xf32>
    %187 = tpu.matmul %186, %6, %cst_80 {dimension_numbers = #tpu.dot_dimension_numbers<[1], [0], [0], [1], [0, 0, 1, 1], [], []>} : vector<2x128xbf16>, vector<128x128xbf16>, vector<2x128xf32> -> vector<2x128xf32>
    %188 = arith.addf %185, %187 : vector<2x128xf32>
    %189 = math.tanh %188 : vector<2x128xf32>
    %190 = arith.truncf %189 : vector<2x128xf32> to vector<2x128xbf16>
    %cst_81 = arith.constant dense<0.000000e+00> : vector<2x128xf32>
    %191 = tpu.matmul %190, %7, %cst_81 {dimension_numbers = #tpu.dot_dimension_numbers<[1], [0], [0], [1], [0, 0, 1, 1], [], []>} : vector<2x128xbf16>, vector<128x128xbf16>, vector<2x128xf32> -> vector<2x128xf32>
    %192 = vector.broadcast %8 : vector<1x128xf32> to vector<2x128xf32>
    %193 = arith.addf %191, %192 : vector<2x128xf32>
    %194 = vector.shape_cast %32 : vector<2x128xf32> to vector<1x2x128xf32>
    %195 = vector.shape_cast %55 : vector<2x128xf32> to vector<1x2x128xf32>
    %196 = vector.shape_cast %78 : vector<2x128xf32> to vector<1x2x128xf32>
    %197 = vector.shape_cast %101 : vector<2x128xf32> to vector<1x2x128xf32>
    %198 = vector.shape_cast %124 : vector<2x128xf32> to vector<1x2x128xf32>
    %199 = vector.shape_cast %147 : vector<2x128xf32> to vector<1x2x128xf32>
    %200 = vector.shape_cast %170 : vector<2x128xf32> to vector<1x2x128xf32>
    %201 = vector.shape_cast %193 : vector<2x128xf32> to vector<1x2x128xf32>
    %202 = tpu.concatenate %194, %195, %196, %197, %198, %199, %200, %201 in 0 : vector<1x2x128xf32>, vector<1x2x128xf32>, vector<1x2x128xf32>, vector<1x2x128xf32>, vector<1x2x128xf32>, vector<1x2x128xf32>, vector<1x2x128xf32>, vector<1x2x128xf32> -> vector<8x2x128xf32>
    %c0_82 = arith.constant 0 : index
    %c0_83 = arith.constant 0 : index
    %c0_84 = arith.constant 0 : index
    %203 = vector.load %arg11[%c0_82, %c0_83, %c0_84] : memref<8x2x128xf32, #tpu.memory_space<vmem>>, vector<8x2x128xf32>
    tpu.vector_store %arg11[%c0_82, %c0_83, %c0_84], %202 {strides = array<i32>} : memref<8x2x128xf32, #tpu.memory_space<vmem>>, vector<8x2x128xf32>,
    return
  }
  func.func @transform_0(%arg0: i32) -> (i32, i32, i32) {
    %c0_i32 = arith.constant 0 : i32
    %c0_i32_0 = arith.constant 0 : i32
    %c0_i32_1 = arith.constant 0 : i32
    return %c0_i32, %arg0, %c0_i32_0 : i32, i32, i32
  }
  func.func @transform_1(%arg0: i32) -> (i32, i32) {
    %c0_i32 = arith.constant 0 : i32
    %c0_i32_0 = arith.constant 0 : i32
    %c0_i32_1 = arith.constant 0 : i32
    return %c0_i32, %c0_i32_0 : i32, i32
  }
  func.func @transform_2(%arg0: i32) -> (i32, i32) {
    %c0_i32 = arith.constant 0 : i32
    %c0_i32_0 = arith.constant 0 : i32
    %c0_i32_1 = arith.constant 0 : i32
    return %c0_i32, %c0_i32_0 : i32, i32
  }
  func.func @transform_3(%arg0: i32) -> (i32, i32) {
    %c0_i32 = arith.constant 0 : i32
    %c0_i32_0 = arith.constant 0 : i32
    %c0_i32_1 = arith.constant 0 : i32
    return %c0_i32, %c0_i32_0 : i32, i32
  }
  func.func @transform_4(%arg0: i32) -> (i32, i32) {
    %c0_i32 = arith.constant 0 : i32
    %c0_i32_0 = arith.constant 0 : i32
    %c0_i32_1 = arith.constant 0 : i32
    return %c0_i32, %c0_i32_0 : i32, i32
  }
  func.func @transform_5(%arg0: i32) -> (i32, i32) {
    %c0_i32 = arith.constant 0 : i32
    %c0_i32_0 = arith.constant 0 : i32
    %c0_i32_1 = arith.constant 0 : i32
    return %c0_i32, %c0_i32_0 : i32, i32
  }
  func.func @transform_6(%arg0: i32) -> (i32, i32) {
    %c0_i32 = arith.constant 0 : i32
    %c0_i32_0 = arith.constant 0 : i32
    %c0_i32_1 = arith.constant 0 : i32
    return %c0_i32, %c0_i32_0 : i32, i32
  }
  func.func @transform_7(%arg0: i32) -> (i32, i32) {
    %c0_i32 = arith.constant 0 : i32
    %c0_i32_0 = arith.constant 0 : i32
    %c0_i32_1 = arith.constant 0 : i32
    return %c0_i32, %c0_i32_0 : i32, i32
  }
  func.func @transform_8(%arg0: i32) -> (i32, i32) {
    %c0_i32 = arith.constant 0 : i32
    %c0_i32_0 = arith.constant 0 : i32
    %c0_i32_1 = arith.constant 0 : i32
    return %c0_i32, %c0_i32_0 : i32, i32
  }
  func.func @transform_9(%arg0: i32) -> (i32, i32) {
    %c0_i32 = arith.constant 0 : i32
    %c0_i32_0 = arith.constant 0 : i32
    %c0_i32_1 = arith.constant 0 : i32
    return %c0_i32, %c0_i32_0 : i32, i32
  }
  func.func @transform_10(%arg0: i32) -> (i32, i32, i32) {
    %c0_i32 = arith.constant 0 : i32
    %c0_i32_0 = arith.constant 0 : i32
    %c0_i32_1 = arith.constant 0 : i32
    return %c0_i32, %arg0, %c0_i32_0 : i32, i32, i32
  }
}

</mosaic_0001>

<bundles_post_ra>
// kernel: rnn_forward.3
= control target key start
LH: loop header
LB: loop body
LE: loop exit
PB: predicated region body
PF: predicated region fallthrough
CT: control target
= control target key end

     0   :  { %s3823_s12 = smov 0   ;;  %s5218_s0 = inlined_call_operand.vmem [shape: bf16[512,128], index: 0, kind: input, shape index: {}]   ;;  %s5219_s1 = inlined_call_operand.vmem [shape: bf16[5,128,256], index: 1, kind: input, shape index: {}]   ;;  %s5220_s2 = inlined_call_operand.vmem [shape: f32[1,256], index: 2, kind: input, shape index: {}]   ;;  %s5221_s3 = inlined_call_operand.vmem [shape: bf16[512,256], index: 3, kind: output, shape index: {}]  }
   0x1 LB: > { %s3396_s13 = sadd.s32 4294967295, %s3800_s12   ;;  %p3400_p0 = scmp.ge.s32.totalorder %s3800_s12, 1  ;;  %s3800_s12 = sphi %s3823_s12, %s13_s12  }
   0x2   : > { %p138_p1 = scmp.lt.s32.totalorder %s3800_s12, 3 }
   0x4   : > { %p139_p2 = pnand %p3400_p0, %p138_p1 }
   0x6   : > { %142 = sbr.rel (%p139_p2) target bundleno = 599 (0x257), region = 32 }
   0xd   : > { %v3658_v0 = vld [vmem:[%s5219_s1 + $0x84] ss:$8 sps:$4 sm:$0xff]   ;;  %s3401_s16 = sshll.u32 %s3396_s13, 5  ;;  %v3660_v1 = vld [vmem:[%s5219_s1 + $0x80] ss:$8 sps:$4 sm:$0xff]   ;;  %v5224_v2 = vmov 0  }
   0xe   : > { %450 = vmatprep.mubr.bf16.mxu0 %v5224_v2  ;;  %530 = vmatprep.mubr.bf16.mxu1 %v5224_v2  ;;  %p164_p3 = scmp.lt.s32.totalorder %s3401_s16, 63  ;;  %v3661_v3 = vld [vmem:[%s5219_s1 + $0x94] ss:$8 sps:$4 sm:$0xff]   ;;  %v3663_v4 = vld [vmem:[%s5219_s1 + $0x90] ss:$8 sps:$4 sm:$0xff]   ;;  %vm675_vm0 = vcmask 1046528  }
   0xf   : > { %418 = vmatprep.subr.bf16.mxu0 %v3658_v0  ;;  %3633 = vmatprep.subr.bf16.mxu1 %v3658_v0  ;;  %v3664_v5 = vld [vmem:[%s5219_s1 + $0xa4] ss:$8 sps:$4 sm:$0xff]   ;;  %v3666_v6 = vld [vmem:[%s5219_s1 + $0xa0] ss:$8 sps:$4 sm:$0xff]   ;;  %v3667_v7 = vld [vmem:[%s5219_s1 + $0xb4] ss:$8 sps:$4 sm:$0xff]  }
  0x10   : > { %419 = vmatpush1.bf16.msra.mxu0 %v3660_v1  ;;  %3641 = vmatpush1.bf16.msra.mxu1 %v3660_v1  ;;  %s5330_s16 = smov (!%p164_p3, %s3401_s16), 63  ;;  %v3669_v8 = vld [vmem:[%s5219_s1 + $0xb0] ss:$8 sps:$4 sm:$0xff]   ;;  %v3670_v9 = vld [vmem:[%s5219_s1 + $0xc4] ss:$8 sps:$4 sm:$0xff]   ;;  %vm1495_vm1 = vcmask 1045504  }
  0x11   : > { %420 = vmatprep.subr.bf16.mxu0 %v3661_v3  ;;  %3634 = vmatprep.subr.bf16.mxu1 %v3661_v3  ;;  %s3402_s25 = sshll.u32 %s5330_s16, 2  ;;  %v3672_v10 = vld [vmem:[%s5219_s1 + $0xc0] ss:$8 sps:$4 sm:$0xff]   ;;  %v3673_v11 = vld [vmem:[%s5219_s1 + $0xd4] ss:$8 sps:$4 sm:$0xff]   ;;  %vm2106_vm2 = vcmask 1044480  }
  0x12   : > { %s3860_s5 = scalar_lea.vmem %s5218_s0, %s3402_s25  ;;  %v3675_v12 = vld [vmem:[%s5219_s1 + $0xd0] ss:$8 sps:$4 sm:$0xff]   ;;  %v3676_v13 = vld [vmem:[%s5219_s1 + $0xe4] ss:$8 sps:$4 sm:$0xff]   ;;  %v3678_v14 = vld [vmem:[%s5219_s1 + $0xe0] ss:$8 sps:$4 sm:$0xff]  }
  0x13   : > { %v3679_v15 = vld [vmem:[%s5219_s1 + $0xf4] ss:$8 sps:$4 sm:$0xff]   ;;  %v3681_v16 = vld [vmem:[%s5219_s1 + $0xf0] ss:$8 sps:$4 sm:$0xff]   ;;  %v3686_v17 = vld [vmem:[%s5219_s1 + $0x4] ss:$8 sps:$4 sm:$0xff]  }
  0x14   : > { %421 = vmatpush1.bf16.msra.mxu0 %v3663_v4  ;;  %3642 = vmatpush1.bf16.msra.mxu1 %v3663_v4  ;;  %v3893_v18 = vld [vmem:[%s3860_s5] sm:$0xff]   ;;  %v3692_v23 = vld [vmem:[%s5219_s1 + $0x10] ss:$8 sps:$4 sm:$0xff]   ;;  %v3694_v24 = vld [vmem:[%s5219_s1 + $0x14] ss:$8 sps:$4 sm:$0xff]   ;;  %vm2717_vm3 = vcmask 1043456  }
  0x15   : > { %422 = vmatprep.subr.bf16.mxu0 %v3664_v5  ;;  %3635 = vmatprep.subr.bf16.mxu1 %v3664_v5  ;;  %v3689_v19 = vld [vmem:[%s5219_s1 + $0x104] ss:$8 sps:$4 sm:$0xff]   ;;  %v3684_v21 = vld [vmem:[%s5219_s1] ss:$8 sps:$4 sm:$0xff]   ;;  %v3697_v25 = vld [vmem:[%s5219_s1 + $0x114] ss:$8 sps:$4 sm:$0xff]  }
  0x16   : > { %v3899_v20 = vld [vmem:[%s3860_s5 + $0x40] sm:$0xff]   ;;  %v3695_v26 = vld [vmem:[%s5219_s1 + $0x110] ss:$8 sps:$4 sm:$0xff]   ;;  %v3930_v29 = vld [vmem:[%s3860_s5 + $0x8] sm:$0xff]   ;;  %s3600_s7 = sshll.u32 %s5330_s16, 3 }
  0x17   : > { %v3687_v22 = vld [vmem:[%s5219_s1 + $0x100] ss:$8 sps:$4 sm:$0xff]   ;;  %v3702_v27 = vld [vmem:[%s5219_s1 + $0x24] ss:$8 sps:$4 sm:$0xff]   ;;  %v3710_v33 = vld [vmem:[%s5219_s1 + $0x34] ss:$8 sps:$4 sm:$0xff]   ;;  %s4775_s9 = scalar_lea.vmem %s5221_s3, %s3600_s7 }
  0x18   : > { %423 = vmatpush1.bf16.msra.mxu0 %v3666_v6  ;;  %3643 = vmatpush1.bf16.msra.mxu1 %v3666_v6  ;;  %v3705_v28 = vld [vmem:[%s5219_s1 + $0x124] ss:$8 sps:$4 sm:$0xff]   ;;  %v3700_v31 = vld [vmem:[%s5219_s1 + $0x20] ss:$8 sps:$4 sm:$0xff]   ;;  %v3713_v34 = vld [vmem:[%s5219_s1 + $0x134] ss:$8 sps:$4 sm:$0xff]  }
  0x19   : > { %424 = vmatprep.subr.bf16.mxu0 %v3667_v7  ;;  %3636 = vmatprep.subr.bf16.mxu1 %v3667_v7  ;;  %v3933_v30 = vld [vmem:[%s3860_s5 + $0x48] sm:$0xff]   ;;  %v3708_v35 = vld [vmem:[%s5219_s1 + $0x30] ss:$8 sps:$4 sm:$0xff]   ;;  %v3726_v43 = vld [vmem:[%s5219_s1 + $0x54] ss:$8 sps:$4 sm:$0xff]  }
  0x1a   : > { %v3703_v32 = vld [vmem:[%s5219_s1 + $0x120] ss:$8 sps:$4 sm:$0xff]   ;;  %v3711_v36 = vld [vmem:[%s5219_s1 + $0x130] ss:$8 sps:$4 sm:$0xff]   ;;  %v3718_v37 = vld [vmem:[%s5219_s1 + $0x44] ss:$8 sps:$4 sm:$0xff]  }
  0x1b   : > { %v3721_v38 = vld [vmem:[%s5219_s1 + $0x144] ss:$8 sps:$4 sm:$0xff]   ;;  %v3964_v39 = vld [vmem:[%s3860_s5 + $0x10] sm:$0xff]   ;;  %v3716_v41 = vld [vmem:[%s5219_s1 + $0x40] ss:$8 sps:$4 sm:$0xff]  }
  0x1c   : > { %425 = vmatpush1.bf16.msra.mxu0 %v3669_v8  ;;  %3644 = vmatpush1.bf16.msra.mxu1 %v3669_v8  ;;  %v3967_v40 = vld [vmem:[%s3860_s5 + $0x50] sm:$0xff]   ;;  %v3719_v42 = vld [vmem:[%s5219_s1 + $0x140] ss:$8 sps:$4 sm:$0xff]   ;;  %v3734_v47 = vld [vmem:[%s5219_s1 + $0x64] ss:$8 sps:$4 sm:$0xff]  }
  0x1d   : > { %426 = vmatprep.subr.bf16.mxu0 %v3670_v9  ;;  %3637 = vmatprep.subr.bf16.mxu1 %v3670_v9  ;;  %v3729_v44 = vld [vmem:[%s5219_s1 + $0x154] ss:$8 sps:$4 sm:$0xff]   ;;  %v3724_v45 = vld [vmem:[%s5219_s1 + $0x50] ss:$8 sps:$4 sm:$0xff]   ;;  %v3737_v48 = vld [vmem:[%s5219_s1 + $0x164] ss:$8 sps:$4 sm:$0xff]  }
  0x1e   : > { %v3727_v46 = vld [vmem:[%s5219_s1 + $0x150] ss:$8 sps:$4 sm:$0xff]   ;;  %v3732_v51 = vld [vmem:[%s5219_s1 + $0x60] ss:$8 sps:$4 sm:$0xff]   ;;  %v3742_v53 = vld [vmem:[%s5219_s1 + $0x74] ss:$8 sps:$4 sm:$0xff]  }
  0x1f   : > { %v3998_v49 = vld [vmem:[%s3860_s5 + $0x18] sm:$0xff]   ;;  %v3735_v52 = vld [vmem:[%s5219_s1 + $0x160] ss:$8 sps:$4 sm:$0xff]   ;;  %v3748_v57 = vld [vmem:[%s5219_s1 + $0x184] ss:$8 sps:$4 sm:$0xff]  }
  0x20   : > { %427 = vmatpush1.bf16.msra.mxu0 %v3672_v10  ;;  %3645 = vmatpush1.bf16.msra.mxu1 %v3672_v10  ;;  %v4001_v50 = vld [vmem:[%s3860_s5 + $0x58] sm:$0xff]   ;;  %v3751_v58 = vld [vmem:[%s5219_s1 + $0x204] ss:$8 sps:$4 sm:$0xff]   ;;  %v4052_v63 = vld [vmem:[%s3860_s5 + $0x30] sm:$0xff]  }
  0x21   : > { %428 = vmatprep.subr.bf16.mxu0 %v3673_v11  ;;  %3638 = vmatprep.subr.bf16.mxu1 %v3673_v11  ;;  %v3745_v54 = vld [vmem:[%s5219_s1 + $0x174] ss:$8 sps:$4 sm:$0xff]   ;;  %v3740_v55 = vld [vmem:[%s5219_s1 + $0x70] ss:$8 sps:$4 sm:$0xff]   ;;  %v4032_v59 = vld [vmem:[%s3860_s5 + $0x20] sm:$0xff]  }
  0x22   : > { %v3743_v56 = vld [vmem:[%s5219_s1 + $0x170] ss:$8 sps:$4 sm:$0xff]   ;;  %v4035_v60 = vld [vmem:[%s3860_s5 + $0x60] sm:$0xff]   ;;  %v4042_v61 = vld [vmem:[%s3860_s5 + $0x28] sm:$0xff]  }
  0x23   : > { %v4045_v62 = vld [vmem:[%s3860_s5 + $0x68] sm:$0xff]   ;;  %v4055_v0 = vld [vmem:[%s3860_s5 + $0x70] sm:$0xff]   ;;  %v4062_v1 = vld [vmem:[%s3860_s5 + $0x38] sm:$0xff]  }
  0x24   : > { %429 = vmatpush1.bf16.msra.mxu0 %v3675_v12  ;;  %3646 = vmatpush1.bf16.msra.mxu1 %v3675_v12  ;;  %v4065_v3 = vld [vmem:[%s3860_s5 + $0x78] sm:$0xff]   ;;  %v3746_v4 = vld [vmem:[%s5219_s1 + $0x180] ss:$8 sps:$4 sm:$0xff]   ;;  %v3760_v10 = vld [vmem:[%s5219_s1 + $0x1a4] ss:$8 sps:$4 sm:$0xff]  }
  0x25   : > { %430 = vmatprep.subr.bf16.mxu0 %v3676_v13  ;;  %3639 = vmatprep.subr.bf16.mxu1 %v3676_v13  ;;  %v3749_v5 = vld [vmem:[%s5219_s1 + $0x200] ss:$8 sps:$4 sm:$0xff]   ;;  %v3754_v6 = vld [vmem:[%s5219_s1 + $0x194] ss:$8 sps:$4 sm:$0xff]   ;;  %v3752_v8 = vld [vmem:[%s5219_s1 + $0x190] ss:$8 sps:$4 sm:$0xff]  }
  0x26   : > { %v3757_v7 = vld [vmem:[%s5219_s1 + $0x214] ss:$8 sps:$4 sm:$0xff]   ;;  %v3755_v9 = vld [vmem:[%s5219_s1 + $0x210] ss:$8 sps:$4 sm:$0xff]   ;;  %v3763_v11 = vld [vmem:[%s5219_s1 + $0x224] ss:$8 sps:$4 sm:$0xff]  }
  0x27   : > { %v3758_v12 = vld [vmem:[%s5219_s1 + $0x1a0] ss:$8 sps:$4 sm:$0xff]  }
  0x28   : > { %431 = vmatpush1.bf16.msra.mxu0 %v3678_v14  ;;  %3647 = vmatpush1.bf16.msra.mxu1 %v3678_v14  ;;  %v3761_v13 = vld [vmem:[%s5219_s1 + $0x220] ss:$8 sps:$4 sm:$0xff]   ;;  %v3766_v14 = vld [vmem:[%s5219_s1 + $0x1b4] ss:$8 sps:$4 sm:$0xff]  }
  0x29   : > { %432 = vmatprep.subr.bf16.mxu0 %v3679_v15  ;;  %3640 = vmatprep.subr.bf16.mxu1 %v3679_v15  ;;  %v3769_v15 = vld [vmem:[%s5219_s1 + $0x234] ss:$8 sps:$4 sm:$0xff]  }
  0x2c   : > { %433 = vmatpush1.bf16.msra.mxu0 %v3681_v16  ;;  %3648 = vmatpush1.bf16.msra.mxu1 %v3681_v16  ;;  %v3764_v16 = vld [vmem:[%s5219_s1 + $0x1b0] ss:$8 sps:$4 sm:$0xff]  }
  0x2d   : > { %948 = vmatprep.subr.bf16.mxu1 %v3686_v17  ;;  %1238 = vmatprep.subr.bf16.mxu0 %v3689_v19  ;;  %v3767_v17 = vld [vmem:[%s5219_s1 + $0x230] ss:$8 sps:$4 sm:$0xff]   ;;  %v3772_v19 = vld [vmem:[%s5219_s1 + $0x1c4] ss:$8 sps:$4 sm:$0xff]  }
  0x2f   : > { %451 = vmatmul.mubr.bf16.vlgmr.msra.gmra.mrb[0].mxu0 %v3893_v18  ;;  %531 = vmatmul.mubr.bf16.vlgmr.msra.gmra.mrb[0].mxu1 %v3899_v20 }
  0x30   : > { %949 = vmatpush1.bf16.msra.mxu1 %v3684_v21  ;;  %1239 = vmatpush1.bf16.msra.mxu0 %v3687_v22  ;;  %v3775_v21 = vld [vmem:[%s5219_s1 + $0x244] ss:$8 sps:$4 sm:$0xff]   ;;  %v3770_v22 = vld [vmem:[%s5219_s1 + $0x1c0] ss:$8 sps:$4 sm:$0xff]  }
  0x31   : > { %460 = vmatprep.mubr.bf16.mxu0 %v5224_v2  ;;  %540 = vmatprep.mubr.bf16.mxu1 %v5224_v2 }
  0x32   : > { %950 = vmatprep.subr.bf16.mxu1 %v3694_v24  ;;  %1240 = vmatprep.subr.bf16.mxu0 %v3697_v25  ;;  %v3778_v24 = vld [vmem:[%s5219_s1 + $0x1d4] ss:$8 sps:$4 sm:$0xff]  }
  0x33   : > { %v3781_v25 = vld [vmem:[%s5219_s1 + $0x254] ss:$8 sps:$4 sm:$0xff]  }
  0x34   : > { %951 = vmatpush1.bf16.msra.mxu1 %v3692_v23  ;;  %1241 = vmatpush1.bf16.msra.mxu0 %v3695_v26  ;;  %v3773_v23 = vld [vmem:[%s5219_s1 + $0x240] ss:$8 sps:$4 sm:$0xff]   ;;  %v3776_v26 = vld [vmem:[%s5219_s1 + $0x1d0] ss:$8 sps:$4 sm:$0xff]  }
  0x35   : > { %952 = vmatprep.subr.bf16.mxu1 %v3702_v27  ;;  %1242 = vmatprep.subr.bf16.mxu0 %v3705_v28  ;;  %v3779_v27 = vld [vmem:[%s5219_s1 + $0x250] ss:$8 sps:$4 sm:$0xff]   ;;  %v3784_v28 = vld [vmem:[%s5219_s1 + $0x1e4] ss:$8 sps:$4 sm:$0xff]  }
  0x37   : > { %461 = vmatmul.mubr.bf16.gmra.mrb[4].mxu0 %v3930_v29  ;;  %541 = vmatmul.mubr.bf16.gmra.mrb[4].mxu1 %v3933_v30 }
  0x38   : > { %470 = vmatprep.mubr.bf16.mxu0 %v5224_v2  ;;  %550 = vmatprep.mubr.bf16.mxu1 %v5224_v2 }
  0x39   : > { %953 = vmatpush1.bf16.msra.mxu1 %v3700_v31  ;;  %1243 = vmatpush1.bf16.msra.mxu0 %v3703_v32  ;;  %v3787_v31 = vld [vmem:[%s5219_s1 + $0x264] ss:$8 sps:$4 sm:$0xff]   ;;  %v3782_v32 = vld [vmem:[%s5219_s1 + $0x1e0] ss:$8 sps:$4 sm:$0xff]  }
  0x3a   : > { %954 = vmatprep.subr.bf16.mxu1 %v3710_v33  ;;  %1244 = vmatprep.subr.bf16.mxu0 %v3713_v34  ;;  %v3785_v33 = vld [vmem:[%s5219_s1 + $0x260] ss:$8 sps:$4 sm:$0xff]   ;;  %v3790_v34 = vld [vmem:[%s5219_s1 + $0x1f4] ss:$8 sps:$4 sm:$0xff]  }
  0x3d   : > { %955 = vmatpush1.bf16.msra.mxu1 %v3708_v35  ;;  %1245 = vmatpush1.bf16.msra.mxu0 %v3711_v36  ;;  %v3793_v35 = vld [vmem:[%s5219_s1 + $0x274] ss:$8 sps:$4 sm:$0xff]   ;;  %v3788_v36 = vld [vmem:[%s5219_s1 + $0x1f0] ss:$8 sps:$4 sm:$0xff]  }
  0x3e   : > { %956 = vmatprep.subr.bf16.mxu1 %v3718_v37  ;;  %1246 = vmatprep.subr.bf16.mxu0 %v3721_v38  ;;  %v3791_v37 = vld [vmem:[%s5219_s1 + $0x270] ss:$8 sps:$4 sm:$0xff]  }
  0x3f   : > { %471 = vmatmul.mubr.bf16.gmra.mrb[8].mxu0 %v3964_v39  ;;  %551 = vmatmul.mubr.bf16.gmra.mrb[8].mxu1 %v3967_v40 }
  0x40   : > { %480 = vmatprep.mubr.bf16.mxu0 %v5224_v2  ;;  %560 = vmatprep.mubr.bf16.mxu1 %v5224_v2 }
  0x41   : > { %957 = vmatpush1.bf16.msra.mxu1 %v3716_v41  ;;  %1247 = vmatpush1.bf16.msra.mxu0 %v3719_v42 }
  0x42   : > { %958 = vmatprep.subr.bf16.mxu1 %v3726_v43  ;;  %1248 = vmatprep.subr.bf16.mxu0 %v3729_v44 }
  0x45   : > { %959 = vmatpush1.bf16.msra.mxu1 %v3724_v45  ;;  %1249 = vmatpush1.bf16.msra.mxu0 %v3727_v46 }
  0x46   : > { %960 = vmatprep.subr.bf16.mxu1 %v3734_v47  ;;  %1250 = vmatprep.subr.bf16.mxu0 %v3737_v48 }
  0x47   : > { %481 = vmatmul.mubr.bf16.gmra.mrb[12].mxu0 %v3998_v49  ;;  %561 = vmatmul.mubr.bf16.gmra.mrb[12].mxu1 %v4001_v50 }
  0x48   : > { %490 = vmatprep.mubr.bf16.mxu0 %v5224_v2  ;;  %570 = vmatprep.mubr.bf16.mxu1 %v5224_v2 }
  0x49   : > { %961 = vmatpush1.bf16.msra.mxu1 %v3732_v51  ;;  %1251 = vmatpush1.bf16.msra.mxu0 %v3735_v52 }
  0x4a   : > { %962 = vmatprep.subr.bf16.mxu1 %v3742_v53  ;;  %1252 = vmatprep.subr.bf16.mxu0 %v3745_v54 }
  0x4d   : > { %963 = vmatpush1.bf16.msra.mxu1 %v3740_v55  ;;  %1253 = vmatpush1.bf16.msra.mxu0 %v3743_v56 }
  0x4e   : > { %1849 = vmatprep.subr.bf16.mxu1 %v3748_v57  ;;  %2460 = vmatprep.subr.bf16.mxu0 %v3751_v58 }
  0x4f   : > { %491 = vmatmul.mubr.bf16.gmra.mrb[16].mxu0 %v4032_v59  ;;  %571 = vmatmul.mubr.bf16.gmra.mrb[16].mxu1 %v4035_v60 }
  0x50   : > { %500 = vmatprep.mubr.bf16.mxu0 %v5224_v2  ;;  %580 = vmatprep.mubr.bf16.mxu1 %v5224_v2 }
  0x57   : > { %501 = vmatmul.mubr.bf16.gmra.mrb[20].mxu0 %v4042_v61  ;;  %581 = vmatmul.mubr.bf16.gmra.mrb[20].mxu1 %v4045_v62 }
  0x58   : > { %510 = vmatprep.mubr.bf16.mxu0 %v5224_v2  ;;  %590 = vmatprep.mubr.bf16.mxu1 %v5224_v2 }
  0x5f   : > { %511 = vmatmul.mubr.bf16.gmra.mrb[24].mxu0 %v4052_v63  ;;  %591 = vmatmul.mubr.bf16.gmra.mrb[24].mxu1 %v4055_v0 }
  0x60   : > { %520 = vmatprep.mubr.bf16.mxu0 %v5224_v2  ;;  %600 = vmatprep.mubr.bf16.mxu1 %v5224_v2 }
  0x67   : > { %521 = vmatmul.mubr.bf16.gmra.mrb[28].mxu0 %v4062_v1  ;;  %601 = vmatmul.mubr.bf16.gmra.mrb[28].mxu1 %v4065_v3 }
  0x68   : > { %980 = vmatprep.mubr.bf16.mxu1 %v5224_v2  ;;  %1270 = vmatprep.mubr.bf16.mxu0 %v5224_v2 }
  0x6f   : > { %981 = vmatmul.mubr.bf16.vlgmr.msra.gmra.mrb[32].mxu1 %v3893_v18  ;;  %1271 = vmatmul.mubr.bf16.vlgmr.msra.gmra.mrb[32].mxu0 %v3893_v18 }
  0x70   : > { %1850 = vmatpush1.bf16.msra.mxu1 %v3746_v4  ;;  %2461 = vmatpush1.bf16.msra.mxu0 %v3749_v5 }
  0x71   : > { %990 = vmatprep.mubr.bf16.mxu1 %v5224_v2  ;;  %1280 = vmatprep.mubr.bf16.mxu0 %v5224_v2 }
  0x72   : > { %1851 = vmatprep.subr.bf16.mxu1 %v3754_v6  ;;  %2462 = vmatprep.subr.bf16.mxu0 %v3757_v7 }
  0x74   : > { %1852 = vmatpush1.bf16.msra.mxu1 %v3752_v8  ;;  %2463 = vmatpush1.bf16.msra.mxu0 %v3755_v9 }
  0x75   : > { %1853 = vmatprep.subr.bf16.mxu1 %v3760_v10  ;;  %2464 = vmatprep.subr.bf16.mxu0 %v3763_v11 }
  0x77   : > { %991 = vmatmul.mubr.bf16.gmra.mrb[36].mxu1 %v3930_v29  ;;  %1281 = vmatmul.mubr.bf16.gmra.mrb[36].mxu0 %v3930_v29 }
  0x78   : > { %1000 = vmatprep.mubr.bf16.mxu1 %v5224_v2  ;;  %1290 = vmatprep.mubr.bf16.mxu0 %v5224_v2 }
  0x79   : > { %1854 = vmatpush1.bf16.msra.mxu1 %v3758_v12  ;;  %2465 = vmatpush1.bf16.msra.mxu0 %v3761_v13 }
  0x7a   : > { %1855 = vmatprep.subr.bf16.mxu1 %v3766_v14  ;;  %2466 = vmatprep.subr.bf16.mxu0 %v3769_v15 }
  0x7d   : > { %1856 = vmatpush1.bf16.msra.mxu1 %v3764_v16  ;;  %2467 = vmatpush1.bf16.msra.mxu0 %v3767_v17 }
  0x7e   : > { %1857 = vmatprep.subr.bf16.mxu1 %v3772_v19  ;;  %2468 = vmatprep.subr.bf16.mxu0 %v3775_v21 }
  0x7f   : > { %1001 = vmatmul.mubr.bf16.gmra.mrb[40].mxu1 %v3964_v39  ;;  %1291 = vmatmul.mubr.bf16.gmra.mrb[40].mxu0 %v3964_v39 }
  0x80   : > { %1010 = vmatprep.mubr.bf16.mxu1 %v5224_v2  ;;  %1300 = vmatprep.mubr.bf16.mxu0 %v5224_v2 }
  0x81   : > { %1858 = vmatpush1.bf16.msra.mxu1 %v3770_v22  ;;  %2469 = vmatpush1.bf16.msra.mxu0 %v3773_v23 }
  0x82   : > { %1859 = vmatprep.subr.bf16.mxu1 %v3778_v24  ;;  %2470 = vmatprep.subr.bf16.mxu0 %v3781_v25 }
  0x85   : > { %1860 = vmatpush1.bf16.msra.mxu1 %v3776_v26  ;;  %2471 = vmatpush1.bf16.msra.mxu0 %v3779_v27 }
  0x86   : > { %1861 = vmatprep.subr.bf16.mxu1 %v3784_v28  ;;  %2472 = vmatprep.subr.bf16.mxu0 %v3787_v31 }
  0x87   : > { %1011 = vmatmul.mubr.bf16.gmra.mrb[44].mxu1 %v3998_v49  ;;  %1301 = vmatmul.mubr.bf16.gmra.mrb[44].mxu0 %v3998_v49 }
  0x88   : > { %1020 = vmatprep.mubr.bf16.mxu1 %v5224_v2  ;;  %1310 = vmatprep.mubr.bf16.mxu0 %v5224_v2 }
  0x89   : > { %1862 = vmatpush1.bf16.msra.mxu1 %v3782_v32  ;;  %2473 = vmatpush1.bf16.msra.mxu0 %v3785_v33 }
  0x8a   : > { %1863 = vmatprep.subr.bf16.mxu1 %v3790_v34  ;;  %2474 = vmatprep.subr.bf16.mxu0 %v3793_v35 }
  0x8d   : > { %1864 = vmatpush1.bf16.msra.mxu1 %v3788_v36  ;;  %2475 = vmatpush1.bf16.msra.mxu0 %v3791_v37 }
  0x8f   : > { %1021 = vmatmul.mubr.bf16.gmra.mrb[48].mxu1 %v4032_v59  ;;  %1311 = vmatmul.mubr.bf16.gmra.mrb[48].mxu0 %v4032_v59 }
  0x90   : > { %1030 = vmatprep.mubr.bf16.mxu1 %v5224_v2  ;;  %1320 = vmatprep.mubr.bf16.mxu0 %v5224_v2 }
  0x97   : > { %1031 = vmatmul.mubr.bf16.gmra.mrb[52].mxu1 %v4042_v61  ;;  %1321 = vmatmul.mubr.bf16.gmra.mrb[52].mxu0 %v4042_v61 }
  0x98   : > { %1040 = vmatprep.mubr.bf16.mxu1 %v5224_v2  ;;  %1330 = vmatprep.mubr.bf16.mxu0 %v5224_v2 }
  0x9f   : > { %1041 = vmatmul.mubr.bf16.gmra.mrb[56].mxu1 %v4052_v63  ;;  %1331 = vmatmul.mubr.bf16.gmra.mrb[56].mxu0 %v4052_v63 }
  0xa0   : > { %1050 = vmatprep.mubr.bf16.mxu1 %v5224_v2  ;;  %1340 = vmatprep.mubr.bf16.mxu0 %v5224_v2 }
  0xa7   : > { %1051 = vmatmul.mubr.bf16.gmra.mrb[60].mxu1 %v4062_v1  ;;  %1341 = vmatmul.mubr.bf16.gmra.mrb[60].mxu0 %v4062_v1 }
  0xa8   : > { %1060 = vmatprep.mubr.bf16.mxu1 %v5224_v2  ;;  %1350 = vmatprep.mubr.bf16.mxu0 %v5224_v2 }
  0xaf   : > { %1061 = vmatmul.mubr.bf16.gmra.mrb[64].mxu1 %v3899_v20  ;;  %1351 = vmatmul.mubr.bf16.gmra.mrb[64].mxu0 %v3899_v20 }
  0xb0   : > { %1070 = vmatprep.mubr.bf16.mxu1 %v5224_v2  ;;  %1360 = vmatprep.mubr.bf16.mxu0 %v5224_v2 }
  0xb7   : > { %1071 = vmatmul.mubr.bf16.gmra.mrb[68].mxu1 %v3933_v30  ;;  %1361 = vmatmul.mubr.bf16.gmra.mrb[68].mxu0 %v3933_v30 }
  0xb8   : > { %1080 = vmatprep.mubr.bf16.mxu1 %v5224_v2  ;;  %1370 = vmatprep.mubr.bf16.mxu0 %v5224_v2 }
  0xbf   : > { %1081 = vmatmul.mubr.bf16.gmra.mrb[72].mxu1 %v3967_v40  ;;  %1371 = vmatmul.mubr.bf16.gmra.mrb[72].mxu0 %v3967_v40 }
  0xc0   : > { %1090 = vmatprep.mubr.bf16.mxu1 %v5224_v2  ;;  %1380 = vmatprep.mubr.bf16.mxu0 %v5224_v2 }
  0xc7   : > { %1091 = vmatmul.mubr.bf16.gmra.mrb[76].mxu1 %v4001_v50  ;;  %1381 = vmatmul.mubr.bf16.gmra.mrb[76].mxu0 %v4001_v50 }
  0xc8   : > { %1100 = vmatprep.mubr.bf16.mxu1 %v5224_v2  ;;  %1390 = vmatprep.mubr.bf16.mxu0 %v5224_v2 }
  0xcf   : > { %1101 = vmatmul.mubr.bf16.gmra.mrb[80].mxu1 %v4035_v60  ;;  %1391 = vmatmul.mubr.bf16.gmra.mrb[80].mxu0 %v4035_v60 }
  0xd0   : > { %1110 = vmatprep.mubr.bf16.mxu1 %v5224_v2  ;;  %1400 = vmatprep.mubr.bf16.mxu0 %v5224_v2 }
  0xd7   : > { %1111 = vmatmul.mubr.bf16.gmra.mrb[84].mxu1 %v4045_v62  ;;  %1401 = vmatmul.mubr.bf16.gmra.mrb[84].mxu0 %v4045_v62 }
  0xd8   : > { %1120 = vmatprep.mubr.bf16.mxu1 %v5224_v2  ;;  %1410 = vmatprep.mubr.bf16.mxu0 %v5224_v2 }
  0xdf   : > { %1121 = vmatmul.mubr.bf16.gmra.mrb[88].mxu1 %v4055_v0  ;;  %1411 = vmatmul.mubr.bf16.gmra.mrb[88].mxu0 %v4055_v0 }
  0xe0   : > { %1130 = vmatprep.mubr.bf16.mxu1 %v5224_v2  ;;  %1420 = vmatprep.mubr.bf16.mxu0 %v5224_v2 }
  0xe7   : > { %1131 = vmatmul.mubr.bf16.gmra.mrb[92].mxu1 %v4065_v3  ;;  %1421 = vmatmul.mubr.bf16.gmra.mrb[92].mxu0 %v4065_v3 }
  0xe8   : > { %1881 = vmatprep.mubr.bf16.mxu1 %v5224_v2  ;;  %2492 = vmatprep.mubr.bf16.mxu0 %v5224_v2 }
  0xef   : > { %1882 = vmatmul.mubr.bf16.vlgmr.msra.gmra.mrb[96].mxu1 %v3893_v18  ;;  %2493 = vmatmul.mubr.bf16.vlgmr.msra.gmra.mrb[96].mxu0 %v3893_v18 }
  0xf0   : > { %1891 = vmatprep.mubr.bf16.mxu1 %v5224_v2  ;;  %2502 = vmatprep.mubr.bf16.mxu0 %v5224_v2 }
  0xf7   : > { %1892 = vmatmul.mubr.bf16.gmra.mrb[100].mxu1 %v3930_v29  ;;  %2503 = vmatmul.mubr.bf16.gmra.mrb[100].mxu0 %v3930_v29 }
  0xf8   : > { %1901 = vmatprep.mubr.bf16.mxu1 %v5224_v2  ;;  %2512 = vmatprep.mubr.bf16.mxu0 %v5224_v2 }
  0xff   : > { %1902 = vmatmul.mubr.bf16.gmra.mrb[104].mxu1 %v3964_v39  ;;  %2513 = vmatmul.mubr.bf16.gmra.mrb[104].mxu0 %v3964_v39 }
 0x100   : > { %1911 = vmatprep.mubr.bf16.mxu1 %v5224_v2  ;;  %2522 = vmatprep.mubr.bf16.mxu0 %v5224_v2 }
 0x102   : > { %v452_v18 = vpop.f32.mrb[0].mxu0  ;;  %v4237_v38 = vpop.f32.mrb[0].mxu1 }
 0x103   : > { %v676_v41 = vrot.slane %v452_v18, 1  ;;  %v454_v42 = vpop.f32.mrb[1].mxu0  ;;  %v4239_v43 = vpop.f32.mrb[1].mxu1  ;;  %v5223_v46 = vrot.slane %v4237_v38, 1 }
 0x104   : > { %v679_v29 = vrot.slane %v454_v42, 1  ;;  %v456_v44 = vpop.f32.mrb[2].mxu0  ;;  %v536_v45 = vpop.f32.mrb[2].mxu1  ;;  %v5222_v52 = vrot.slane %v4239_v43, 1 }
 0x105   : > { %v677_v47 = vrot.slane %v456_v44, 1  ;;  %v742_v48 = vrot.slane %v536_v45, 1  ;;  %v458_v39 = vpop.f32.mrb[3].mxu0  ;;  %v538_v51 = vpop.f32.mrb[3].mxu1 }
 0x106   : > { %v680_v53 = vrot.slane %v458_v39, 1  ;;  %v744_v54 = vrot.slane %v538_v51, 1 }
 0x107   : > { %1912 = vmatmul.mubr.bf16.gmra.mrb[108].mxu1 %v3998_v49  ;;  %2523 = vmatmul.mubr.bf16.gmra.mrb[108].mxu0 %v3998_v49  ;;  %v4246_v55 = vsel %vm675_vm0, %v676_v41, %v677_v47  ;;  %v4251_v56 = vsel %vm675_vm0, %v5223_v46, %v742_v48 }
 0x108   : > { %1921 = vmatprep.mubr.bf16.mxu1 %v5224_v2  ;;  %2532 = vmatprep.mubr.bf16.mxu0 %v5224_v2  ;;  %v4256_v57 = vsel %vm675_vm0, %v679_v29, %v680_v53  ;;  %v4261_v58 = vsel %vm675_vm0, %v5222_v52, %v744_v54 }
 0x10a   : > { %v462_v49 = vpop.f32.mrb[4].mxu0  ;;  %v542_v4 = vpop.f32.mrb[4].mxu1 }
 0x10b   : > { %v682_v5 = vrot.slane %v462_v49, 1  ;;  %v746_v6 = vrot.slane %v542_v4, 1  ;;  %v464_v7 = vpop.f32.mrb[5].mxu0  ;;  %v544_v8 = vpop.f32.mrb[5].mxu1 }
 0x10c   : > { %v684_v9 = vrot.slane %v464_v7, 1  ;;  %v748_v10 = vrot.slane %v544_v8, 1  ;;  %v466_v11 = vpop.f32.mrb[6].mxu0  ;;  %v546_v12 = vpop.f32.mrb[6].mxu1 }
 0x10d   : > { %v686_v13 = vrot.slane %v466_v11, 1  ;;  %v750_v14 = vrot.slane %v546_v12, 1  ;;  %v468_v15 = vpop.f32.mrb[7].mxu0  ;;  %v548_v16 = vpop.f32.mrb[7].mxu1  ;;  %v4264_v17 = vsel %vm675_vm0, %v677_v47, %v682_v5  ;;  %v4267_v19 = vsel %vm675_vm0, %v742_v48, %v746_v6 }
 0x10e   : > { %v688_v21 = vrot.slane %v468_v15, 1  ;;  %v752_v22 = vrot.slane %v548_v16, 1  ;;  %v4270_v23 = vsel %vm675_vm0, %v680_v53, %v684_v9  ;;  %v4273_v24 = vsel %vm675_vm0, %v744_v54, %v748_v10 }
 0x10f   : > { %1922 = vmatmul.mubr.bf16.gmra.mrb[112].mxu1 %v4032_v59  ;;  %2533 = vmatmul.mubr.bf16.gmra.mrb[112].mxu0 %v4032_v59  ;;  %v4278_v25 = vsel %vm675_vm0, %v682_v5, %v686_v13  ;;  %v4281_v26 = vsel %vm675_vm0, %v746_v6, %v750_v14 }
 0x110   : > { %1931 = vmatprep.mubr.bf16.mxu1 %v5224_v2  ;;  %2542 = vmatprep.mubr.bf16.mxu0 %v5224_v2  ;;  %v4286_v27 = vsel %vm675_vm0, %v684_v9, %v688_v21  ;;  %v4289_v28 = vsel %vm675_vm0, %v748_v10, %v752_v22 }
 0x112   : > { %v472_v31 = vpop.f32.mrb[8].mxu0  ;;  %v552_v32 = vpop.f32.mrb[8].mxu1 }
 0x113   : > { %v690_v33 = vrot.slane %v472_v31, 1  ;;  %v754_v59 = vrot.slane %v552_v32, 1  ;;  %v474_v34 = vpop.f32.mrb[9].mxu0  ;;  %v554_v35 = vpop.f32.mrb[9].mxu1 }
 0x114   : > { %v692_v36 = vrot.slane %v474_v34, 1  ;;  %v756_v37 = vrot.slane %v554_v35, 1  ;;  %v476_v18 = vpop.f32.mrb[10].mxu0  ;;  %v556_v41 = vpop.f32.mrb[10].mxu1 }
 0x115   : > { %v694_v42 = vrot.slane %v476_v18, 1  ;;  %v758_v29 = vrot.slane %v556_v41, 1  ;;  %v478_v44 = vpop.f32.mrb[11].mxu0  ;;  %v558_v45 = vpop.f32.mrb[11].mxu1  ;;  %v4292_v47 = vsel %vm675_vm0, %v686_v13, %v690_v33  ;;  %v4295_v48 = vsel %vm675_vm0, %v750_v14, %v754_v59 }
 0x116   : > { %v696_v39 = vrot.slane %v478_v44, 1  ;;  %v760_v51 = vrot.slane %v558_v45, 1  ;;  %v4298_v53 = vsel %vm675_vm0, %v688_v21, %v692_v36  ;;  %v4301_v54 = vsel %vm675_vm0, %v752_v22, %v756_v37 }
 0x117   : > { %5226 = vst [vmem:[#allocation2_spill] sm:$0xff] %v4301_v54  ;;  %1932 = vmatmul.mubr.bf16.gmra.mrb[116].mxu1 %v4042_v61  ;;  %2543 = vmatmul.mubr.bf16.gmra.mrb[116].mxu0 %v4042_v61  ;;  %v4306_v49 = vsel %vm675_vm0, %v690_v33, %v694_v42  ;;  %v4309_v4 = vsel %vm675_vm0, %v754_v59, %v758_v29 }
 0x118   : > { %5227 = vst [vmem:[#allocation3_spill] sm:$0xff] %v4309_v4  ;;  %1941 = vmatprep.mubr.bf16.mxu1 %v5224_v2  ;;  %2552 = vmatprep.mubr.bf16.mxu0 %v5224_v2  ;;  %v4314_v5 = vsel %vm675_vm0, %v692_v36, %v696_v39  ;;  %v4317_v6 = vsel %vm675_vm0, %v756_v37, %v760_v51 }
 0x119   : > { %5228 = vst [vmem:[#allocation4_spill] sm:$0xff] %v4317_v6 }
 0x11a   : > { %v482_v7 = vpop.f32.mrb[12].mxu0  ;;  %v562_v8 = vpop.f32.mrb[12].mxu1 }
 0x11b   : > { %v698_v9 = vrot.slane %v482_v7, 1  ;;  %v762_v61 = vrot.slane %v562_v8, 1  ;;  %v484_v10 = vpop.f32.mrb[13].mxu0  ;;  %v564_v11 = vpop.f32.mrb[13].mxu1 }
 0x11c   : > { %v700_v12 = vrot.slane %v484_v10, 1  ;;  %v764_v13 = vrot.slane %v564_v11, 1  ;;  %v486_v14 = vpop.f32.mrb[14].mxu0  ;;  %v566_v15 = vpop.f32.mrb[14].mxu1 }
 0x11d   : > { %v702_v16 = vrot.slane %v486_v14, 1  ;;  %v766_v21 = vrot.slane %v566_v15, 1  ;;  %v488_v22 = vpop.f32.mrb[15].mxu0  ;;  %v568_v31 = vpop.f32.mrb[15].mxu1  ;;  %v4320_v32 = vsel %vm675_vm0, %v694_v42, %v698_v9  ;;  %v4323_v33 = vsel %vm675_vm0, %v758_v29, %v762_v61 }
 0x11e   : > { %5229 = vst [vmem:[#allocation5_spill] sm:$0xff] %v4323_v33  ;;  %v704_v59 = vrot.slane %v488_v22, 1  ;;  %v768_v34 = vrot.slane %v568_v31, 1  ;;  %v4326_v35 = vsel %vm675_vm0, %v696_v39, %v700_v12  ;;  %v4329_v36 = vsel %vm675_vm0, %v760_v51, %v764_v13 }
 0x11f   : > { %5230 = vst [vmem:[#allocation6_spill] sm:$0xff] %v4329_v36  ;;  %1942 = vmatmul.mubr.bf16.gmra.mrb[120].mxu1 %v4052_v63  ;;  %2553 = vmatmul.mubr.bf16.gmra.mrb[120].mxu0 %v4052_v63  ;;  %v4334_v37 = vsel %vm675_vm0, %v698_v9, %v702_v16  ;;  %v4337_v18 = vsel %vm675_vm0, %v762_v61, %v766_v21 }
 0x120   : > { %5231 = vst [vmem:[#allocation7_spill] sm:$0xff] %v4337_v18  ;;  %1951 = vmatprep.mubr.bf16.mxu1 %v5224_v2  ;;  %2562 = vmatprep.mubr.bf16.mxu0 %v5224_v2  ;;  %v4342_v41 = vsel %vm675_vm0, %v700_v12, %v704_v59  ;;  %v4345_v42 = vsel %vm675_vm0, %v764_v13, %v768_v34 }
 0x121   : > { %5232 = vst [vmem:[#allocation8_spill] sm:$0xff] %v4345_v42 }
 0x122   : > { %v492_v29 = vpop.f32.mrb[16].mxu0  ;;  %v572_v44 = vpop.f32.mrb[16].mxu1 }
 0x123   : > { %v706_v45 = vrot.slane %v492_v29, 1  ;;  %v770_v63 = vrot.slane %v572_v44, 1  ;;  %v494_v39 = vpop.f32.mrb[17].mxu0  ;;  %v574_v51 = vpop.f32.mrb[17].mxu1 }
 0x124   : > { %v708_v7 = vrot.slane %v494_v39, 1  ;;  %v772_v8 = vrot.slane %v574_v51, 1  ;;  %v496_v9 = vpop.f32.mrb[18].mxu0  ;;  %v576_v61 = vpop.f32.mrb[18].mxu1 }
 0x125   : > { %v710_v10 = vrot.slane %v496_v9, 1  ;;  %v774_v11 = vrot.slane %v576_v61, 1  ;;  %v498_v14 = vpop.f32.mrb[19].mxu0  ;;  %v578_v15 = vpop.f32.mrb[19].mxu1  ;;  %v4348_v12 = vsel %vm675_vm0, %v702_v16, %v706_v45  ;;  %v4351_v13 = vsel %vm675_vm0, %v766_v21, %v770_v63 }
 0x126   : > { %5233 = vst [vmem:[#allocation9_spill] sm:$0xff] %v4351_v13  ;;  %v712_v22 = vrot.slane %v498_v14, 1  ;;  %v776_v31 = vrot.slane %v578_v15, 1  ;;  %v4354_v29 = vsel %vm675_vm0, %v704_v59, %v708_v7  ;;  %v4357_v44 = vsel %vm675_vm0, %v768_v34, %v772_v8 }
 0x127   : > { %5234 = vst [vmem:[#allocation10_spill] sm:$0xff] %v4357_v44  ;;  %1952 = vmatmul.mubr.bf16.gmra.mrb[124].mxu1 %v4062_v1  ;;  %2563 = vmatmul.mubr.bf16.gmra.mrb[124].mxu0 %v4062_v1  ;;  %v4362_v39 = vsel %vm675_vm0, %v706_v45, %v710_v10  ;;  %v4365_v16 = vsel %vm675_vm0, %v770_v63, %v774_v11 }
 0x128   : > { %5235 = vst [vmem:[#allocation11_spill] sm:$0xff] %v4365_v16  ;;  %1961 = vmatprep.mubr.bf16.mxu1 %v5224_v2  ;;  %2572 = vmatprep.mubr.bf16.mxu0 %v5224_v2  ;;  %v4370_v21 = vsel %vm675_vm0, %v708_v7, %v712_v22  ;;  %v4373_v59 = vsel %vm675_vm0, %v772_v8, %v776_v31 }
 0x129   : > { %5236 = vst [vmem:[#allocation12_spill] sm:$0xff] %v4373_v59 }
 0x12a   : > { %v502_v34 = vpop.f32.mrb[20].mxu0  ;;  %v582_v51 = vpop.f32.mrb[20].mxu1 }
 0x12b   : > { %v714_v9 = vrot.slane %v502_v34, 1  ;;  %v778_v1 = vrot.slane %v582_v51, 1  ;;  %v504_v61 = vpop.f32.mrb[21].mxu0  ;;  %v584_v45 = vpop.f32.mrb[21].mxu1 }
 0x12c   : > { %v716_v14 = vrot.slane %v504_v61, 1  ;;  %v780_v15 = vrot.slane %v584_v45, 1  ;;  %v506_v63 = vpop.f32.mrb[22].mxu0  ;;  %v586_v52 = vpop.f32.mrb[22].mxu1 }
 0x12d   : > { %v718_v46 = vrot.slane %v506_v63, 1  ;;  %v782_v16 = vrot.slane %v586_v52, 1  ;;  %v508_v44 = vpop.f32.mrb[23].mxu0  ;;  %v588_v2 = vpop.f32.mrb[23].mxu1  ;;  %v4376_v7 = vsel %vm675_vm0, %v710_v10, %v714_v9  ;;  %v4379_v8 = vsel %vm675_vm0, %v774_v11, %v778_v1 }
 0x12e   : > { %5237 = vst [vmem:[#allocation13_spill] sm:$0xff] %v4379_v8  ;;  %v720_v59 = vrot.slane %v508_v44, 1  ;;  %v784_v13 = vrot.slane %v588_v2, 1  ;;  %v4382_v34 = vsel %vm675_vm0, %v712_v22, %v716_v14  ;;  %v4385_v51 = vsel %vm675_vm0, %v776_v31, %v780_v15 }
 0x12f   : > { %5238 = vst [vmem:[#allocation14_spill] sm:$0xff] %v4385_v51  ;;  %1962 = vmatmul.mubr.bf16.gmra.mrb[128].mxu1 %v3899_v20  ;;  %2573 = vmatmul.mubr.bf16.gmra.mrb[128].mxu0 %v3899_v20  ;;  %v4390_v52 = vsel %vm675_vm0, %v714_v9, %v718_v46  ;;  %v4393_v10 = vsel %vm675_vm0, %v778_v1, %v782_v16  ;;  %v5240_v11 = vmov 0  }
 0x130   : > { %5239 = vst [vmem:[#allocation15_spill] sm:$0xff] %v4393_v10  ;;  %1971 = vmatprep.mubr.bf16.mxu1 %v5240_v11  ;;  %2582 = vmatprep.mubr.bf16.mxu0 %v5240_v11  ;;  %v4398_v2 = vsel %vm675_vm0, %v716_v14, %v720_v59  ;;  %v4401_v22 = vsel %vm675_vm0, %v780_v15, %v784_v13 }
 0x131   : > { %5241 = vst [vmem:[#allocation16_spill] sm:$0xff] %v4401_v22 }
 0x132   : > { %v512_v31 = vpop.f32.mrb[24].mxu0  ;;  %v592_v44 = vpop.f32.mrb[24].mxu1 }
 0x133   : > { %v722_v61 = vrot.slane %v512_v31, 1  ;;  %v786_v20 = vrot.slane %v592_v44, 1  ;;  %v514_v45 = vpop.f32.mrb[25].mxu0  ;;  %v594_v9 = vpop.f32.mrb[25].mxu1 }
 0x134   : > { %v724_v63 = vrot.slane %v514_v45, 1  ;;  %v788_v51 = vrot.slane %v594_v9, 1  ;;  %v516_v1 = vpop.f32.mrb[26].mxu0  ;;  %v596_v10 = vpop.f32.mrb[26].mxu1 }
 0x135   : > { %v726_v8 = vrot.slane %v516_v1, 1  ;;  %v790_v42 = vrot.slane %v596_v10, 1  ;;  %v518_v18 = vpop.f32.mrb[27].mxu0  ;;  %v598_v36 = vpop.f32.mrb[27].mxu1  ;;  %v4404_v14 = vsel %vm675_vm0, %v718_v46, %v722_v61  ;;  %v4407_v15 = vsel %vm675_vm0, %v782_v16, %v786_v20 }
 0x136   : > { %5242 = vst [vmem:[#allocation17_spill] sm:$0xff] %v4407_v15  ;;  %v728_v22 = vrot.slane %v518_v18, 1  ;;  %v792_v33 = vrot.slane %v598_v36, 1  ;;  %v4410_v31 = vsel %vm675_vm0, %v720_v59, %v724_v63  ;;  %v4413_v44 = vsel %vm675_vm0, %v784_v13, %v788_v51 }
 0x137   : > { %5243 = vst [vmem:[#allocation18_spill] sm:$0xff] %v4413_v44  ;;  %1972 = vmatmul.mubr.bf16.gmra.mrb[132].mxu1 %v3933_v30  ;;  %2583 = vmatmul.mubr.bf16.gmra.mrb[132].mxu0 %v3933_v30  ;;  %v4418_v10 = vsel %vm675_vm0, %v722_v61, %v726_v8  ;;  %v4421_v46 = vsel %vm675_vm0, %v786_v20, %v790_v42 }
 0x138   : > { %5244 = vst [vmem:[#allocation19_spill] sm:$0xff] %v4421_v46  ;;  %1981 = vmatprep.mubr.bf16.mxu1 %v5240_v11  ;;  %2592 = vmatprep.mubr.bf16.mxu0 %v5240_v11  ;;  %v4426_v36 = vsel %vm675_vm0, %v724_v63, %v728_v22  ;;  %v4429_v18 = vsel %vm675_vm0, %v788_v51, %v792_v33 }
 0x139   : > { %5245 = vst [vmem:[#allocation20_spill] sm:$0xff] %v4429_v18 }
 0x13a   : > { %v522_v13 = vpop.f32.mrb[28].mxu0  ;;  %v602_v16 = vpop.f32.mrb[28].mxu1 }
 0x13b   : > { %v730_v59 = vrot.slane %v522_v13, 1  ;;  %v794_v30 = vrot.slane %v602_v16, 1  ;;  %v524_v45 = vpop.f32.mrb[29].mxu0  ;;  %v604_v61 = vpop.f32.mrb[29].mxu1 }
 0x13c   : > { %v732_v9 = vrot.slane %v524_v45, 1  ;;  %v796_v1 = vrot.slane %v604_v61, 1  ;;  %v526_v20 = vpop.f32.mrb[30].mxu0  ;;  %v606_v46 = vpop.f32.mrb[30].mxu1 }
 0x13d   : > { %v734_v44 = vrot.slane %v526_v20, 1  ;;  %v798_v15 = vrot.slane %v606_v46, 1  ;;  %v528_v6 = vpop.f32.mrb[31].mxu0  ;;  %v608_v4 = vpop.f32.mrb[31].mxu1  ;;  %v4432_v63 = vsel %vm675_vm0, %v726_v8, %v730_v59  ;;  %v4435_v51 = vsel %vm675_vm0, %v790_v42, %v794_v30 }
 0x13e   : > { %v736_v18 = vrot.slane %v528_v6, 1  ;;  %v800_v54 = vrot.slane %v608_v4, 1  ;;  %v4438_v13 = vsel %vm675_vm0, %v728_v22, %v732_v9  ;;  %v4441_v16 = vsel %vm675_vm0, %v792_v33, %v796_v1 }
 0x13f   : > { %1982 = vmatmul.mubr.bf16.gmra.mrb[136].mxu1 %v3967_v40  ;;  %2593 = vmatmul.mubr.bf16.gmra.mrb[136].mxu0 %v3967_v40  ;;  %v4446_v46 = vsel %vm675_vm0, %v730_v59, %v734_v44  ;;  %v5246_v8 = vrot.slane %v4237_v38, 1  ;;  %v4454_v4 = vsel %vm675_vm0, %v794_v30, %v798_v15  ;;  %v4457_v6 = vsel %vm675_vm0, %v798_v15, 0.0 }
 0x140   : > { %5247 = vst [vmem:[#allocation21_spill] sm:$0xff] %v4454_v4  ;;  %5248 = vst [vmem:[#allocation22_spill] sm:$0xff] %v4457_v6  ;;  %1991 = vmatprep.mubr.bf16.mxu1 %v5240_v11  ;;  %2602 = vmatprep.mubr.bf16.mxu0 %v5240_v11  ;;  %v4462_v40 = vsel %vm675_vm0, %v732_v9, %v736_v18  ;;  %v5249_v33 = vrot.slane %v4239_v43, 1  ;;  %v4470_v22 = vsel %vm675_vm0, %v796_v1, %v800_v54 }
 0x141   : > { %v4451_v42 = vsel %vm675_vm0, %v734_v44, %v5246_v8  ;;  %5250 = vst [vmem:[#allocation23_spill] sm:$0xff] %v4470_v22  ;;  %v4473_v44 = vsel %vm675_vm0, %v800_v54, 0.0 }
 0x142   : > { %v4467_v38 = vsel %vm675_vm0, %v736_v18, %v5249_v33  ;;  %5251 = vst [vmem:[#allocation24_spill] sm:$0xff] %v4473_v44  ;;  %v982_v15 = vpop.f32.mrb[32].mxu1  ;;  %v1272_v59 = vpop.f32.mrb[32].mxu0 }
 0x143   : > { %v983_v30 = vadd.f32 %v982_v15, %v4246_v55  ;;  %v1496_v45 = vrot.slane %v1272_v59, 2  ;;  %v984_v61 = vpop.f32.mrb[33].mxu1  ;;  %v1274_v20 = vpop.f32.mrb[33].mxu0 }
 0x144   : > { %v985_v9 = vadd.f32 %v984_v61, %v4256_v57  ;;  %v1499_v8 = vrot.slane %v1274_v20, 2  ;;  %v986_v43 = vpop.f32.mrb[34].mxu1  ;;  %v1276_v6 = vpop.f32.mrb[34].mxu0 }
 0x145   : > { %v987_v18 = vadd.f32 %v986_v43, %v4264_v17  ;;  %v1497_v1 = vrot.slane %v1276_v6, 2  ;;  %v988_v33 = vpop.f32.mrb[35].mxu1  ;;  %v1278_v22 = vpop.f32.mrb[35].mxu0 }
 0x146   : > { %v989_v54 = vadd.f32 %v988_v33, %v4270_v23  ;;  %v1500_v44 = vrot.slane %v1278_v22, 2 }
 0x147   : > { %v1498_v4 = vsel %vm1495_vm1, %v1496_v45, %v1497_v1  ;;  %1992 = vmatmul.mubr.bf16.gmra.mrb[140].mxu1 %v4001_v50  ;;  %2603 = vmatmul.mubr.bf16.gmra.mrb[140].mxu0 %v4001_v50 }
 0x148   : > { %v4482_v55 = vadd.f32 %v1498_v4, %v983_v30  ;;  %v1501_v57 = vsel %vm1495_vm1, %v1499_v8, %v1500_v44  ;;  %2001 = vmatprep.mubr.bf16.mxu1 %v5240_v11  ;;  %2612 = vmatprep.mubr.bf16.mxu0 %v5240_v11 }
 0x149   : > { %v4487_v17 = vadd.f32 %v1501_v57, %v985_v9 }
 0x14a   : > { %v992_v6 = vpop.f32.mrb[36].mxu1  ;;  %v1282_v15 = vpop.f32.mrb[36].mxu0 }
 0x14b   : > { %5252 = vst [vmem:[#allocation25_spill] sm:$0xff] %v4487_v17  ;;  %v993_v23 = vadd.f32 %v992_v6, %v4278_v25  ;;  %v1502_v22 = vrot.slane %v1282_v15, 2  ;;  %v994_v59 = vpop.f32.mrb[37].mxu1  ;;  %v1284_v45 = vpop.f32.mrb[37].mxu0 }
 0x14c   : > { %v995_v61 = vadd.f32 %v994_v59, %v4286_v27  ;;  %v1504_v50 = vrot.slane %v1284_v45, 2  ;;  %v996_v4 = vpop.f32.mrb[38].mxu1  ;;  %v1286_v30 = vpop.f32.mrb[38].mxu0 }
 0x14d   : > { %v1503_v20 = vsel %vm1495_vm1, %v1497_v1, %v1502_v22  ;;  %v997_v8 = vadd.f32 %v996_v4, %v4292_v47  ;;  %v1506_v43 = vrot.slane %v1286_v30, 2  ;;  %v998_v33 = vpop.f32.mrb[39].mxu1  ;;  %v1288_v9 = vpop.f32.mrb[39].mxu0 }
 0x14e   : > { %v4493_v57 = vadd.f32 %v1503_v20, %v987_v18  ;;  %v1505_v17 = vsel %vm1495_vm1, %v1500_v44, %v1504_v50  ;;  %v999_v25 = vadd.f32 %v998_v33, %v4298_v53  ;;  %v1508_v6 = vrot.slane %v1288_v9, 2 }
 0x14f   : > { %v4497_v15 = vadd.f32 %v1505_v17, %v989_v54  ;;  %v1507_v27 = vsel %vm1495_vm1, %v1502_v22, %v1506_v43  ;;  %2002 = vmatmul.mubr.bf16.gmra.mrb[144].mxu1 %v4035_v60  ;;  %2613 = vmatmul.mubr.bf16.gmra.mrb[144].mxu0 %v4035_v60 }
 0x150   : > { %v4502_v1 = vadd.f32 %v1507_v27, %v993_v23  ;;  %v1509_v47 = vsel %vm1495_vm1, %v1504_v50, %v1508_v6  ;;  %2011 = vmatprep.mubr.bf16.mxu1 %v5240_v11  ;;  %2622 = vmatprep.mubr.bf16.mxu0 %v5240_v11 }
 0x151   : > { %v4507_v44 = vadd.f32 %v1509_v47, %v995_v61 }
 0x152   : > { %v1002_v53 = vpop.f32.mrb[40].mxu1  ;;  %v1292_v18 = vpop.f32.mrb[40].mxu0 }
 0x153   : > { %v1003_v54 = vadd.f32 %v1002_v53, %v4306_v49  ;;  %v1510_v17 = vrot.slane %v1292_v18, 2  ;;  %v1004_v22 = vpop.f32.mrb[41].mxu1  ;;  %v1294_v59 = vpop.f32.mrb[41].mxu0 }
 0x154   : > { %v1005_v45 = vadd.f32 %v1004_v22, %v4314_v5  ;;  %v1512_v60 = vrot.slane %v1294_v59, 2  ;;  %v1006_v23 = vpop.f32.mrb[42].mxu1  ;;  %v1296_v4 = vpop.f32.mrb[42].mxu0 }
 0x155   : > { %v1511_v50 = vsel %vm1495_vm1, %v1506_v43, %v1510_v17  ;;  %v1007_v30 = vadd.f32 %v1006_v23, %v4320_v32  ;;  %v1514_v20 = vrot.slane %v1296_v4, 2  ;;  %v1008_v33 = vpop.f32.mrb[43].mxu1  ;;  %v1298_v61 = vpop.f32.mrb[43].mxu0 }
 0x156   : > { %v4513_v9 = vadd.f32 %v1511_v50, %v997_v8  ;;  %v1513_v27 = vsel %vm1495_vm1, %v1508_v6, %v1512_v60  ;;  %v1009_v49 = vadd.f32 %v1008_v33, %v4326_v35  ;;  %v1516_v47 = vrot.slane %v1298_v61, 2 }
 0x157   : > { %v4517_v53 = vadd.f32 %v1513_v27, %v999_v25  ;;  %v1515_v5 = vsel %vm1495_vm1, %v1510_v17, %v1514_v20  ;;  %2012 = vmatmul.mubr.bf16.gmra.mrb[148].mxu1 %v4045_v62  ;;  %2623 = vmatmul.mubr.bf16.gmra.mrb[148].mxu0 %v4045_v62 }
 0x158   : > { %v4522_v43 = vadd.f32 %v1515_v5, %v1003_v54  ;;  %v1517_v32 = vsel %vm1495_vm1, %v1512_v60, %v1516_v47  ;;  %2021 = vmatprep.mubr.bf16.mxu1 %v5240_v11  ;;  %2632 = vmatprep.mubr.bf16.mxu0 %v5240_v11 }
 0x159   : > { %v4527_v8 = vadd.f32 %v1517_v32, %v1005_v45 }
 0x15a   : > { %v1012_v35 = vpop.f32.mrb[44].mxu1  ;;  %v1302_v6 = vpop.f32.mrb[44].mxu0 }
 0x15b   : > { %v1013_v25 = vadd.f32 %v1012_v35, %v4334_v37  ;;  %v1518_v18 = vrot.slane %v1302_v6, 2  ;;  %v1014_v17 = vpop.f32.mrb[45].mxu1  ;;  %v1304_v22 = vpop.f32.mrb[45].mxu0 }
 0x15c   : > { %v1015_v59 = vadd.f32 %v1014_v17, %v4342_v41  ;;  %v1520_v62 = vrot.slane %v1304_v22, 2  ;;  %v1016_v54 = vpop.f32.mrb[46].mxu1  ;;  %v1306_v23 = vpop.f32.mrb[46].mxu0 }
 0x15d   : > { %v1519_v60 = vsel %vm1495_vm1, %v1514_v20, %v1518_v18  ;;  %v1017_v4 = vadd.f32 %v1016_v54, %v4348_v12  ;;  %v1522_v50 = vrot.slane %v1306_v23, 2  ;;  %v1018_v33 = vpop.f32.mrb[47].mxu1  ;;  %v1308_v45 = vpop.f32.mrb[47].mxu0 }
 0x15e   : > { %v4533_v61 = vadd.f32 %v1519_v60, %v1007_v30  ;;  %v1521_v27 = vsel %vm1495_vm1, %v1516_v47, %v1520_v62  ;;  %v1019_v37 = vadd.f32 %v1018_v33, %v4354_v29  ;;  %v1524_v5 = vrot.slane %v1308_v45, 2 }
 0x15f   : > { %v4537_v32 = vadd.f32 %v1521_v27, %v1009_v49  ;;  %v1523_v41 = vsel %vm1495_vm1, %v1518_v18, %v1522_v50  ;;  %2022 = vmatmul.mubr.bf16.gmra.mrb[152].mxu1 %v4055_v0  ;;  %2633 = vmatmul.mubr.bf16.gmra.mrb[152].mxu0 %v4055_v0 }
 0x160   : > { %v4542_v20 = vadd.f32 %v1523_v41, %v1013_v25  ;;  %v1525_v12 = vsel %vm1495_vm1, %v1520_v62, %v1524_v5  ;;  %2031 = vmatprep.mubr.bf16.mxu1 %v5240_v11  ;;  %2642 = vmatprep.mubr.bf16.mxu0 %v5240_v11 }
 0x161   : > { %v4547_v30 = vadd.f32 %v1525_v12, %v1015_v59 }
 0x162   : > { %v1022_v29 = vpop.f32.mrb[48].mxu1  ;;  %v1312_v47 = vpop.f32.mrb[48].mxu0 }
 0x163   : > { %v1023_v49 = vadd.f32 %v1022_v29, %v4362_v39  ;;  %v1526_v35 = vrot.slane %v1312_v47, 2  ;;  %v1024_v6 = vpop.f32.mrb[49].mxu1  ;;  %v1314_v18 = vpop.f32.mrb[49].mxu0 }
 0x164   : > { %v1025_v17 = vadd.f32 %v1024_v6, %v4370_v21  ;;  %v1528_v0 = vrot.slane %v1314_v18, 2  ;;  %v1026_v25 = vpop.f32.mrb[50].mxu1  ;;  %v1316_v22 = vpop.f32.mrb[50].mxu0 }
 0x165   : > { %v1527_v62 = vsel %vm1495_vm1, %v1522_v50, %v1526_v35  ;;  %v1027_v54 = vadd.f32 %v1026_v25, %v4376_v7  ;;  %v1530_v23 = vrot.slane %v1316_v22, 2  ;;  %v1028_v11 = vpop.f32.mrb[51].mxu1  ;;  %v1318_v59 = vpop.f32.mrb[51].mxu0 }
 0x166   : > { %v4553_v60 = vadd.f32 %v1527_v62, %v1017_v4  ;;  %v1529_v33 = vsel %vm1495_vm1, %v1524_v5, %v1528_v0  ;;  %v1029_v39 = vadd.f32 %v1028_v11, %v4382_v34  ;;  %v1532_v45 = vrot.slane %v1318_v59, 2 }
 0x167   : > { %v4557_v27 = vadd.f32 %v1529_v33, %v1019_v37  ;;  %v1531_v21 = vsel %vm1495_vm1, %v1526_v35, %v1530_v23  ;;  %2032 = vmatmul.mubr.bf16.gmra.mrb[156].mxu1 %v4065_v3  ;;  %2643 = vmatmul.mubr.bf16.gmra.mrb[156].mxu0 %v4065_v3 }
 0x168   : > { %v4562_v50 = vadd.f32 %v1531_v21, %v1023_v49  ;;  %v1533_v7 = vsel %vm1495_vm1, %v1528_v0, %v1532_v45 }
 0x169   : > { %v4565_v41 = vadd.f32 %v1533_v7, %v1025_v17 }
 0x16a   : > { %v1032_v4 = vpop.f32.mrb[52].mxu1  ;;  %v1322_v12 = vpop.f32.mrb[52].mxu0 }
 0x16b   : > { %v1033_v5 = vadd.f32 %v1032_v4, %v4390_v52  ;;  %v1534_v34 = vrot.slane %v1322_v12, 2  ;;  %v1034_v29 = vpop.f32.mrb[53].mxu1  ;;  %v1324_v37 = vpop.f32.mrb[53].mxu0 }
 0x16c   : > { %v1035_v47 = vadd.f32 %v1034_v29, %v4398_v2  ;;  %v1536_v35 = vrot.slane %v1324_v37, 2  ;;  %v1036_v6 = vpop.f32.mrb[54].mxu1  ;;  %v1326_v18 = vpop.f32.mrb[54].mxu0 }
 0x16d   : > { %v1535_v3 = vsel %vm1495_vm1, %v1530_v23, %v1534_v34  ;;  %v1037_v49 = vadd.f32 %v1036_v6, %v4404_v14  ;;  %v1538_v25 = vrot.slane %v1326_v18, 2  ;;  %v1038_v0 = vpop.f32.mrb[55].mxu1  ;;  %v1328_v17 = vpop.f32.mrb[55].mxu0 }
 0x16e   : > { %v4571_v22 = vadd.f32 %v1535_v3, %v1027_v54  ;;  %v1537_v62 = vsel %vm1495_vm1, %v1532_v45, %v1536_v35  ;;  %v1039_v52 = vadd.f32 %v1038_v0, %v4410_v31  ;;  %v1540_v11 = vrot.slane %v1328_v17, 2 }
 0x16f   : > { %v4575_v59 = vadd.f32 %v1537_v62, %v1029_v39  ;;  %v1539_v2 = vsel %vm1495_vm1, %v1534_v34, %v1538_v25 }
 0x170   : > { %v4578_v33 = vadd.f32 %v1539_v2, %v1033_v5  ;;  %v1541_v23 = vsel %vm1495_vm1, %v1536_v35, %v1540_v11 }
 0x171   : > { %v4581_v21 = vadd.f32 %v1541_v23, %v1035_v47 }
 0x172   : > { %v1042_v14 = vpop.f32.mrb[56].mxu1  ;;  %v1332_v7 = vpop.f32.mrb[56].mxu0 }
 0x173   : > { %v1043_v54 = vadd.f32 %v1042_v14, %v4418_v10  ;;  %v1542_v4 = vrot.slane %v1332_v7, 2  ;;  %v1044_v12 = vpop.f32.mrb[57].mxu1  ;;  %v1334_v45 = vpop.f32.mrb[57].mxu0 }
 0x174   : > { %v1045_v31 = vadd.f32 %v1044_v12, %v4426_v36  ;;  %v1544_v29 = vrot.slane %v1334_v45, 2  ;;  %v1046_v39 = vpop.f32.mrb[58].mxu1  ;;  %v1336_v37 = vpop.f32.mrb[58].mxu0 }
 0x175   : > { %v1543_v34 = vsel %vm1495_vm1, %v1538_v25, %v1542_v4  ;;  %v1047_v5 = vadd.f32 %v1046_v39, %v4432_v63  ;;  %v1546_v6 = vrot.slane %v1336_v37, 2  ;;  %v1048_v35 = vpop.f32.mrb[59].mxu1  ;;  %v1338_v47 = vpop.f32.mrb[59].mxu0 }
 0x176   : > { %v4587_v18 = vadd.f32 %v1543_v34, %v1037_v49  ;;  %v1545_v3 = vsel %vm1495_vm1, %v1540_v11, %v1544_v29  ;;  %v1049_v10 = vadd.f32 %v1048_v35, %v4438_v13  ;;  %v1548_v0 = vrot.slane %v1338_v47, 2 }
 0x177   : > { %v4591_v17 = vadd.f32 %v1545_v3, %v1039_v52  ;;  %v1547_v36 = vsel %vm1495_vm1, %v1542_v4, %v1546_v6 }
 0x178   : > { %v4594_v62 = vadd.f32 %v1547_v36, %v1043_v54  ;;  %v1549_v25 = vsel %vm1495_vm1, %v1544_v29, %v1548_v0 }
 0x179   : > { %v4597_v2 = vadd.f32 %v1549_v25, %v1045_v31 }
 0x17a   : > { %v1052_v63 = vpop.f32.mrb[60].mxu1  ;;  %v1342_v23 = vpop.f32.mrb[60].mxu0 }
 0x17b   : > { %v1053_v49 = vadd.f32 %v1052_v63, %v4446_v46  ;;  %v1550_v14 = vrot.slane %v1342_v23, 2  ;;  %v1054_v7 = vpop.f32.mrb[61].mxu1  ;;  %v1344_v11 = vpop.f32.mrb[61].mxu0 }
 0x17c   : > { %v1055_v13 = vadd.f32 %v1054_v7, %v4462_v40  ;;  %v1552_v12 = vrot.slane %v1344_v11, 2  ;;  %v1056_v52 = vpop.f32.mrb[62].mxu1  ;;  %v1346_v45 = vpop.f32.mrb[62].mxu0 }
 0x17d   : > { %v1551_v4 = vsel %vm1495_vm1, %v1546_v6, %v1550_v14  ;;  %v1057_v54 = vadd.f32 %v1056_v52, %v4451_v42  ;;  %v1554_v39 = vrot.slane %v1346_v45, 2  ;;  %v1058_v29 = vpop.f32.mrb[63].mxu1  ;;  %v1348_v31 = vpop.f32.mrb[63].mxu0 }
 0x17e   : > { %v4603_v37 = vadd.f32 %v1551_v4, %v1047_v5  ;;  %v1553_v34 = vsel %vm1495_vm1, %v1548_v0, %v1552_v12  ;;  %v1059_v46 = vadd.f32 %v1058_v29, %v4467_v38  ;;  %v1556_v35 = vrot.slane %v1348_v31, 2 }
 0x17f   : > { %v4607_v47 = vadd.f32 %v1553_v34, %v1049_v10  ;;  %v1555_v40 = vsel %vm1495_vm1, %v1550_v14, %v1554_v39 }
 0x180   : > { %v4610_v3 = vadd.f32 %v1555_v40, %v1053_v49  ;;  %v1557_v6 = vsel %vm1495_vm1, %v1552_v12, %v1556_v35 }
 0x181   : > { %v4613_v36 = vadd.f32 %v1557_v6, %v1055_v13 }
 0x182   : > { %v1062_v42 = vpop.f32.mrb[64].mxu1  ;;  %v1352_v25 = vpop.f32.mrb[64].mxu0 }
 0x183   : > { %v1063_v5 = vadd.f32 %v1062_v42, %v4251_v56  ;;  %v1558_v63 = vrot.slane %v1352_v25, 2  ;;  %v1064_v23 = vpop.f32.mrb[65].mxu1  ;;  %v1354_v0 = vpop.f32.mrb[65].mxu0 }
 0x184   : > { %v1065_v38 = vadd.f32 %v1064_v23, %v4261_v58  ;;  %v1560_v7 = vrot.slane %v1354_v0, 2  ;;  %v1066_v10 = vpop.f32.mrb[66].mxu1  ;;  %v1356_v11 = vpop.f32.mrb[66].mxu0 }
 0x185   : > { %v1559_v14 = vsel %vm1495_vm1, %v1554_v39, %v1558_v63  ;;  %v1067_v49 = vadd.f32 %v1066_v10, %v4267_v19  ;;  %v1562_v52 = vrot.slane %v1356_v11, 2  ;;  %v1068_v12 = vpop.f32.mrb[67].mxu1  ;;  %v1358_v13 = vpop.f32.mrb[67].mxu0 }
 0x186   : > { %v4619_v45 = vadd.f32 %v1559_v14, %v1057_v54  ;;  %v1561_v4 = vsel %vm1495_vm1, %v1556_v35, %v1560_v7  ;;  %v1069_v56 = vadd.f32 %v1068_v12, %v4273_v24  ;;  %v1564_v29 = vrot.slane %v1358_v13, 2 }
 0x187   : > { %v4623_v31 = vadd.f32 %v1561_v4, %v1059_v46  ;;  %v1563_v58 = vsel %vm1495_vm1, %v1558_v63, %v1562_v52 }
 0x188   : > { %v4626_v34 = vadd.f32 %v1563_v58, %v1063_v5  ;;  %v1565_v39 = vsel %vm1495_vm1, %v1560_v7, %v1564_v29 }
 0x189   : > { %v4629_v40 = vadd.f32 %v1565_v39, %v1065_v38 }
 0x18a   : > { %v1072_v19 = vpop.f32.mrb[68].mxu1  ;;  %v1362_v6 = vpop.f32.mrb[68].mxu0 }
 0x18b   : > { %v1073_v54 = vadd.f32 %v1072_v19, %v4281_v26  ;;  %v1566_v42 = vrot.slane %v1362_v6, 2  ;;  %v1074_v25 = vpop.f32.mrb[69].mxu1  ;;  %v1364_v35 = vpop.f32.mrb[69].mxu0  ;;  %v5253_v26 = vld [vmem:[#allocation2_spill] sm:$0xff]  ;;  %v5255_v6 = vld [vmem:[#allocation3_spill] sm:$0xff] }
 0x18c   : > { %v1075_v24 = vadd.f32 %v1074_v25, %v4289_v28  ;;  %v1568_v23 = vrot.slane %v1364_v35, 2  ;;  %v1076_v46 = vpop.f32.mrb[70].mxu1  ;;  %v1366_v0 = vpop.f32.mrb[70].mxu0 }
 0x18d   : > { %v1567_v63 = vsel %vm1495_vm1, %v1562_v52, %v1566_v42  ;;  %v1077_v5 = vadd.f32 %v1076_v46, %v4295_v48  ;;  %v1570_v10 = vrot.slane %v1366_v0, 2  ;;  %v1078_v7 = vpop.f32.mrb[71].mxu1  ;;  %v1368_v38 = vpop.f32.mrb[71].mxu0  ;;  %v5256_v46 = vld [vmem:[#allocation4_spill] sm:$0xff] }
 0x18e   : > { %v4635_v11 = vadd.f32 %v1567_v63, %v1067_v49  ;;  %v1569_v14 = vsel %vm1495_vm1, %v1564_v29, %v1568_v23  ;;  %v1079_v12 = vadd.f32 %v1078_v7, %v5253_v26  ;;  %v1572_v13 = vrot.slane %v1368_v38, 2 }
 0x18f   : > { %v4639_v4 = vadd.f32 %v1569_v14, %v1069_v56  ;;  %v1571_v28 = vsel %vm1495_vm1, %v1566_v42, %v1570_v10 }
 0x190   : > { %v4642_v58 = vadd.f32 %v1571_v28, %v1073_v54  ;;  %v1573_v52 = vsel %vm1495_vm1, %v1568_v23, %v1572_v13  ;;  %v5257_v54 = vld [vmem:[#allocation5_spill] sm:$0xff] }
 0x191   : > { %v4645_v39 = vadd.f32 %v1573_v52, %v1075_v24  ;;  %v5259_v52 = vld [vmem:[#allocation6_spill] sm:$0xff] }
 0x192   : > { %v1082_v48 = vpop.f32.mrb[72].mxu1  ;;  %v1372_v19 = vpop.f32.mrb[72].mxu0 }
 0x193   : > { %5254 = vst [vmem:[#allocation2_spill] sm:$0xff] %v4645_v39  ;;  %v1083_v49 = vadd.f32 %v1082_v48, %v5255_v6  ;;  %v1574_v25 = vrot.slane %v1372_v19, 2  ;;  %v1084_v35 = vpop.f32.mrb[73].mxu1  ;;  %v1374_v29 = vpop.f32.mrb[73].mxu0  ;;  %v5264_v39 = vld [vmem:[#allocation8_spill] sm:$0xff] }
 0x194   : > { %v1085_v0 = vadd.f32 %v1084_v35, %v5256_v46  ;;  %v1576_v63 = vrot.slane %v1374_v29, 2  ;;  %v1086_v56 = vpop.f32.mrb[74].mxu1  ;;  %v1376_v7 = vpop.f32.mrb[74].mxu0 }
 0x195   : > { %v1575_v42 = vsel %vm1495_vm1, %v1570_v10, %v1574_v25  ;;  %v1087_v38 = vadd.f32 %v1086_v56, %v5257_v54  ;;  %v1578_v14 = vrot.slane %v1376_v7, 2  ;;  %v1088_v23 = vpop.f32.mrb[75].mxu1  ;;  %v1378_v24 = vpop.f32.mrb[75].mxu0  ;;  %v5263_v54 = vld [vmem:[#allocation7_spill] sm:$0xff] }
 0x196   : > { %v4651_v26 = vadd.f32 %v1575_v42, %v1077_v5  ;;  %v1577_v28 = vsel %vm1495_vm1, %v1572_v13, %v1576_v63  ;;  %v1089_v48 = vadd.f32 %v1088_v23, %v5259_v52  ;;  %v1580_v19 = vrot.slane %v1378_v24, 2 }
 0x197   : > { %v4655_v6 = vadd.f32 %v1577_v28, %v1079_v12  ;;  %v1579_v35 = vsel %vm1495_vm1, %v1574_v25, %v1578_v14 }
 0x198   : > { %5258 = vst [vmem:[#allocation3_spill] sm:$0xff] %v4651_v26  ;;  %v4658_v29 = vadd.f32 %v1579_v35, %v1083_v49  ;;  %v1581_v10 = vsel %vm1495_vm1, %v1576_v63, %v1580_v19  ;;  %v5265_v49 = vld [vmem:[#allocation9_spill] sm:$0xff] }
 0x199   : > { %5260 = vst [vmem:[#allocation4_spill] sm:$0xff] %v4655_v6  ;;  %v4661_v46 = vadd.f32 %v1581_v10, %v1085_v0  ;;  %v5272_v6 = vld [vmem:[#allocation12_spill] sm:$0xff] }
 0x19a   : > { %5261 = vst [vmem:[#allocation5_spill] sm:$0xff] %v4658_v29  ;;  %v1092_v56 = vpop.f32.mrb[76].mxu1  ;;  %v1382_v7 = vpop.f32.mrb[76].mxu0 }
 0x19b   : > { %5262 = vst [vmem:[#allocation6_spill] sm:$0xff] %v4661_v46  ;;  %v1093_v5 = vadd.f32 %v1092_v56, %v5263_v54  ;;  %v1582_v42 = vrot.slane %v1382_v7, 2  ;;  %v1094_v26 = vpop.f32.mrb[77].mxu1  ;;  %v1384_v13 = vpop.f32.mrb[77].mxu0  ;;  %v5267_v56 = vld [vmem:[#allocation10_spill] sm:$0xff] }
 0x19c   : > { %v1095_v23 = vadd.f32 %v1094_v26, %v5264_v39  ;;  %v1584_v24 = vrot.slane %v1384_v13, 2  ;;  %v1096_v12 = vpop.f32.mrb[78].mxu1  ;;  %v1386_v28 = vpop.f32.mrb[78].mxu0 }
 0x19d   : > { %v1583_v25 = vsel %vm1495_vm1, %v1578_v14, %v1582_v42  ;;  %v1097_v52 = vadd.f32 %v1096_v12, %v5265_v49  ;;  %v1586_v35 = vrot.slane %v1386_v28, 2  ;;  %v1098_v63 = vpop.f32.mrb[79].mxu1  ;;  %v1388_v0 = vpop.f32.mrb[79].mxu0  ;;  %v5271_v49 = vld [vmem:[#allocation11_spill] sm:$0xff] }
 0x19e   : > { %v4667_v10 = vadd.f32 %v1583_v25, %v1087_v38  ;;  %v1585_v46 = vsel %vm1495_vm1, %v1580_v19, %v1584_v24  ;;  %v1099_v7 = vadd.f32 %v1098_v63, %v5267_v56  ;;  %v1588_v54 = vrot.slane %v1388_v0, 2 }
 0x19f   : > { %v4671_v29 = vadd.f32 %v1585_v46, %v1089_v48  ;;  %v1587_v39 = vsel %vm1495_vm1, %v1582_v42, %v1586_v35 }
 0x1a0   : > { %5266 = vst [vmem:[#allocation7_spill] sm:$0xff] %v4667_v10  ;;  %v4674_v26 = vadd.f32 %v1587_v39, %v1093_v5  ;;  %v1589_v14 = vsel %vm1495_vm1, %v1584_v24, %v1588_v54  ;;  %v5273_v5 = vld [vmem:[#allocation13_spill] sm:$0xff] }
 0x1a1   : > { %5268 = vst [vmem:[#allocation8_spill] sm:$0xff] %v4671_v29  ;;  %v4677_v13 = vadd.f32 %v1589_v14, %v1095_v23  ;;  %v5280_v29 = vld [vmem:[#allocation16_spill] sm:$0xff] }
 0x1a2   : > { %5269 = vst [vmem:[#allocation9_spill] sm:$0xff] %v4674_v26  ;;  %v1102_v12 = vpop.f32.mrb[80].mxu1  ;;  %v1392_v28 = vpop.f32.mrb[80].mxu0 }
 0x1a3   : > { %5270 = vst [vmem:[#allocation10_spill] sm:$0xff] %v4677_v13  ;;  %v1103_v38 = vadd.f32 %v1102_v12, %v5271_v49  ;;  %v1590_v25 = vrot.slane %v1392_v28, 2  ;;  %v1104_v10 = vpop.f32.mrb[81].mxu1  ;;  %v1394_v19 = vpop.f32.mrb[81].mxu0  ;;  %v5275_v12 = vld [vmem:[#allocation14_spill] sm:$0xff] }
 0x1a4   : > { %v1105_v63 = vadd.f32 %v1104_v10, %v5272_v6  ;;  %v1592_v0 = vrot.slane %v1394_v19, 2  ;;  %v1106_v48 = vpop.f32.mrb[82].mxu1  ;;  %v1396_v46 = vpop.f32.mrb[82].mxu0 }
 0x1a5   : > { %v1591_v42 = vsel %vm1495_vm1, %v1586_v35, %v1590_v25  ;;  %v1107_v56 = vadd.f32 %v1106_v48, %v5273_v5  ;;  %v1594_v39 = vrot.slane %v1396_v46, 2  ;;  %v1108_v24 = vpop.f32.mrb[83].mxu1  ;;  %v1398_v23 = vpop.f32.mrb[83].mxu0  ;;  %v5279_v5 = vld [vmem:[#allocation15_spill] sm:$0xff] }
 0x1a6   : > { %v4683_v14 = vadd.f32 %v1591_v42, %v1097_v52  ;;  %v1593_v13 = vsel %vm1495_vm1, %v1588_v54, %v1592_v0  ;;  %v1109_v28 = vadd.f32 %v1108_v24, %v5275_v12  ;;  %v1596_v49 = vrot.slane %v1398_v23, 2 }
 0x1a7   : > { %v4687_v26 = vadd.f32 %v1593_v13, %v1099_v7  ;;  %v1595_v6 = vsel %vm1495_vm1, %v1590_v25, %v1594_v39 }
 0x1a8   : > { %5274 = vst [vmem:[#allocation11_spill] sm:$0xff] %v4683_v14  ;;  %v4690_v10 = vadd.f32 %v1595_v6, %v1103_v38  ;;  %v1597_v35 = vsel %vm1495_vm1, %v1592_v0, %v1596_v49  ;;  %v5281_v38 = vld [vmem:[#allocation17_spill] sm:$0xff] }
 0x1a9   : > { %5276 = vst [vmem:[#allocation12_spill] sm:$0xff] %v4687_v26  ;;  %v4693_v19 = vadd.f32 %v1597_v35, %v1105_v63  ;;  %v5287_v26 = vld [vmem:[#allocation20_spill] sm:$0xff] }
 0x1aa   : > { %5277 = vst [vmem:[#allocation13_spill] sm:$0xff] %v4690_v10  ;;  %v1112_v48 = vpop.f32.mrb[84].mxu1  ;;  %v1402_v46 = vpop.f32.mrb[84].mxu0 }
 0x1ab   : > { %5278 = vst [vmem:[#allocation14_spill] sm:$0xff] %v4693_v19  ;;  %v1113_v52 = vadd.f32 %v1112_v48, %v5279_v5  ;;  %v1598_v42 = vrot.slane %v1402_v46, 2  ;;  %v1114_v14 = vpop.f32.mrb[85].mxu1  ;;  %v1404_v54 = vpop.f32.mrb[85].mxu0  ;;  %v5283_v48 = vld [vmem:[#allocation18_spill] sm:$0xff] }
 0x1ac   : > { %v1115_v24 = vadd.f32 %v1114_v14, %v5280_v29  ;;  %v1600_v23 = vrot.slane %v1404_v54, 2  ;;  %v1116_v7 = vpop.f32.mrb[86].mxu1  ;;  %v1406_v13 = vpop.f32.mrb[86].mxu0 }
 0x1ad   : > { %v1599_v25 = vsel %vm1495_vm1, %v1594_v39, %v1598_v42  ;;  %v1117_v12 = vadd.f32 %v1116_v7, %v5281_v38  ;;  %v1602_v6 = vrot.slane %v1406_v13, 2  ;;  %v1118_v0 = vpop.f32.mrb[87].mxu1  ;;  %v1408_v63 = vpop.f32.mrb[87].mxu0  ;;  %v5286_v38 = vld [vmem:[#allocation19_spill] sm:$0xff] }
 0x1ae   : > { %v4699_v35 = vadd.f32 %v1599_v25, %v1107_v56  ;;  %v1601_v19 = vsel %vm1495_vm1, %v1596_v49, %v1600_v23  ;;  %v1119_v46 = vadd.f32 %v1118_v0, %v5283_v48  ;;  %v1604_v5 = vrot.slane %v1408_v63, 2 }
 0x1af   : > { %v4703_v10 = vadd.f32 %v1601_v19, %v1109_v28  ;;  %v1603_v29 = vsel %vm1495_vm1, %v1598_v42, %v1602_v6 }
 0x1b0   : > { %5282 = vst [vmem:[#allocation15_spill] sm:$0xff] %v4699_v35  ;;  %v4706_v14 = vadd.f32 %v1603_v29, %v1113_v52  ;;  %v1605_v39 = vsel %vm1495_vm1, %v1600_v23, %v1604_v5 }
 0x1b1   : > { %v4709_v54 = vadd.f32 %v1605_v39, %v1115_v24 }
 0x1b2   : > { %5284 = vst [vmem:[#allocation16_spill] sm:$0xff] %v4706_v14  ;;  %v1122_v7 = vpop.f32.mrb[88].mxu1  ;;  %v1412_v13 = vpop.f32.mrb[88].mxu0 }
 0x1b3   : > { %5285 = vst [vmem:[#allocation17_spill] sm:$0xff] %v4709_v54  ;;  %v1123_v56 = vadd.f32 %v1122_v7, %v5286_v38  ;;  %v1606_v25 = vrot.slane %v1412_v13, 2  ;;  %v1124_v35 = vpop.f32.mrb[89].mxu1  ;;  %v1414_v49 = vpop.f32.mrb[89].mxu0  ;;  %v2976_v54 = vlaneseq }
 0x1b4   : > { %v1125_v0 = vadd.f32 %v1124_v35, %v5287_v26  ;;  %v1608_v63 = vrot.slane %v1414_v49, 2  ;;  %v1126_v28 = vpop.f32.mrb[90].mxu1  ;;  %v1416_v19 = vpop.f32.mrb[90].mxu0 }
 0x1b5   : > { %v1607_v42 = vsel %vm1495_vm1, %v1602_v6, %v1606_v25  ;;  %v1127_v52 = vadd.f32 %v1126_v28, %v4435_v51  ;;  %v1610_v48 = vrot.slane %v1416_v19, 2  ;;  %v1128_v23 = vpop.f32.mrb[91].mxu1  ;;  %v1418_v24 = vpop.f32.mrb[91].mxu0  ;;  %v5292_v19 = vld [vmem:[#allocation21_spill] sm:$0xff] }
 0x1b6   : > { %v4715_v29 = vadd.f32 %v1607_v42, %v1117_v12  ;;  %v1609_v39 = vsel %vm1495_vm1, %v1604_v5, %v1608_v63  ;;  %v1129_v7 = vadd.f32 %v1128_v23, %v4441_v16  ;;  %v1612_v13 = vrot.slane %v1418_v24, 2  ;;  %v5293_v16 = vld [vmem:[#allocation23_spill] sm:$0xff] }
 0x1b7   : > { %v4719_v38 = vadd.f32 %v1609_v39, %v1119_v46  ;;  %v1611_v26 = vsel %vm1495_vm1, %v1606_v25, %v1610_v48  ;;  %v5294_v25 = vld [vmem:[#allocation22_spill] sm:$0xff] }
 0x1b8   : > { %5288 = vst [vmem:[#allocation18_spill] sm:$0xff] %v4715_v29  ;;  %v4722_v35 = vadd.f32 %v1611_v26, %v1123_v56  ;;  %v1613_v6 = vsel %vm1495_vm1, %v1608_v63, %v1612_v13 }
 0x1b9   : > { %5289 = vst [vmem:[#allocation19_spill] sm:$0xff] %v4719_v38  ;;  %v4725_v49 = vadd.f32 %v1613_v6, %v1125_v0 }
 0x1ba   : > { %5290 = vst [vmem:[#allocation20_spill] sm:$0xff] %v4722_v35  ;;  %v1132_v51 = vpop.f32.mrb[92].mxu1  ;;  %v1422_v28 = vpop.f32.mrb[92].mxu0 }
 0x1bb   : > { %5291 = vst [vmem:[#allocation26_spill] sm:$0xff] %v4725_v49  ;;  %v1133_v12 = vadd.f32 %v1132_v51, %v5292_v19  ;;  %v1614_v42 = vrot.slane %v1422_v28, 2  ;;  %v1134_v29 = vpop.f32.mrb[93].mxu1  ;;  %v1424_v5 = vpop.f32.mrb[93].mxu0  ;;  %v5296_v28 = vld [vmem:[#allocation24_spill] sm:$0xff] }
 0x1bc   : > { %v1135_v23 = vadd.f32 %v1134_v29, %v5293_v16  ;;  %v1616_v46 = vrot.slane %v1424_v5, 2  ;;  %v1136_v24 = vpop.f32.mrb[94].mxu1  ;;  %v1426_v39 = vpop.f32.mrb[94].mxu0  ;;  %v2977_v16 = vshrl.u32 %v2976_v54, 7 }
 0x1bd   : > { %v1615_v56 = vsel %vm1495_vm1, %v1610_v48, %v1614_v42  ;;  %v1137_v26 = vadd.f32 %v1136_v24, %v5294_v25  ;;  %v1618_v63 = vrot.slane %v1426_v39, 2  ;;  %v1138_v0 = vpop.f32.mrb[95].mxu1  ;;  %v1428_v6 = vpop.f32.mrb[95].mxu0 }
 0x1be   : > { %v4731_v49 = vadd.f32 %v1615_v56, %v1127_v52  ;;  %v1617_v51 = vsel %vm1495_vm1, %v1612_v13, %v1616_v46  ;;  %v1139_v19 = vadd.f32 %v1138_v0, %v5296_v28  ;;  %v1620_v35 = vrot.slane %v1428_v6, 2 }
 0x1bf   : > { %v4735_v38 = vadd.f32 %v1617_v51, %v1129_v7  ;;  %v1619_v29 = vsel %vm1495_vm1, %v1614_v42, %v1618_v63  ;;  %v1686_v5 = vsel %vm1495_vm1, %v1618_v63, 0.0 }
 0x1c0   : > { %5295 = vst [vmem:[#allocation21_spill] sm:$0xff] %v4731_v49  ;;  %v4739_v48 = vadd.f32 %v1619_v29, %v1133_v12  ;;  %v4741_v24 = vadd.f32 %v1686_v5, %v1137_v26  ;;  %v1621_v39 = vsel %vm1495_vm1, %v1616_v46, %v1620_v35  ;;  %v1687_v52 = vsel %vm1495_vm1, %v1620_v35, 0.0  ;;  %v2974_v46 = vld [vmem:[%s5220_s2] sm:$0x3] }
 0x1c1   : > { %5297 = vst [vmem:[#allocation23_spill] sm:$0xff] %v4735_v38  ;;  %v4745_v56 = vadd.f32 %v1621_v39, %v1135_v23  ;;  %v4747_v13 = vadd.f32 %v1687_v52, %v1139_v19  ;;  %v2978_v26 = vsub.s32 0, %v2977_v16  ;;  %v2982_v29 = vsub.s32 1, %v2977_v16 }
 0x1c2   : > { %5298 = vst [vmem:[#allocation22_spill] sm:$0xff] %v4739_v48  ;;  %5299 = vst [vmem:[#allocation24_spill] sm:$0xff] %v4741_v24  ;;  %v1883_v25 = vpop.f32.mrb[96].mxu1  ;;  %v2494_v7 = vpop.f32.mrb[96].mxu0 }
 0x1c3   : > { %5300 = vst [vmem:[#allocation27_spill] sm:$0xff] %v4745_v56  ;;  %5301 = vst [vmem:[#allocation28_spill] sm:$0xff] %v4747_v13  ;;  %v2718_v0 = vrot.slane %v2494_v7, 4  ;;  %v1885_v6 = vpop.f32.mrb[97].mxu1  ;;  %v2496_v42 = vpop.f32.mrb[97].mxu0  ;;  %v2107_v35 = vrot.slane %v1883_v25, 3  ;;  %v4755_v56 = vrot.slane %v2974_v46, %v2978_v26  ;;  %v4760_v48 = vrot.slane %v2974_v46, %v2982_v29 }
 0x1c4   : > { %v2721_v54 = vrot.slane %v2496_v42, 4  ;;  %v1887_v12 = vpop.f32.mrb[98].mxu1  ;;  %v2498_v63 = vpop.f32.mrb[98].mxu0  ;;  %v2110_v5 = vrot.slane %v1885_v6, 3 }
 0x1c5   : > { %v2108_v23 = vrot.slane %v1887_v12, 3  ;;  %v2719_v51 = vrot.slane %v2498_v63, 4  ;;  %v1889_v28 = vpop.f32.mrb[99].mxu1  ;;  %v2500_v19 = vpop.f32.mrb[99].mxu0  ;;  %v5302_v12 = vld [vmem:[#allocation25_spill] sm:$0xff] }
 0x1c6   : > { %v2111_v39 = vrot.slane %v1889_v28, 3  ;;  %v2722_v52 = vrot.slane %v2500_v19, 4 }
 0x1c7   : > { %v2109_v7 = vsel %vm2106_vm2, %v2107_v35, %v2108_v23  ;;  %v2720_v42 = vsel %vm2717_vm3, %v2718_v0, %v2719_v51 }
 0x1c8   : > { %v2299_v13 = vadd.f32 %v2109_v7, %v4482_v55  ;;  %v2112_v24 = vsel %vm2106_vm2, %v2110_v5, %v2111_v39  ;;  %v2723_v25 = vsel %vm2717_vm3, %v2721_v54, %v2722_v52 }
 0x1c9   : > { %v2300_v63 = vadd.f32 %v2112_v24, %v5302_v12 }
 0x1ca   : > { %v2910_v16 = vadd.f32 %v2720_v42, %v2299_v13  ;;  %v1893_v6 = vpop.f32.mrb[100].mxu1  ;;  %v2504_v28 = vpop.f32.mrb[100].mxu0 }
 0x1cb   : > { %v2911_v19 = vadd.f32 %v2723_v25, %v2300_v63  ;;  %v2113_v35 = vrot.slane %v1893_v6, 3  ;;  %v2724_v38 = vrot.slane %v2504_v28, 4  ;;  %v1895_v0 = vpop.f32.mrb[101].mxu1  ;;  %v2506_v49 = vpop.f32.mrb[101].mxu0 }
 0x1cc   : > { %v2986_v55 = vadd.f32 %v4755_v56, %v2910_v16  ;;  %v2115_v26 = vrot.slane %v1895_v0, 3  ;;  %v2726_v7 = vrot.slane %v2506_v49, 4  ;;  %v1897_v5 = vpop.f32.mrb[102].mxu1  ;;  %v2508_v14 = vpop.f32.mrb[102].mxu0 }
 0x1cd   : > { %v2987_v54 = vadd.f32 %v4760_v48, %v2911_v19  ;;  %v2114_v24 = vsel %vm2106_vm2, %v2108_v23, %v2113_v35  ;;  %v2725_v13 = vsel %vm2717_vm3, %v2719_v51, %v2724_v38  ;;  %v2117_v46 = vrot.slane %v1897_v5, 3  ;;  %v1899_v29 = vpop.f32.mrb[103].mxu1  ;;  %v2510_v42 = vpop.f32.mrb[103].mxu0 }
 0x1ce   : > { %v3050_v25 = vmax.f32 %v2986_v55, 0.0  ;;  %v2301_v12 = vadd.f32 %v2114_v24, %v4493_v57  ;;  %v2116_v63 = vsel %vm2106_vm2, %v2111_v39, %v2115_v26  ;;  %v2727_v16 = vsel %vm2717_vm3, %v2722_v52, %v2726_v7 }
 0x1cf   : > { %v3051_v49 = vmax.f32 %v2987_v54, 0.0  ;;  %v2302_v6 = vadd.f32 %v2116_v63, %v4497_v15  ;;  %v2118_v28 = vsel %vm2106_vm2, %v2113_v35, %v2117_v46  ;;  %v2728_v19 = vrot.slane %v2508_v14, 4 }
 0x1d0   : > { %v2912_v23 = vadd.f32 %v2725_v13, %v2301_v12  ;;  %v2303_v51 = vadd.f32 %v2118_v28, %v4502_v1  ;;  %v2119_v57 = vrot.slane %v1899_v29, 3  ;;  %v2730_v0 = vrot.slane %v2510_v42, 4 }
 0x1d1   : > { %v3601_v39 = vpack.c.bf16 %v3051_v49, %v3050_v25  ;;  %v2913_v55 = vadd.f32 %v2727_v16, %v2302_v6  ;;  %v2729_v52 = vsel %vm2717_vm3, %v2724_v38, %v2728_v19 }
 0x1d2   : > { %v2988_v15 = vadd.f32 %v4755_v56, %v2912_v23  ;;  %v2914_v5 = vadd.f32 %v2729_v52, %v2303_v51  ;;  %v2120_v14 = vsel %vm2106_vm2, %v2115_v26, %v2119_v57  ;;  %v2731_v35 = vsel %vm2717_vm3, %v2726_v7, %v2730_v0  ;;  %v1903_v54 = vpop.f32.mrb[104].mxu1  ;;  %v2514_v24 = vpop.f32.mrb[104].mxu0 }
 0x1d3   : > { %3306 = vst [vmem:[%s4775_s9] sm:$0xff] %v3601_v39  ;;  %v2989_v13 = vadd.f32 %v4760_v48, %v2913_v55  ;;  %v2304_v1 = vadd.f32 %v2120_v14, %v4507_v44  ;;  %v2121_v29 = vrot.slane %v1903_v54, 3  ;;  %v2732_v42 = vrot.slane %v2514_v24, 4  ;;  %v1905_v25 = vpop.f32.mrb[105].mxu1  ;;  %v2516_v12 = vpop.f32.mrb[105].mxu0 }
 0x1d4   : > { %v3052_v63 = vmax.f32 %v2988_v15, 0.0  ;;  %v2990_v38 = vadd.f32 %v4755_v56, %v2914_v5  ;;  %v2123_v16 = vrot.slane %v1905_v25, 3  ;;  %v2734_v49 = vrot.slane %v2516_v12, 4  ;;  %v1907_v6 = vpop.f32.mrb[106].mxu1  ;;  %v2518_v26 = vpop.f32.mrb[106].mxu0 }
 0x1d5   : > { %v3053_v28 = vmax.f32 %v2989_v13, 0.0  ;;  %v2915_v7 = vadd.f32 %v2731_v35, %v2304_v1  ;;  %v2122_v23 = vsel %vm2106_vm2, %v2117_v46, %v2121_v29  ;;  %v2733_v51 = vsel %vm2717_vm3, %v2728_v19, %v2732_v42  ;;  %v1909_v39 = vpop.f32.mrb[107].mxu1  ;;  %v2520_v44 = vpop.f32.mrb[107].mxu0 }
 0x1d6   : > { %v3054_v55 = vmax.f32 %v2990_v38, 0.0  ;;  %v2305_v52 = vadd.f32 %v2122_v23, %v4513_v9  ;;  %v2124_v15 = vsel %vm2106_vm2, %v2119_v57, %v2123_v16  ;;  %v2735_v5 = vsel %vm2717_vm3, %v2730_v0, %v2734_v49 }
 0x1d7   : > { %v3602_v14 = vpack.c.bf16 %v3053_v28, %v3052_v63  ;;  %v2991_v54 = vadd.f32 %v4760_v48, %v2915_v7  ;;  %v2306_v24 = vadd.f32 %v2124_v15, %v4517_v53  ;;  %v2125_v35 = vrot.slane %v1907_v6, 3 }
 0x1d8   : > { %v2916_v13 = vadd.f32 %v2733_v51, %v2305_v52  ;;  %v2736_v46 = vrot.slane %v2518_v26, 4  ;;  %v2127_v1 = vrot.slane %v1909_v39, 3  ;;  %v2738_v25 = vrot.slane %v2520_v44, 4 }
 0x1d9   : > { %3307 = vst [vmem:[%s4775_s9 + $0x8] sm:$0xff] %v3602_v14  ;;  %v3055_v19 = vmax.f32 %v2991_v54, 0.0  ;;  %v2917_v12 = vadd.f32 %v2735_v5, %v2306_v24  ;;  %v2126_v38 = vsel %vm2106_vm2, %v2121_v29, %v2125_v35 }
 0x1da   : > { %v2992_v9 = vadd.f32 %v4755_v56, %v2916_v13  ;;  %v2307_v57 = vadd.f32 %v2126_v38, %v4522_v43  ;;  %v2737_v0 = vsel %vm2717_vm3, %v2732_v42, %v2736_v46  ;;  %v2128_v63 = vsel %vm2106_vm2, %v2123_v16, %v2127_v1  ;;  %v1913_v53 = vpop.f32.mrb[108].mxu1  ;;  %v2524_v6 = vpop.f32.mrb[108].mxu0 }
 0x1db   : > { %v3603_v28 = vpack.c.bf16 %v3055_v19, %v3054_v55  ;;  %v2993_v26 = vadd.f32 %v4760_v48, %v2917_v12  ;;  %v2308_v7 = vadd.f32 %v2128_v63, %v4527_v8  ;;  %v2739_v23 = vsel %vm2717_vm3, %v2734_v49, %v2738_v25  ;;  %v1915_v51 = vpop.f32.mrb[109].mxu1  ;;  %v2526_v29 = vpop.f32.mrb[109].mxu0 }
 0x1dc   : > { %v3056_v39 = vmax.f32 %v2992_v9, 0.0  ;;  %v2918_v44 = vadd.f32 %v2737_v0, %v2307_v57  ;;  %v2129_v52 = vrot.slane %v1913_v53, 3  ;;  %v2740_v43 = vrot.slane %v2524_v6, 4  ;;  %v1917_v15 = vpop.f32.mrb[110].mxu1  ;;  %v2528_v42 = vpop.f32.mrb[110].mxu0 }
 0x1dd   : > { %3308 = vst [vmem:[%s4775_s9 + $0x10] sm:$0xff] %v3603_v28  ;;  %v3057_v5 = vmax.f32 %v2993_v26, 0.0  ;;  %v2919_v16 = vadd.f32 %v2739_v23, %v2308_v7  ;;  %v2131_v14 = vrot.slane %v1915_v51, 3  ;;  %v2742_v55 = vrot.slane %v2526_v29, 4  ;;  %v1919_v54 = vpop.f32.mrb[111].mxu1  ;;  %v2530_v24 = vpop.f32.mrb[111].mxu0 }
 0x1de   : > { %v2994_v8 = vadd.f32 %v4755_v56, %v2918_v44  ;;  %v2130_v49 = vsel %vm2106_vm2, %v2125_v35, %v2129_v52  ;;  %v2741_v13 = vsel %vm2717_vm3, %v2736_v46, %v2740_v43  ;;  %v2133_v19 = vrot.slane %v1917_v15, 3 }
 0x1df   : > { %v3604_v12 = vpack.c.bf16 %v3057_v5, %v3056_v39  ;;  %v2995_v38 = vadd.f32 %v4760_v48, %v2919_v16  ;;  %v2309_v9 = vadd.f32 %v2130_v49, %v4533_v61  ;;  %v2132_v57 = vsel %vm2106_vm2, %v2127_v1, %v2131_v14 }
 0x1e0   : > { %v3058_v0 = vmax.f32 %v2994_v8, 0.0  ;;  %v2310_v63 = vadd.f32 %v2132_v57, %v4537_v32  ;;  %v2743_v53 = vsel %vm2717_vm3, %v2738_v25, %v2742_v55  ;;  %v2134_v6 = vsel %vm2106_vm2, %v2129_v52, %v2133_v19 }
 0x1e1   : > { %3309 = vst [vmem:[%s4775_s9 + $0x18] sm:$0xff] %v3604_v12  ;;  %v3059_v28 = vmax.f32 %v2995_v38, 0.0  ;;  %v2920_v35 = vadd.f32 %v2741_v13, %v2309_v9  ;;  %v2311_v46 = vadd.f32 %v2134_v6, %v4542_v20  ;;  %v2744_v26 = vrot.slane %v2528_v42, 4 }
 0x1e2   : > { %v2921_v7 = vadd.f32 %v2743_v53, %v2310_v63  ;;  %v2135_v23 = vrot.slane %v1919_v54, 3  ;;  %v2746_v51 = vrot.slane %v2530_v24, 4  ;;  %v1923_v61 = vpop.f32.mrb[112].mxu1  ;;  %v2534_v29 = vpop.f32.mrb[112].mxu0 }
 0x1e3   : > { %v3605_v1 = vpack.c.bf16 %v3059_v28, %v3058_v0  ;;  %v2996_v39 = vadd.f32 %v4755_v56, %v2920_v35  ;;  %v2745_v32 = vsel %vm2717_vm3, %v2740_v43, %v2744_v26  ;;  %v2137_v25 = vrot.slane %v1923_v61, 3  ;;  %v1925_v44 = vpop.f32.mrb[113].mxu1  ;;  %v2536_v52 = vpop.f32.mrb[113].mxu0 }
 0x1e4   : > { %v2997_v15 = vadd.f32 %v4760_v48, %v2921_v7  ;;  %v2922_v5 = vadd.f32 %v2745_v32, %v2311_v46  ;;  %v2136_v20 = vsel %vm2106_vm2, %v2131_v14, %v2135_v23  ;;  %v2747_v42 = vsel %vm2717_vm3, %v2742_v55, %v2746_v51  ;;  %v1927_v16 = vpop.f32.mrb[114].mxu1  ;;  %v2538_v54 = vpop.f32.mrb[114].mxu0 }
 0x1e5   : > { %3310 = vst [vmem:[%s4775_s9 + $0x20] sm:$0xff] %v3605_v1  ;;  %v3060_v24 = vmax.f32 %v2996_v39, 0.0  ;;  %v2312_v8 = vadd.f32 %v2136_v20, %v4547_v30  ;;  %v2138_v49 = vsel %vm2106_vm2, %v2133_v19, %v2137_v25  ;;  %v2748_v13 = vrot.slane %v2534_v29, 4  ;;  %v1929_v43 = vpop.f32.mrb[115].mxu1  ;;  %v2540_v12 = vpop.f32.mrb[115].mxu0 }
 0x1e6   : > { %v3061_v38 = vmax.f32 %v2997_v15, 0.0  ;;  %v2998_v9 = vadd.f32 %v4755_v56, %v2922_v5  ;;  %v2313_v57 = vadd.f32 %v2138_v49, %v4553_v60  ;;  %v2139_v14 = vrot.slane %v1925_v44, 3 }
 0x1e7   : > { %v2923_v0 = vadd.f32 %v2747_v42, %v2312_v8  ;;  %v2749_v55 = vsel %vm2717_vm3, %v2744_v26, %v2748_v13  ;;  %v2750_v63 = vrot.slane %v2536_v52, 4  ;;  %v2141_v53 = vrot.slane %v1927_v16, 3 }
 0x1e8   : > { %v3606_v6 = vpack.c.bf16 %v3061_v38, %v3060_v24  ;;  %v3062_v28 = vmax.f32 %v2998_v9, 0.0  ;;  %v2924_v30 = vadd.f32 %v2749_v55, %v2313_v57  ;;  %v2140_v19 = vsel %vm2106_vm2, %v2135_v23, %v2139_v14 }
 0x1e9   : > { %v2999_v35 = vadd.f32 %v4760_v48, %v2923_v0  ;;  %v2314_v46 = vadd.f32 %v2140_v19, %v4557_v27  ;;  %v2751_v7 = vsel %vm2717_vm3, %v2746_v51, %v2750_v63  ;;  %v2142_v61 = vsel %vm2106_vm2, %v2137_v25, %v2141_v53 }
 0x1ea   : > { %3311 = vst [vmem:[%s4775_s9 + $0x28] sm:$0xff] %v3606_v6  ;;  %v3000_v60 = vadd.f32 %v4755_v56, %v2924_v30  ;;  %v2315_v26 = vadd.f32 %v2142_v61, %v4562_v50  ;;  %v2752_v29 = vrot.slane %v2538_v54, 4  ;;  %v2143_v1 = vrot.slane %v1929_v43, 3  ;;  %v1933_v39 = vpop.f32.mrb[116].mxu1  ;;  %v2544_v32 = vpop.f32.mrb[116].mxu0 }
 0x1eb   : > { %v3063_v44 = vmax.f32 %v2999_v35, 0.0  ;;  %v2925_v52 = vadd.f32 %v2751_v7, %v2314_v46  ;;  %v2754_v23 = vrot.slane %v2540_v12, 4  ;;  %v2145_v15 = vrot.slane %v1933_v39, 3  ;;  %v1935_v5 = vpop.f32.mrb[117].mxu1  ;;  %v2546_v20 = vpop.f32.mrb[117].mxu0 }
 0x1ec   : > { %v3064_v27 = vmax.f32 %v3000_v60, 0.0  ;;  %v2753_v51 = vsel %vm2717_vm3, %v2748_v13, %v2752_v29  ;;  %v2144_v25 = vsel %vm2106_vm2, %v2139_v14, %v2143_v1  ;;  %v2756_v42 = vrot.slane %v2544_v32, 4  ;;  %v1937_v16 = vpop.f32.mrb[118].mxu1  ;;  %v2548_v24 = vpop.f32.mrb[118].mxu0 }
 0x1ed   : > { %v3607_v50 = vpack.c.bf16 %v3063_v44, %v3062_v28  ;;  %v3001_v54 = vadd.f32 %v4760_v48, %v2925_v52  ;;  %v2926_v8 = vadd.f32 %v2753_v51, %v2315_v26  ;;  %v2316_v49 = vadd.f32 %v2144_v25, %v4565_v41  ;;  %v1939_v43 = vpop.f32.mrb[119].mxu1  ;;  %v4837_v12 = vpop.f32.mrb[119].mxu0 }
 0x1ee   : > { %v2755_v38 = vsel %vm2717_vm3, %v2750_v63, %v2754_v23  ;;  %v2146_v9 = vsel %vm2106_vm2, %v2141_v53, %v2145_v15  ;;  %v2757_v13 = vsel %vm2717_vm3, %v2752_v29, %v2756_v42  ;;  %v2147_v57 = vrot.slane %v1935_v5, 3 }
 0x1ef   : > { %3312 = vst [vmem:[%s4775_s9 + $0x30] sm:$0xff] %v3607_v50  ;;  %v3065_v14 = vmax.f32 %v3001_v54, 0.0  ;;  %v3002_v0 = vadd.f32 %v4755_v56, %v2926_v8  ;;  %v2927_v55 = vadd.f32 %v2755_v38, %v2316_v49  ;;  %v2317_v6 = vadd.f32 %v2146_v9, %v4571_v22 }
 0x1f0   : > { %v2148_v41 = vsel %vm2106_vm2, %v2143_v1, %v2147_v57  ;;  %v2758_v28 = vrot.slane %v2546_v20, 4  ;;  %v2149_v30 = vrot.slane %v1937_v16, 3  ;;  %v2760_v19 = vrot.slane %v2548_v24, 4 }
 0x1f1   : > { %v3608_v35 = vpack.c.bf16 %v3065_v14, %v3064_v27  ;;  %v3066_v63 = vmax.f32 %v3002_v0, 0.0  ;;  %v3003_v53 = vadd.f32 %v4760_v48, %v2927_v55  ;;  %v2928_v46 = vadd.f32 %v2757_v13, %v2317_v6 }
 0x1f2   : > { %v2318_v7 = vadd.f32 %v2148_v41, %v4575_v59  ;;  %v2759_v61 = vsel %vm2717_vm3, %v2754_v23, %v2758_v28  ;;  %v2150_v60 = vsel %vm2106_vm2, %v2145_v15, %v2149_v30  ;;  %v2761_v26 = vsel %vm2717_vm3, %v2756_v42, %v2760_v19  ;;  %v1943_v29 = vpop.f32.mrb[120].mxu1  ;;  %v2554_v22 = vpop.f32.mrb[120].mxu0 }
 0x1f3   : > { %3313 = vst [vmem:[%s4775_s9 + $0x38] sm:$0xff] %v3608_v35  ;;  %v3067_v1 = vmax.f32 %v3003_v53, 0.0  ;;  %v3004_v39 = vadd.f32 %v4755_v56, %v2928_v46  ;;  %v2319_v32 = vadd.f32 %v2150_v60, %v4578_v33  ;;  %v2151_v44 = vrot.slane %v1939_v43, 3  ;;  %v1945_v52 = vpop.f32.mrb[121].mxu1  ;;  %v2556_v5 = vpop.f32.mrb[121].mxu0 }
 0x1f4   : > { %v2929_v20 = vadd.f32 %v2759_v61, %v2318_v7  ;;  %v2762_v59 = vrot.slane %v4837_v12, 4  ;;  %v2153_v23 = vrot.slane %v1943_v29, 3  ;;  %v2764_v27 = vrot.slane %v2554_v22, 4  ;;  %v1947_v15 = vpop.f32.mrb[122].mxu1  ;;  %v2558_v51 = vpop.f32.mrb[122].mxu0 }
 0x1f5   : > { %v3609_v25 = vpack.c.bf16 %v3067_v1, %v3066_v63  ;;  %v3068_v42 = vmax.f32 %v3004_v39, 0.0  ;;  %v2930_v16 = vadd.f32 %v2761_v26, %v2319_v32  ;;  %v2152_v24 = vsel %vm2106_vm2, %v2147_v57, %v2151_v44  ;;  %v1949_v50 = vpop.f32.mrb[123].mxu1  ;;  %v4856_v54 = vpop.f32.mrb[123].mxu0 }
 0x1f6   : > { %v3005_v33 = vadd.f32 %v4760_v48, %v2929_v20  ;;  %v2320_v8 = vadd.f32 %v2152_v24, %v4581_v21  ;;  %v2763_v49 = vsel %vm2717_vm3, %v2758_v28, %v2762_v59  ;;  %v2154_v43 = vsel %vm2106_vm2, %v2149_v30, %v2153_v23 }
 0x1f7   : > { %3314 = vst [vmem:[%s4775_s9 + $0x40] sm:$0xff] %v3609_v25  ;;  %v3006_v12 = vadd.f32 %v4755_v56, %v2930_v16  ;;  %v2321_v38 = vadd.f32 %v2154_v43, %v4587_v18  ;;  %v2765_v9 = vsel %vm2717_vm3, %v2760_v19, %v2764_v27  ;;  %v2155_v13 = vrot.slane %v1945_v52, 3 }
 0x1f8   : > { %v3069_v57 = vmax.f32 %v3005_v33, 0.0  ;;  %v2931_v14 = vadd.f32 %v2763_v49, %v2320_v8  ;;  %v2766_v0 = vrot.slane %v2556_v5, 4  ;;  %v2157_v55 = vrot.slane %v1947_v15, 3 }
 0x1f9   : > { %v3070_v6 = vmax.f32 %v3006_v12, 0.0  ;;  %v2932_v41 = vadd.f32 %v2765_v9, %v2321_v38  ;;  %v2156_v21 = vsel %vm2106_vm2, %v2151_v44, %v2155_v13  ;;  %v2768_v28 = vrot.slane %v2558_v51, 4 }
 0x1fa   : > { %v3610_v35 = vpack.c.bf16 %v3069_v57, %v3068_v42  ;;  %v3007_v30 = vadd.f32 %v4760_v48, %v2931_v14  ;;  %v2322_v63 = vadd.f32 %v2156_v21, %v4591_v17  ;;  %v2767_v18 = vsel %vm2717_vm3, %v2762_v59, %v2766_v0  ;;  %v1953_v53 = vpop.f32.mrb[124].mxu1  ;;  %v2564_v19 = vpop.f32.mrb[124].mxu0 }
 0x1fb   : > { %v3008_v46 = vadd.f32 %v4755_v56, %v2932_v41  ;;  %v2158_v7 = vsel %vm2106_vm2, %v2153_v23, %v2157_v55  ;;  %v2769_v61 = vsel %vm2717_vm3, %v2764_v27, %v2768_v28  ;;  %v2159_v60 = vrot.slane %v1949_v50, 3  ;;  %v1955_v26 = vpop.f32.mrb[125].mxu1  ;;  %v4873_v29 = vpop.f32.mrb[125].mxu0 }
 0x1fc   : > { %3315 = vst [vmem:[%s4775_s9 + $0x48] sm:$0xff] %v3610_v35  ;;  %v3071_v22 = vmax.f32 %v3007_v30, 0.0  ;;  %v2933_v1 = vadd.f32 %v2767_v18, %v2322_v63  ;;  %v2323_v39 = vadd.f32 %v2158_v7, %v4594_v62  ;;  %v2770_v17 = vrot.slane %v4856_v54, 4  ;;  %v1957_v32 = vpop.f32.mrb[126].mxu1  ;;  %v2568_v44 = vpop.f32.mrb[126].mxu0 }
 0x1fd   : > { %v3072_v52 = vmax.f32 %v3008_v46, 0.0  ;;  %v2160_v5 = vsel %vm2106_vm2, %v2155_v13, %v2159_v60  ;;  %v2161_v20 = vrot.slane %v1953_v53, 3  ;;  %v2772_v59 = vrot.slane %v2564_v19, 4  ;;  %v4879_v23 = vpop.f32.mrb[127].mxu1  ;;  %v4881_v27 = vpop.f32.mrb[127].mxu0 }
 0x1fe   : > { %v3611_v15 = vpack.c.bf16 %v3071_v22, %v3070_v6  ;;  %v3009_v51 = vadd.f32 %v4760_v48, %v2933_v1  ;;  %v2934_v25 = vadd.f32 %v2769_v61, %v2323_v39  ;;  %v2324_v62 = vadd.f32 %v2160_v5, %v4597_v2 }
 0x1ff   : > { %v2771_v42 = vsel %vm2717_vm3, %v2766_v0, %v2770_v17  ;;  %v2162_v16 = vsel %vm2106_vm2, %v2157_v55, %v2161_v20  ;;  %v2773_v24 = vsel %vm2717_vm3, %v2768_v28, %v2772_v59  ;;  %v2163_v50 = vrot.slane %v1955_v26, 3 }
 0x200   : > { %3316 = vst [vmem:[%s4775_s9 + $0x50] sm:$0xff] %v3611_v15  ;;  %v3073_v54 = vmax.f32 %v3009_v51, 0.0  ;;  %v3010_v33 = vadd.f32 %v4755_v56, %v2934_v25  ;;  %v2935_v8 = vadd.f32 %v2771_v42, %v2324_v62  ;;  %v2325_v49 = vadd.f32 %v2162_v16, %v4603_v37 }
 0x201   : > { %v2164_v43 = vsel %vm2106_vm2, %v2159_v60, %v2163_v50  ;;  %v2774_v12 = vrot.slane %v4873_v29, 4  ;;  %v2165_v2 = vrot.slane %v1957_v32, 3  ;;  %v2776_v38 = vrot.slane %v2568_v44, 4 }
 0x202   : > { %v3612_v9 = vpack.c.bf16 %v3073_v54, %v3072_v52  ;;  %v3074_v13 = vmax.f32 %v3010_v33, 0.0  ;;  %v3011_v57 = vadd.f32 %v4760_v48, %v2935_v8  ;;  %v2936_v14 = vadd.f32 %v2773_v24, %v2325_v49  ;;  %v1963_v0 = vpop.f32.mrb[128].mxu1  ;;  %v2574_v55 = vpop.f32.mrb[128].mxu0 }
 0x203   : > { %v2326_v6 = vadd.f32 %v2164_v43, %v4607_v47  ;;  %v2775_v41 = vsel %vm2717_vm3, %v2770_v17, %v2774_v12  ;;  %v2166_v37 = vsel %vm2106_vm2, %v2161_v20, %v2165_v2  ;;  %v2777_v21 = vsel %vm2717_vm3, %v2772_v59, %v2776_v38  ;;  %v1965_v28 = vpop.f32.mrb[129].mxu1  ;;  %v4898_v35 = vpop.f32.mrb[129].mxu0 }
 0x204   : > { %3317 = vst [vmem:[%s4775_s9 + $0x58] sm:$0xff] %v3612_v9  ;;  %v3075_v30 = vmax.f32 %v3011_v57, 0.0  ;;  %v3012_v63 = vadd.f32 %v4755_v56, %v2936_v14  ;;  %v2327_v18 = vadd.f32 %v2166_v37, %v4610_v3  ;;  %v2167_v53 = vrot.slane %v4879_v23, 3  ;;  %v1967_v19 = vpop.f32.mrb[130].mxu1  ;;  %v2578_v47 = vpop.f32.mrb[130].mxu0 }
 0x205   : > { %v2937_v46 = vadd.f32 %v2775_v41, %v2326_v6  ;;  %v2778_v7 = vrot.slane %v4881_v27, 4  ;;  %v2169_v61 = vrot.slane %v1963_v0, 3  ;;  %v2780_v60 = vrot.slane %v2574_v55, 4  ;;  %v4905_v26 = vpop.f32.mrb[131].mxu1  ;;  %v4907_v29 = vpop.f32.mrb[131].mxu0 }
 0x206   : > { %v3613_v22 = vpack.c.bf16 %v3075_v30, %v3074_v13  ;;  %v3076_v1 = vmax.f32 %v3012_v63, 0.0  ;;  %v2938_v39 = vadd.f32 %v2777_v21, %v2327_v18  ;;  %v2168_v17 = vsel %vm2106_vm2, %v2163_v50, %v2167_v53 }
 0x207   : > { %v3013_v3 = vadd.f32 %v4760_v48, %v2937_v46  ;;  %v2328_v32 = vadd.f32 %v2168_v17, %v4613_v36  ;;  %v2779_v44 = vsel %vm2717_vm3, %v2774_v12, %v2778_v7  ;;  %v2170_v52 = vsel %vm2106_vm2, %v2165_v2, %v2169_v61 }
 0x208   : > { %3318 = vst [vmem:[%s4775_s9 + $0x60] sm:$0xff] %v3613_v22  ;;  %v3014_v5 = vadd.f32 %v4755_v56, %v2938_v39  ;;  %v2329_v20 = vadd.f32 %v2170_v52, %v4619_v45  ;;  %v2781_v59 = vsel %vm2717_vm3, %v2776_v38, %v2780_v60  ;;  %v2171_v23 = vrot.slane %v1965_v28, 3 }
 0x209   : > { %v3077_v27 = vmax.f32 %v3013_v3, 0.0  ;;  %v2939_v15 = vadd.f32 %v2779_v44, %v2328_v32  ;;  %v2782_v51 = vrot.slane %v4898_v35, 4  ;;  %v2173_v25 = vrot.slane %v1967_v19, 3 }
 0x20a   : > { %v3078_v62 = vmax.f32 %v3014_v5, 0.0  ;;  %v2940_v42 = vadd.f32 %v2781_v59, %v2329_v20  ;;  %v2172_v36 = vsel %vm2106_vm2, %v2167_v53, %v2171_v23  ;;  %v2784_v16 = vrot.slane %v2578_v47, 4  ;;  %v1973_v24 = vpop.f32.mrb[132].mxu1  ;;  %v2584_v50 = vpop.f32.mrb[132].mxu0 }
 0x20b   : > { %v3614_v54 = vpack.c.bf16 %v3077_v27, %v3076_v1  ;;  %v3015_v33 = vadd.f32 %v4760_v48, %v2939_v15  ;;  %v2330_v45 = vadd.f32 %v2172_v36, %v4623_v31  ;;  %v2783_v8 = vsel %vm2717_vm3, %v2778_v7, %v2782_v51  ;;  %v4923_v49 = vpop.f32.mrb[133].mxu1  ;;  %v4925_v43 = vpop.f32.mrb[133].mxu0 }
 0x20c   : > { %v3016_v12 = vadd.f32 %v4755_v56, %v2940_v42  ;;  %v2174_v2 = vsel %vm2106_vm2, %v2169_v61, %v2173_v25  ;;  %v2785_v38 = vsel %vm2717_vm3, %v2780_v60, %v2784_v16  ;;  %v2175_v9 = vrot.slane %v4905_v26, 3  ;;  %v4931_v13 = vpop.f32.mrb[134].mxu1  ;;  %v4933_v57 = vpop.f32.mrb[134].mxu0 }
 0x20d   : > { %3319 = vst [vmem:[%s4775_s9 + $0x68] sm:$0xff] %v3614_v54  ;;  %v3079_v31 = vmax.f32 %v3015_v33, 0.0  ;;  %v2941_v14 = vadd.f32 %v2783_v8, %v2330_v45  ;;  %v2331_v0 = vadd.f32 %v2174_v2, %v4626_v34  ;;  %v2786_v55 = vrot.slane %v4907_v29, 4  ;;  %v4938_v6 = vpop.f32.mrb[135].mxu1  ;;  %v4940_v41 = vpop.f32.mrb[135].mxu0 }
 0x20e   : > { %v3080_v37 = vmax.f32 %v3016_v12, 0.0  ;;  %v2176_v21 = vsel %vm2106_vm2, %v2171_v23, %v2175_v9  ;;  %v2177_v28 = vrot.slane %v1973_v24, 3  ;;  %v2788_v35 = vrot.slane %v2584_v50, 4 }
 0x20f   : > { %v3615_v30 = vpack.c.bf16 %v3079_v31, %v3078_v62  ;;  %v3017_v63 = vadd.f32 %v4760_v48, %v2941_v14  ;;  %v2942_v18 = vadd.f32 %v2785_v38, %v2331_v0  ;;  %v2332_v53 = vadd.f32 %v2176_v21, %v4629_v40 }
 0x210   : > { %v2787_v34 = vsel %vm2717_vm3, %v2782_v51, %v2786_v55  ;;  %v2178_v19 = vsel %vm2106_vm2, %v2173_v25, %v2177_v28  ;;  %v2789_v47 = vsel %vm2717_vm3, %v2784_v16, %v2788_v35  ;;  %v2179_v46 = vrot.slane %v4923_v49, 3 }
 0x211   : > { %3320 = vst [vmem:[%s4775_s9 + $0x70] sm:$0xff] %v3615_v30  ;;  %v3081_v7 = vmax.f32 %v3017_v63, 0.0  ;;  %v3018_v61 = vadd.f32 %v4755_v56, %v2942_v18  ;;  %v2943_v60 = vadd.f32 %v2787_v34, %v2332_v53  ;;  %v2333_v26 = vadd.f32 %v2178_v19, %v4635_v11 }
 0x212   : > { %v2180_v29 = vsel %vm2106_vm2, %v2175_v9, %v2179_v46  ;;  %v2790_v22 = vrot.slane %v4925_v43, 4  ;;  %v2181_v40 = vrot.slane %v4931_v13, 3  ;;  %v2792_v1 = vrot.slane %v4933_v57, 4  ;;  %v1983_v39 = vpop.f32.mrb[136].mxu1  ;;  %v2594_v17 = vpop.f32.mrb[136].mxu0  ;;  %v5304_v57 = vld [vmem:[#allocation3_spill] sm:$0xff] }
 0x213   : > { %v3616_v3 = vpack.c.bf16 %v3081_v7, %v3080_v37  ;;  %v3082_v32 = vmax.f32 %v3018_v61, 0.0  ;;  %v3019_v44 = vadd.f32 %v4760_v48, %v2943_v60  ;;  %v2944_v52 = vadd.f32 %v2789_v47, %v2333_v26  ;;  %v4957_v5 = vpop.f32.mrb[137].mxu1  ;;  %v4959_v20 = vpop.f32.mrb[137].mxu0 }
 0x214   : > { %v2334_v11 = vadd.f32 %v2180_v29, %v4639_v4  ;;  %v2791_v59 = vsel %vm2717_vm3, %v2786_v55, %v2790_v22  ;;  %v2182_v23 = vsel %vm2106_vm2, %v2177_v28, %v2181_v40  ;;  %v2793_v27 = vsel %vm2717_vm3, %v2788_v35, %v2792_v1  ;;  %v4965_v15 = vpop.f32.mrb[138].mxu1  ;;  %v4967_v51 = vpop.f32.mrb[138].mxu0 }
 0x215   : > { %3321 = vst [vmem:[%s4775_s9 + $0x78] sm:$0xff] %v3616_v3  ;;  %v3083_v25 = vmax.f32 %v3019_v44, 0.0  ;;  %v3020_v62 = vadd.f32 %v4755_v56, %v2944_v52  ;;  %v2335_v42 = vadd.f32 %v2182_v23, %v4642_v58  ;;  %v2183_v36 = vrot.slane %v4938_v6, 3  ;;  %v4973_v4 = vpop.f32.mrb[139].mxu1  ;;  %v4975_v16 = vpop.f32.mrb[139].mxu0  ;;  %v5303_v58 = vld [vmem:[#allocation2_spill] sm:$0xff] }
 0x216   : > { %v2945_v24 = vadd.f32 %v2791_v59, %v2334_v11  ;;  %v2794_v50 = vrot.slane %v4940_v41, 4  ;;  %v2185_v54 = vrot.slane %v1983_v39, 3  ;;  %v2796_v33 = vrot.slane %v2594_v17, 4  ;;  %v5306_v44 = vld [vmem:[#allocation5_spill] sm:$0xff] }
 0x217   : > { %v3617_v45 = vpack.c.bf16 %v3083_v25, %v3082_v32  ;;  %v3084_v8 = vmax.f32 %v3020_v62, 0.0  ;;  %v2946_v49 = vadd.f32 %v2793_v27, %v2335_v42  ;;  %v2184_v43 = vsel %vm2106_vm2, %v2179_v46, %v2183_v36  ;;  %v5305_v46 = vld [vmem:[#allocation4_spill] sm:$0xff]  ;;  %v5307_v25 = vld [vmem:[#allocation6_spill] sm:$0xff] }
 0x218   : > { %v3021_v12 = vadd.f32 %v4760_v48, %v2945_v24  ;;  %v2336_v2 = vadd.f32 %v2184_v43, %v5303_v58  ;;  %v2795_v38 = vsel %vm2717_vm3, %v2790_v22, %v2794_v50  ;;  %v2186_v9 = vsel %vm2106_vm2, %v2181_v40, %v2185_v54 }
 0x219   : > { %3322 = vst [vmem:[%s4775_s9 + $0x80] sm:$0xff] %v3617_v45  ;;  %v3022_v13 = vadd.f32 %v4755_v56, %v2946_v49  ;;  %v2337_v31 = vadd.f32 %v2186_v9, %v5304_v57  ;;  %v2797_v14 = vsel %vm2717_vm3, %v2792_v1, %v2796_v33  ;;  %v2187_v0 = vrot.slane %v4957_v5, 3 }
 0x21a   : > { %v3085_v55 = vmax.f32 %v3021_v12, 0.0  ;;  %v2947_v6 = vadd.f32 %v2795_v38, %v2336_v2  ;;  %v2798_v41 = vrot.slane %v4959_v20, 4  ;;  %v2189_v37 = vrot.slane %v4965_v15, 3  ;;  %v1993_v21 = vpop.f32.mrb[140].mxu1  ;;  %v2604_v28 = vpop.f32.mrb[140].mxu0 }
 0x21b   : > { %v3086_v35 = vmax.f32 %v3022_v13, 0.0  ;;  %v2948_v30 = vadd.f32 %v2797_v14, %v2337_v31  ;;  %v2188_v63 = vsel %vm2106_vm2, %v2183_v36, %v2187_v0  ;;  %v2800_v18 = vrot.slane %v4967_v51, 4  ;;  %v4992_v53 = vpop.f32.mrb[141].mxu1  ;;  %v4994_v34 = vpop.f32.mrb[141].mxu0 }
 0x21c   : > { %v3618_v19 = vpack.c.bf16 %v3085_v55, %v3084_v8  ;;  %v3023_v47 = vadd.f32 %v4760_v48, %v2947_v6  ;;  %v2338_v7 = vadd.f32 %v2188_v63, %v5305_v46  ;;  %v2799_v61 = vsel %vm2717_vm3, %v2794_v50, %v2798_v41  ;;  %v4999_v60 = vpop.f32.mrb[142].mxu1  ;;  %v5001_v26 = vpop.f32.mrb[142].mxu0  ;;  %v5309_v6 = vld [vmem:[#allocation8_spill] sm:$0xff] }
 0x21d   : > { %v3024_v29 = vadd.f32 %v4755_v56, %v2948_v30  ;;  %v2190_v22 = vsel %vm2106_vm2, %v2185_v54, %v2189_v37  ;;  %v2801_v40 = vsel %vm2717_vm3, %v2796_v33, %v2800_v18  ;;  %v2191_v1 = vrot.slane %v4973_v4, 3  ;;  %v5007_v39 = vpop.f32.mrb[143].mxu1  ;;  %v5009_v17 = vpop.f32.mrb[143].mxu0  ;;  %v5308_v33 = vld [vmem:[#allocation7_spill] sm:$0xff] }
 0x21e   : > { %3323 = vst [vmem:[%s4775_s9 + $0x88] sm:$0xff] %v3618_v19  ;;  %v3087_v3 = vmax.f32 %v3023_v47, 0.0  ;;  %v2949_v32 = vadd.f32 %v2799_v61, %v2338_v7  ;;  %v2339_v52 = vadd.f32 %v2190_v22, %v5306_v44  ;;  %v2802_v5 = vrot.slane %v4975_v16, 4  ;;  %v5312_v44 = vld [vmem:[#allocation11_spill] sm:$0xff] }
 0x21f   : > { %v3088_v20 = vmax.f32 %v3024_v29, 0.0  ;;  %v2192_v11 = vsel %vm2106_vm2, %v2187_v0, %v2191_v1  ;;  %v2193_v59 = vrot.slane %v1993_v21, 3  ;;  %v2804_v23 = vrot.slane %v2604_v28, 4 }
 0x220   : > { %v3619_v27 = vpack.c.bf16 %v3087_v3, %v3086_v35  ;;  %v3025_v15 = vadd.f32 %v4760_v48, %v2949_v32  ;;  %v2950_v51 = vadd.f32 %v2801_v40, %v2339_v52  ;;  %v2340_v62 = vadd.f32 %v2192_v11, %v5307_v25 }
 0x221   : > { %v2803_v42 = vsel %vm2717_vm3, %v2798_v41, %v2802_v5  ;;  %v2194_v36 = vsel %vm2106_vm2, %v2189_v37, %v2193_v59  ;;  %v2805_v4 = vsel %vm2717_vm3, %v2800_v18, %v2804_v23  ;;  %v2195_v24 = vrot.slane %v4992_v53, 3  ;;  %v5310_v53 = vld [vmem:[#allocation9_spill] sm:$0xff] }
 0x222   : > { %3324 = vst [vmem:[%s4775_s9 + $0x90] sm:$0xff] %v3619_v27  ;;  %v3089_v16 = vmax.f32 %v3025_v15, 0.0  ;;  %v3026_v50 = vadd.f32 %v4755_v56, %v2950_v51  ;;  %v2951_v54 = vadd.f32 %v2803_v42, %v2340_v62  ;;  %v2341_v45 = vadd.f32 %v2194_v36, %v5308_v33  ;;  %v5024_v8 = vpop.f32.mrb[144].mxu1  ;;  %v5026_v49 = vpop.f32.mrb[144].mxu0 }
 0x223   : > { %v2196_v43 = vsel %vm2106_vm2, %v2191_v1, %v2195_v24  ;;  %v2806_v12 = vrot.slane %v4994_v34, 4  ;;  %v2197_v58 = vrot.slane %v4999_v60, 3  ;;  %v2808_v2 = vrot.slane %v5001_v26, 4  ;;  %v5032_v38 = vpop.f32.mrb[145].mxu1  ;;  %v5034_v9 = vpop.f32.mrb[145].mxu0  ;;  %v5311_v1 = vld [vmem:[#allocation10_spill] sm:$0xff] }
 0x224   : > { %v3620_v13 = vpack.c.bf16 %v3089_v16, %v3088_v20  ;;  %v3090_v57 = vmax.f32 %v3026_v50, 0.0  ;;  %v3027_v31 = vadd.f32 %v4760_v48, %v2951_v54  ;;  %v2952_v14 = vadd.f32 %v2805_v4, %v2341_v45  ;;  %v5037_v0 = vpop.f32.mrb[146].mxu1  ;;  %v5039_v55 = vpop.f32.mrb[146].mxu0  ;;  %v5313_v45 = vld [vmem:[#allocation12_spill] sm:$0xff] }
 0x225   : > { %v2342_v41 = vadd.f32 %v2196_v43, %v5309_v6  ;;  %v2807_v37 = vsel %vm2717_vm3, %v2802_v5, %v2806_v12  ;;  %v2198_v21 = vsel %vm2106_vm2, %v2193_v59, %v2197_v58  ;;  %v2809_v28 = vsel %vm2717_vm3, %v2804_v23, %v2808_v2  ;;  %v5045_v35 = vpop.f32.mrb[147].mxu1  ;;  %v5047_v30 = vpop.f32.mrb[147].mxu0 }
 0x226   : > { %3325 = vst [vmem:[%s4775_s9 + $0x98] sm:$0xff] %v3620_v13  ;;  %v3091_v63 = vmax.f32 %v3027_v31, 0.0  ;;  %v3028_v18 = vadd.f32 %v4755_v56, %v2952_v14  ;;  %v2343_v34 = vadd.f32 %v2198_v21, %v5310_v53  ;;  %v2199_v19 = vrot.slane %v5007_v39, 3  ;;  %v5314_v31 = vld [vmem:[#allocation13_spill] sm:$0xff] }
 0x227   : > { %v2953_v47 = vadd.f32 %v2807_v37, %v2342_v41  ;;  %v2810_v46 = vrot.slane %v5009_v17, 4  ;;  %v2201_v7 = vrot.slane %v5024_v8, 3  ;;  %v2812_v61 = vrot.slane %v5026_v49, 4 }
 0x228   : > { %v3621_v60 = vpack.c.bf16 %v3091_v63, %v3090_v57  ;;  %v3092_v26 = vmax.f32 %v3028_v18, 0.0  ;;  %v2954_v29 = vadd.f32 %v2809_v28, %v2343_v34  ;;  %v2200_v22 = vsel %vm2106_vm2, %v2195_v24, %v2199_v19 }
 0x229   : > { %v3029_v40 = vadd.f32 %v4760_v48, %v2953_v47  ;;  %v2344_v3 = vadd.f32 %v2200_v22, %v5311_v1  ;;  %v2811_v32 = vsel %vm2717_vm3, %v2806_v12, %v2810_v46  ;;  %v2202_v39 = vsel %vm2106_vm2, %v2197_v58, %v2201_v7 }
 0x22a   : > { %3326 = vst [vmem:[%s4775_s9 + $0xa0] sm:$0xff] %v3621_v60  ;;  %v3030_v17 = vadd.f32 %v4755_v56, %v2954_v29  ;;  %v2345_v52 = vadd.f32 %v2202_v39, %v5312_v44  ;;  %v2813_v5 = vsel %vm2717_vm3, %v2808_v2, %v2812_v61  ;;  %v2203_v20 = vrot.slane %v5032_v38, 3  ;;  %v5066_v11 = vpop.f32.mrb[148].mxu1  ;;  %v5068_v59 = vpop.f32.mrb[148].mxu0 }
 0x22b   : > { %v3093_v23 = vmax.f32 %v3029_v40, 0.0  ;;  %v2955_v27 = vadd.f32 %v2811_v32, %v2344_v3  ;;  %v2814_v15 = vrot.slane %v5034_v9, 4  ;;  %v2205_v51 = vrot.slane %v5037_v0, 3  ;;  %v5072_v25 = vpop.f32.mrb[149].mxu1  ;;  %v5074_v62 = vpop.f32.mrb[149].mxu0 }
 0x22c   : > { %v3094_v42 = vmax.f32 %v3030_v17, 0.0  ;;  %v2956_v36 = vadd.f32 %v2813_v5, %v2345_v52  ;;  %v2204_v4 = vsel %vm2106_vm2, %v2199_v19, %v2203_v20  ;;  %v2816_v24 = vrot.slane %v5039_v55, 4  ;;  %v5078_v16 = vpop.f32.mrb[150].mxu1  ;;  %v5080_v50 = vpop.f32.mrb[150].mxu0 }
 0x22d   : > { %v3622_v54 = vpack.c.bf16 %v3093_v23, %v3092_v26  ;;  %v3031_v33 = vadd.f32 %v4760_v48, %v2955_v27  ;;  %v2346_v8 = vadd.f32 %v2204_v4, %v5313_v45  ;;  %v2815_v49 = vsel %vm2717_vm3, %v2810_v46, %v2814_v15  ;;  %v5085_v43 = vpop.f32.mrb[151].mxu1  ;;  %v5087_v12 = vpop.f32.mrb[151].mxu0  ;;  %v5316_v26 = vld [vmem:[#allocation15_spill] sm:$0xff] }
 0x22e   : > { %v3032_v58 = vadd.f32 %v4755_v56, %v2956_v36  ;;  %v2206_v2 = vsel %vm2106_vm2, %v2201_v7, %v2205_v51  ;;  %v2817_v38 = vsel %vm2717_vm3, %v2812_v61, %v2816_v24  ;;  %v2207_v9 = vrot.slane %v5045_v35, 3  ;;  %v5315_v35 = vld [vmem:[#allocation14_spill] sm:$0xff]  ;;  %v5317_v36 = vld [vmem:[#allocation16_spill] sm:$0xff] }
 0x22f   : > { %3327 = vst [vmem:[%s4775_s9 + $0xa8] sm:$0xff] %v3622_v54  ;;  %v3095_v13 = vmax.f32 %v3031_v33, 0.0  ;;  %v2957_v57 = vadd.f32 %v2815_v49, %v2346_v8  ;;  %v2347_v14 = vadd.f32 %v2206_v2, %v5314_v31  ;;  %v2818_v0 = vrot.slane %v5047_v30, 4  ;;  %v5318_v2 = vld [vmem:[#allocation17_spill] sm:$0xff]  ;;  %v5319_v31 = vld [vmem:[#allocation18_spill] sm:$0xff] }
 0x230   : > { %v3096_v55 = vmax.f32 %v3032_v58, 0.0  ;;  %v2208_v6 = vsel %vm2106_vm2, %v2203_v20, %v2207_v9  ;;  %v2209_v41 = vrot.slane %v5066_v11, 3  ;;  %v2820_v37 = vrot.slane %v5068_v59, 4 }
 0x231   : > { %v3623_v21 = vpack.c.bf16 %v3095_v13, %v3094_v42  ;;  %v3033_v28 = vadd.f32 %v4760_v48, %v2957_v57  ;;  %v2958_v63 = vadd.f32 %v2817_v38, %v2347_v14  ;;  %v2348_v18 = vadd.f32 %v2208_v6, %v5315_v35 }
 0x232   : > { %v2819_v53 = vsel %vm2717_vm3, %v2814_v15, %v2818_v0  ;;  %v2210_v34 = vsel %vm2106_vm2, %v2205_v51, %v2209_v41  ;;  %v2821_v19 = vsel %vm2717_vm3, %v2816_v24, %v2820_v37  ;;  %v2211_v30 = vrot.slane %v5072_v25, 3  ;;  %v5105_v47 = vpop.f32.mrb[152].mxu1  ;;  %v5107_v46 = vpop.f32.mrb[152].mxu0 }
 0x233   : > { %3328 = vst [vmem:[%s4775_s9 + $0xb0] sm:$0xff] %v3623_v21  ;;  %v3097_v7 = vmax.f32 %v3033_v28, 0.0  ;;  %v3034_v61 = vadd.f32 %v4755_v56, %v2958_v63  ;;  %v2959_v60 = vadd.f32 %v2819_v53, %v2348_v18  ;;  %v2349_v29 = vadd.f32 %v2210_v34, %v5316_v26  ;;  %v5112_v22 = vpop.f32.mrb[153].mxu1  ;;  %v5114_v40 = vpop.f32.mrb[153].mxu0 }
 0x234   : > { %v2212_v1 = vsel %vm2106_vm2, %v2207_v9, %v2211_v30  ;;  %v2822_v3 = vrot.slane %v5074_v62, 4  ;;  %v2213_v32 = vrot.slane %v5078_v16, 3  ;;  %v2824_v39 = vrot.slane %v5080_v50, 4  ;;  %v5120_v17 = vpop.f32.mrb[154].mxu1  ;;  %v5122_v44 = vpop.f32.mrb[154].mxu0 }
 0x235   : > { %v3624_v52 = vpack.c.bf16 %v3097_v7, %v3096_v55  ;;  %v3098_v5 = vmax.f32 %v3034_v61, 0.0  ;;  %v3035_v20 = vadd.f32 %v4760_v48, %v2959_v60  ;;  %v2960_v11 = vadd.f32 %v2821_v19, %v2349_v29  ;;  %v5125_v59 = vpop.f32.mrb[155].mxu1  ;;  %v5127_v23 = vpop.f32.mrb[155].mxu0  ;;  %v5320_v60 = vld [vmem:[#allocation19_spill] sm:$0xff] }
 0x236   : > { %v2350_v27 = vadd.f32 %v2212_v1, %v4703_v10  ;;  %v2823_v15 = vsel %vm2717_vm3, %v2818_v0, %v2822_v3  ;;  %v2214_v51 = vsel %vm2106_vm2, %v2209_v41, %v2213_v32  ;;  %v2825_v25 = vsel %vm2717_vm3, %v2820_v37, %v2824_v39 }
 0x237   : > { %3329 = vst [vmem:[%s4775_s9 + $0xb8] sm:$0xff] %v3624_v52  ;;  %v3099_v62 = vmax.f32 %v3035_v20, 0.0  ;;  %v3036_v42 = vadd.f32 %v4755_v56, %v2960_v11  ;;  %v2351_v4 = vadd.f32 %v2214_v51, %v5317_v36  ;;  %v2215_v24 = vrot.slane %v5085_v43, 3 }
 0x238   : > { %v2961_v16 = vadd.f32 %v2823_v15, %v2350_v27  ;;  %v2826_v50 = vrot.slane %v5087_v12, 4  ;;  %v2217_v10 = vrot.slane %v5105_v47, 3  ;;  %v2828_v54 = vrot.slane %v5107_v46, 4 }
 0x239   : > { %v3625_v33 = vpack.c.bf16 %v3099_v62, %v3098_v5  ;;  %v3100_v45 = vmax.f32 %v3036_v42, 0.0  ;;  %v2962_v8 = vadd.f32 %v2825_v25, %v2351_v4  ;;  %v2216_v49 = vsel %vm2106_vm2, %v2211_v30, %v2215_v24 }
 0x23a   : > { %v3037_v58 = vadd.f32 %v4760_v48, %v2961_v16  ;;  %v2352_v38 = vadd.f32 %v2216_v49, %v5318_v2  ;;  %v2827_v9 = vsel %vm2717_vm3, %v2822_v3, %v2826_v50  ;;  %v2218_v43 = vsel %vm2106_vm2, %v2213_v32, %v2217_v10  ;;  %v5145_v13 = vpop.f32.mrb[156].mxu1  ;;  %v5147_v12 = vpop.f32.mrb[156].mxu0 }
 0x23b   : > { %3330 = vst [vmem:[%s4775_s9 + $0xc0] sm:$0xff] %v3625_v33  ;;  %v3038_v57 = vadd.f32 %v4755_v56, %v2962_v8  ;;  %v2353_v14 = vadd.f32 %v2218_v43, %v5319_v31  ;;  %v2829_v0 = vsel %vm2717_vm3, %v2824_v39, %v2828_v54  ;;  %v2219_v55 = vrot.slane %v5112_v22, 3  ;;  %v5154_v6 = vpop.f32.mrb[157].mxu1  ;;  %v5156_v41 = vpop.f32.mrb[157].mxu0  ;;  %v5324_v43 = vld [vmem:[#allocation23_spill] sm:$0xff] }
 0x23c   : > { %v3101_v37 = vmax.f32 %v3037_v58, 0.0  ;;  %v2963_v21 = vadd.f32 %v2827_v9, %v2352_v38  ;;  %v2830_v28 = vrot.slane %v5114_v40, 4  ;;  %v2221_v63 = vrot.slane %v5120_v17, 3  ;;  %v2037_v35 = vpop.f32.mrb[158].mxu1  ;;  %v2648_v18 = vpop.f32.mrb[158].mxu0  ;;  %v5321_v17 = vld [vmem:[#allocation20_spill] sm:$0xff] }
 0x23d   : > { %v3102_v53 = vmax.f32 %v3038_v57, 0.0  ;;  %v2964_v34 = vadd.f32 %v2829_v0, %v2353_v14  ;;  %v2220_v19 = vsel %vm2106_vm2, %v2215_v24, %v2219_v55  ;;  %v2832_v30 = vrot.slane %v5122_v44, 4  ;;  %v2039_v47 = vpop.f32.mrb[159].mxu1  ;;  %v5162_v46 = vpop.f32.mrb[159].mxu0 }
 0x23e   : > { %v3626_v7 = vpack.c.bf16 %v3101_v37, %v3100_v45  ;;  %v3039_v61 = vadd.f32 %v4760_v48, %v2963_v21  ;;  %v2354_v26 = vadd.f32 %v2220_v19, %v5320_v60  ;;  %v2831_v29 = vsel %vm2717_vm3, %v2826_v50, %v2830_v28 }
 0x23f   : > { %v3040_v22 = vadd.f32 %v4755_v56, %v2964_v34  ;;  %v2222_v40 = vsel %vm2106_vm2, %v2217_v10, %v2221_v63  ;;  %v2833_v1 = vsel %vm2717_vm3, %v2828_v54, %v2832_v30  ;;  %v2223_v3 = vrot.slane %v5125_v59, 3  ;;  %v5322_v59 = vld [vmem:[#allocation26_spill] sm:$0xff]  ;;  %v5323_v10 = vld [vmem:[#allocation21_spill] sm:$0xff] }
 0x240   : > { %3331 = vst [vmem:[%s4775_s9 + $0xc8] sm:$0xff] %v3626_v7  ;;  %v3103_v32 = vmax.f32 %v3039_v61, 0.0  ;;  %v2965_v39 = vadd.f32 %v2831_v29, %v2354_v26  ;;  %v2355_v44 = vadd.f32 %v2222_v40, %v5321_v17  ;;  %v2834_v52 = vrot.slane %v5127_v23, 4  ;;  %v5328_v40 = vld [vmem:[#allocation28_spill] sm:$0xff] }
 0x241   : > { %v3104_v5 = vmax.f32 %v3040_v22, 0.0  ;;  %v2224_v20 = vsel %vm2106_vm2, %v2219_v55, %v2223_v3  ;;  %v2225_v11 = vrot.slane %v5145_v13, 3  ;;  %v2836_v27 = vrot.slane %v5147_v12, 4  ;;  %v5325_v55 = vld [vmem:[#allocation22_spill] sm:$0xff]  ;;  %v5327_v22 = vld [vmem:[#allocation27_spill] sm:$0xff] }
 0x242   : > { %v3627_v15 = vpack.c.bf16 %v3103_v32, %v3102_v53  ;;  %v3041_v51 = vadd.f32 %v4760_v48, %v2965_v39  ;;  %v2966_v25 = vadd.f32 %v2833_v1, %v2355_v44  ;;  %v2356_v62 = vadd.f32 %v2224_v20, %v5322_v59 }
 0x243   : > { %v2835_v42 = vsel %vm2717_vm3, %v2830_v28, %v2834_v52  ;;  %v2226_v36 = vsel %vm2106_vm2, %v2221_v63, %v2225_v11  ;;  %v2837_v4 = vsel %vm2717_vm3, %v2832_v30, %v2836_v27  ;;  %v2227_v23 = vrot.slane %v5154_v6, 3 }
 0x244   : > { %3332 = vst [vmem:[%s4775_s9 + $0xd0] sm:$0xff] %v3627_v15  ;;  %v3105_v24 = vmax.f32 %v3041_v51, 0.0  ;;  %v3042_v16 = vadd.f32 %v4755_v56, %v2966_v25  ;;  %v2967_v50 = vadd.f32 %v2835_v42, %v2356_v62  ;;  %v2357_v54 = vadd.f32 %v2226_v36, %v5323_v10 }
 0x245   : > { %v2228_v33 = vsel %vm2106_vm2, %v2223_v3, %v2227_v23  ;;  %v2838_v45 = vrot.slane %v5156_v41, 4  ;;  %v2229_v8 = vrot.slane %v2037_v35, 3  ;;  %v2840_v49 = vrot.slane %v2648_v18, 4  ;;  %v5326_v41 = vld [vmem:[#allocation24_spill] sm:$0xff] }
 0x246   : > { %v3628_v58 = vpack.c.bf16 %v3105_v24, %v3104_v5  ;;  %v3106_v2 = vmax.f32 %v3042_v16, 0.0  ;;  %v3043_v38 = vadd.f32 %v4760_v48, %v2967_v50  ;;  %v2968_v9 = vadd.f32 %v2837_v4, %v2357_v54 }
 0x247   : > { %v2358_v13 = vadd.f32 %v2228_v33, %v5324_v43  ;;  %v2839_v12 = vsel %vm2717_vm3, %v2834_v52, %v2838_v45  ;;  %v2230_v57 = vsel %vm2106_vm2, %v2225_v11, %v2229_v8  ;;  %v2297_v31 = vsel %vm2106_vm2, %v2229_v8, 0.0 }
 0x248   : > { %3333 = vst [vmem:[%s4775_s9 + $0xd8] sm:$0xff] %v3628_v58  ;;  %v3107_v14 = vmax.f32 %v3043_v38, 0.0  ;;  %v3044_v0 = vadd.f32 %v4755_v56, %v2968_v9  ;;  %v2359_v6 = vadd.f32 %v2230_v57, %v5325_v55  ;;  %v2361_v37 = vadd.f32 %v2297_v31, %v5326_v41 }
 0x249   : > { %v2969_v21 = vadd.f32 %v2839_v12, %v2358_v13  ;;  %v2841_v28 = vsel %vm2717_vm3, %v2836_v27, %v2840_v49  ;;  %v2908_v63 = vsel %vm2717_vm3, %v2840_v49, 0.0  ;;  %v2231_v35 = vrot.slane %v2039_v47, 3 }
 0x24a   : > { %v3629_v18 = vpack.c.bf16 %v3107_v14, %v3106_v2  ;;  %v3108_v53 = vmax.f32 %v3044_v0, 0.0  ;;  %v2970_v34 = vadd.f32 %v2841_v28, %v2359_v6  ;;  %v2972_v19 = vadd.f32 %v2908_v63, %v2361_v37 }
 0x24b   : > { %v3045_v30 = vadd.f32 %v4760_v48, %v2969_v21  ;;  %v2232_v7 = vsel %vm2106_vm2, %v2227_v23, %v2231_v35  ;;  %v2298_v61 = vsel %vm2106_vm2, %v2231_v35, 0.0  ;;  %v2842_v60 = vrot.slane %v5162_v46, 4 }
 0x24c   : > { %3334 = vst [vmem:[%s4775_s9 + $0xe0] sm:$0xff] %v3629_v18  ;;  %v3046_v26 = vadd.f32 %v4755_v56, %v2970_v34  ;;  %v3048_v29 = vadd.f32 %v4755_v56, %v2972_v19  ;;  %v2360_v47 = vadd.f32 %v2232_v7, %v5327_v22  ;;  %v2362_v1 = vadd.f32 %v2298_v61, %v5328_v40 }
 0x24d   : > { %v3109_v3 = vmax.f32 %v3045_v30, 0.0  ;;  %v2843_v32 = vsel %vm2717_vm3, %v2838_v45, %v2842_v60  ;;  %v2909_v39 = vsel %vm2717_vm3, %v2842_v60, 0.0 }
 0x24e   : > { %v2971_v17 = vadd.f32 %v2843_v32, %v2360_v47  ;;  %v2973_v44 = vadd.f32 %v2909_v39, %v2362_v1  ;;  %v3110_v52 = vmax.f32 %v3046_v26, 0.0  ;;  %v3112_v5 = vmax.f32 %v3048_v29, 0.0 }
 0x24f   : > { %v3630_v46 = vpack.c.bf16 %v3109_v3, %v3108_v53 }
 0x250   : > { %v3047_v20 = vadd.f32 %v4760_v48, %v2971_v17  ;;  %v3049_v56 = vadd.f32 %v4760_v48, %v2973_v44 }
 0x251   : > { %3335 = vst [vmem:[%s4775_s9 + $0xe8] sm:$0xff] %v3630_v46 }
 0x252   : > { %v3111_v11 = vmax.f32 %v3047_v20, 0.0  ;;  %v3113_v27 = vmax.f32 %v3049_v56, 0.0 }
 0x254   : > { %v3631_v15 = vpack.c.bf16 %v3111_v11, %v3110_v52  ;;  %v3632_v51 = vpack.c.bf16 %v3113_v27, %v3112_v5 }
 0x256   : > { %3336 = vst [vmem:[%s4775_s9 + $0xf0] sm:$0xff] %v3631_v15  ;;  %3337 = vst [vmem:[%s4775_s9 + $0xf8] sm:$0xff] %v3632_v51 }
 0x257 PF: > { %s13_s12 = sadd.s32 1, %s3800_s12  }
 0x258   : > { %p10_p4 = scmp.ge.s32.totalorder %s13_s12, 4  }
 0x25a   :  { %12 = sbr.rel (!%p10_p4) target bundleno = 1 (0x1), region = 66 }

// kernel: rnn_forward.4
= control target key start
LH: loop header
LB: loop body
LE: loop exit
PB: predicated region body
PF: predicated region fallthrough
CT: control target
= control target key end

     0   :  { %s2687_s12 = smov 0   ;;  %s3552_s0 = inlined_call_operand.vmem [shape: bf16[288,128], index: 0, kind: input, shape index: {}]   ;;  %s3553_s1 = inlined_call_operand.vmem [shape: bf16[5,128,256], index: 1, kind: input, shape index: {}]   ;;  %s3554_s2 = inlined_call_operand.vmem [shape: f32[1,256], index: 2, kind: input, shape index: {}]   ;;  %s3555_s3 = inlined_call_operand.vmem [shape: bf16[288,256], index: 3, kind: output, shape index: {}]  }
   0x1 LB: > { %s2304_s13 = sadd.s32 4294967295, %s2664_s12   ;;  %p2308_p0 = scmp.ge.s32.totalorder %s2664_s12, 1  ;;  %s2664_s12 = sphi %s2687_s12, %s13_s12  }
   0x2   : > { %p138_p1 = scmp.lt.s32.totalorder %s2664_s12, 3 }
   0x4   : > { %p139_p2 = pnand %p2308_p0, %p138_p1 }
   0x6   : > { %142 = sbr.rel (%p139_p2) target bundleno = 458 (0x1ca), region = 32 }
   0xd   : > { %v2529_v0 = vld [vmem:[%s3553_s1 + $0x84] ss:$8 sps:$4 sm:$0xff]   ;;  %s163_s16 = smul.u32 18, %s2304_s13  ;;  %v2531_v1 = vld [vmem:[%s3553_s1 + $0x80] ss:$8 sps:$4 sm:$0xff]   ;;  %v2666_v2 = vmov 0  }
   0xe   : > { %394 = vmatprep.mubr.bf16.mxu0 %v2666_v2  ;;  %434 = vmatprep.mubr.bf16.mxu1 %v2666_v2  ;;  %v2532_v3 = vld [vmem:[%s3553_s1 + $0x94] ss:$8 sps:$4 sm:$0xff]   ;;  %v2534_v4 = vld [vmem:[%s3553_s1 + $0x90] ss:$8 sps:$4 sm:$0xff]   ;;  %v2535_v5 = vld [vmem:[%s3553_s1 + $0xa4] ss:$8 sps:$4 sm:$0xff]  }
   0xf   : > { %362 = vmatprep.subr.bf16.mxu0 %v2529_v0  ;;  %2504 = vmatprep.subr.bf16.mxu1 %v2529_v0  ;;  %p164_p3 = scmp.lt.s32.totalorder %s163_s16, 35  ;;  %v2537_v6 = vld [vmem:[%s3553_s1 + $0xa0] ss:$8 sps:$4 sm:$0xff]   ;;  %v2538_v7 = vld [vmem:[%s3553_s1 + $0xb4] ss:$8 sps:$4 sm:$0xff]   ;;  %vm521_vm0 = vcmask 1046528  }
  0x10   : > { %363 = vmatpush1.bf16.msra.mxu0 %v2531_v1  ;;  %2512 = vmatpush1.bf16.msra.mxu1 %v2531_v1  ;;  %v2540_v8 = vld [vmem:[%s3553_s1 + $0xb0] ss:$8 sps:$4 sm:$0xff]   ;;  %v2541_v9 = vld [vmem:[%s3553_s1 + $0xc4] ss:$8 sps:$4 sm:$0xff]   ;;  %v2543_v10 = vld [vmem:[%s3553_s1 + $0xc0] ss:$8 sps:$4 sm:$0xff]  }
  0x11   : > { %364 = vmatprep.subr.bf16.mxu0 %v2532_v3  ;;  %2505 = vmatprep.subr.bf16.mxu1 %v2532_v3  ;;  %s3561_s16 = smov (!%p164_p3, %s163_s16), 35  ;;  %v2544_v11 = vld [vmem:[%s3553_s1 + $0xd4] ss:$8 sps:$4 sm:$0xff]   ;;  %v2546_v12 = vld [vmem:[%s3553_s1 + $0xd0] ss:$8 sps:$4 sm:$0xff]   ;;  %vm1089_vm1 = vcmask 1045504  }
  0x12   : > { %s2309_s25 = sshll.u32 %s3561_s16, 2  ;;  %v2547_v13 = vld [vmem:[%s3553_s1 + $0xe4] ss:$8 sps:$4 sm:$0xff]   ;;  %v2549_v14 = vld [vmem:[%s3553_s1 + $0xe0] ss:$8 sps:$4 sm:$0xff]   ;;  %vm1891_vm2 = vcmask 1043456  }
  0x13   : > { %s2724_s5 = scalar_lea.vmem %s3552_s0, %s2309_s25  ;;  %v2550_v15 = vld [vmem:[%s3553_s1 + $0xf4] ss:$8 sps:$4 sm:$0xff]   ;;  %v2552_v16 = vld [vmem:[%s3553_s1 + $0xf0] ss:$8 sps:$4 sm:$0xff]   ;;  %v2557_v18 = vld [vmem:[%s3553_s1 + $0x4] ss:$8 sps:$4 sm:$0xff]  }
  0x14   : > { %365 = vmatpush1.bf16.msra.mxu0 %v2534_v4  ;;  %2513 = vmatpush1.bf16.msra.mxu1 %v2534_v4  ;;  %v2754_v17 = vld [vmem:[%s2724_s5] sm:$0xff]   ;;  %v2563_v23 = vld [vmem:[%s3553_s1 + $0x14] ss:$8 sps:$4 sm:$0xff]   ;;  %v2561_v25 = vld [vmem:[%s3553_s1 + $0x10] ss:$8 sps:$4 sm:$0xff]   ;;  %vm1490_vm3 = vcmask 1044480  }
  0x15   : > { %366 = vmatprep.subr.bf16.mxu0 %v2535_v5  ;;  %2506 = vmatprep.subr.bf16.mxu1 %v2535_v5  ;;  %v2560_v19 = vld [vmem:[%s3553_s1 + $0x104] ss:$8 sps:$4 sm:$0xff]   ;;  %v2555_v21 = vld [vmem:[%s3553_s1] ss:$8 sps:$4 sm:$0xff]   ;;  %v2566_v24 = vld [vmem:[%s3553_s1 + $0x114] ss:$8 sps:$4 sm:$0xff]  }
  0x16   : > { %v2763_v20 = vld [vmem:[%s2724_s5 + $0x20] sm:$0xff]   ;;  %v2564_v26 = vld [vmem:[%s3553_s1 + $0x110] ss:$8 sps:$4 sm:$0xff]   ;;  %v2794_v29 = vld [vmem:[%s2724_s5 + $0x8] sm:$0xff]   ;;  %s2485_s7 = sshll.u32 %s3561_s16, 3 }
  0x17   : > { %v2558_v22 = vld [vmem:[%s3553_s1 + $0x100] ss:$8 sps:$4 sm:$0xff]   ;;  %v2571_v27 = vld [vmem:[%s3553_s1 + $0x124] ss:$8 sps:$4 sm:$0xff]   ;;  %v2577_v33 = vld [vmem:[%s3553_s1 + $0x134] ss:$8 sps:$4 sm:$0xff]   ;;  %s3358_s9 = scalar_lea.vmem %s3555_s3, %s2485_s7 }
  0x18   : > { %367 = vmatpush1.bf16.msra.mxu0 %v2537_v6  ;;  %2514 = vmatpush1.bf16.msra.mxu1 %v2537_v6  ;;  %v2574_v28 = vld [vmem:[%s3553_s1 + $0x24] ss:$8 sps:$4 sm:$0xff]   ;;  %v2569_v31 = vld [vmem:[%s3553_s1 + $0x120] ss:$8 sps:$4 sm:$0xff]   ;;  %v2580_v34 = vld [vmem:[%s3553_s1 + $0x34] ss:$8 sps:$4 sm:$0xff]  }
  0x19   : > { %368 = vmatprep.subr.bf16.mxu0 %v2538_v7  ;;  %2507 = vmatprep.subr.bf16.mxu1 %v2538_v7  ;;  %v2797_v30 = vld [vmem:[%s2724_s5 + $0x28] sm:$0xff]   ;;  %v2575_v35 = vld [vmem:[%s3553_s1 + $0x130] ss:$8 sps:$4 sm:$0xff]   ;;  %v2591_v43 = vld [vmem:[%s3553_s1 + $0x154] ss:$8 sps:$4 sm:$0xff]  }
  0x1a   : > { %v2572_v32 = vld [vmem:[%s3553_s1 + $0x20] ss:$8 sps:$4 sm:$0xff]   ;;  %v2578_v36 = vld [vmem:[%s3553_s1 + $0x30] ss:$8 sps:$4 sm:$0xff]   ;;  %v2585_v37 = vld [vmem:[%s3553_s1 + $0x144] ss:$8 sps:$4 sm:$0xff]  }
  0x1b   : > { %v2588_v38 = vld [vmem:[%s3553_s1 + $0x44] ss:$8 sps:$4 sm:$0xff]   ;;  %v2828_v39 = vld [vmem:[%s2724_s5 + $0x10] sm:$0xff]   ;;  %v2583_v41 = vld [vmem:[%s3553_s1 + $0x140] ss:$8 sps:$4 sm:$0xff]  }
  0x1c   : > { %369 = vmatpush1.bf16.msra.mxu0 %v2540_v8  ;;  %2515 = vmatpush1.bf16.msra.mxu1 %v2540_v8  ;;  %v2831_v40 = vld [vmem:[%s2724_s5 + $0x30] sm:$0xff]   ;;  %v2586_v42 = vld [vmem:[%s3553_s1 + $0x40] ss:$8 sps:$4 sm:$0xff]   ;;  %v2599_v47 = vld [vmem:[%s3553_s1 + $0x164] ss:$8 sps:$4 sm:$0xff]  }
  0x1d   : > { %370 = vmatprep.subr.bf16.mxu0 %v2541_v9  ;;  %2508 = vmatprep.subr.bf16.mxu1 %v2541_v9  ;;  %v2596_v44 = vld [vmem:[%s3553_s1 + $0x54] ss:$8 sps:$4 sm:$0xff]   ;;  %v2589_v45 = vld [vmem:[%s3553_s1 + $0x150] ss:$8 sps:$4 sm:$0xff]   ;;  %v2605_v48 = vld [vmem:[%s3553_s1 + $0x64] ss:$8 sps:$4 sm:$0xff]  }
  0x1e   : > { %v2594_v46 = vld [vmem:[%s3553_s1 + $0x50] ss:$8 sps:$4 sm:$0xff]   ;;  %v2597_v51 = vld [vmem:[%s3553_s1 + $0x160] ss:$8 sps:$4 sm:$0xff]   ;;  %v2602_v52 = vld [vmem:[%s3553_s1 + $0x174] ss:$8 sps:$4 sm:$0xff]  }
  0x1f   : > { %v2862_v49 = vld [vmem:[%s2724_s5 + $0x18] sm:$0xff]   ;;  %v2603_v53 = vld [vmem:[%s3553_s1 + $0x60] ss:$8 sps:$4 sm:$0xff]   ;;  %v2615_v57 = vld [vmem:[%s3553_s1 + $0x204] ss:$8 sps:$4 sm:$0xff]  }
  0x20   : > { %371 = vmatpush1.bf16.msra.mxu0 %v2543_v10  ;;  %2516 = vmatpush1.bf16.msra.mxu1 %v2543_v10  ;;  %v2865_v50 = vld [vmem:[%s2724_s5 + $0x38] sm:$0xff]   ;;  %v2612_v58 = vld [vmem:[%s3553_s1 + $0x184] ss:$8 sps:$4 sm:$0xff]   ;;  %v2613_v60 = vld [vmem:[%s3553_s1 + $0x200] ss:$8 sps:$4 sm:$0xff]  }
  0x21   : > { %372 = vmatprep.subr.bf16.mxu0 %v2544_v11  ;;  %2509 = vmatprep.subr.bf16.mxu1 %v2544_v11  ;;  %v2609_v54 = vld [vmem:[%s3553_s1 + $0x74] ss:$8 sps:$4 sm:$0xff]   ;;  %v2600_v55 = vld [vmem:[%s3553_s1 + $0x170] ss:$8 sps:$4 sm:$0xff]   ;;  %v2896_v59 = vld [vmem:[%s2724_s5 + $0x40] sm:$0xff]  }
  0x22   : > { %v2607_v56 = vld [vmem:[%s3553_s1 + $0x70] ss:$8 sps:$4 sm:$0xff]   ;;  %v2621_v61 = vld [vmem:[%s3553_s1 + $0x214] ss:$8 sps:$4 sm:$0xff]   ;;  %v2627_v63 = vld [vmem:[%s3553_s1 + $0x224] ss:$8 sps:$4 sm:$0xff]  }
  0x23   : > { %v2619_v62 = vld [vmem:[%s3553_s1 + $0x210] ss:$8 sps:$4 sm:$0xff]   ;;  %v2610_v0 = vld [vmem:[%s3553_s1 + $0x180] ss:$8 sps:$4 sm:$0xff]   ;;  %v2618_v1 = vld [vmem:[%s3553_s1 + $0x194] ss:$8 sps:$4 sm:$0xff]  }
  0x24   : > { %373 = vmatpush1.bf16.msra.mxu0 %v2546_v12  ;;  %2517 = vmatpush1.bf16.msra.mxu1 %v2546_v12  ;;  %v2625_v3 = vld [vmem:[%s3553_s1 + $0x220] ss:$8 sps:$4 sm:$0xff]   ;;  %v2633_v4 = vld [vmem:[%s3553_s1 + $0x234] ss:$8 sps:$4 sm:$0xff]   ;;  %v2616_v5 = vld [vmem:[%s3553_s1 + $0x190] ss:$8 sps:$4 sm:$0xff]  }
  0x25   : > { %374 = vmatprep.subr.bf16.mxu0 %v2547_v13  ;;  %2510 = vmatprep.subr.bf16.mxu1 %v2547_v13  ;;  %v2624_v6 = vld [vmem:[%s3553_s1 + $0x1a4] ss:$8 sps:$4 sm:$0xff]   ;;  %v2631_v7 = vld [vmem:[%s3553_s1 + $0x230] ss:$8 sps:$4 sm:$0xff]   ;;  %v2622_v8 = vld [vmem:[%s3553_s1 + $0x1a0] ss:$8 sps:$4 sm:$0xff]  }
  0x26   : > { %v2639_v9 = vld [vmem:[%s3553_s1 + $0x244] ss:$8 sps:$4 sm:$0xff]   ;;  %v2630_v10 = vld [vmem:[%s3553_s1 + $0x1b4] ss:$8 sps:$4 sm:$0xff]   ;;  %v2637_v11 = vld [vmem:[%s3553_s1 + $0x240] ss:$8 sps:$4 sm:$0xff]  }
  0x27   : > { %v2645_v12 = vld [vmem:[%s3553_s1 + $0x254] ss:$8 sps:$4 sm:$0xff]   ;;  %v2628_v13 = vld [vmem:[%s3553_s1 + $0x1b0] ss:$8 sps:$4 sm:$0xff]  }
  0x28   : > { %375 = vmatpush1.bf16.msra.mxu0 %v2549_v14  ;;  %2518 = vmatpush1.bf16.msra.mxu1 %v2549_v14  ;;  %v2636_v14 = vld [vmem:[%s3553_s1 + $0x1c4] ss:$8 sps:$4 sm:$0xff]  }
  0x29   : > { %376 = vmatprep.subr.bf16.mxu0 %v2550_v15  ;;  %2511 = vmatprep.subr.bf16.mxu1 %v2550_v15  ;;  %v2643_v15 = vld [vmem:[%s3553_s1 + $0x250] ss:$8 sps:$4 sm:$0xff]  }
  0x2c   : > { %377 = vmatpush1.bf16.msra.mxu0 %v2552_v16  ;;  %2519 = vmatpush1.bf16.msra.mxu1 %v2552_v16  ;;  %v2634_v16 = vld [vmem:[%s3553_s1 + $0x1c0] ss:$8 sps:$4 sm:$0xff]  }
  0x2d   : > { %710 = vmatprep.subr.bf16.mxu1 %v2557_v18  ;;  %930 = vmatprep.subr.bf16.mxu0 %v2560_v19  ;;  %v2651_v18 = vld [vmem:[%s3553_s1 + $0x264] ss:$8 sps:$4 sm:$0xff]   ;;  %v2642_v19 = vld [vmem:[%s3553_s1 + $0x1d4] ss:$8 sps:$4 sm:$0xff]  }
  0x2f   : > { %395 = vmatmul.mubr.bf16.vlgmr.msra.gmra.mrb[0].mxu0 %v2754_v17  ;;  %435 = vmatmul.mubr.bf16.vlgmr.msra.gmra.mrb[0].mxu1 %v2763_v20 }
  0x30   : > { %711 = vmatpush1.bf16.msra.mxu1 %v2555_v21  ;;  %931 = vmatpush1.bf16.msra.mxu0 %v2558_v22  ;;  %v2649_v21 = vld [vmem:[%s3553_s1 + $0x260] ss:$8 sps:$4 sm:$0xff]   ;;  %v2654_v22 = vld [vmem:[%s3553_s1 + $0x274] ss:$8 sps:$4 sm:$0xff]  }
  0x31   : > { %712 = vmatprep.subr.bf16.mxu1 %v2563_v23  ;;  %932 = vmatprep.subr.bf16.mxu0 %v2566_v24  ;;  %v2640_v23 = vld [vmem:[%s3553_s1 + $0x1d0] ss:$8 sps:$4 sm:$0xff]   ;;  %v2648_v24 = vld [vmem:[%s3553_s1 + $0x1e4] ss:$8 sps:$4 sm:$0xff]  }
  0x32   : > { %404 = vmatprep.mubr.bf16.mxu0 %v2666_v2  ;;  %444 = vmatprep.mubr.bf16.mxu1 %v2666_v2 }
  0x34   : > { %713 = vmatpush1.bf16.msra.mxu1 %v2561_v25  ;;  %933 = vmatpush1.bf16.msra.mxu0 %v2564_v26  ;;  %v2652_v25 = vld [vmem:[%s3553_s1 + $0x270] ss:$8 sps:$4 sm:$0xff]   ;;  %v2646_v26 = vld [vmem:[%s3553_s1 + $0x1e0] ss:$8 sps:$4 sm:$0xff]  }
  0x35   : > { %934 = vmatprep.subr.bf16.mxu0 %v2571_v27  ;;  %714 = vmatprep.subr.bf16.mxu1 %v2574_v28  ;;  %v2657_v27 = vld [vmem:[%s3553_s1 + $0x1f4] ss:$8 sps:$4 sm:$0xff]   ;;  %v2655_v28 = vld [vmem:[%s3553_s1 + $0x1f0] ss:$8 sps:$4 sm:$0xff]  }
  0x37   : > { %405 = vmatmul.mubr.bf16.gmra.mrb[4].mxu0 %v2794_v29  ;;  %445 = vmatmul.mubr.bf16.gmra.mrb[4].mxu1 %v2797_v30 }
  0x38   : > { %935 = vmatpush1.bf16.msra.mxu0 %v2569_v31  ;;  %715 = vmatpush1.bf16.msra.mxu1 %v2572_v32 }
  0x39   : > { %936 = vmatprep.subr.bf16.mxu0 %v2577_v33  ;;  %414 = vmatprep.mubr.bf16.mxu0 %v2666_v2 }
  0x3a   : > { %454 = vmatprep.mubr.bf16.mxu1 %v2666_v2  ;;  %716 = vmatprep.subr.bf16.mxu1 %v2580_v34 }
  0x3c   : > { %937 = vmatpush1.bf16.msra.mxu0 %v2575_v35  ;;  %717 = vmatpush1.bf16.msra.mxu1 %v2578_v36 }
  0x3d   : > { %938 = vmatprep.subr.bf16.mxu0 %v2585_v37  ;;  %718 = vmatprep.subr.bf16.mxu1 %v2588_v38 }
  0x3f   : > { %415 = vmatmul.mubr.bf16.gmra.mrb[8].mxu0 %v2828_v39  ;;  %455 = vmatmul.mubr.bf16.gmra.mrb[8].mxu1 %v2831_v40 }
  0x40   : > { %939 = vmatpush1.bf16.msra.mxu0 %v2583_v41  ;;  %719 = vmatpush1.bf16.msra.mxu1 %v2586_v42 }
  0x41   : > { %940 = vmatprep.subr.bf16.mxu0 %v2591_v43  ;;  %424 = vmatprep.mubr.bf16.mxu0 %v2666_v2 }
  0x42   : > { %464 = vmatprep.mubr.bf16.mxu1 %v2666_v2  ;;  %720 = vmatprep.subr.bf16.mxu1 %v2596_v44 }
  0x44   : > { %941 = vmatpush1.bf16.msra.mxu0 %v2589_v45  ;;  %721 = vmatpush1.bf16.msra.mxu1 %v2594_v46 }
  0x45   : > { %942 = vmatprep.subr.bf16.mxu0 %v2599_v47  ;;  %722 = vmatprep.subr.bf16.mxu1 %v2605_v48 }
  0x47   : > { %425 = vmatmul.mubr.bf16.gmra.mrb[12].mxu0 %v2862_v49  ;;  %465 = vmatmul.mubr.bf16.gmra.mrb[12].mxu1 %v2865_v50 }
  0x48   : > { %943 = vmatpush1.bf16.msra.mxu0 %v2597_v51  ;;  %474 = vmatprep.mubr.bf16.mxu1 %v2666_v2 }
  0x49   : > { %944 = vmatprep.subr.bf16.mxu0 %v2602_v52  ;;  %723 = vmatpush1.bf16.msra.mxu1 %v2603_v53 }
  0x4a   : > { %962 = vmatprep.mubr.bf16.mxu0 %v2666_v2  ;;  %724 = vmatprep.subr.bf16.mxu1 %v2609_v54 }
  0x4c   : > { %945 = vmatpush1.bf16.msra.mxu0 %v2600_v55 }
  0x4d   : > { %725 = vmatpush1.bf16.msra.mxu1 %v2607_v56  ;;  %1732 = vmatprep.subr.bf16.mxu0 %v2615_v57 }
  0x4e   : > { %1331 = vmatprep.subr.bf16.mxu1 %v2612_v58 }
  0x4f   : > { %475 = vmatmul.mubr.bf16.gmra.mrb[16].mxu1 %v2896_v59  ;;  %963 = vmatmul.mubr.bf16.vlgmr.msra.gmra.mrb[16].mxu0 %v2754_v17 }
  0x50   : > { %742 = vmatprep.mubr.bf16.mxu1 %v2666_v2  ;;  %972 = vmatprep.mubr.bf16.mxu0 %v2666_v2 }
  0x51   : > { %1733 = vmatpush1.bf16.msra.mxu0 %v2613_v60 }
  0x52   : > { %1734 = vmatprep.subr.bf16.mxu0 %v2621_v61 }
  0x55   : > { %1735 = vmatpush1.bf16.msra.mxu0 %v2619_v62 }
  0x56   : > { %1736 = vmatprep.subr.bf16.mxu0 %v2627_v63 }
  0x57   : > { %743 = vmatmul.mubr.bf16.vlgmr.msra.gmra.mrb[20].mxu1 %v2754_v17  ;;  %973 = vmatmul.mubr.bf16.gmra.mrb[20].mxu0 %v2794_v29 }
  0x58   : > { %1332 = vmatpush1.bf16.msra.mxu1 %v2610_v0  ;;  %752 = vmatprep.mubr.bf16.mxu1 %v2666_v2 }
  0x59   : > { %982 = vmatprep.mubr.bf16.mxu0 %v2666_v2  ;;  %1333 = vmatprep.subr.bf16.mxu1 %v2618_v1 }
  0x5a   : > { %1737 = vmatpush1.bf16.msra.mxu0 %v2625_v3 }
  0x5b   : > { %1738 = vmatprep.subr.bf16.mxu0 %v2633_v4 }
  0x5c   : > { %1334 = vmatpush1.bf16.msra.mxu1 %v2616_v5 }
  0x5d   : > { %1335 = vmatprep.subr.bf16.mxu1 %v2624_v6 }
  0x5e   : > { %1739 = vmatpush1.bf16.msra.mxu0 %v2631_v7 }
  0x5f   : > { %753 = vmatmul.mubr.bf16.gmra.mrb[24].mxu1 %v2794_v29  ;;  %983 = vmatmul.mubr.bf16.gmra.mrb[24].mxu0 %v2828_v39 }
  0x60   : > { %762 = vmatprep.mubr.bf16.mxu1 %v2666_v2  ;;  %992 = vmatprep.mubr.bf16.mxu0 %v2666_v2 }
  0x61   : > { %1336 = vmatpush1.bf16.msra.mxu1 %v2622_v8  ;;  %1740 = vmatprep.subr.bf16.mxu0 %v2639_v9 }
  0x62   : > { %1337 = vmatprep.subr.bf16.mxu1 %v2630_v10  ;;  %1741 = vmatpush1.bf16.msra.mxu0 %v2637_v11 }
  0x63   : > { %1742 = vmatprep.subr.bf16.mxu0 %v2645_v12 }
  0x65   : > { %1338 = vmatpush1.bf16.msra.mxu1 %v2628_v13 }
  0x66   : > { %1339 = vmatprep.subr.bf16.mxu1 %v2636_v14  ;;  %1743 = vmatpush1.bf16.msra.mxu0 %v2643_v15 }
  0x67   : > { %763 = vmatmul.mubr.bf16.gmra.mrb[28].mxu1 %v2828_v39  ;;  %993 = vmatmul.mubr.bf16.gmra.mrb[28].mxu0 %v2862_v49 }
  0x68   : > { %772 = vmatprep.mubr.bf16.mxu1 %v2666_v2  ;;  %1002 = vmatprep.mubr.bf16.mxu0 %v2666_v2 }
  0x69   : > { %1340 = vmatpush1.bf16.msra.mxu1 %v2634_v16  ;;  %1744 = vmatprep.subr.bf16.mxu0 %v2651_v18 }
  0x6a   : > { %1341 = vmatprep.subr.bf16.mxu1 %v2642_v19  ;;  %1745 = vmatpush1.bf16.msra.mxu0 %v2649_v21 }
  0x6b   : > { %1746 = vmatprep.subr.bf16.mxu0 %v2654_v22 }
  0x6d   : > { %1342 = vmatpush1.bf16.msra.mxu1 %v2640_v23 }
  0x6e   : > { %1343 = vmatprep.subr.bf16.mxu1 %v2648_v24  ;;  %1747 = vmatpush1.bf16.msra.mxu0 %v2652_v25 }
  0x6f   : > { %773 = vmatmul.mubr.bf16.gmra.mrb[32].mxu1 %v2862_v49  ;;  %1003 = vmatmul.mubr.bf16.gmra.mrb[32].mxu0 %v2763_v20 }
  0x70   : > { %782 = vmatprep.mubr.bf16.mxu1 %v2666_v2  ;;  %1012 = vmatprep.mubr.bf16.mxu0 %v2666_v2 }
  0x71   : > { %1344 = vmatpush1.bf16.msra.mxu1 %v2646_v26 }
  0x72   : > { %1345 = vmatprep.subr.bf16.mxu1 %v2657_v27 }
  0x75   : > { %1346 = vmatpush1.bf16.msra.mxu1 %v2655_v28 }
  0x77   : > { %783 = vmatmul.mubr.bf16.gmra.mrb[36].mxu1 %v2763_v20  ;;  %1013 = vmatmul.mubr.bf16.gmra.mrb[36].mxu0 %v2797_v30 }
  0x78   : > { %792 = vmatprep.mubr.bf16.mxu1 %v2666_v2  ;;  %1022 = vmatprep.mubr.bf16.mxu0 %v2666_v2 }
  0x7f   : > { %793 = vmatmul.mubr.bf16.gmra.mrb[40].mxu1 %v2797_v30  ;;  %1023 = vmatmul.mubr.bf16.gmra.mrb[40].mxu0 %v2831_v40 }
  0x80   : > { %802 = vmatprep.mubr.bf16.mxu1 %v2666_v2  ;;  %1032 = vmatprep.mubr.bf16.mxu0 %v2666_v2 }
  0x87   : > { %803 = vmatmul.mubr.bf16.gmra.mrb[44].mxu1 %v2831_v40  ;;  %1033 = vmatmul.mubr.bf16.gmra.mrb[44].mxu0 %v2865_v50 }
  0x88   : > { %812 = vmatprep.mubr.bf16.mxu1 %v2666_v2  ;;  %1042 = vmatprep.mubr.bf16.mxu0 %v2666_v2 }
  0x8f   : > { %813 = vmatmul.mubr.bf16.gmra.mrb[48].mxu1 %v2865_v50  ;;  %1043 = vmatmul.mubr.bf16.gmra.mrb[48].mxu0 %v2896_v59 }
  0x90   : > { %822 = vmatprep.mubr.bf16.mxu1 %v2666_v2  ;;  %1764 = vmatprep.mubr.bf16.mxu0 %v2666_v2 }
  0x97   : > { %823 = vmatmul.mubr.bf16.gmra.mrb[52].mxu1 %v2896_v59  ;;  %1765 = vmatmul.mubr.bf16.vlgmr.msra.gmra.mrb[52].mxu0 %v2754_v17 }
  0x98   : > { %1363 = vmatprep.mubr.bf16.mxu1 %v2666_v2  ;;  %1774 = vmatprep.mubr.bf16.mxu0 %v2666_v2 }
  0x9f   : > { %1364 = vmatmul.mubr.bf16.vlgmr.msra.gmra.mrb[56].mxu1 %v2754_v17  ;;  %1775 = vmatmul.mubr.bf16.gmra.mrb[56].mxu0 %v2794_v29 }
  0xa0   : > { %1373 = vmatprep.mubr.bf16.mxu1 %v2666_v2  ;;  %1784 = vmatprep.mubr.bf16.mxu0 %v2666_v2 }
  0xa7   : > { %1374 = vmatmul.mubr.bf16.gmra.mrb[60].mxu1 %v2794_v29  ;;  %1785 = vmatmul.mubr.bf16.gmra.mrb[60].mxu0 %v2828_v39 }
  0xa8   : > { %1383 = vmatprep.mubr.bf16.mxu1 %v2666_v2  ;;  %1794 = vmatprep.mubr.bf16.mxu0 %v2666_v2 }
  0xaf   : > { %1384 = vmatmul.mubr.bf16.gmra.mrb[64].mxu1 %v2828_v39  ;;  %1795 = vmatmul.mubr.bf16.gmra.mrb[64].mxu0 %v2862_v49 }
  0xb0   : > { %1393 = vmatprep.mubr.bf16.mxu1 %v2666_v2  ;;  %1804 = vmatprep.mubr.bf16.mxu0 %v2666_v2 }
  0xb7   : > { %1394 = vmatmul.mubr.bf16.gmra.mrb[68].mxu1 %v2862_v49  ;;  %1805 = vmatmul.mubr.bf16.gmra.mrb[68].mxu0 %v2763_v20 }
  0xb8   : > { %1403 = vmatprep.mubr.bf16.mxu1 %v2666_v2  ;;  %1814 = vmatprep.mubr.bf16.mxu0 %v2666_v2 }
  0xbf   : > { %1404 = vmatmul.mubr.bf16.gmra.mrb[72].mxu1 %v2763_v20  ;;  %1815 = vmatmul.mubr.bf16.gmra.mrb[72].mxu0 %v2797_v30 }
  0xc0   : > { %1413 = vmatprep.mubr.bf16.mxu1 %v2666_v2  ;;  %1824 = vmatprep.mubr.bf16.mxu0 %v2666_v2 }
  0xc7   : > { %1414 = vmatmul.mubr.bf16.gmra.mrb[76].mxu1 %v2797_v30  ;;  %1825 = vmatmul.mubr.bf16.gmra.mrb[76].mxu0 %v2831_v40 }
  0xc8   : > { %1423 = vmatprep.mubr.bf16.mxu1 %v2666_v2  ;;  %1834 = vmatprep.mubr.bf16.mxu0 %v2666_v2 }
  0xcf   : > { %1424 = vmatmul.mubr.bf16.gmra.mrb[80].mxu1 %v2831_v40  ;;  %1835 = vmatmul.mubr.bf16.gmra.mrb[80].mxu0 %v2865_v50 }
  0xd0   : > { %1433 = vmatprep.mubr.bf16.mxu1 %v2666_v2  ;;  %1844 = vmatprep.mubr.bf16.mxu0 %v2666_v2 }
  0xd7   : > { %1434 = vmatmul.mubr.bf16.gmra.mrb[84].mxu1 %v2865_v50  ;;  %1845 = vmatmul.mubr.bf16.gmra.mrb[84].mxu0 %v2896_v59 }
  0xd8   : > { %1443 = vmatprep.mubr.bf16.mxu1 %v2666_v2 }
  0xdf   : > { %1444 = vmatmul.mubr.bf16.gmra.mrb[88].mxu1 %v2896_v59 }
 0x102   : > { %v3060_v17 = vpop.f32.mrb[0].mxu1  ;;  %v396_v20 = vpop.f32.mrb[0].mxu0 }
 0x103   : > { %v3062_v29 = vpop.f32.mrb[1].mxu1  ;;  %v522_v30 = vrot.slane %v396_v20, 1  ;;  %v398_v31 = vpop.f32.mrb[1].mxu0  ;;  %v552_v35 = vrot.slane %v3060_v17, 1 }
 0x104   : > { %v440_v32 = vpop.f32.mrb[2].mxu1  ;;  %v525_v33 = vrot.slane %v398_v31, 1  ;;  %v400_v34 = vpop.f32.mrb[2].mxu0  ;;  %v554_v2 = vrot.slane %v3062_v29, 1 }
 0x105   : > { %v556_v36 = vrot.slane %v440_v32, 1  ;;  %v442_v37 = vpop.f32.mrb[3].mxu1  ;;  %v523_v38 = vrot.slane %v400_v34, 1  ;;  %v402_v39 = vpop.f32.mrb[3].mxu0 }
 0x106   : > { %v558_v40 = vrot.slane %v442_v37, 1  ;;  %v526_v41 = vrot.slane %v402_v39, 1 }
 0x107   : > { %v3067_v42 = vsel %vm521_vm0, %v522_v30, %v523_v38  ;;  %v3072_v43 = vsel %vm521_vm0, %v552_v35, %v556_v36 }
 0x108   : > { %v3075_v44 = vsel %vm521_vm0, %v525_v33, %v526_v41  ;;  %v3080_v45 = vsel %vm521_vm0, %v554_v2, %v558_v40 }
 0x10a   : > { %v446_v46 = vpop.f32.mrb[4].mxu1  ;;  %v406_v47 = vpop.f32.mrb[4].mxu0 }
 0x10b   : > { %v560_v48 = vrot.slane %v446_v46, 1  ;;  %v448_v49 = vpop.f32.mrb[5].mxu1  ;;  %v528_v50 = vrot.slane %v406_v47, 1  ;;  %v408_v51 = vpop.f32.mrb[5].mxu0 }
 0x10c   : > { %v562_v52 = vrot.slane %v448_v49, 1  ;;  %v450_v53 = vpop.f32.mrb[6].mxu1  ;;  %v530_v54 = vrot.slane %v408_v51, 1  ;;  %v410_v55 = vpop.f32.mrb[6].mxu0 }
 0x10d   : > { %v564_v56 = vrot.slane %v450_v53, 1  ;;  %v452_v57 = vpop.f32.mrb[7].mxu1  ;;  %v532_v58 = vrot.slane %v410_v55, 1  ;;  %v412_v59 = vpop.f32.mrb[7].mxu0  ;;  %v3083_v60 = vsel %vm521_vm0, %v523_v38, %v528_v50  ;;  %v3086_v61 = vsel %vm521_vm0, %v556_v36, %v560_v48 }
 0x10e   : > { %v566_v62 = vrot.slane %v452_v57, 1  ;;  %v534_v63 = vrot.slane %v412_v59, 1  ;;  %v3089_v0 = vsel %vm521_vm0, %v526_v41, %v530_v54  ;;  %v3092_v1 = vsel %vm521_vm0, %v558_v40, %v562_v52 }
 0x10f   : > { %v3095_v3 = vsel %vm521_vm0, %v528_v50, %v532_v58  ;;  %v3098_v4 = vsel %vm521_vm0, %v560_v48, %v564_v56 }
 0x110   : > { %v3101_v5 = vsel %vm521_vm0, %v530_v54, %v534_v63  ;;  %v3104_v6 = vsel %vm521_vm0, %v562_v52, %v566_v62 }
 0x112   : > { %v456_v7 = vpop.f32.mrb[8].mxu1  ;;  %v416_v8 = vpop.f32.mrb[8].mxu0 }
 0x113   : > { %v568_v9 = vrot.slane %v456_v7, 1  ;;  %v458_v10 = vpop.f32.mrb[9].mxu1  ;;  %v536_v11 = vrot.slane %v416_v8, 1  ;;  %v418_v12 = vpop.f32.mrb[9].mxu0 }
 0x114   : > { %v570_v13 = vrot.slane %v458_v10, 1  ;;  %v460_v14 = vpop.f32.mrb[10].mxu1  ;;  %v538_v15 = vrot.slane %v418_v12, 1  ;;  %v420_v16 = vpop.f32.mrb[10].mxu0 }
 0x115   : > { %v572_v18 = vrot.slane %v460_v14, 1  ;;  %v462_v19 = vpop.f32.mrb[11].mxu1  ;;  %v540_v21 = vrot.slane %v420_v16, 1  ;;  %v422_v22 = vpop.f32.mrb[11].mxu0  ;;  %v3107_v23 = vsel %vm521_vm0, %v532_v58, %v536_v11  ;;  %v3110_v24 = vsel %vm521_vm0, %v564_v56, %v568_v9 }
 0x116   : > { %v574_v25 = vrot.slane %v462_v19, 1  ;;  %v542_v26 = vrot.slane %v422_v22, 1  ;;  %v3113_v27 = vsel %vm521_vm0, %v534_v63, %v538_v15  ;;  %v3116_v28 = vsel %vm521_vm0, %v566_v62, %v570_v13 }
 0x117   : > { %v3119_v20 = vsel %vm521_vm0, %v536_v11, %v540_v21  ;;  %v3122_v30 = vsel %vm521_vm0, %v568_v9, %v572_v18 }
 0x118   : > { %v3125_v31 = vsel %vm521_vm0, %v538_v15, %v542_v26  ;;  %v3128_v32 = vsel %vm521_vm0, %v570_v13, %v574_v25 }
 0x11a   : > { %v426_v33 = vpop.f32.mrb[12].mxu0  ;;  %v466_v34 = vpop.f32.mrb[12].mxu1 }
 0x11b   : > { %v544_v36 = vrot.slane %v426_v33, 1  ;;  %v576_v37 = vrot.slane %v466_v34, 1  ;;  %v428_v38 = vpop.f32.mrb[13].mxu0  ;;  %v468_v39 = vpop.f32.mrb[13].mxu1 }
 0x11c   : > { %v546_v40 = vrot.slane %v428_v38, 1  ;;  %v578_v41 = vrot.slane %v468_v39, 1  ;;  %v430_v46 = vpop.f32.mrb[14].mxu0  ;;  %v470_v47 = vpop.f32.mrb[14].mxu1 }
 0x11d   : > { %v548_v48 = vrot.slane %v430_v46, 1  ;;  %v580_v49 = vrot.slane %v470_v47, 1  ;;  %v432_v50 = vpop.f32.mrb[15].mxu0  ;;  %v472_v51 = vpop.f32.mrb[15].mxu1  ;;  %v3131_v52 = vsel %vm521_vm0, %v540_v21, %v544_v36  ;;  %v3134_v53 = vsel %vm521_vm0, %v572_v18, %v576_v37 }
 0x11e   : > { %v550_v54 = vrot.slane %v432_v50, 1  ;;  %v582_v55 = vrot.slane %v472_v51, 1  ;;  %v3137_v56 = vsel %vm521_vm0, %v542_v26, %v546_v40  ;;  %v3140_v57 = vsel %vm521_vm0, %v574_v25, %v578_v41 }
 0x11f   : > { %v3143_v58 = vsel %vm521_vm0, %v544_v36, %v548_v48  ;;  %v3148_v59 = vsel %vm521_vm0, %v548_v48, %v552_v35  ;;  %v3151_v62 = vsel %vm521_vm0, %v576_v37, %v580_v49 }
 0x120   : > { %v3154_v63 = vsel %vm521_vm0, %v546_v40, %v550_v54  ;;  %v3159_v7 = vsel %vm521_vm0, %v550_v54, %v554_v2  ;;  %v3162_v8 = vsel %vm521_vm0, %v578_v41, %v582_v55 }
 0x122   : > { %v476_v9 = vpop.f32.mrb[16].mxu1  ;;  %v964_v10 = vpop.f32.mrb[16].mxu0 }
 0x123   : > { %v584_v17 = vrot.slane %v476_v9, 1  ;;  %v478_v11 = vpop.f32.mrb[17].mxu1  ;;  %v1090_v35 = vrot.slane %v964_v10, 2  ;;  %v966_v12 = vpop.f32.mrb[17].mxu0 }
 0x124   : > { %v586_v13 = vrot.slane %v478_v11, 1  ;;  %v480_v14 = vpop.f32.mrb[18].mxu1  ;;  %v1093_v15 = vrot.slane %v966_v12, 2  ;;  %v968_v16 = vpop.f32.mrb[18].mxu0 }
 0x125   : > { %v588_v18 = vrot.slane %v480_v14, 1  ;;  %v482_v19 = vpop.f32.mrb[19].mxu1  ;;  %v1091_v29 = vrot.slane %v968_v16, 2  ;;  %v970_v21 = vpop.f32.mrb[19].mxu0  ;;  %v3165_v2 = vsel %vm521_vm0, %v580_v49, %v584_v17 }
 0x126   : > { %v590_v22 = vrot.slane %v482_v19, 1  ;;  %v1094_v25 = vrot.slane %v970_v21, 2  ;;  %v3168_v26 = vsel %vm521_vm0, %v582_v55, %v586_v13 }
 0x127   : > { %v1092_v33 = vsel %vm1089_vm1, %v1090_v35, %v1091_v29  ;;  %v3172_v34 = vsel %vm521_vm0, %v584_v17, %v588_v18  ;;  %v3175_v36 = vsel %vm521_vm0, %v588_v18, 0.0 }
 0x128   : > { %v1095_v37 = vsel %vm1089_vm1, %v1093_v15, %v1094_v25  ;;  %v3179_v38 = vsel %vm521_vm0, %v586_v13, %v590_v22  ;;  %v3182_v39 = vsel %vm521_vm0, %v590_v22, 0.0 }
 0x12a   : > { %v744_v40 = vpop.f32.mrb[20].mxu1  ;;  %v974_v41 = vpop.f32.mrb[20].mxu0 }
 0x12b   : > { %v745_v46 = vadd.f32 %v744_v40, %v3067_v42  ;;  %v746_v47 = vpop.f32.mrb[21].mxu1  ;;  %v1096_v48 = vrot.slane %v974_v41, 2  ;;  %v976_v49 = vpop.f32.mrb[21].mxu0 }
 0x12c   : > { %v747_v50 = vadd.f32 %v746_v47, %v3075_v44  ;;  %v748_v51 = vpop.f32.mrb[22].mxu1  ;;  %v1098_v54 = vrot.slane %v976_v49, 2  ;;  %v978_v55 = vpop.f32.mrb[22].mxu0 }
 0x12d   : > { %v3186_v9 = vadd.f32 %v1092_v33, %v745_v46  ;;  %v749_v10 = vadd.f32 %v748_v51, %v3083_v60  ;;  %v1097_v17 = vsel %vm1089_vm1, %v1091_v29, %v1096_v48  ;;  %v750_v11 = vpop.f32.mrb[23].mxu1  ;;  %v1100_v35 = vrot.slane %v978_v55, 2  ;;  %v980_v12 = vpop.f32.mrb[23].mxu0 }
 0x12e   : > { %v3190_v13 = vadd.f32 %v1095_v37, %v747_v50  ;;  %v751_v42 = vadd.f32 %v750_v11, %v3089_v0  ;;  %v1099_v14 = vsel %vm1089_vm1, %v1094_v25, %v1098_v54  ;;  %v1102_v15 = vrot.slane %v980_v12, 2 }
 0x12f   : > { %v3194_v44 = vadd.f32 %v1097_v17, %v749_v10  ;;  %v1101_v16 = vsel %vm1089_vm1, %v1096_v48, %v1100_v35 }
 0x130   : > { %v3197_v18 = vadd.f32 %v1099_v14, %v751_v42  ;;  %v1103_v60 = vsel %vm1089_vm1, %v1098_v54, %v1102_v15 }
 0x132   : > { %v754_v19 = vpop.f32.mrb[24].mxu1  ;;  %v984_v29 = vpop.f32.mrb[24].mxu0 }
 0x133   : > { %v755_v21 = vadd.f32 %v754_v19, %v3095_v3  ;;  %v756_v22 = vpop.f32.mrb[25].mxu1  ;;  %v1104_v33 = vrot.slane %v984_v29, 2  ;;  %v986_v37 = vpop.f32.mrb[25].mxu0 }
 0x134   : > { %v757_v0 = vadd.f32 %v756_v22, %v3101_v5  ;;  %v758_v40 = vpop.f32.mrb[26].mxu1  ;;  %v1106_v25 = vrot.slane %v986_v37, 2  ;;  %v988_v41 = vpop.f32.mrb[26].mxu0 }
 0x135   : > { %v3202_v46 = vadd.f32 %v1101_v16, %v755_v21  ;;  %v759_v47 = vadd.f32 %v758_v40, %v3107_v23  ;;  %v1105_v48 = vsel %vm1089_vm1, %v1100_v35, %v1104_v33  ;;  %v760_v49 = vpop.f32.mrb[27].mxu1  ;;  %v1108_v50 = vrot.slane %v988_v41, 2  ;;  %v990_v51 = vpop.f32.mrb[27].mxu0 }
 0x136   : > { %v3206_v54 = vadd.f32 %v1103_v60, %v757_v0  ;;  %v761_v3 = vadd.f32 %v760_v49, %v3113_v27  ;;  %v1107_v55 = vsel %vm1089_vm1, %v1102_v15, %v1106_v25  ;;  %v1110_v10 = vrot.slane %v990_v51, 2 }
 0x137   : > { %v3210_v5 = vadd.f32 %v1105_v48, %v759_v47  ;;  %v1109_v17 = vsel %vm1089_vm1, %v1104_v33, %v1108_v50 }
 0x138   : > { %v3213_v11 = vadd.f32 %v1107_v55, %v761_v3  ;;  %v1111_v23 = vsel %vm1089_vm1, %v1106_v25, %v1110_v10 }
 0x13a   : > { %v764_v12 = vpop.f32.mrb[28].mxu1  ;;  %v994_v35 = vpop.f32.mrb[28].mxu0 }
 0x13b   : > { %v765_v42 = vadd.f32 %v764_v12, %v3119_v20  ;;  %v766_v14 = vpop.f32.mrb[29].mxu1  ;;  %v1112_v16 = vrot.slane %v994_v35, 2  ;;  %v996_v60 = vpop.f32.mrb[29].mxu0 }
 0x13c   : > { %v767_v27 = vadd.f32 %v766_v14, %v3125_v31  ;;  %v768_v19 = vpop.f32.mrb[30].mxu1  ;;  %v1114_v15 = vrot.slane %v996_v60, 2  ;;  %v998_v29 = vpop.f32.mrb[30].mxu0 }
 0x13d   : > { %v3218_v21 = vadd.f32 %v1109_v17, %v765_v42  ;;  %v769_v22 = vadd.f32 %v768_v19, %v3131_v52  ;;  %v1113_v33 = vsel %vm1089_vm1, %v1108_v50, %v1112_v16  ;;  %v770_v37 = vpop.f32.mrb[31].mxu1  ;;  %v1116_v0 = vrot.slane %v998_v29, 2  ;;  %v1000_v40 = vpop.f32.mrb[31].mxu0 }
 0x13e   : > { %v3222_v25 = vadd.f32 %v1111_v23, %v767_v27  ;;  %v771_v20 = vadd.f32 %v770_v37, %v3137_v56  ;;  %v1115_v41 = vsel %vm1089_vm1, %v1110_v10, %v1114_v15  ;;  %v1118_v47 = vrot.slane %v1000_v40, 2 }
 0x13f   : > { %v3226_v31 = vadd.f32 %v1113_v33, %v769_v22  ;;  %v1117_v48 = vsel %vm1089_vm1, %v1112_v16, %v1116_v0 }
 0x140   : > { %v3229_v49 = vadd.f32 %v1115_v41, %v771_v20  ;;  %v1119_v52 = vsel %vm1089_vm1, %v1114_v15, %v1118_v47 }
 0x142   : > { %v774_v51 = vpop.f32.mrb[32].mxu1  ;;  %v1004_v50 = vpop.f32.mrb[32].mxu0 }
 0x143   : > { %v775_v3 = vadd.f32 %v774_v51, %v3143_v58  ;;  %v776_v55 = vpop.f32.mrb[33].mxu1  ;;  %v1120_v17 = vrot.slane %v1004_v50, 2  ;;  %v1006_v23 = vpop.f32.mrb[33].mxu0 }
 0x144   : > { %v777_v56 = vadd.f32 %v776_v55, %v3154_v63  ;;  %v778_v12 = vpop.f32.mrb[34].mxu1  ;;  %v1122_v10 = vrot.slane %v1006_v23, 2  ;;  %v1008_v35 = vpop.f32.mrb[34].mxu0 }
 0x145   : > { %v3234_v42 = vadd.f32 %v1117_v48, %v775_v3  ;;  %v779_v14 = vadd.f32 %v778_v12, %v3148_v59  ;;  %v1121_v16 = vsel %vm1089_vm1, %v1116_v0, %v1120_v17  ;;  %v780_v60 = vpop.f32.mrb[35].mxu1  ;;  %v1124_v27 = vrot.slane %v1008_v35, 2  ;;  %v1010_v19 = vpop.f32.mrb[35].mxu0 }
 0x146   : > { %v3238_v15 = vadd.f32 %v1119_v52, %v777_v56  ;;  %v781_v58 = vadd.f32 %v780_v60, %v3159_v7  ;;  %v1123_v29 = vsel %vm1089_vm1, %v1118_v47, %v1122_v10  ;;  %v1126_v22 = vrot.slane %v1010_v19, 2 }
 0x147   : > { %v3242_v63 = vadd.f32 %v1121_v16, %v779_v14  ;;  %v1125_v33 = vsel %vm1089_vm1, %v1120_v17, %v1124_v27 }
 0x148   : > { %v3245_v37 = vadd.f32 %v1123_v29, %v781_v58  ;;  %v1127_v59 = vsel %vm1089_vm1, %v1122_v10, %v1126_v22 }
 0x14a   : > { %v784_v40 = vpop.f32.mrb[36].mxu1  ;;  %v1014_v0 = vpop.f32.mrb[36].mxu0 }
 0x14b   : > { %v785_v20 = vadd.f32 %v784_v40, %v3072_v43  ;;  %v786_v41 = vpop.f32.mrb[37].mxu1  ;;  %v1128_v48 = vrot.slane %v1014_v0, 2  ;;  %v1016_v52 = vpop.f32.mrb[37].mxu0 }
 0x14c   : > { %v787_v7 = vadd.f32 %v786_v41, %v3080_v45  ;;  %v788_v51 = vpop.f32.mrb[38].mxu1  ;;  %v1130_v47 = vrot.slane %v1016_v52, 2  ;;  %v1018_v50 = vpop.f32.mrb[38].mxu0 }
 0x14d   : > { %v3250_v3 = vadd.f32 %v1125_v33, %v785_v20  ;;  %v789_v55 = vadd.f32 %v788_v51, %v3086_v61  ;;  %v1129_v17 = vsel %vm1089_vm1, %v1124_v27, %v1128_v48  ;;  %v790_v23 = vpop.f32.mrb[39].mxu1  ;;  %v1132_v56 = vrot.slane %v1018_v50, 2  ;;  %v1020_v12 = vpop.f32.mrb[39].mxu0 }
 0x14e   : > { %v3254_v10 = vadd.f32 %v1127_v59, %v787_v7  ;;  %v791_v43 = vadd.f32 %v790_v23, %v3092_v1  ;;  %v1131_v35 = vsel %vm1089_vm1, %v1126_v22, %v1130_v47  ;;  %v1134_v14 = vrot.slane %v1020_v12, 2 }
 0x14f   : > { %v3258_v45 = vadd.f32 %v1129_v17, %v789_v55  ;;  %v1133_v16 = vsel %vm1089_vm1, %v1128_v48, %v1132_v56 }
 0x150   : > { %v3261_v60 = vadd.f32 %v1131_v35, %v791_v43  ;;  %v1135_v61 = vsel %vm1089_vm1, %v1130_v47, %v1134_v14 }
 0x152   : > { %v794_v19 = vpop.f32.mrb[40].mxu1  ;;  %v1024_v27 = vpop.f32.mrb[40].mxu0 }
 0x153   : > { %v795_v58 = vadd.f32 %v794_v19, %v3098_v4  ;;  %v796_v29 = vpop.f32.mrb[41].mxu1  ;;  %v1136_v33 = vrot.slane %v1024_v27, 2  ;;  %v1026_v59 = vpop.f32.mrb[41].mxu0 }
 0x154   : > { %v797_v1 = vadd.f32 %v796_v29, %v3104_v6  ;;  %v798_v40 = vpop.f32.mrb[42].mxu1  ;;  %v1138_v22 = vrot.slane %v1026_v59, 2  ;;  %v1028_v0 = vpop.f32.mrb[42].mxu0 }
 0x155   : > { %v3266_v20 = vadd.f32 %v1133_v16, %v795_v58  ;;  %v799_v41 = vadd.f32 %v798_v40, %v3110_v24  ;;  %v1137_v48 = vsel %vm1089_vm1, %v1132_v56, %v1136_v33  ;;  %v800_v52 = vpop.f32.mrb[43].mxu1  ;;  %v1140_v7 = vrot.slane %v1028_v0, 2  ;;  %v1030_v51 = vpop.f32.mrb[43].mxu0 }
 0x156   : > { %v3270_v47 = vadd.f32 %v1135_v61, %v797_v1  ;;  %v801_v4 = vadd.f32 %v800_v52, %v3116_v28  ;;  %v1139_v50 = vsel %vm1089_vm1, %v1134_v14, %v1138_v22  ;;  %v1142_v55 = vrot.slane %v1030_v51, 2 }
 0x157   : > { %v3274_v6 = vadd.f32 %v1137_v48, %v799_v41  ;;  %v1141_v17 = vsel %vm1089_vm1, %v1136_v33, %v1140_v7 }
 0x158   : > { %v3277_v23 = vadd.f32 %v1139_v50, %v801_v4  ;;  %v1143_v24 = vsel %vm1089_vm1, %v1138_v22, %v1142_v55 }
 0x15a   : > { %v804_v12 = vpop.f32.mrb[44].mxu1  ;;  %v1034_v56 = vpop.f32.mrb[44].mxu0 }
 0x15b   : > { %v805_v43 = vadd.f32 %v804_v12, %v3122_v30  ;;  %v806_v35 = vpop.f32.mrb[45].mxu1  ;;  %v1144_v16 = vrot.slane %v1034_v56, 2  ;;  %v1036_v61 = vpop.f32.mrb[45].mxu0 }
 0x15c   : > { %v807_v28 = vadd.f32 %v806_v35, %v3128_v32  ;;  %v808_v19 = vpop.f32.mrb[46].mxu1  ;;  %v1146_v14 = vrot.slane %v1036_v61, 2  ;;  %v1038_v27 = vpop.f32.mrb[46].mxu0 }
 0x15d   : > { %v3282_v58 = vadd.f32 %v1141_v17, %v805_v43  ;;  %v809_v29 = vadd.f32 %v808_v19, %v3134_v53  ;;  %v1145_v33 = vsel %vm1089_vm1, %v1140_v7, %v1144_v16  ;;  %v810_v59 = vpop.f32.mrb[47].mxu1  ;;  %v1148_v1 = vrot.slane %v1038_v27, 2  ;;  %v1040_v40 = vpop.f32.mrb[47].mxu0 }
 0x15e   : > { %v3286_v22 = vadd.f32 %v1143_v24, %v807_v28  ;;  %v811_v30 = vadd.f32 %v810_v59, %v3140_v57  ;;  %v1147_v0 = vsel %vm1089_vm1, %v1142_v55, %v1146_v14  ;;  %v1150_v41 = vrot.slane %v1040_v40, 2 }
 0x15f   : > { %v3290_v32 = vadd.f32 %v1145_v33, %v809_v29  ;;  %v1149_v48 = vsel %vm1089_vm1, %v1144_v16, %v1148_v1 }
 0x160   : > { %v3293_v52 = vadd.f32 %v1147_v0, %v811_v30  ;;  %v1151_v53 = vsel %vm1089_vm1, %v1146_v14, %v1150_v41 }
 0x162   : > { %v814_v51 = vpop.f32.mrb[48].mxu1  ;;  %v1044_v7 = vpop.f32.mrb[48].mxu0 }
 0x163   : > { %v815_v4 = vadd.f32 %v814_v51, %v3151_v62  ;;  %v816_v50 = vpop.f32.mrb[49].mxu1  ;;  %v1152_v17 = vrot.slane %v1044_v7, 2  ;;  %v1046_v24 = vpop.f32.mrb[49].mxu0  ;;  %v2038_v51 = vlaneseq }
 0x164   : > { %v817_v57 = vadd.f32 %v816_v50, %v3162_v8  ;;  %v818_v12 = vpop.f32.mrb[50].mxu1  ;;  %v1154_v55 = vrot.slane %v1046_v24, 2  ;;  %v1048_v56 = vpop.f32.mrb[50].mxu0 }
 0x165   : > { %v3298_v43 = vadd.f32 %v1149_v48, %v815_v4  ;;  %v819_v35 = vadd.f32 %v818_v12, %v3165_v2  ;;  %v1153_v16 = vsel %vm1089_vm1, %v1148_v1, %v1152_v17  ;;  %v820_v61 = vpop.f32.mrb[51].mxu1  ;;  %v1156_v28 = vrot.slane %v1048_v56, 2  ;;  %v1050_v19 = vpop.f32.mrb[51].mxu0 }
 0x166   : > { %v3302_v14 = vadd.f32 %v1151_v53, %v817_v57  ;;  %v821_v62 = vadd.f32 %v820_v61, %v3168_v26  ;;  %v1155_v27 = vsel %vm1089_vm1, %v1150_v41, %v1154_v55  ;;  %v1158_v29 = vrot.slane %v1050_v19, 2 }
 0x167   : > { %v3306_v8 = vadd.f32 %v1153_v16, %v819_v35  ;;  %v1157_v33 = vsel %vm1089_vm1, %v1152_v17, %v1156_v28  ;;  %v1196_v26 = vsel %vm1089_vm1, %v1156_v28, 0.0  ;;  %v2039_v28 = vshrl.u32 %v2038_v51, 7 }
 0x168   : > { %v3309_v59 = vadd.f32 %v1155_v27, %v821_v62  ;;  %v1159_v2 = vsel %vm1089_vm1, %v1154_v55, %v1158_v29  ;;  %v1197_v24 = vsel %vm1089_vm1, %v1158_v29, 0.0 }
 0x16a   : > { %v824_v40 = vpop.f32.mrb[52].mxu1  ;;  %v1766_v1 = vpop.f32.mrb[52].mxu0 }
 0x16b   : > { %v825_v30 = vadd.f32 %v824_v40, %v3172_v34  ;;  %v826_v0 = vpop.f32.mrb[53].mxu1  ;;  %v1892_v48 = vrot.slane %v1766_v1, 4  ;;  %v1768_v53 = vpop.f32.mrb[53].mxu0 }
 0x16c   : > { %v827_v41 = vadd.f32 %v826_v0, %v3179_v38  ;;  %v828_v7 = vpop.f32.mrb[54].mxu1  ;;  %v1895_v4 = vrot.slane %v1768_v53, 4  ;;  %v1770_v50 = vpop.f32.mrb[54].mxu0 }
 0x16d   : > { %v3315_v17 = vadd.f32 %v1157_v33, %v825_v30  ;;  %v829_v57 = vadd.f32 %v828_v7, %v3175_v36  ;;  %v830_v12 = vpop.f32.mrb[55].mxu1  ;;  %v1893_v34 = vrot.slane %v1770_v50, 4  ;;  %v1772_v55 = vpop.f32.mrb[55].mxu0  ;;  %v2040_v33 = vsub.s32 0, %v2039_v28 }
 0x16e   : > { %v3319_v56 = vadd.f32 %v1159_v2, %v827_v41  ;;  %v831_v35 = vadd.f32 %v830_v12, %v3182_v39  ;;  %v1896_v16 = vrot.slane %v1772_v55, 4  ;;  %v2036_v39 = vld [vmem:[%s3554_s2] sm:$0x3]  ;;  %v2044_v30 = vsub.s32 1, %v2039_v28 }
 0x16f   : > { %v3322_v61 = vadd.f32 %v1196_v26, %v829_v57  ;;  %v1894_v38 = vsel %vm1891_vm2, %v1892_v48, %v1893_v34 }
 0x170   : > { %3556 = vst [vmem:[#allocation2_spill] sm:$0xff] %v3319_v56  ;;  %v3325_v19 = vadd.f32 %v1197_v24, %v831_v35  ;;  %v1897_v62 = vsel %vm1891_vm2, %v1895_v4, %v1896_v16 }
 0x172   : > { %3557 = vst [vmem:[#allocation3_spill] sm:$0xff] %v3325_v19  ;;  %v1365_v27 = vpop.f32.mrb[56].mxu1  ;;  %v1776_v29 = vpop.f32.mrb[56].mxu0 }
 0x173   : > { %v1367_v36 = vpop.f32.mrb[57].mxu1  ;;  %v1898_v40 = vrot.slane %v1776_v29, 4  ;;  %v1778_v2 = vpop.f32.mrb[57].mxu0  ;;  %v1491_v53 = vrot.slane %v1365_v27, 3  ;;  %v3336_v29 = vrot.slane %v2036_v39, %v2040_v33 }
 0x174   : > { %v1369_v1 = vpop.f32.mrb[58].mxu1  ;;  %v1900_v0 = vrot.slane %v1778_v2, 4  ;;  %v1780_v48 = vpop.f32.mrb[58].mxu0  ;;  %v1494_v50 = vrot.slane %v1367_v36, 3  ;;  %v3341_v36 = vrot.slane %v2036_v39, %v2044_v30 }
 0x175   : > { %v1492_v51 = vrot.slane %v1369_v1, 3  ;;  %v1899_v26 = vsel %vm1891_vm2, %v1893_v34, %v1898_v40  ;;  %v1371_v41 = vpop.f32.mrb[59].mxu1  ;;  %v1902_v7 = vrot.slane %v1780_v48, 4  ;;  %v1782_v4 = vpop.f32.mrb[59].mxu0 }
 0x176   : > { %v1495_v24 = vrot.slane %v1371_v41, 3  ;;  %v1901_v57 = vsel %vm1891_vm2, %v1896_v16, %v1900_v0  ;;  %v1904_v12 = vrot.slane %v1782_v4, 4 }
 0x177   : > { %v1493_v55 = vsel %vm1490_vm3, %v1491_v53, %v1492_v51  ;;  %v1903_v35 = vsel %vm1891_vm2, %v1898_v40, %v1902_v7 }
 0x178   : > { %v1599_v28 = vadd.f32 %v1493_v55, %v3186_v9  ;;  %v1496_v27 = vsel %vm1490_vm3, %v1494_v50, %v1495_v24  ;;  %v1905_v34 = vsel %vm1891_vm2, %v1900_v0, %v1904_v12 }
 0x179   : > { %v1600_v2 = vadd.f32 %v1496_v27, %v3190_v13 }
 0x17a   : > { %v2000_v1 = vadd.f32 %v1894_v38, %v1599_v28  ;;  %v1375_v16 = vpop.f32.mrb[60].mxu1  ;;  %v1786_v48 = vpop.f32.mrb[60].mxu0 }
 0x17b   : > { %v2001_v41 = vadd.f32 %v1897_v62, %v1600_v2  ;;  %v1497_v53 = vrot.slane %v1375_v16, 3  ;;  %v1377_v4 = vpop.f32.mrb[61].mxu1  ;;  %v1906_v40 = vrot.slane %v1786_v48, 4  ;;  %v1788_v19 = vpop.f32.mrb[61].mxu0 }
 0x17c   : > { %v2048_v9 = vadd.f32 %v3336_v29, %v2000_v1  ;;  %v1499_v33 = vrot.slane %v1377_v4, 3  ;;  %v1379_v55 = vpop.f32.mrb[62].mxu1  ;;  %v1908_v50 = vrot.slane %v1788_v19, 4  ;;  %v1790_v56 = vpop.f32.mrb[62].mxu0 }
 0x17d   : > { %v2049_v0 = vadd.f32 %v3341_v36, %v2001_v41  ;;  %v1498_v13 = vsel %vm1490_vm3, %v1492_v51, %v1497_v53  ;;  %v1501_v39 = vrot.slane %v1379_v55, 3  ;;  %v1907_v38 = vsel %vm1891_vm2, %v1902_v7, %v1906_v40  ;;  %v1381_v30 = vpop.f32.mrb[63].mxu1  ;;  %v3348_v62 = vpop.f32.mrb[63].mxu0 }
 0x17e   : > { %v2084_v28 = vmax.f32 %v2048_v9, 0.0  ;;  %v1601_v27 = vadd.f32 %v1498_v13, %v3194_v44  ;;  %v1500_v2 = vsel %vm1490_vm3, %v1495_v24, %v1499_v33  ;;  %v1503_v1 = vrot.slane %v1381_v30, 3 }
 0x17f   : > { %v2085_v16 = vmax.f32 %v2049_v0, 0.0  ;;  %v1602_v19 = vadd.f32 %v1500_v2, %v3197_v18  ;;  %v1502_v48 = vsel %vm1490_vm3, %v1497_v53, %v1501_v39  ;;  %v1909_v41 = vsel %vm1891_vm2, %v1904_v12, %v1908_v50 }
 0x180   : > { %v2002_v51 = vadd.f32 %v1899_v26, %v1601_v27  ;;  %v1603_v7 = vadd.f32 %v1502_v48, %v3202_v46  ;;  %v1504_v44 = vsel %vm1490_vm3, %v1499_v33, %v1503_v1  ;;  %v1910_v24 = vrot.slane %v1790_v56, 4 }
 0x181   : > { %v2486_v4 = vpack.c.bf16 %v2085_v16, %v2084_v28  ;;  %v2003_v9 = vadd.f32 %v1901_v57, %v1602_v19  ;;  %v1604_v18 = vadd.f32 %v1504_v44, %v3206_v54  ;;  %v1912_v53 = vrot.slane %v3348_v62, 4 }
 0x182   : > { %v2050_v12 = vadd.f32 %v3336_v29, %v2002_v51  ;;  %v2004_v55 = vadd.f32 %v1903_v35, %v1603_v7  ;;  %v1385_v0 = vpop.f32.mrb[64].mxu1  ;;  %v1911_v13 = vsel %vm1891_vm2, %v1906_v40, %v1910_v24  ;;  %v1796_v30 = vpop.f32.mrb[64].mxu0 }
 0x183   : > { %2228 = vst [vmem:[%s3358_s9] sm:$0xff] %v2486_v4  ;;  %v2051_v26 = vadd.f32 %v3341_v36, %v2003_v9  ;;  %v2005_v46 = vadd.f32 %v1905_v34, %v1604_v18  ;;  %v1505_v27 = vrot.slane %v1385_v0, 3  ;;  %v1387_v33 = vpop.f32.mrb[65].mxu1  ;;  %v1913_v56 = vsel %vm1891_vm2, %v1908_v50, %v1912_v53  ;;  %v1798_v57 = vpop.f32.mrb[65].mxu0 }
 0x184   : > { %v2086_v28 = vmax.f32 %v2050_v12, 0.0  ;;  %v2052_v54 = vadd.f32 %v3336_v29, %v2004_v55  ;;  %v1507_v62 = vrot.slane %v1387_v33, 3  ;;  %v1389_v2 = vpop.f32.mrb[66].mxu1  ;;  %v1914_v16 = vrot.slane %v1796_v30, 4  ;;  %v1800_v35 = vpop.f32.mrb[66].mxu0 }
 0x185   : > { %v2087_v19 = vmax.f32 %v2051_v26, 0.0  ;;  %v2053_v40 = vadd.f32 %v3341_v36, %v2005_v46  ;;  %v1506_v48 = vsel %vm1490_vm3, %v1501_v39, %v1505_v27  ;;  %v1509_v51 = vrot.slane %v1389_v2, 3  ;;  %v1391_v34 = vpop.f32.mrb[67].mxu1  ;;  %v3372_v7 = vpop.f32.mrb[67].mxu0 }
 0x186   : > { %v2088_v44 = vmax.f32 %v2052_v54, 0.0  ;;  %v1605_v50 = vadd.f32 %v1506_v48, %v3210_v5  ;;  %v1508_v4 = vsel %vm1490_vm3, %v1503_v1, %v1507_v62  ;;  %v1915_v9 = vsel %vm1891_vm2, %v1910_v24, %v1914_v16 }
 0x187   : > { %v2487_v18 = vpack.c.bf16 %v2087_v19, %v2086_v28  ;;  %v2089_v12 = vmax.f32 %v2053_v40, 0.0  ;;  %v1606_v55 = vadd.f32 %v1508_v4, %v3213_v11  ;;  %v1510_v0 = vsel %vm1490_vm3, %v1505_v27, %v1509_v51 }
 0x188   : > { %v2006_v39 = vadd.f32 %v1907_v38, %v1605_v50  ;;  %v1607_v30 = vadd.f32 %v1510_v0, %v3218_v21  ;;  %v1511_v26 = vrot.slane %v1391_v34, 3  ;;  %v1916_v46 = vrot.slane %v1798_v57, 4 }
 0x189   : > { %2229 = vst [vmem:[%s3358_s9 + $0x8] sm:$0xff] %v2487_v18  ;;  %v2488_v33 = vpack.c.bf16 %v2089_v12, %v2088_v44  ;;  %v2007_v54 = vadd.f32 %v1909_v41, %v1606_v55  ;;  %v1918_v5 = vrot.slane %v1800_v35, 4  ;;  %v1920_v1 = vrot.slane %v3372_v7, 4 }
 0x18a   : > { %v2054_v24 = vadd.f32 %v3336_v29, %v2006_v39  ;;  %v2008_v28 = vadd.f32 %v1911_v13, %v1607_v30  ;;  %v1512_v2 = vsel %vm1490_vm3, %v1507_v62, %v1511_v26  ;;  %v1917_v11 = vsel %vm1891_vm2, %v1912_v53, %v1916_v46  ;;  %v1395_v27 = vpop.f32.mrb[68].mxu1  ;;  %v1806_v19 = vpop.f32.mrb[68].mxu0 }
 0x18b   : > { %2230 = vst [vmem:[%s3358_s9 + $0x10] sm:$0xff] %v2488_v33  ;;  %v2055_v21 = vadd.f32 %v3341_v36, %v2007_v54  ;;  %v1608_v38 = vadd.f32 %v1512_v2, %v3222_v25  ;;  %v1513_v57 = vrot.slane %v1395_v27, 3  ;;  %v1919_v41 = vsel %vm1891_vm2, %v1914_v16, %v1918_v5  ;;  %v1397_v35 = vpop.f32.mrb[69].mxu1  ;;  %v1808_v40 = vpop.f32.mrb[69].mxu0 }
 0x18c   : > { %v2090_v48 = vmax.f32 %v2054_v24, 0.0  ;;  %v2056_v34 = vadd.f32 %v3336_v29, %v2008_v28  ;;  %v1515_v13 = vrot.slane %v1397_v35, 3  ;;  %v1921_v62 = vsel %vm1891_vm2, %v1916_v46, %v1920_v1  ;;  %v1399_v7 = vpop.f32.mrb[70].mxu1  ;;  %v1810_v53 = vpop.f32.mrb[70].mxu0 }
 0x18d   : > { %v2091_v44 = vmax.f32 %v2055_v21, 0.0  ;;  %v2009_v50 = vadd.f32 %v1913_v56, %v1608_v38  ;;  %v1514_v4 = vsel %vm1490_vm3, %v1509_v51, %v1513_v57  ;;  %v1517_v18 = vrot.slane %v1399_v7, 3  ;;  %v1401_v25 = vpop.f32.mrb[71].mxu1  ;;  %v3392_v12 = vpop.f32.mrb[71].mxu0 }
 0x18e   : > { %v2092_v16 = vmax.f32 %v2056_v34, 0.0  ;;  %v1609_v55 = vadd.f32 %v1514_v4, %v3226_v31  ;;  %v1516_v0 = vsel %vm1490_vm3, %v1511_v26, %v1515_v13  ;;  %v1922_v39 = vrot.slane %v1806_v19, 4 }
 0x18f   : > { %v2489_v30 = vpack.c.bf16 %v2091_v44, %v2090_v48  ;;  %v2057_v46 = vadd.f32 %v3341_v36, %v2009_v50  ;;  %v1610_v33 = vadd.f32 %v1516_v0, %v3229_v49  ;;  %v1518_v56 = vsel %vm1490_vm3, %v1513_v57, %v1517_v18 }
 0x190   : > { %v2010_v54 = vadd.f32 %v1915_v9, %v1609_v55  ;;  %v1611_v51 = vadd.f32 %v1518_v56, %v3234_v42  ;;  %v1923_v24 = vsel %vm1891_vm2, %v1918_v5, %v1922_v39  ;;  %v1519_v28 = vrot.slane %v1401_v25, 3 }
 0x191   : > { %2231 = vst [vmem:[%s3358_s9 + $0x18] sm:$0xff] %v2489_v30  ;;  %v2093_v2 = vmax.f32 %v2057_v46, 0.0  ;;  %v2011_v27 = vadd.f32 %v1917_v11, %v1610_v33  ;;  %v1924_v31 = vrot.slane %v1808_v40, 4  ;;  %v1926_v21 = vrot.slane %v1810_v53, 4 }
 0x192   : > { %v2058_v26 = vadd.f32 %v3336_v29, %v2010_v54  ;;  %v2012_v19 = vadd.f32 %v1919_v41, %v1611_v51  ;;  %v1520_v38 = vsel %vm1490_vm3, %v1515_v13, %v1519_v28  ;;  %v1405_v49 = vpop.f32.mrb[72].mxu1  ;;  %v1928_v57 = vrot.slane %v3392_v12, 4  ;;  %v1816_v9 = vpop.f32.mrb[72].mxu0 }
 0x193   : > { %v2490_v35 = vpack.c.bf16 %v2093_v2, %v2092_v16  ;;  %v2059_v42 = vadd.f32 %v3341_v36, %v2011_v27  ;;  %v1612_v5 = vadd.f32 %v1520_v38, %v3238_v15  ;;  %v1925_v48 = vsel %vm1891_vm2, %v1920_v1, %v1924_v31  ;;  %v1407_v11 = vpop.f32.mrb[73].mxu1  ;;  %v1818_v40 = vpop.f32.mrb[73].mxu0 }
 0x194   : > { %v2094_v34 = vmax.f32 %v2058_v26, 0.0  ;;  %v2060_v7 = vadd.f32 %v3336_v29, %v2012_v19  ;;  %v1521_v41 = vrot.slane %v1405_v49, 3  ;;  %v1927_v13 = vsel %vm1891_vm2, %v1922_v39, %v1926_v21  ;;  %v1409_v53 = vpop.f32.mrb[74].mxu1  ;;  %v3410_v44 = vpop.f32.mrb[74].mxu0 }
 0x195   : > { %2232 = vst [vmem:[%s3358_s9 + $0x20] sm:$0xff] %v2490_v35  ;;  %v2095_v50 = vmax.f32 %v2059_v42, 0.0  ;;  %v2013_v4 = vadd.f32 %v1921_v62, %v1612_v5  ;;  %v1523_v25 = vrot.slane %v1407_v11, 3  ;;  %v1929_v15 = vsel %vm1891_vm2, %v1924_v31, %v1928_v57  ;;  %v1411_v12 = vpop.f32.mrb[75].mxu1  ;;  %v3414_v1 = vpop.f32.mrb[75].mxu0 }
 0x196   : > { %v2096_v16 = vmax.f32 %v2060_v7, 0.0  ;;  %v1522_v55 = vsel %vm1490_vm3, %v1517_v18, %v1521_v41  ;;  %v1525_v0 = vrot.slane %v1409_v53, 3  ;;  %v1930_v30 = vrot.slane %v1816_v9, 4 }
 0x197   : > { %v2491_v46 = vpack.c.bf16 %v2095_v50, %v2094_v34  ;;  %v2061_v39 = vadd.f32 %v3341_v36, %v2013_v4  ;;  %v1613_v33 = vadd.f32 %v1522_v55, %v3242_v63  ;;  %v1524_v56 = vsel %vm1490_vm3, %v1519_v28, %v1523_v25 }
 0x198   : > { %v1614_v62 = vadd.f32 %v1524_v56, %v3245_v37  ;;  %v1526_v54 = vsel %vm1490_vm3, %v1521_v41, %v1525_v0  ;;  %v1931_v51 = vsel %vm1891_vm2, %v1926_v21, %v1930_v30  ;;  %v1527_v2 = vrot.slane %v1411_v12, 3 }
 0x199   : > { %2233 = vst [vmem:[%s3358_s9 + $0x28] sm:$0xff] %v2491_v46  ;;  %v2097_v27 = vmax.f32 %v2061_v39, 0.0  ;;  %v2014_v31 = vadd.f32 %v1923_v24, %v1613_v33  ;;  %v1615_v18 = vadd.f32 %v1526_v54, %v3250_v3  ;;  %v1932_v26 = vrot.slane %v1818_v40, 4 }
 0x19a   : > { %v2015_v19 = vadd.f32 %v1925_v48, %v1614_v62  ;;  %v1528_v38 = vsel %vm1490_vm3, %v1523_v25, %v1527_v2  ;;  %v1415_v49 = vpop.f32.mrb[76].mxu1  ;;  %v1934_v63 = vrot.slane %v3410_v44, 4  ;;  %v1936_v37 = vrot.slane %v3414_v1, 4  ;;  %v1826_v28 = vpop.f32.mrb[76].mxu0 }
 0x19b   : > { %v2492_v9 = vpack.c.bf16 %v2097_v27, %v2096_v16  ;;  %v2062_v21 = vadd.f32 %v3336_v29, %v2014_v31  ;;  %v2016_v35 = vadd.f32 %v1927_v13, %v1615_v18  ;;  %v1616_v42 = vadd.f32 %v1528_v38, %v3254_v10  ;;  %v1417_v24 = vpop.f32.mrb[77].mxu1  ;;  %v3430_v5 = vpop.f32.mrb[77].mxu0 }
 0x19c   : > { %v2063_v3 = vadd.f32 %v3341_v36, %v2015_v19  ;;  %v1933_v48 = vsel %vm1891_vm2, %v1928_v57, %v1932_v26  ;;  %v1529_v11 = vrot.slane %v1415_v49, 3  ;;  %v1935_v40 = vsel %vm1891_vm2, %v1930_v30, %v1934_v63  ;;  %v1419_v34 = vpop.f32.mrb[78].mxu1  ;;  %v3435_v7 = vpop.f32.mrb[78].mxu0 }
 0x19d   : > { %2234 = vst [vmem:[%s3358_s9 + $0x30] sm:$0xff] %v2492_v9  ;;  %v2098_v41 = vmax.f32 %v2062_v21, 0.0  ;;  %v2064_v53 = vadd.f32 %v3336_v29, %v2016_v35  ;;  %v2017_v13 = vadd.f32 %v1929_v15, %v1616_v42  ;;  %v1531_v44 = vrot.slane %v1417_v24, 3  ;;  %v1421_v10 = vpop.f32.mrb[79].mxu1  ;;  %v3439_v50 = vpop.f32.mrb[79].mxu0 }
 0x19e   : > { %v2099_v4 = vmax.f32 %v2063_v3, 0.0  ;;  %v1530_v25 = vsel %vm1490_vm3, %v1525_v0, %v1529_v11  ;;  %v1937_v57 = vsel %vm1891_vm2, %v1932_v26, %v1936_v37  ;;  %v1533_v12 = vrot.slane %v1419_v34, 3 }
 0x19f   : > { %v2100_v1 = vmax.f32 %v2064_v53, 0.0  ;;  %v2065_v16 = vadd.f32 %v3341_v36, %v2017_v13  ;;  %v1617_v55 = vadd.f32 %v1530_v25, %v3258_v45  ;;  %v1532_v30 = vsel %vm1490_vm3, %v1527_v2, %v1531_v44 }
 0x1a0   : > { %v2493_v46 = vpack.c.bf16 %v2099_v4, %v2098_v41  ;;  %v1618_v15 = vadd.f32 %v1532_v30, %v3261_v60  ;;  %v1534_v39 = vsel %vm1490_vm3, %v1529_v11, %v1533_v12  ;;  %v1938_v33 = vrot.slane %v1826_v28, 4 }
 0x1a1   : > { %v2101_v56 = vmax.f32 %v2065_v16, 0.0  ;;  %v2018_v62 = vadd.f32 %v1931_v51, %v1617_v55  ;;  %v1619_v0 = vadd.f32 %v1534_v39, %v3266_v20  ;;  %v1535_v54 = vrot.slane %v1421_v10, 3 }
 0x1a2   : > { %2235 = vst [vmem:[%s3358_s9 + $0x38] sm:$0xff] %v2493_v46  ;;  %v2019_v27 = vadd.f32 %v1933_v48, %v1618_v15  ;;  %v1939_v31 = vsel %vm1891_vm2, %v1934_v63, %v1938_v33  ;;  %v1940_v18 = vrot.slane %v3430_v5, 4  ;;  %v1425_v45 = vpop.f32.mrb[80].mxu1  ;;  %v1942_v2 = vrot.slane %v3435_v7, 4  ;;  %v3453_v26 = vpop.f32.mrb[80].mxu0 }
 0x1a3   : > { %v2494_v60 = vpack.c.bf16 %v2101_v56, %v2100_v1  ;;  %v2066_v19 = vadd.f32 %v3336_v29, %v2018_v62  ;;  %v2020_v38 = vadd.f32 %v1935_v40, %v1619_v0  ;;  %v1536_v51 = vsel %vm1490_vm3, %v1531_v44, %v1535_v54  ;;  %v1427_v20 = vpop.f32.mrb[81].mxu1  ;;  %v3457_v49 = vpop.f32.mrb[81].mxu0 }
 0x1a4   : > { %v2067_v28 = vadd.f32 %v3341_v36, %v2019_v27  ;;  %v1620_v63 = vadd.f32 %v1536_v51, %v3270_v47  ;;  %v1941_v9 = vsel %vm1891_vm2, %v1936_v37, %v1940_v18  ;;  %v1537_v21 = vrot.slane %v1425_v45, 3  ;;  %v1429_v35 = vpop.f32.mrb[82].mxu1  ;;  %v3462_v42 = vpop.f32.mrb[82].mxu0 }
 0x1a5   : > { %2236 = vst [vmem:[%s3358_s9 + $0x40] sm:$0xff] %v2494_v60  ;;  %v2102_v24 = vmax.f32 %v2066_v19, 0.0  ;;  %v2068_v5 = vadd.f32 %v3336_v29, %v2020_v38  ;;  %v1943_v3 = vsel %vm1891_vm2, %v1938_v33, %v1942_v2  ;;  %v1539_v48 = vrot.slane %v1427_v20, 3  ;;  %v1431_v11 = vpop.f32.mrb[83].mxu1  ;;  %v3467_v40 = vpop.f32.mrb[83].mxu0 }
 0x1a6   : > { %v2103_v34 = vmax.f32 %v2067_v28, 0.0  ;;  %v2021_v7 = vadd.f32 %v1937_v57, %v1620_v63  ;;  %v1538_v47 = vsel %vm1490_vm3, %v1533_v12, %v1537_v21  ;;  %v1944_v37 = vrot.slane %v3439_v50, 4 }
 0x1a7   : > { %v2104_v41 = vmax.f32 %v2068_v5, 0.0  ;;  %v1621_v53 = vadd.f32 %v1538_v47, %v3274_v6  ;;  %v1540_v13 = vsel %vm1490_vm3, %v1535_v54, %v1539_v48  ;;  %v1541_v44 = vrot.slane %v1429_v35, 3 }
 0x1a8   : > { %v2495_v10 = vpack.c.bf16 %v2103_v34, %v2102_v24  ;;  %v2069_v4 = vadd.f32 %v3341_v36, %v2021_v7  ;;  %v1622_v25 = vadd.f32 %v1540_v13, %v3277_v23  ;;  %v1945_v1 = vsel %vm1891_vm2, %v1940_v18, %v1944_v37 }
 0x1a9   : > { %v2022_v16 = vadd.f32 %v1939_v31, %v1621_v53  ;;  %v1542_v57 = vsel %vm1490_vm3, %v1537_v21, %v1541_v44  ;;  %v1946_v12 = vrot.slane %v3453_v26, 4  ;;  %v1543_v55 = vrot.slane %v1431_v11, 3 }
 0x1aa   : > { %2237 = vst [vmem:[%s3358_s9 + $0x48] sm:$0xff] %v2495_v10  ;;  %v2105_v50 = vmax.f32 %v2069_v4, 0.0  ;;  %v2023_v30 = vadd.f32 %v1941_v9, %v1622_v25  ;;  %v1623_v6 = vadd.f32 %v1542_v57, %v3282_v58  ;;  %v1948_v46 = vrot.slane %v3457_v49, 4  ;;  %v1435_v15 = vpop.f32.mrb[84].mxu1  ;;  %v3481_v39 = vpop.f32.mrb[84].mxu0 }
 0x1ab   : > { %v2070_v23 = vadd.f32 %v3336_v29, %v2022_v16  ;;  %v1947_v33 = vsel %vm1891_vm2, %v1942_v2, %v1946_v12  ;;  %v1544_v56 = vsel %vm1490_vm3, %v1539_v48, %v1543_v55  ;;  %v1545_v62 = vrot.slane %v1435_v15, 3  ;;  %v1437_v0 = vpop.f32.mrb[85].mxu1  ;;  %v3486_v54 = vpop.f32.mrb[85].mxu0 }
 0x1ac   : > { %v2496_v27 = vpack.c.bf16 %v2105_v50, %v2104_v41  ;;  %v2071_v31 = vadd.f32 %v3341_v36, %v2023_v30  ;;  %v2024_v58 = vadd.f32 %v1943_v3, %v1623_v6  ;;  %v1624_v18 = vadd.f32 %v1544_v56, %v3286_v22  ;;  %v1439_v45 = vpop.f32.mrb[86].mxu1  ;;  %v3490_v26 = vpop.f32.mrb[86].mxu0 }
 0x1ad   : > { %v2106_v60 = vmax.f32 %v2070_v23, 0.0  ;;  %v1949_v19 = vsel %vm1891_vm2, %v1944_v37, %v1948_v46  ;;  %v1546_v2 = vsel %vm1490_vm3, %v1541_v44, %v1545_v62  ;;  %v1950_v38 = vrot.slane %v3462_v42, 4  ;;  %v1441_v51 = vpop.f32.mrb[87].mxu1  ;;  %v3495_v20 = vpop.f32.mrb[87].mxu0 }
 0x1ae   : > { %2238 = vst [vmem:[%s3358_s9 + $0x50] sm:$0xff] %v2496_v27  ;;  %v2107_v49 = vmax.f32 %v2071_v31, 0.0  ;;  %v2072_v28 = vadd.f32 %v3336_v29, %v2024_v58  ;;  %v2025_v63 = vadd.f32 %v1945_v1, %v1624_v18  ;;  %v1625_v22 = vadd.f32 %v1546_v2, %v3290_v32 }
 0x1af   : > { %v1951_v9 = vsel %vm1891_vm2, %v1946_v12, %v1950_v38  ;;  %v1547_v21 = vrot.slane %v1437_v0, 3  ;;  %v1952_v35 = vrot.slane %v3467_v40, 4  ;;  %v1549_v24 = vrot.slane %v1439_v45, 3 }
 0x1b0   : > { %v2497_v5 = vpack.c.bf16 %v2107_v49, %v2106_v60  ;;  %v2108_v3 = vmax.f32 %v2072_v28, 0.0  ;;  %v2073_v42 = vadd.f32 %v3341_v36, %v2025_v63  ;;  %v2026_v48 = vadd.f32 %v1947_v33, %v1625_v22 }
 0x1b1   : > { %v1548_v11 = vsel %vm1490_vm3, %v1543_v55, %v1547_v21  ;;  %v1953_v34 = vsel %vm1891_vm2, %v1948_v46, %v1952_v35  ;;  %v1550_v7 = vsel %vm1490_vm3, %v1545_v62, %v1549_v24  ;;  %v1954_v47 = vrot.slane %v3481_v39, 4 }
 0x1b2   : > { %2239 = vst [vmem:[%s3358_s9 + $0x58] sm:$0xff] %v2497_v5  ;;  %v2109_v32 = vmax.f32 %v2073_v42, 0.0  ;;  %v2074_v37 = vadd.f32 %v3336_v29, %v2026_v48  ;;  %v1626_v40 = vadd.f32 %v1548_v11, %v3293_v52  ;;  %v1627_v41 = vadd.f32 %v1550_v7, %v3298_v43  ;;  %v1445_v53 = vpop.f32.mrb[88].mxu1  ;;  %v3559_v5 = vld [vmem:[#allocation3_spill] sm:$0xff] }
 0x1b3   : > { %v1955_v13 = vsel %vm1891_vm2, %v1950_v38, %v1954_v47  ;;  %v1551_v44 = vrot.slane %v1441_v51, 3  ;;  %v1956_v10 = vrot.slane %v3486_v54, 4  ;;  %v1553_v4 = vrot.slane %v1445_v53, 3  ;;  %v1447_v25 = vpop.f32.mrb[89].mxu1 }
 0x1b4   : > { %v2498_v1 = vpack.c.bf16 %v2109_v32, %v2108_v3  ;;  %v2110_v16 = vmax.f32 %v2074_v37, 0.0  ;;  %v2027_v57 = vadd.f32 %v1949_v19, %v1626_v40  ;;  %v2028_v12 = vadd.f32 %v1951_v9, %v1627_v41  ;;  %v1449_v55 = vpop.f32.mrb[90].mxu1 }
 0x1b5   : > { %v1552_v50 = vsel %vm1490_vm3, %v1547_v21, %v1551_v44  ;;  %v1957_v52 = vsel %vm1891_vm2, %v1952_v35, %v1956_v10  ;;  %v1554_v43 = vsel %vm1490_vm3, %v1549_v24, %v1553_v4  ;;  %v1555_v30 = vrot.slane %v1447_v25, 3  ;;  %v1451_v6 = vpop.f32.mrb[91].mxu1  ;;  %v3558_v24 = vld [vmem:[#allocation2_spill] sm:$0xff] }
 0x1b6   : > { %2240 = vst [vmem:[%s3358_s9 + $0x60] sm:$0xff] %v2498_v1  ;;  %v2075_v46 = vadd.f32 %v3341_v36, %v2027_v57  ;;  %v2076_v15 = vadd.f32 %v3336_v29, %v2028_v12  ;;  %v1628_v39 = vadd.f32 %v1552_v50, %v3302_v14  ;;  %v1629_v23 = vadd.f32 %v1554_v43, %v3306_v8 }
 0x1b7   : > { %v1556_v33 = vsel %vm1490_vm3, %v1551_v44, %v1555_v30  ;;  %v1557_v56 = vrot.slane %v1449_v55, 3  ;;  %v1958_v62 = vrot.slane %v3490_v26, 4  ;;  %v1559_v0 = vrot.slane %v1451_v6, 3 }
 0x1b8   : > { %v2111_v54 = vmax.f32 %v2075_v46, 0.0  ;;  %v2112_v27 = vmax.f32 %v2076_v15, 0.0  ;;  %v2029_v31 = vadd.f32 %v1953_v34, %v1628_v39  ;;  %v2030_v58 = vadd.f32 %v1955_v13, %v1629_v23 }
 0x1b9   : > { %v1630_v18 = vadd.f32 %v1556_v33, %v3309_v59  ;;  %v1558_v45 = vsel %vm1490_vm3, %v1553_v4, %v1557_v56  ;;  %v1597_v60 = vsel %vm1490_vm3, %v1557_v56, 0.0  ;;  %v1959_v14 = vsel %vm1891_vm2, %v1954_v47, %v1958_v62 }
 0x1ba   : > { %v2499_v8 = vpack.c.bf16 %v2111_v54, %v2110_v16  ;;  %v2077_v19 = vadd.f32 %v3341_v36, %v2029_v31  ;;  %v2078_v2 = vadd.f32 %v3336_v29, %v2030_v58  ;;  %v1631_v26 = vadd.f32 %v1558_v45, %v3315_v17 }
 0x1bb   : > { %v2031_v38 = vadd.f32 %v1957_v52, %v1630_v18  ;;  %v1633_v51 = vadd.f32 %v1597_v60, %v3322_v61  ;;  %v1998_v49 = vsel %vm1891_vm2, %v1958_v62, 0.0  ;;  %v1560_v59 = vsel %vm1490_vm3, %v1555_v30, %v1559_v0 }
 0x1bc   : > { %2241 = vst [vmem:[%s3358_s9 + $0x68] sm:$0xff] %v2499_v8  ;;  %v2113_v28 = vmax.f32 %v2077_v19, 0.0  ;;  %v2114_v63 = vmax.f32 %v2078_v2, 0.0  ;;  %v2032_v22 = vadd.f32 %v1959_v14, %v1631_v26  ;;  %v1598_v9 = vsel %vm1490_vm3, %v1559_v0, 0.0 }
 0x1bd   : > { %v2079_v21 = vadd.f32 %v3341_v36, %v2031_v38  ;;  %v2034_v35 = vadd.f32 %v1998_v49, %v1633_v51  ;;  %v1632_v17 = vadd.f32 %v1560_v59, %v3558_v24  ;;  %v1634_v3 = vadd.f32 %v1598_v9, %v3559_v5 }
 0x1be   : > { %v2500_v61 = vpack.c.bf16 %v2113_v28, %v2112_v27  ;;  %v1960_v42 = vrot.slane %v3495_v20, 4  ;;  %v2080_v11 = vadd.f32 %v3336_v29, %v2032_v22 }
 0x1bf   : > { %v2115_v48 = vmax.f32 %v2079_v21, 0.0  ;;  %v2082_v34 = vadd.f32 %v3336_v29, %v2034_v35 }
 0x1c0   : > { %2242 = vst [vmem:[%s3358_s9 + $0x70] sm:$0xff] %v2500_v61  ;;  %v1961_v7 = vsel %vm1891_vm2, %v1956_v10, %v1960_v42  ;;  %v1999_v47 = vsel %vm1891_vm2, %v1960_v42, 0.0  ;;  %v2116_v41 = vmax.f32 %v2080_v11, 0.0 }
 0x1c1   : > { %v2501_v32 = vpack.c.bf16 %v2115_v48, %v2114_v63  ;;  %v2033_v37 = vadd.f32 %v1961_v7, %v1632_v17  ;;  %v2035_v40 = vadd.f32 %v1999_v47, %v1634_v3  ;;  %v2118_v53 = vmax.f32 %v2082_v34, 0.0 }
 0x1c3   : > { %2243 = vst [vmem:[%s3358_s9 + $0x78] sm:$0xff] %v2501_v32  ;;  %v2081_v20 = vadd.f32 %v3341_v36, %v2033_v37  ;;  %v2083_v13 = vadd.f32 %v3341_v36, %v2035_v40 }
 0x1c5   : > { %v2117_v44 = vmax.f32 %v2081_v20, 0.0  ;;  %v2119_v4 = vmax.f32 %v2083_v13, 0.0 }
 0x1c7   : > { %v2502_v29 = vpack.c.bf16 %v2117_v44, %v2116_v41  ;;  %v2503_v25 = vpack.c.bf16 %v2119_v4, %v2118_v53 }
 0x1c9   : > { %2244 = vst [vmem:[%s3358_s9 + $0x80] sm:$0xff] %v2502_v29  ;;  %2245 = vst [vmem:[%s3358_s9 + $0x88] sm:$0xff] %v2503_v25 }
 0x1ca PF: > { %s13_s12 = sadd.s32 1, %s2664_s12  }
 0x1cb   : > { %p10_p4 = scmp.ge.s32.totalorder %s13_s12, 4  }
 0x1cd   :  { %12 = sbr.rel (!%p10_p4) target bundleno = 1 (0x1), region = 66 }

// kernel: rnn_forward.5
= control target key start
LH: loop header
LB: loop body
LE: loop exit
PB: predicated region body
PF: predicated region fallthrough
CT: control target
= control target key end

     0   :  { %v5751_v21 = vmov 1966171168   ;;  %v214_v23 = vlaneseq  ;;  %v8349_v45 = vmov 0.0   ;;  %vm5753_vm0 = vmmov 0   ;;  %s8308_s1 = inlined_call_operand.vmem [shape: bf16[784,128], index: 1, kind: input, shape index: {}]   ;;  %s8309_s0 = inlined_call_operand.vmem [shape: bf16[8,2,784], index: 0, kind: input, shape index: {}]   ;;  %s8310_s3 = inlined_call_operand.vmem [shape: bf16[128,128], index: 3, kind: input, shape index: {}]   ;;  %s8311_s5 = inlined_call_operand.vmem [shape: bf16[128,128], index: 5, kind: input, shape index: {}]   ;;  %s8312_s2 = inlined_call_operand.vmem [shape: f32[1,128], index: 2, kind: input, shape index: {}]   ;;  %s8313_s7 = inlined_call_operand.vmem [shape: bf16[128,128], index: 7, kind: input, shape index: {}]   ;;  %s8314_s8 = inlined_call_operand.vmem [shape: bf16[128,128], index: 8, kind: input, shape index: {}]   ;;  %s8315_s4 = inlined_call_operand.vmem [shape: f32[1,128], index: 4, kind: input, shape index: {}]   ;;  %s8316_s6 = inlined_call_operand.vmem [shape: f32[1,128], index: 6, kind: input, shape index: {}]   ;;  %s8317_s9 = inlined_call_operand.vmem [shape: f32[1,128], index: 9, kind: input, shape index: {}]   ;;  %s8318_s10 = inlined_call_operand.vmem [shape: f32[8,2,128], index: 10, kind: output, shape index: {}]  }
   0x1   :  { %v5813_v0 = vld [vmem:[%s8308_s1 + $0x40] sm:$0xff]   ;;  %v5836_v4 = vld [vmem:[%s8308_s1 + $0x48] sm:$0xff]   ;;  %v5860_v8 = vld [vmem:[%s8308_s1 + $0x50] sm:$0xff]   ;;  %v212_v22 = vunpack.c.l.s4 %v5751_v21  ;;  %vm558_vm1 = vcmask 130048  }
   0x2   :  { %v5818_v1 = vld [vmem:[%s8308_s1] sm:$0xff]   ;;  %3912 = vmatprep.subr.bf16.mxu0 %v5813_v0  ;;  %v5842_v5 = vld [vmem:[%s8308_s1 + $0x8] sm:$0xff]   ;;  %v5866_v9 = vld [vmem:[%s8308_s1 + $0x10] sm:$0xff]   ;;  %v215_v29 = vshrl.u32 %v214_v23, 7 }
   0x3   :  { %v5824_v2 = vld [vmem:[%s8308_s1 + $0xc0] sm:$0xff]   ;;  %3913 = vmatpush3.bf16.msra.mxu0 %v5818_v1  ;;  %v5848_v6 = vld [vmem:[%s8308_s1 + $0xc8] sm:$0xff]   ;;  %v5872_v10 = vld [vmem:[%s8308_s1 + $0xd0] sm:$0xff]   ;;  %v213_v28 = vunpack.c.0.s8 %v212_v22 }
   0x4   :  { %v5830_v3 = vld [vmem:[%s8308_s1 + $0x80] sm:$0xff]   ;;  %3934 = vmatprep.subr.bf16.mxu1 %v5824_v2  ;;  %3914 = vmatprep.subr.bf16.mxu0 %v5836_v4  ;;  %v5854_v7 = vld [vmem:[%s8308_s1 + $0x88] sm:$0xff]   ;;  %v5878_v11 = vld [vmem:[%s8308_s1 + $0x90] sm:$0xff]  }
   0x5   :  { %3935 = vmatpush3.bf16.msra.mxu1 %v5830_v3  ;;  %v5884_v12 = vld [vmem:[%s8308_s1 + $0x58] sm:$0xff]   ;;  %v5908_v16 = vld [vmem:[%s8308_s1 + $0x60] sm:$0xff]   ;;  %v5932_v20 = vld [vmem:[%s8308_s1 + $0x68] sm:$0xff]   ;;  %v5982_v34 = vsub.s32 %v213_v28, %v215_v29 }
   0x6   :  { %3936 = vmatprep.subr.bf16.mxu1 %v5848_v6  ;;  %v5890_v13 = vld [vmem:[%s8308_s1 + $0x18] sm:$0xff]   ;;  %v5914_v17 = vld [vmem:[%s8308_s1 + $0x20] sm:$0xff]   ;;  %v5938_v24 = vld [vmem:[%s8308_s1 + $0x28] sm:$0xff]  }
   0x7   :  { %3915 = vmatpush3.bf16.msra.mxu0 %v5842_v5  ;;  %v5896_v14 = vld [vmem:[%s8308_s1 + $0xd8] sm:$0xff]   ;;  %v5920_v18 = vld [vmem:[%s8308_s1 + $0xe0] sm:$0xff]   ;;  %v5944_v25 = vld [vmem:[%s8308_s1 + $0xe8] sm:$0xff]  }
   0x8   :  { %3916 = vmatprep.subr.bf16.mxu0 %v5860_v8  ;;  %v5902_v15 = vld [vmem:[%s8308_s1 + $0x98] sm:$0xff]   ;;  %v5926_v19 = vld [vmem:[%s8308_s1 + $0xa0] sm:$0xff]   ;;  %v5950_v26 = vld [vmem:[%s8308_s1 + $0xa8] sm:$0xff]  }
   0x9   :  { %3937 = vmatpush3.bf16.msra.mxu1 %v5854_v7  ;;  %v5956_v27 = vld [vmem:[%s8308_s1 + $0x70] sm:$0xff]   ;;  %v5980_v33 = vld [vmem:[%s8308_s1 + $0x78] sm:$0xff]   ;;  %v202_v37 = vld [vmem:[%s8309_s0] sm:$0x7f] }
   0xa   :  { %3938 = vmatprep.subr.bf16.mxu1 %v5872_v10  ;;  %v5962_v30 = vld [vmem:[%s8308_s1 + $0x30] sm:$0xff]   ;;  %v5988_v35 = vld [vmem:[%s8308_s1 + $0x38] sm:$0xff]   ;;  %v210_v38 = vcombine.high %v202_v37, %v202_v37  ;;  %v217_v39 = vrot.slane %v202_v37, %v5982_v34  ;;  %v6010_v41 = vld [vmem:[%s8308_s1 + $0x140] sm:$0xff]  }
   0xb   :  { %3917 = vmatpush3.bf16.msra.mxu0 %v5866_v9  ;;  %v5968_v31 = vld [vmem:[%s8308_s1 + $0xf0] sm:$0xff]   ;;  %8481 = vst [vmem:[#allocation2_spill] sm:$0xff] %v5988_v35  ;;  %v5994_v36 = vld [vmem:[%s8308_s1 + $0xf8] sm:$0xff]   ;;  %8482 = vst [vmem:[#allocation3_spill] sm:$0xff] %v6010_v41 }
   0xc   :  { %3918 = vmatprep.subr.bf16.mxu0 %v5884_v12  ;;  %v5974_v32 = vld [vmem:[%s8308_s1 + $0xb0] sm:$0xff]   ;;  %v6005_v40 = vld [vmem:[%s8308_s1 + $0xb8] sm:$0xff]   ;;  %v225_v42 = vcombine.high %v217_v39, %v217_v39  ;;  %v233_v43 = vrot.slane %v217_v39, %v5982_v34  ;;  %v224_v44 = vrot.slane %v210_v38, %v5982_v34  ;;  %v6021_v47 = vld [vmem:[%s8308_s1 + $0x100] sm:$0xff]  }
   0xd   :  { %3939 = vmatpush3.bf16.msra.mxu1 %v5878_v11  ;;  %8483 = vst [vmem:[#allocation4_spill] sm:$0xff] %v6021_v47  ;;  %v6026_v50 = vld [vmem:[%s8308_s1 + $0x148] sm:$0xff]   ;;  %v6039_v54 = vld [vmem:[%s8308_s1 + $0x150] sm:$0xff]   ;;  %v6053_v56 = vld [vmem:[%s8308_s1 + $0x158] sm:$0xff]  }
   0xe   :  { %3940 = vmatprep.subr.bf16.mxu1 %v5896_v14  ;;  %v247_v46 = vrot.slane %v225_v42, %v5982_v34  ;;  %v226_v48 = vcombine.high %v224_v44, %v224_v44  ;;  %v255_v49 = vcombine.high %v233_v43, %v233_v43  ;;  %8484 = vst [vmem:[#allocation5_spill] sm:$0xff] %v6026_v50  ;;  %v6033_v53 = vld [vmem:[%s8308_s1 + $0x108] sm:$0xff]   ;;  %8486 = vst [vmem:[#allocation7_spill] sm:$0xff] %v6039_v54  ;;  %v6047_v55 = vld [vmem:[%s8308_s1 + $0x110] sm:$0xff]  }
   0xf   :  { %3919 = vmatpush3.bf16.msra.mxu0 %v5890_v13  ;;  %8485 = vst [vmem:[#allocation6_spill] sm:$0xff] %v6033_v53  ;;  %8487 = vst [vmem:[#allocation8_spill] sm:$0xff] %v6047_v55  ;;  %v240_v57 = vrot.slane %v224_v44, %v5982_v34  ;;  %v6060_v58 = vld [vmem:[%s8308_s1 + $0x118] sm:$0xff]   ;;  %v6066_v59 = vld [vmem:[%s8308_s1 + $0x160] sm:$0xff]  }
  0x10   :  { %3920 = vmatprep.subr.bf16.mxu0 %v5908_v16  ;;  %594 = vmatprep.mubr.bf16.mxu0 %v247_v46  ;;  %v257_v51 = vcombine.high %v247_v46, %v247_v46  ;;  %v254_v52 = vrot.slane %v226_v48, %v5982_v34  ;;  %8488 = vst [vmem:[#allocation9_spill] sm:$0xff] %v6053_v56  ;;  %8489 = vst [vmem:[#allocation10_spill] sm:$0xff] %v6060_v58  ;;  %v6071_v60 = vld [vmem:[%s8308_s1 + $0x180] sm:$0xff]   ;;  %v6085_v63 = vld [vmem:[%s8308_s1 + $0x168] sm:$0xff]  }
  0x11   :  { %3941 = vmatpush3.bf16.msra.mxu1 %v5902_v15  ;;  %8490 = vst [vmem:[#allocation11_spill] sm:$0xff] %v6066_v59  ;;  %v256_v61 = vcombine.high %v240_v57, %v240_v57  ;;  %v6078_v62 = vld [vmem:[%s8308_s1 + $0x120] sm:$0xff]   ;;  %8492 = vst [vmem:[#allocation13_spill] sm:$0xff] %v6085_v63  ;;  %v6094_v21 = vld [vmem:[%s8308_s1 + $0x128] sm:$0xff]  }
  0x12   :  { %3942 = vmatprep.subr.bf16.mxu1 %v5920_v18  ;;  %634 = vmatprep.mubr.bf16.mxu1 %v257_v51  ;;  %8491 = vst [vmem:[#allocation12_spill] sm:$0xff] %v6078_v62  ;;  %8493 = vst [vmem:[#allocation14_spill] sm:$0xff] %v6094_v21  ;;  %v6100_v22 = vld [vmem:[%s8308_s1 + $0x170] sm:$0xff]   ;;  %v6112_v28 = vld [vmem:[%s8308_s1 + $0x178] sm:$0xff]  }
  0x13   :  { %3921 = vmatpush3.bf16.msra.mxu0 %v5914_v17  ;;  %8494 = vst [vmem:[#allocation15_spill] sm:$0xff] %v6100_v22  ;;  %v6106_v23 = vld [vmem:[%s8308_s1 + $0x130] sm:$0xff]   ;;  %8496 = vst [vmem:[#allocation17_spill] sm:$0xff] %v6112_v28  ;;  %v6118_v29 = vld [vmem:[%s8308_s1 + $0x138] sm:$0xff]  }
  0x14   :  { %3922 = vmatprep.subr.bf16.mxu0 %v5932_v20  ;;  %8495 = vst [vmem:[#allocation16_spill] sm:$0xff] %v6106_v23  ;;  %8497 = vst [vmem:[#allocation18_spill] sm:$0xff] %v6118_v29  ;;  %v6128_v37 = vld [vmem:[%s8310_s3] sm:$0xff]   ;;  %v6134_v38 = vld [vmem:[%s8310_s3 + $0x8] sm:$0xff]  }
  0x15   :  { %3943 = vmatpush3.bf16.msra.mxu1 %v5926_v19  ;;  %v6140_v39 = vld [vmem:[%s8310_s3 + $0x10] sm:$0xff]   ;;  %v6148_v42 = vld [vmem:[%s8310_s3 + $0x18] sm:$0xff]   ;;  %v6163_v44 = vld [vmem:[%s8310_s3 + $0x28] sm:$0xff]  }
  0x16   :  { %3944 = vmatprep.subr.bf16.mxu1 %v5944_v25  ;;  %v6170_v46 = vld [vmem:[%s8310_s3 + $0x30] sm:$0xff]   ;;  %v6177_v48 = vld [vmem:[%s8310_s3 + $0x38] sm:$0xff]   ;;  %v6190_v51 = vld [vmem:[%s8311_s5 + $0x8] sm:$0xff]  }
  0x17   :  { %3923 = vmatpush3.bf16.msra.mxu0 %v5938_v24  ;;  %8499 = vst [vmem:[#allocation20_spill] sm:$0xff] %v6190_v51 }
  0x18   :  { %3924 = vmatprep.subr.bf16.mxu0 %v5956_v27 }
  0x19   :  { %3945 = vmatpush3.bf16.msra.mxu1 %v5950_v26 }
  0x1a   :  { %3946 = vmatprep.subr.bf16.mxu1 %v5968_v31 }
  0x1b   :  { %3925 = vmatpush3.bf16.msra.mxu0 %v5962_v30 }
  0x1c   :  { %3926 = vmatprep.subr.bf16.mxu0 %v5980_v33 }
  0x1d   :  { %3947 = vmatpush3.bf16.msra.mxu1 %v5974_v32 }
  0x1e   :  { %3948 = vmatprep.subr.bf16.mxu1 %v5994_v36 }
  0x1f   :  { %3927 = vmatpush3.bf16.msra.mxu0 %v5988_v35  ;;  %v8505_v35 = vmov 0.0  }
  0x20   :  { %3956 = vmatprep.subr.bf16.mxu0 %v6010_v41 }
  0x21   :  { %3949 = vmatpush3.bf16.msra.mxu1 %v6005_v40 }
  0x22   :  { %4744 = vmatprep.subr.bf16.mxu1 %v8349_v45  ;;  %595 = vmatmul.mubr.bf16.vlgmr.msra.gmra.mrb[0].mxu0 %v233_v43  ;;  %v6155_v43 = vld [vmem:[%s8310_s3 + $0x20] sm:$0xff]  }
  0x23   :  { %3957 = vmatpush3.bf16.msra.mxu0 %v6021_v47  ;;  %674 = vmatprep.mubr.bf16.mxu0 %v254_v52  ;;  %v6197_v52 = vld [vmem:[%s8311_s5 + $0x10] sm:$0xff]  }
  0x24   :  { %635 = vmatmul.mubr.bf16.vlgmr.msra.gmra.mrb[0].mxu1 %v255_v49  ;;  %3958 = vmatprep.subr.bf16.mxu0 %v6026_v50  ;;  %v6184_v49 = vld [vmem:[%s8311_s5] sm:$0xff]   ;;  %8500 = vst [vmem:[#allocation21_spill] sm:$0xff] %v6197_v52 }
  0x25   :  { %4746 = vmatprep.mubr.msk.bf16.mxu1 %vm5753_vm0, %v8349_v45  ;;  %4745 = vmatpush3.bf16.msra.mxu1 %v6071_v60  ;;  %8498 = vst [vmem:[#allocation19_spill] sm:$0xff] %v6184_v49 }
  0x26   :  { %4750 = vmatprep.subr.bf16.mxu1 %v8349_v45 }
  0x27   :  { %3959 = vmatpush3.bf16.msra.mxu0 %v6033_v53 }
  0x28   :  { %3960 = vmatprep.subr.bf16.mxu0 %v6039_v54 }
  0x2b   :  { %3961 = vmatpush3.bf16.msra.mxu0 %v6047_v55 }
  0x2c   :  { %3962 = vmatprep.subr.bf16.mxu0 %v6053_v56  ;;  %4747 = vmatmul.mubr.msk.bf16.vlgmr.msra.gmra.mrb[4].mxu1 %vm558_vm1, %v256_v61  ;;  %v6211_v61 = vld [vmem:[%s8311_s5 + $0x20] sm:$0xff]  }
  0x2d   :  { %4766 = vmatprep.mubr.msk.bf16.mxu1 %vm5753_vm0, %v8349_v45  ;;  %4751 = vmatpush3.bf16.msra.mxu1 %v6128_v37  ;;  %8502 = vst [vmem:[#allocation23_spill] sm:$0xff] %v6211_v61 }
  0x2e   :  { %4752 = vmatprep.subr.bf16.mxu1 %v8349_v45 }
  0x2f   :  { %3963 = vmatpush3.bf16.msra.mxu0 %v6060_v58 }
  0x30   :  { %3964 = vmatprep.subr.bf16.mxu0 %v6066_v59 }
  0x31   :  { %4753 = vmatpush3.bf16.msra.mxu1 %v6134_v38 }
  0x32   :  { %4754 = vmatprep.subr.bf16.mxu1 %v8349_v45 }
  0x33   :  { %3965 = vmatpush3.bf16.msra.mxu0 %v6078_v62 }
  0x34   :  { %3966 = vmatprep.subr.bf16.mxu0 %v6085_v63 }
  0x35   :  { %4755 = vmatpush3.bf16.msra.mxu1 %v6140_v39 }
  0x36   :  { %4756 = vmatprep.subr.bf16.mxu1 %v8349_v45 }
  0x37   :  { %3967 = vmatpush3.bf16.msra.mxu0 %v6094_v21 }
  0x38   :  { %3968 = vmatprep.subr.bf16.mxu0 %v6100_v22 }
  0x39   :  { %4757 = vmatpush3.bf16.msra.mxu1 %v6148_v42 }
  0x3a   :  { %4758 = vmatprep.subr.bf16.mxu1 %v8349_v45 }
  0x3b   :  { %3969 = vmatpush3.bf16.msra.mxu0 %v6106_v23 }
  0x3c   :  { %3970 = vmatprep.subr.bf16.mxu0 %v6112_v28 }
  0x3d   :  { %4759 = vmatpush3.bf16.msra.mxu1 %v6155_v43 }
  0x3e   :  { %4760 = vmatprep.subr.bf16.mxu1 %v8349_v45 }
  0x3f   :  { %3971 = vmatpush3.bf16.msra.mxu0 %v6118_v29 }
  0x40   :  { %4770 = vmatprep.subr.bf16.mxu0 %v8349_v45 }
  0x41   :  { %4761 = vmatpush3.bf16.msra.mxu1 %v6163_v44 }
  0x42   :  { %675 = vmatmul.mubr.bf16.vlgmr.msra.gmra.mrb[4].mxu0 %v240_v57  ;;  %4762 = vmatprep.subr.bf16.mxu1 %v8349_v45  ;;  %v6204_v57 = vld [vmem:[%s8311_s5 + $0x18] sm:$0xff]  }
  0x43   :  { %4786 = vmatprep.mubr.msk.bf16.mxu0 %vm5753_vm0, %v8349_v45  ;;  %4771 = vmatpush3.bf16.msra.mxu0 %v6184_v49  ;;  %8501 = vst [vmem:[#allocation22_spill] sm:$0xff] %v6204_v57 }
  0x44   :  { %4772 = vmatprep.subr.bf16.mxu0 %v8349_v45 }
  0x45   :  { %4763 = vmatpush3.bf16.msra.mxu1 %v6170_v46 }
  0x46   :  { %4764 = vmatprep.subr.bf16.mxu1 %v8349_v45 }
  0x47   :  { %4773 = vmatpush3.bf16.msra.mxu0 %v6190_v51  ;;  %v6233_v51 = vld [vmem:[%s8312_s2] ss:$0 sm:$0xff] }
  0x48   :  { %4774 = vmatprep.subr.bf16.mxu0 %v8349_v45 }
  0x49   :  { %4765 = vmatpush3.bf16.msra.mxu1 %v6177_v48 }
  0x4a   :  { %4810 = vmatprep.subr.bf16.mxu1 %v8349_v45 }
  0x4b   :  { %4775 = vmatpush3.bf16.msra.mxu0 %v6197_v52  ;;  %v6218_v52 = vld [vmem:[%s8311_s5 + $0x28] sm:$0xff]  }
  0x4c   :  { %4776 = vmatprep.subr.bf16.mxu0 %v8349_v45  ;;  %8503 = vst [vmem:[#allocation24_spill] sm:$0xff] %v6218_v52 }
  0x4f   :  { %4777 = vmatpush3.bf16.msra.mxu0 %v6204_v57  ;;  %v6225_v57 = vld [vmem:[%s8311_s5 + $0x30] sm:$0xff]  }
  0x50   :  { %4778 = vmatprep.subr.bf16.mxu0 %v8349_v45  ;;  %8504 = vst [vmem:[#allocation25_spill] sm:$0xff] %v6225_v57 }
  0x53   :  { %4779 = vmatpush3.bf16.msra.mxu0 %v6211_v61 }
  0x54   :  { %4780 = vmatprep.subr.bf16.mxu0 %v8349_v45 }
  0x57   :  { %4781 = vmatpush3.bf16.msra.mxu0 %v6218_v52 }
  0x58   :  { %4782 = vmatprep.subr.bf16.mxu0 %v8349_v45 }
  0x5b   :  { %4783 = vmatpush3.bf16.msra.mxu0 %v6225_v57 }
  0x5c   :  { %4784 = vmatprep.subr.bf16.mxu0 %v8349_v45 }
  0xf5   :  { %v3928_v61 = vpop.f32.mrb[0].mxu0 }
  0xf6   :  { %v3929_v49 = vpop.f32.mrb[1].mxu0 }
  0xf7   :  { %v3930_v29 = vadd.f32 %v3929_v49, %v3928_v61  ;;  %v3931_v52 = vpop.f32.mrb[2].mxu0  ;;  %v3950_v28 = vpop.f32.mrb[0].mxu1 }
  0xf8   :  { %v3932_v23 = vpop.f32.mrb[3].mxu0  ;;  %v3951_v22 = vpop.f32.mrb[1].mxu1 }
  0xf9   :  { %v597_v21 = vadd.f32 %v3930_v29, %v6233_v51  ;;  %v3952_v63 = vadd.f32 %v3951_v22, %v3950_v28  ;;  %v3953_v62 = vpop.f32.mrb[2].mxu1  ;;  %v6288_v22 = vld [vmem:[%s8313_s7 + $0x8] sm:$0xff]   ;;  %v6297_v28 = vld [vmem:[%s8313_s7 + $0x10] sm:$0xff]   ;;  %v6304_v29 = vld [vmem:[%s8313_s7 + $0x18] sm:$0xff]  }
  0xfa   :  { %v3954_v59 = vpop.f32.mrb[3].mxu1  ;;  %v6282_v62 = vld [vmem:[%s8313_s7] sm:$0xff]  }
  0xfb   :  { %v637_v57 = vadd.f32 %v3952_v63, %v597_v21  ;;  %v6241_v59 = vld [vmem:[%s8311_s5 + $0x38] sm:$0xff]  }
  0xfc   :  { %8506 = vst [vmem:[#allocation26_spill] sm:$0xff] %v6241_v59  ;;  %4785 = vmatpush3.bf16.msra.mxu0 %v6241_v59 }
  0xfd   :  { %4790 = vmatprep.subr.bf16.mxu0 %v8505_v35 }
  0xff   :  { %v716_v58 = vpop.f32.mrb[4].mxu1 }
 0x100   :  { %v4748_v45 = vpop.f32.mrb[5].mxu1 }
 0x101   :  { %v719_v56 = vpop.f32.mrb[6].mxu1  ;;  %v6254_v45 = vld [vmem:[%s8314_s8 + $0x8] sm:$0xff]  }
 0x102   :  { %v4749_v55 = vpop.f32.mrb[7].mxu1 }
 0x115   :  { %v3972_v54 = vpop.f32.mrb[4].mxu0 }
 0x116   :  { %v3973_v53 = vpop.f32.mrb[5].mxu0 }
 0x117   :  { %v3974_v50 = vadd.f32 %v3973_v53, %v3972_v54  ;;  %v3975_v47 = vpop.f32.mrb[6].mxu0  ;;  %v6276_v53 = vld [vmem:[%s8315_s4] ss:$0 sm:$0xff] }
 0x118   :  { %v3976_v41 = vpop.f32.mrb[7].mxu0  ;;  %v6260_v47 = vld [vmem:[%s8314_s8 + $0x10] sm:$0xff]  }
 0x119   :  { %v677_v49 = vadd.f32 %v3974_v50, %v637_v57  ;;  %v6248_v41 = vld [vmem:[%s8314_s8] sm:$0xff]   ;;  %v6268_v50 = vld [vmem:[%s8314_s8 + $0x18] sm:$0xff]  }
 0x11a   :  { %v6311_v57 = vld [vmem:[%s8313_s7 + $0x20] sm:$0xff]  }
 0x11b   :  { %v717_v52 = vadd.f32 %v716_v58, %v677_v49  ;;  %v6318_v49 = vld [vmem:[%s8313_s7 + $0x28] sm:$0xff]  }
 0x11d   :  { %v722_v61 = vmax.f32 %v717_v52, 0.0  ;;  %v6325_v52 = vld [vmem:[%s8313_s7 + $0x30] sm:$0xff]  }
 0x11f   :  { %v723_v23 = vpack.c.bf16 %v722_v61, %v722_v61  ;;  %v6332_v61 = vld [vmem:[%s8313_s7 + $0x38] sm:$0xff]  }
 0x121   :  { %4767 = vmatmul.mubr.bf16.vlgmr.msra.gmra.mrb[8].mxu1 %v723_v23  ;;  %v5754_v23 = vmov 0  }
 0x122   :  { %4826 = vmatprep.mubr.msk.bf16.mxu1 %vm5753_vm0, %v8505_v35  ;;  %4811 = vmatpush3.bf16.msra.mxu1 %v6248_v41 }
 0x123   :  { %4812 = vmatprep.subr.bf16.mxu1 %v8505_v35 }
 0x126   :  { %4813 = vmatpush3.bf16.msra.mxu1 %v6254_v45 }
 0x127   :  { %4814 = vmatprep.subr.bf16.mxu1 %v8505_v35 }
 0x12a   :  { %4815 = vmatpush3.bf16.msra.mxu1 %v6260_v47 }
 0x12b   :  { %4816 = vmatprep.subr.bf16.mxu1 %v8505_v35 }
 0x12e   :  { %4817 = vmatpush3.bf16.msra.mxu1 %v6268_v50 }
 0x12f   :  { %4818 = vmatprep.subr.bf16.mxu1 %v8505_v35 }
 0x1f4   :  { %v812_v54 = vpop.f32.mrb[8].mxu1 }
 0x1f5   :  { %v813_v55 = vadd.f32 %v6276_v53, %v812_v54  ;;  %v4768_v56 = vpop.f32.mrb[9].mxu1 }
 0x1f6   :  { %v815_v58 = vpop.f32.mrb[10].mxu1 }
 0x1f7   :  { %v818_v63 = vpack.c.bf16 %v813_v55, %v813_v55  ;;  %v4769_v21 = vpop.f32.mrb[11].mxu1 }
 0x1f9   :  { %4787 = vmatmul.mubr.bf16.vlgmr.msra.gmra.mrb[8].mxu0 %v818_v63 }
 0x1fa   :  { %4791 = vmatpush3.bf16.msra.mxu0 %v6282_v62  ;;  %4806 = vmatprep.mubr.msk.bf16.mxu0 %vm5753_vm0, %v8505_v35 }
 0x1fb   :  { %4792 = vmatprep.subr.bf16.mxu0 %v8505_v35 }
 0x1fe   :  { %4793 = vmatpush3.bf16.msra.mxu0 %v6288_v22 }
 0x1ff   :  { %4794 = vmatprep.subr.bf16.mxu0 %v8505_v35 }
 0x202   :  { %4795 = vmatpush3.bf16.msra.mxu0 %v6297_v28 }
 0x203   :  { %4796 = vmatprep.subr.bf16.mxu0 %v8505_v35 }
 0x206   :  { %4797 = vmatpush3.bf16.msra.mxu0 %v6304_v29 }
 0x207   :  { %4798 = vmatprep.subr.bf16.mxu0 %v8505_v35 }
 0x20a   :  { %4799 = vmatpush3.bf16.msra.mxu0 %v6311_v57 }
 0x20b   :  { %4800 = vmatprep.subr.bf16.mxu0 %v8505_v35 }
 0x20e   :  { %4801 = vmatpush3.bf16.msra.mxu0 %v6318_v49 }
 0x20f   :  { %4802 = vmatprep.subr.bf16.mxu0 %v8505_v35 }
 0x212   :  { %4803 = vmatpush3.bf16.msra.mxu0 %v6325_v52 }
 0x213   :  { %4804 = vmatprep.subr.bf16.mxu0 %v8505_v35 }
 0x216   :  { %4805 = vmatpush3.bf16.msra.mxu0 %v6332_v61 }
 0x217   :  { %4038 = vmatprep.subr.bf16.mxu0 %v5824_v2  ;;  %v6356_v2 = vld [vmem:[%s8314_s8 + $0x20] sm:$0xff]  }
 0x218   :  { %4819 = vmatpush3.bf16.msra.mxu1 %v6356_v2 }
 0x219   :  { %4807 = vmatmul.mubr.bf16.vlgmr.msra.gmra.mrb[8].mxu0 %v5754_v23  ;;  %4820 = vmatprep.subr.bf16.mxu1 %v8505_v35 }
 0x21a   :  { %4039 = vmatpush3.bf16.msra.mxu0 %v5830_v3  ;;  %v6363_v3 = vld [vmem:[%s8314_s8 + $0x28] sm:$0xff]  }
 0x21b   :  { %4040 = vmatprep.subr.bf16.mxu0 %v5848_v6  ;;  %v6370_v6 = vld [vmem:[%s8314_s8 + $0x30] sm:$0xff]  }
 0x21c   :  { %4821 = vmatpush3.bf16.msra.mxu1 %v6363_v3 }
 0x21d   :  { %4822 = vmatprep.subr.bf16.mxu1 %v8505_v35 }
 0x21e   :  { %4041 = vmatpush3.bf16.msra.mxu0 %v5854_v7  ;;  %v6377_v7 = vld [vmem:[%s8314_s8 + $0x38] sm:$0xff]  }
 0x21f   :  { %4042 = vmatprep.subr.bf16.mxu0 %v5872_v10  ;;  %v3898_v10 = vld [vmem:[%s8309_s0 + $0x7] sm:$0x7f] }
 0x220   :  { %4823 = vmatpush3.bf16.msra.mxu1 %v6370_v6 }
 0x221   :  { %4824 = vmatprep.subr.bf16.mxu1 %v8505_v35 }
 0x222   :  { %4043 = vmatpush3.bf16.msra.mxu0 %v5878_v11  ;;  %v1108_v11 = vrot.slane %v3898_v10, %v5982_v34 }
 0x223   :  { %4044 = vmatprep.subr.bf16.mxu0 %v5896_v14 }
 0x224   :  { %4825 = vmatpush3.bf16.msra.mxu1 %v6377_v7  ;;  %v1116_v14 = vcombine.high %v1108_v11, %v1108_v11 }
 0x225   :  { %4016 = vmatprep.subr.bf16.mxu1 %v5813_v0  ;;  %v1101_v0 = vcombine.high %v3898_v10, %v3898_v10  ;;  %v8519_v10 = vld [vmem:[#allocation14_spill] sm:$0xff] }
 0x226   :  { %4045 = vmatpush3.bf16.msra.mxu0 %v5902_v15  ;;  %v1138_v15 = vrot.slane %v1116_v14, %v5982_v34  ;;  %v8521_v14 = vld [vmem:[#allocation16_spill] sm:$0xff] }
 0x227   :  { %4046 = vmatprep.subr.bf16.mxu0 %v5920_v18  ;;  %v1124_v18 = vrot.slane %v1108_v11, %v5982_v34  ;;  %v8520_v11 = vld [vmem:[#allocation15_spill] sm:$0xff] }
 0x22a   :  { %4047 = vmatpush3.bf16.msra.mxu0 %v5926_v19  ;;  %v1148_v19 = vcombine.high %v1138_v15, %v1138_v15 }
 0x22b   :  { %4048 = vmatprep.subr.bf16.mxu0 %v5944_v25  ;;  %v1146_v25 = vcombine.high %v1124_v18, %v1124_v18 }
 0x22c   :  { %1230 = vmatprep.mubr.bf16.mxu0 %v1148_v19  ;;  %v8524_v19 = vld [vmem:[#allocation19_spill] sm:$0xff] }
 0x22e   :  { %4049 = vmatpush3.bf16.msra.mxu0 %v5950_v26  ;;  %v1115_v26 = vrot.slane %v1101_v0, %v5982_v34  ;;  %v8526_v0 = vld [vmem:[#allocation21_spill] sm:$0xff] }
 0x22f   :  { %4050 = vmatprep.subr.bf16.mxu0 %v5968_v31 }
 0x230   :  { %v6393_v31 = vrot.slane %v1115_v26, %v5982_v34 }
 0x232   :  { %4051 = vmatpush3.bf16.msra.mxu0 %v5974_v32  ;;  %v1147_v32 = vcombine.high %v6393_v31, %v6393_v31 }
 0x233   :  { %4052 = vmatprep.subr.bf16.mxu0 %v5994_v36  ;;  %v6419_v36 = vld [vmem:[%s8316_s6] ss:$0 sm:$0xff] }
 0x236   :  { %4053 = vmatpush3.bf16.msra.mxu0 %v6005_v40 }
 0x237   :  { %4830 = vmatprep.subr.bf16.mxu0 %v8505_v35 }
 0x239   :  { %1231 = vmatmul.mubr.bf16.vlgmr.msra.gmra.mrb[12].mxu0 %v1146_v25  ;;  %v8525_v25 = vld [vmem:[#allocation20_spill] sm:$0xff] }
 0x23a   :  { %4831 = vmatpush3.bf16.msra.mxu0 %v6071_v60  ;;  %4832 = vmatprep.mubr.msk.bf16.mxu0 %vm5753_vm0, %v8505_v35 }
 0x23b   :  { %4836 = vmatprep.subr.bf16.mxu0 %v8505_v35 }
 0x241   :  { %4833 = vmatmul.mubr.msk.bf16.vlgmr.msra.gmra.mrb[16].mxu0 %vm558_vm1, %v1147_v32  ;;  %v8529_v32 = vld [vmem:[#allocation24_spill] sm:$0xff] }
 0x242   :  { %4837 = vmatpush3.bf16.msra.mxu0 %v6128_v37  ;;  %4852 = vmatprep.mubr.msk.bf16.mxu0 %vm5753_vm0, %v8505_v35 }
 0x243   :  { %4838 = vmatprep.subr.bf16.mxu0 %v8505_v35 }
 0x246   :  { %4839 = vmatpush3.bf16.msra.mxu0 %v6134_v38 }
 0x247   :  { %4840 = vmatprep.subr.bf16.mxu0 %v8505_v35 }
 0x24a   :  { %4841 = vmatpush3.bf16.msra.mxu0 %v6140_v39 }
 0x24b   :  { %4842 = vmatprep.subr.bf16.mxu0 %v8505_v35 }
 0x24e   :  { %4843 = vmatpush3.bf16.msra.mxu0 %v6148_v42 }
 0x24f   :  { %4844 = vmatprep.subr.bf16.mxu0 %v8505_v35 }
 0x252   :  { %4845 = vmatpush3.bf16.msra.mxu0 %v6155_v43 }
 0x253   :  { %4846 = vmatprep.subr.bf16.mxu0 %v8505_v35 }
 0x256   :  { %4847 = vmatpush3.bf16.msra.mxu0 %v6163_v44 }
 0x257   :  { %4848 = vmatprep.subr.bf16.mxu0 %v8505_v35 }
 0x25a   :  { %4849 = vmatpush3.bf16.msra.mxu0 %v6170_v46 }
 0x25b   :  { %4850 = vmatprep.subr.bf16.mxu0 %v8505_v35 }
 0x25e   :  { %4851 = vmatpush3.bf16.msra.mxu0 %v6177_v48 }
 0x25f   :  { %4896 = vmatprep.subr.bf16.mxu0 %v8505_v35 }
 0x2ec   :  { %v995_v54 = vpop.f32.mrb[8].mxu0 }
 0x2ed   :  { %v5432_v55 = vadd.f32 %v6419_v36, %v995_v54  ;;  %v4808_v56 = vpop.f32.mrb[9].mxu0  ;;  %v8530_v54 = vld [vmem:[#allocation25_spill] sm:$0xff] }
 0x2ee   :  { %v998_v58 = vpop.f32.mrb[10].mxu0 }
 0x2ef   :  { %5565 = vtanh.f32 %v5432_v55  ;;  %v4809_v63 = vpop.f32.mrb[11].mxu0 }
 0x2f9   :  { %v5566_v21 = vpop.eup %5565 }
 0x2fa   :  { %v6422_v23 = vpack.c.bf16 %v5566_v21, %v5566_v21 }
 0x2fc   :  { %4827 = vmatmul.mubr.bf16.vlgmr.msra.gmra.mrb[12].mxu1 %v6422_v23 }
 0x2fd   :  { %4017 = vmatpush3.bf16.msra.mxu1 %v5818_v1  ;;  %1190 = vmatprep.mubr.bf16.mxu1 %v1138_v15  ;;  %v1117_v1 = vcombine.high %v1115_v26, %v1115_v26  ;;  %v8522_v15 = vld [vmem:[#allocation17_spill] sm:$0xff]  ;;  %v8527_v26 = vld [vmem:[#allocation22_spill] sm:$0xff] }
 0x2fe   :  { %4018 = vmatprep.subr.bf16.mxu1 %v5836_v4  ;;  %v8507_v4 = vld [vmem:[#allocation2_spill] sm:$0xff] }
 0x301   :  { %4019 = vmatpush3.bf16.msra.mxu1 %v5842_v5  ;;  %v1145_v5 = vrot.slane %v1117_v1, %v5982_v34 }
 0x302   :  { %4020 = vmatprep.subr.bf16.mxu1 %v5860_v8  ;;  %v8508_v8 = vld [vmem:[#allocation3_spill] sm:$0xff] }
 0x305   :  { %4021 = vmatpush3.bf16.msra.mxu1 %v5866_v9  ;;  %v8509_v9 = vld [vmem:[#allocation4_spill] sm:$0xff] }
 0x306   :  { %4022 = vmatprep.subr.bf16.mxu1 %v5884_v12  ;;  %v8510_v12 = vld [vmem:[#allocation5_spill] sm:$0xff] }
 0x309   :  { %4023 = vmatpush3.bf16.msra.mxu1 %v5890_v13  ;;  %v8511_v13 = vld [vmem:[#allocation6_spill] sm:$0xff] }
 0x30a   :  { %4024 = vmatprep.subr.bf16.mxu1 %v5908_v16  ;;  %v8512_v16 = vld [vmem:[#allocation7_spill] sm:$0xff] }
 0x30c   :  { %v4054_v55 = vpop.f32.mrb[12].mxu0 }
 0x30d   :  { %4025 = vmatpush3.bf16.msra.mxu1 %v5914_v17  ;;  %v8513_v17 = vld [vmem:[#allocation8_spill] sm:$0xff]  ;;  %v4055_v56 = vpop.f32.mrb[13].mxu0 }
 0x30e   :  { %4026 = vmatprep.subr.bf16.mxu1 %v5932_v20  ;;  %v8514_v20 = vld [vmem:[#allocation9_spill] sm:$0xff]  ;;  %v4056_v58 = vadd.f32 %v4055_v56, %v4054_v55  ;;  %v4057_v63 = vpop.f32.mrb[14].mxu0 }
 0x30f   :  { %v4058_v21 = vpop.f32.mrb[15].mxu0 }
 0x311   :  { %4027 = vmatpush3.bf16.msra.mxu1 %v5938_v24  ;;  %v8515_v24 = vld [vmem:[#allocation10_spill] sm:$0xff] }
 0x312   :  { %4028 = vmatprep.subr.bf16.mxu1 %v5956_v27  ;;  %v8516_v27 = vld [vmem:[#allocation11_spill] sm:$0xff] }
 0x314   :  { %v1312_v1 = vpop.f32.mrb[16].mxu0 }
 0x315   :  { %4029 = vmatpush3.bf16.msra.mxu1 %v5962_v30  ;;  %v8517_v30 = vld [vmem:[#allocation12_spill] sm:$0xff] }
 0x316   :  { %4030 = vmatprep.subr.bf16.mxu1 %v5980_v33  ;;  %v8518_v33 = vld [vmem:[#allocation13_spill] sm:$0xff] }
 0x319   :  { %4031 = vmatpush3.bf16.msra.mxu1 %v8507_v4  ;;  %v4834_v4 = vpop.f32.mrb[17].mxu0 }
 0x31a   :  { %4060 = vmatprep.subr.bf16.mxu1 %v8508_v8 }
 0x31c   :  { %1191 = vmatmul.mubr.bf16.vlgmr.msra.gmra.mrb[16].mxu1 %v1124_v18  ;;  %v8523_v18 = vld [vmem:[#allocation18_spill] sm:$0xff] }
 0x31d   :  { %4061 = vmatpush3.bf16.msra.mxu1 %v8509_v9  ;;  %1270 = vmatprep.mubr.bf16.mxu1 %v1145_v5  ;;  %v1315_v5 = vpop.f32.mrb[18].mxu0  ;;  %v6480_v9 = vld [vmem:[%s8317_s9] ss:$0 sm:$0xff] }
 0x31e   :  { %4062 = vmatprep.subr.bf16.mxu1 %v8510_v12  ;;  %v4835_v8 = vpop.f32.mrb[19].mxu0  ;;  %8531 = vst [vmem:[#allocation2_spill] sm:$0xff] %v6480_v9 }
 0x321   :  { %4063 = vmatpush3.bf16.msra.mxu1 %v8511_v13 }
 0x322   :  { %4064 = vmatprep.subr.bf16.mxu1 %v8512_v16 }
 0x325   :  { %4065 = vmatpush3.bf16.msra.mxu1 %v8513_v17 }
 0x326   :  { %4066 = vmatprep.subr.bf16.mxu1 %v8514_v20 }
 0x329   :  { %4067 = vmatpush3.bf16.msra.mxu1 %v8515_v24 }
 0x32a   :  { %4068 = vmatprep.subr.bf16.mxu1 %v8516_v27 }
 0x32d   :  { %4069 = vmatpush3.bf16.msra.mxu1 %v8517_v30 }
 0x32e   :  { %4070 = vmatprep.subr.bf16.mxu1 %v8518_v33 }
 0x331   :  { %4071 = vmatpush3.bf16.msra.mxu1 %v8519_v10 }
 0x332   :  { %4072 = vmatprep.subr.bf16.mxu1 %v8520_v11 }
 0x335   :  { %4073 = vmatpush3.bf16.msra.mxu1 %v8521_v14 }
 0x336   :  { %4074 = vmatprep.subr.bf16.mxu1 %v8522_v15 }
 0x339   :  { %4075 = vmatpush3.bf16.msra.mxu1 %v8523_v18 }
 0x33a   :  { %4856 = vmatprep.subr.bf16.mxu1 %v8505_v35 }
 0x33c   :  { %1271 = vmatmul.mubr.bf16.vlgmr.msra.gmra.mrb[20].mxu1 %v6393_v31  ;;  %v8528_v31 = vld [vmem:[#allocation23_spill] sm:$0xff] }
 0x33d   :  { %4857 = vmatpush3.bf16.msra.mxu1 %v8524_v19  ;;  %4872 = vmatprep.mubr.msk.bf16.mxu1 %vm5753_vm0, %v8505_v35 }
 0x33e   :  { %4858 = vmatprep.subr.bf16.mxu1 %v8505_v35 }
 0x341   :  { %4859 = vmatpush3.bf16.msra.mxu1 %v8525_v25 }
 0x342   :  { %4860 = vmatprep.subr.bf16.mxu1 %v8505_v35 }
 0x345   :  { %4861 = vmatpush3.bf16.msra.mxu1 %v8526_v0 }
 0x346   :  { %4862 = vmatprep.subr.bf16.mxu1 %v8505_v35 }
 0x349   :  { %4863 = vmatpush3.bf16.msra.mxu1 %v8527_v26 }
 0x34a   :  { %4864 = vmatprep.subr.bf16.mxu1 %v8505_v35 }
 0x34d   :  { %4865 = vmatpush3.bf16.msra.mxu1 %v8528_v31 }
 0x34e   :  { %4866 = vmatprep.subr.bf16.mxu1 %v8505_v35 }
 0x351   :  { %4867 = vmatpush3.bf16.msra.mxu1 %v8529_v32 }
 0x352   :  { %4868 = vmatprep.subr.bf16.mxu1 %v8505_v35 }
 0x355   :  { %4869 = vmatpush3.bf16.msra.mxu1 %v8530_v54 }
 0x356   :  { %4870 = vmatprep.subr.bf16.mxu1 %v8505_v35 }
 0x359   :  { %4871 = vmatpush3.bf16.msra.mxu1 %v6241_v59 }
 0x35a   :  { %4876 = vmatprep.subr.bf16.mxu1 %v8505_v35 }
 0x3cf   :  { %v1092_v12 = vpop.f32.mrb[12].mxu1 }
 0x3d0   :  { %v1093_v13 = vadd.f32 %v6480_v9, %v1092_v12  ;;  %v4828_v16 = vpop.f32.mrb[13].mxu1 }
 0x3d1   :  { %v1095_v17 = vpop.f32.mrb[14].mxu1 }
 0x3d2   :  { %3800 = vst [vmem:[%s8318_s10] sm:$0x3] %v1093_v13  ;;  %v4829_v20 = vpop.f32.mrb[15].mxu1 }
 0x3d3   :  { %v6531_v20 = vld [vmem:[%s8308_s1 + $0xc0] sm:$0xff]  }
 0x3ef   :  { %v4032_v24 = vpop.f32.mrb[16].mxu1 }
 0x3f0   :  { %v4033_v27 = vpop.f32.mrb[17].mxu1 }
 0x3f1   :  { %v4034_v55 = vadd.f32 %v4033_v27, %v4032_v24  ;;  %v4035_v56 = vpop.f32.mrb[18].mxu1  ;;  %v6538_v24 = vld [vmem:[%s8308_s1 + $0x80] sm:$0xff]   ;;  %v6544_v27 = vld [vmem:[%s8308_s1 + $0xc8] sm:$0xff]  }
 0x3f2   :  { %v4036_v63 = vpop.f32.mrb[19].mxu1  ;;  %v6562_v56 = vld [vmem:[%s8308_s1 + $0x90] sm:$0xff]  }
 0x3f3   :  { %v1193_v21 = vadd.f32 %v4034_v55, %v6233_v51  ;;  %v6550_v55 = vld [vmem:[%s8308_s1 + $0x88] sm:$0xff]   ;;  %v6568_v63 = vld [vmem:[%s8308_s1 + $0xd8] sm:$0xff]  }
 0x3f5   :  { %v1233_v4 = vadd.f32 %v4056_v58, %v1193_v21  ;;  %v6574_v21 = vld [vmem:[%s8308_s1 + $0x98] sm:$0xff]  }
 0x40f   :  { %v4076_v5 = vpop.f32.mrb[20].mxu1 }
 0x410   :  { %v4077_v8 = vpop.f32.mrb[21].mxu1 }
 0x411   :  { %v4078_v59 = vadd.f32 %v4077_v8, %v4076_v5  ;;  %v4079_v54 = vpop.f32.mrb[22].mxu1  ;;  %v6586_v5 = vld [vmem:[%s8308_s1 + $0xa0] sm:$0xff]   ;;  %v6592_v8 = vld [vmem:[%s8308_s1 + $0xe8] sm:$0xff]  }
 0x412   :  { %v4080_v12 = vpop.f32.mrb[23].mxu1 }
 0x413   :  { %v1273_v16 = vadd.f32 %v4078_v59, %v1233_v4  ;;  %v6507_v59 = vld [vmem:[%s8308_s1 + $0x40] sm:$0xff]   ;;  %v6598_v12 = vld [vmem:[%s8308_s1 + $0xa8] sm:$0xff]  }
 0x414   :  { %v6580_v4 = vld [vmem:[%s8308_s1 + $0xe0] sm:$0xff]  }
 0x415   :  { %v1313_v17 = vadd.f32 %v1312_v1, %v1273_v16  ;;  %v6604_v16 = vld [vmem:[%s8308_s1 + $0xf0] sm:$0xff]  }
 0x416   :  { %8532 = vst [vmem:[#allocation3_spill] sm:$0xff] %v6604_v16 }
 0x417   :  { %v1318_v9 = vmax.f32 %v1313_v17, 0.0  ;;  %v6610_v17 = vld [vmem:[%s8308_s1 + $0xb0] sm:$0xff]  }
 0x418   :  { %8533 = vst [vmem:[#allocation4_spill] sm:$0xff] %v6610_v17 }
 0x419   :  { %v1319_v32 = vpack.c.bf16 %v1318_v9, %v1318_v9 }
 0x41b   :  { %4853 = vmatmul.mubr.bf16.vlgmr.msra.gmra.mrb[20].mxu0 %v1319_v32 }
 0x41c   :  { %4897 = vmatpush3.bf16.msra.mxu0 %v6248_v41  ;;  %4912 = vmatprep.mubr.msk.bf16.mxu0 %vm5753_vm0, %v8505_v35 }
 0x41d   :  { %4898 = vmatprep.subr.bf16.mxu0 %v8505_v35 }
 0x420   :  { %4899 = vmatpush3.bf16.msra.mxu0 %v6254_v45 }
 0x421   :  { %4900 = vmatprep.subr.bf16.mxu0 %v8505_v35 }
 0x424   :  { %4901 = vmatpush3.bf16.msra.mxu0 %v6260_v47 }
 0x425   :  { %4902 = vmatprep.subr.bf16.mxu0 %v8505_v35 }
 0x428   :  { %4903 = vmatpush3.bf16.msra.mxu0 %v6268_v50 }
 0x429   :  { %4904 = vmatprep.subr.bf16.mxu0 %v8505_v35 }
 0x42c   :  { %4905 = vmatpush3.bf16.msra.mxu0 %v6356_v2 }
 0x42d   :  { %4906 = vmatprep.subr.bf16.mxu0 %v8505_v35 }
 0x430   :  { %4907 = vmatpush3.bf16.msra.mxu0 %v6363_v3 }
 0x431   :  { %4908 = vmatprep.subr.bf16.mxu0 %v8505_v35 }
 0x434   :  { %4909 = vmatpush3.bf16.msra.mxu0 %v6370_v6 }
 0x435   :  { %4910 = vmatprep.subr.bf16.mxu0 %v8505_v35 }
 0x438   :  { %4911 = vmatpush3.bf16.msra.mxu0 %v6377_v7 }
 0x439   :  { %4120 = vmatprep.subr.bf16.mxu0 %v6507_v59 }
 0x4ee   :  { %v1354_v32 = vpop.f32.mrb[20].mxu0 }
 0x4ef   :  { %v1355_v54 = vadd.f32 %v6276_v53, %v1354_v32  ;;  %v4854_v58 = vpop.f32.mrb[21].mxu0  ;;  %v6616_v32 = vld [vmem:[%s8308_s1 + $0xf8] sm:$0xff]  }
 0x4f0   :  { %v1357_v1 = vpop.f32.mrb[22].mxu0  ;;  %8534 = vst [vmem:[#allocation5_spill] sm:$0xff] %v6616_v32 }
 0x4f1   :  { %v1360_v9 = vpack.c.bf16 %v1355_v54, %v1355_v54  ;;  %v4855_v13 = vpop.f32.mrb[23].mxu0  ;;  %v3900_v54 = vld [vmem:[%s8309_s0 + $0xe] sm:$0x7f] }
 0x4f2   :  { %v1494_v58 = vrot.slane %v3900_v54, %v5982_v34 }
 0x4f3   :  { %4873 = vmatmul.mubr.bf16.vlgmr.msra.gmra.mrb[24].mxu1 %v1360_v9 }
 0x4f4   :  { %4877 = vmatpush3.bf16.msra.mxu1 %v6282_v62  ;;  %4892 = vmatprep.mubr.msk.bf16.mxu1 %vm5753_vm0, %v8505_v35  ;;  %v1502_v1 = vcombine.high %v1494_v58, %v1494_v58  ;;  %v6627_v13 = vrot.slane %v1494_v58, %v5982_v34 }
 0x4f5   :  { %4878 = vmatprep.subr.bf16.mxu1 %v8505_v35 }
 0x4f6   :  { %v1524_v9 = vrot.slane %v1502_v1, %v5982_v34 }
 0x4f8   :  { %4879 = vmatpush3.bf16.msra.mxu1 %v6288_v22 }
 0x4f9   :  { %4880 = vmatprep.subr.bf16.mxu1 %v8505_v35 }
 0x4fc   :  { %4881 = vmatpush3.bf16.msra.mxu1 %v6297_v28 }
 0x4fd   :  { %4882 = vmatprep.subr.bf16.mxu1 %v8505_v35 }
 0x500   :  { %4883 = vmatpush3.bf16.msra.mxu1 %v6304_v29 }
 0x501   :  { %4884 = vmatprep.subr.bf16.mxu1 %v8505_v35 }
 0x504   :  { %4885 = vmatpush3.bf16.msra.mxu1 %v6311_v57 }
 0x505   :  { %4886 = vmatprep.subr.bf16.mxu1 %v8505_v35 }
 0x508   :  { %4887 = vmatpush3.bf16.msra.mxu1 %v6318_v49 }
 0x509   :  { %4888 = vmatprep.subr.bf16.mxu1 %v8505_v35 }
 0x50c   :  { %4889 = vmatpush3.bf16.msra.mxu1 %v6325_v52 }
 0x50d   :  { %4890 = vmatprep.subr.bf16.mxu1 %v8505_v35 }
 0x510   :  { %4891 = vmatpush3.bf16.msra.mxu1 %v6332_v61 }
 0x511   :  { %4142 = vmatprep.subr.bf16.mxu1 %v6531_v20 }
 0x513   :  { %4893 = vmatmul.mubr.bf16.vlgmr.msra.gmra.mrb[24].mxu1 %v6422_v23  ;;  %v6556_v23 = vld [vmem:[%s8308_s1 + $0xd0] sm:$0xff]  }
 0x514   :  { %4143 = vmatpush3.bf16.msra.mxu1 %v6538_v24 }
 0x515   :  { %4144 = vmatprep.subr.bf16.mxu1 %v6544_v27 }
 0x518   :  { %4145 = vmatpush3.bf16.msra.mxu1 %v6550_v55 }
 0x519   :  { %4146 = vmatprep.subr.bf16.mxu1 %v6556_v23 }
 0x51c   :  { %4147 = vmatpush3.bf16.msra.mxu1 %v6562_v56 }
 0x51d   :  { %4148 = vmatprep.subr.bf16.mxu1 %v6568_v63 }
 0x520   :  { %4149 = vmatpush3.bf16.msra.mxu1 %v6574_v21 }
 0x521   :  { %4150 = vmatprep.subr.bf16.mxu1 %v6580_v4 }
 0x524   :  { %4151 = vmatpush3.bf16.msra.mxu1 %v6586_v5 }
 0x525   :  { %4152 = vmatprep.subr.bf16.mxu1 %v6592_v8 }
 0x528   :  { %4153 = vmatpush3.bf16.msra.mxu1 %v6598_v12 }
 0x529   :  { %4154 = vmatprep.subr.bf16.mxu1 %v6604_v16 }
 0x52c   :  { %4155 = vmatpush3.bf16.msra.mxu1 %v6610_v17  ;;  %v1534_v17 = vcombine.high %v1524_v9, %v1524_v9 }
 0x52d   :  { %4156 = vmatprep.subr.bf16.mxu1 %v6616_v32  ;;  %v1532_v32 = vcombine.high %v6627_v13, %v6627_v13 }
 0x52e   :  { %1616 = vmatprep.mubr.bf16.mxu1 %v1534_v17 }
 0x530   :  { %4157 = vmatpush3.bf16.msra.mxu1 %v6005_v40  ;;  %v1487_v40 = vcombine.high %v3900_v54, %v3900_v54  ;;  %v6694_v54 = vld [vmem:[%s8308_s1 + $0x10] sm:$0xff]  }
 0x531   :  { %4916 = vmatprep.subr.bf16.mxu1 %v8505_v35 }
 0x532   :  { %v6636_v16 = vrot.slane %v1487_v40, %v5982_v34  ;;  %v6706_v40 = vld [vmem:[%s8308_s1 + $0x18] sm:$0xff]  }
 0x533   :  { %1617 = vmatmul.mubr.bf16.vlgmr.msra.gmra.mrb[28].mxu1 %v1532_v32  ;;  %v6688_v32 = vld [vmem:[%s8308_s1 + $0x50] sm:$0xff]  }
 0x534   :  { %4917 = vmatpush3.bf16.msra.mxu1 %v6071_v60  ;;  %4918 = vmatprep.mubr.msk.bf16.mxu1 %vm5753_vm0, %v8505_v35  ;;  %v6640_v58 = vrot.slane %v6636_v16, %v5982_v34 }
 0x535   :  { %4922 = vmatprep.subr.bf16.mxu1 %v8505_v35 }
 0x536   :  { %v1533_v1 = vcombine.high %v6640_v58, %v6640_v58 }
 0x53b   :  { %4919 = vmatmul.mubr.msk.bf16.vlgmr.msra.gmra.mrb[32].mxu1 %vm558_vm1, %v1533_v1  ;;  %v6712_v1 = vld [vmem:[%s8308_s1 + $0x60] sm:$0xff]  }
 0x53c   :  { %4923 = vmatpush3.bf16.msra.mxu1 %v6128_v37  ;;  %4938 = vmatprep.mubr.msk.bf16.mxu1 %vm5753_vm0, %v8505_v35 }
 0x53d   :  { %4924 = vmatprep.subr.bf16.mxu1 %v8505_v35 }
 0x540   :  { %4925 = vmatpush3.bf16.msra.mxu1 %v6134_v38 }
 0x541   :  { %4926 = vmatprep.subr.bf16.mxu1 %v8505_v35 }
 0x544   :  { %4927 = vmatpush3.bf16.msra.mxu1 %v6140_v39 }
 0x545   :  { %4928 = vmatprep.subr.bf16.mxu1 %v8505_v35 }
 0x548   :  { %4929 = vmatpush3.bf16.msra.mxu1 %v6148_v42 }
 0x549   :  { %4930 = vmatprep.subr.bf16.mxu1 %v8505_v35 }
 0x54c   :  { %4931 = vmatpush3.bf16.msra.mxu1 %v6155_v43 }
 0x54d   :  { %4932 = vmatprep.subr.bf16.mxu1 %v8505_v35 }
 0x550   :  { %4933 = vmatpush3.bf16.msra.mxu1 %v6163_v44  ;;  %v6670_v44 = vld [vmem:[%s8308_s1] sm:$0xff]  }
 0x551   :  { %4934 = vmatprep.subr.bf16.mxu1 %v8505_v35 }
 0x554   :  { %4935 = vmatpush3.bf16.msra.mxu1 %v6170_v46  ;;  %v6676_v46 = vld [vmem:[%s8308_s1 + $0x48] sm:$0xff]  }
 0x555   :  { %4936 = vmatprep.subr.bf16.mxu1 %v8505_v35 }
 0x558   :  { %4937 = vmatpush3.bf16.msra.mxu1 %v6177_v48  ;;  %v6682_v48 = vld [vmem:[%s8308_s1 + $0x8] sm:$0xff]  }
 0x559   :  { %4982 = vmatprep.subr.bf16.mxu1 %v8505_v35 }
 0x5e6   :  { %v1435_v60 = vpop.f32.mrb[24].mxu1 }
 0x5e7   :  { %v5433_v37 = vadd.f32 %v6419_v36, %v1435_v60  ;;  %v4894_v38 = vpop.f32.mrb[25].mxu1  ;;  %v6718_v60 = vld [vmem:[%s8308_s1 + $0x20] sm:$0xff]  }
 0x5e8   :  { %v1438_v39 = vpop.f32.mrb[26].mxu1  ;;  %v6730_v38 = vld [vmem:[%s8308_s1 + $0x28] sm:$0xff]  }
 0x5e9   :  { %5567 = vtanh.f32 %v5433_v37  ;;  %v4895_v42 = vpop.f32.mrb[27].mxu1  ;;  %v6724_v37 = vld [vmem:[%s8308_s1 + $0x68] sm:$0xff]   ;;  %8536 = vst [vmem:[#allocation7_spill] sm:$0xff] %v6730_v38  ;;  %v6736_v39 = vld [vmem:[%s8308_s1 + $0x70] sm:$0xff]  }
 0x5ea   :  { %8535 = vst [vmem:[#allocation6_spill] sm:$0xff] %v6724_v37  ;;  %8537 = vst [vmem:[#allocation8_spill] sm:$0xff] %v6736_v39  ;;  %v6742_v42 = vld [vmem:[%s8308_s1 + $0x30] sm:$0xff]  }
 0x5eb   :  { %8538 = vst [vmem:[#allocation9_spill] sm:$0xff] %v6742_v42 }
 0x5f3   :  { %v5568_v43 = vpop.eup %5567 }
 0x5f4   :  { %v6664_v17 = vpack.c.bf16 %v5568_v43, %v5568_v43  ;;  %v1503_v43 = vcombine.high %v6636_v16, %v6636_v16  ;;  %v6763_v16 = vld [vmem:[%s8308_s1 + $0x140] sm:$0xff]  }
 0x5f5   :  { %8541 = vst [vmem:[#allocation12_spill] sm:$0xff] %v6763_v16 }
 0x5f6   :  { %4913 = vmatmul.mubr.bf16.vlgmr.msra.gmra.mrb[24].mxu0 %v6664_v17 }
 0x5f7   :  { %4121 = vmatpush3.bf16.msra.mxu0 %v6670_v44  ;;  %1576 = vmatprep.mubr.bf16.mxu0 %v1524_v9  ;;  %v6700_v9 = vld [vmem:[%s8308_s1 + $0x58] sm:$0xff]  }
 0x5f8   :  { %4122 = vmatprep.subr.bf16.mxu0 %v6676_v46 }
 0x5fb   :  { %4123 = vmatpush3.bf16.msra.mxu0 %v6682_v48 }
 0x5fc   :  { %4124 = vmatprep.subr.bf16.mxu0 %v6688_v32 }
 0x5ff   :  { %4125 = vmatpush3.bf16.msra.mxu0 %v6694_v54 }
 0x600   :  { %4126 = vmatprep.subr.bf16.mxu0 %v6700_v9 }
 0x603   :  { %4127 = vmatpush3.bf16.msra.mxu0 %v6706_v40 }
 0x604   :  { %4128 = vmatprep.subr.bf16.mxu0 %v6712_v1 }
 0x607   :  { %4129 = vmatpush3.bf16.msra.mxu0 %v6718_v60 }
 0x608   :  { %4130 = vmatprep.subr.bf16.mxu0 %v6724_v37  ;;  %v1531_v37 = vrot.slane %v1503_v43, %v5982_v34  ;;  %v6776_v43 = vld [vmem:[%s8308_s1 + $0x148] sm:$0xff]  }
 0x609   :  { %8543 = vst [vmem:[#allocation14_spill] sm:$0xff] %v6776_v43 }
 0x60b   :  { %4131 = vmatpush3.bf16.msra.mxu0 %v6730_v38  ;;  %v6750_v38 = vld [vmem:[%s8308_s1 + $0x78] sm:$0xff]  }
 0x60c   :  { %4132 = vmatprep.subr.bf16.mxu0 %v6736_v39  ;;  %8539 = vst [vmem:[#allocation10_spill] sm:$0xff] %v6750_v38  ;;  %v6756_v39 = vld [vmem:[%s8308_s1 + $0x38] sm:$0xff]  }
 0x60d   :  { %8540 = vst [vmem:[#allocation11_spill] sm:$0xff] %v6756_v39 }
 0x60f   :  { %4133 = vmatpush3.bf16.msra.mxu0 %v6742_v42 }
 0x610   :  { %4134 = vmatprep.subr.bf16.mxu0 %v6750_v38  ;;  %v6770_v38 = vld [vmem:[%s8308_s1 + $0x100] sm:$0xff]  }
 0x611   :  { %8542 = vst [vmem:[#allocation13_spill] sm:$0xff] %v6770_v38 }
 0x613   :  { %4135 = vmatpush3.bf16.msra.mxu0 %v6756_v39 }
 0x614   :  { %4164 = vmatprep.subr.bf16.mxu0 %v6763_v16  ;;  %v6782_v16 = vld [vmem:[%s8308_s1 + $0x108] sm:$0xff]  }
 0x615   :  { %8544 = vst [vmem:[#allocation15_spill] sm:$0xff] %v6782_v16 }
 0x616   :  { %1577 = vmatmul.mubr.bf16.vlgmr.msra.gmra.mrb[28].mxu0 %v6627_v13  ;;  %v6788_v13 = vld [vmem:[%s8308_s1 + $0x150] sm:$0xff]  }
 0x617   :  { %4165 = vmatpush3.bf16.msra.mxu0 %v6770_v38  ;;  %1656 = vmatprep.mubr.bf16.mxu0 %v1531_v37  ;;  %8545 = vst [vmem:[#allocation16_spill] sm:$0xff] %v6788_v13  ;;  %v6794_v37 = vld [vmem:[%s8308_s1 + $0x110] sm:$0xff]  }
 0x618   :  { %4166 = vmatprep.subr.bf16.mxu0 %v6776_v43  ;;  %8546 = vst [vmem:[#allocation17_spill] sm:$0xff] %v6794_v37  ;;  %v6800_v43 = vld [vmem:[%s8308_s1 + $0x158] sm:$0xff]  }
 0x619   :  { %8547 = vst [vmem:[#allocation18_spill] sm:$0xff] %v6800_v43 }
 0x61b   :  { %4167 = vmatpush3.bf16.msra.mxu0 %v6782_v16  ;;  %v6806_v16 = vld [vmem:[%s8308_s1 + $0x118] sm:$0xff]  }
 0x61c   :  { %4168 = vmatprep.subr.bf16.mxu0 %v6788_v13  ;;  %8548 = vst [vmem:[#allocation19_spill] sm:$0xff] %v6806_v16  ;;  %v6812_v13 = vld [vmem:[%s8308_s1 + $0x160] sm:$0xff]  }
 0x61d   :  { %8549 = vst [vmem:[#allocation20_spill] sm:$0xff] %v6812_v13 }
 0x61f   :  { %4169 = vmatpush3.bf16.msra.mxu0 %v6794_v37 }
 0x620   :  { %4170 = vmatprep.subr.bf16.mxu0 %v6800_v43 }
 0x623   :  { %4171 = vmatpush3.bf16.msra.mxu0 %v6806_v16 }
 0x624   :  { %4172 = vmatprep.subr.bf16.mxu0 %v6812_v13 }
 0x627   :  { %4173 = vmatpush3.bf16.msra.mxu0 %v8517_v30  ;;  %v8550_v30 = vld [vmem:[#allocation24_spill] sm:$0xff] }
 0x628   :  { %4174 = vmatprep.subr.bf16.mxu0 %v8518_v33  ;;  %v8551_v33 = vld [vmem:[#allocation25_spill] sm:$0xff] }
 0x62b   :  { %4175 = vmatpush3.bf16.msra.mxu0 %v8519_v10  ;;  %v8552_v10 = vld [vmem:[#allocation26_spill] sm:$0xff] }
 0x62c   :  { %4176 = vmatprep.subr.bf16.mxu0 %v8520_v11  ;;  %v4158_v11 = vpop.f32.mrb[28].mxu1 }
 0x62f   :  { %4177 = vmatpush3.bf16.msra.mxu0 %v8521_v14  ;;  %v4159_v14 = vpop.f32.mrb[29].mxu1 }
 0x630   :  { %4178 = vmatprep.subr.bf16.mxu0 %v8522_v15  ;;  %v4160_v15 = vadd.f32 %v4159_v14, %v4158_v11 }
 0x633   :  { %4179 = vmatpush3.bf16.msra.mxu0 %v8523_v18  ;;  %v4161_v18 = vpop.f32.mrb[30].mxu1 }
 0x634   :  { %4942 = vmatprep.subr.bf16.mxu0 %v8505_v35 }
 0x636   :  { %1657 = vmatmul.mubr.bf16.vlgmr.msra.gmra.mrb[32].mxu0 %v6640_v58 }
 0x637   :  { %4943 = vmatpush3.bf16.msra.mxu0 %v8524_v19  ;;  %4958 = vmatprep.mubr.msk.bf16.mxu0 %vm5753_vm0, %v8505_v35  ;;  %v4162_v19 = vpop.f32.mrb[31].mxu1 }
 0x638   :  { %4944 = vmatprep.subr.bf16.mxu0 %v8505_v35 }
 0x63b   :  { %4945 = vmatpush3.bf16.msra.mxu0 %v8525_v25  ;;  %v1698_v25 = vpop.f32.mrb[32].mxu1 }
 0x63c   :  { %4946 = vmatprep.subr.bf16.mxu0 %v8505_v35 }
 0x63f   :  { %4947 = vmatpush3.bf16.msra.mxu0 %v8526_v0  ;;  %v4920_v0 = vpop.f32.mrb[33].mxu1 }
 0x640   :  { %4948 = vmatprep.subr.bf16.mxu0 %v8505_v35 }
 0x643   :  { %4949 = vmatpush3.bf16.msra.mxu0 %v8527_v26  ;;  %v1701_v26 = vpop.f32.mrb[34].mxu1 }
 0x644   :  { %4950 = vmatprep.subr.bf16.mxu0 %v8505_v35 }
 0x647   :  { %4951 = vmatpush3.bf16.msra.mxu0 %v8528_v31  ;;  %v4921_v31 = vpop.f32.mrb[35].mxu1 }
 0x648   :  { %4952 = vmatprep.subr.bf16.mxu0 %v8505_v35 }
 0x64b   :  { %4953 = vmatpush3.bf16.msra.mxu0 %v8550_v30  ;;  %v8553_v30 = vld [vmem:[#allocation2_spill] sm:$0xff] }
 0x64c   :  { %4954 = vmatprep.subr.bf16.mxu0 %v8505_v35 }
 0x64f   :  { %4955 = vmatpush3.bf16.msra.mxu0 %v8551_v33 }
 0x650   :  { %4956 = vmatprep.subr.bf16.mxu0 %v8505_v35 }
 0x653   :  { %4957 = vmatpush3.bf16.msra.mxu0 %v8552_v10 }
 0x654   :  { %4962 = vmatprep.subr.bf16.mxu0 %v8505_v35 }
 0x6c9   :  { %v1478_v58 = vpop.f32.mrb[24].mxu0 }
 0x6ca   :  { %v1479_v13 = vadd.f32 %v8553_v30, %v1478_v58  ;;  %v4914_v16 = vpop.f32.mrb[25].mxu0 }
 0x6cb   :  { %v1481_v33 = vpop.f32.mrb[26].mxu0 }
 0x6cc   :  { %3801 = vst [vmem:[%s8318_s10 + $0x2] sm:$0x3] %v1479_v13  ;;  %v4915_v10 = vpop.f32.mrb[27].mxu0  ;;  %v6944_v13 = vld [vmem:[%s8310_s3 + $0x8] sm:$0xff]  }
 0x6cd   :  { %v6979_v10 = vld [vmem:[%s8310_s3 + $0x30] sm:$0xff]  }
 0x6e9   :  { %v4136_v43 = vpop.f32.mrb[28].mxu0 }
 0x6ea   :  { %v4137_v37 = vpop.f32.mrb[29].mxu0 }
 0x6eb   :  { %v4138_v38 = vadd.f32 %v4137_v37, %v4136_v43  ;;  %v4139_v11 = vpop.f32.mrb[30].mxu0  ;;  %v6935_v43 = vld [vmem:[%s8310_s3] sm:$0xff]   ;;  %v6951_v37 = vld [vmem:[%s8310_s3 + $0x10] sm:$0xff]  }
 0x6ec   :  { %v4140_v14 = vpop.f32.mrb[31].mxu0  ;;  %v6986_v11 = vld [vmem:[%s8310_s3 + $0x38] sm:$0xff]  }
 0x6ed   :  { %v1579_v18 = vadd.f32 %v4138_v38, %v6233_v51 }
 0x6ef   :  { %v1619_v19 = vadd.f32 %v4160_v15, %v1579_v18  ;;  %v6958_v15 = vld [vmem:[%s8310_s3 + $0x18] sm:$0xff]  }
 0x709   :  { %v4180_v0 = vpop.f32.mrb[32].mxu0 }
 0x70a   :  { %v4181_v26 = vpop.f32.mrb[33].mxu0 }
 0x70b   :  { %v4182_v31 = vadd.f32 %v4181_v26, %v4180_v0  ;;  %v4183_v39 = vpop.f32.mrb[34].mxu0 }
 0x70c   :  { %v4184_v58 = vpop.f32.mrb[35].mxu0 }
 0x70d   :  { %v1659_v16 = vadd.f32 %v4182_v31, %v1619_v19 }
 0x70f   :  { %v1699_v33 = vadd.f32 %v1698_v25, %v1659_v16  ;;  %v6965_v25 = vld [vmem:[%s8310_s3 + $0x20] sm:$0xff]   ;;  %v8558_v16 = vld [vmem:[#allocation7_spill] sm:$0xff] }
 0x711   :  { %v1704_v30 = vmax.f32 %v1699_v33, 0.0  ;;  %v8559_v33 = vld [vmem:[#allocation8_spill] sm:$0xff] }
 0x713   :  { %v1705_v42 = vpack.c.bf16 %v1704_v30, %v1704_v30  ;;  %v6972_v30 = vld [vmem:[%s8310_s3 + $0x28] sm:$0xff]  }
 0x715   :  { %4939 = vmatmul.mubr.bf16.vlgmr.msra.gmra.mrb[36].mxu1 %v1705_v42 }
 0x716   :  { %4983 = vmatpush3.bf16.msra.mxu1 %v6248_v41  ;;  %4998 = vmatprep.mubr.msk.bf16.mxu1 %vm5753_vm0, %v8505_v35 }
 0x717   :  { %4984 = vmatprep.subr.bf16.mxu1 %v8505_v35 }
 0x71a   :  { %4985 = vmatpush3.bf16.msra.mxu1 %v6254_v45 }
 0x71b   :  { %4986 = vmatprep.subr.bf16.mxu1 %v8505_v35 }
 0x71e   :  { %4987 = vmatpush3.bf16.msra.mxu1 %v6260_v47 }
 0x71f   :  { %4988 = vmatprep.subr.bf16.mxu1 %v8505_v35 }
 0x722   :  { %4989 = vmatpush3.bf16.msra.mxu1 %v6268_v50 }
 0x723   :  { %4990 = vmatprep.subr.bf16.mxu1 %v8505_v35 }
 0x726   :  { %4991 = vmatpush3.bf16.msra.mxu1 %v6356_v2 }
 0x727   :  { %4992 = vmatprep.subr.bf16.mxu1 %v8505_v35 }
 0x72a   :  { %4993 = vmatpush3.bf16.msra.mxu1 %v6363_v3 }
 0x72b   :  { %4994 = vmatprep.subr.bf16.mxu1 %v8505_v35 }
 0x72e   :  { %4995 = vmatpush3.bf16.msra.mxu1 %v6370_v6 }
 0x72f   :  { %4996 = vmatprep.subr.bf16.mxu1 %v8505_v35 }
 0x732   :  { %4997 = vmatpush3.bf16.msra.mxu1 %v6377_v7  ;;  %v6919_v7 = vld [vmem:[%s8308_s1 + $0x180] sm:$0xff]  }
 0x733   :  { %4224 = vmatprep.subr.bf16.mxu1 %v6507_v59 }
 0x7e8   :  { %v1740_v51 = vpop.f32.mrb[36].mxu1 }
 0x7e9   :  { %v1741_v41 = vadd.f32 %v6276_v53, %v1740_v51  ;;  %v4940_v45 = vpop.f32.mrb[37].mxu1  ;;  %v8554_v53 = vld [vmem:[#allocation3_spill] sm:$0xff]  ;;  %v8560_v51 = vld [vmem:[#allocation9_spill] sm:$0xff] }
 0x7ea   :  { %v1743_v47 = vpop.f32.mrb[38].mxu1  ;;  %v8561_v45 = vld [vmem:[#allocation10_spill] sm:$0xff] }
 0x7eb   :  { %v1746_v50 = vpack.c.bf16 %v1741_v41, %v1741_v41  ;;  %v4941_v2 = vpop.f32.mrb[39].mxu1  ;;  %v8562_v47 = vld [vmem:[#allocation11_spill] sm:$0xff] }
 0x7ec   :  { %v8563_v2 = vld [vmem:[#allocation12_spill] sm:$0xff] }
 0x7ed   :  { %4959 = vmatmul.mubr.bf16.vlgmr.msra.gmra.mrb[36].mxu0 %v1746_v50 }
 0x7ee   :  { %4963 = vmatpush3.bf16.msra.mxu0 %v6282_v62  ;;  %4978 = vmatprep.mubr.msk.bf16.mxu0 %vm5753_vm0, %v8505_v35  ;;  %v8555_v62 = vld [vmem:[#allocation4_spill] sm:$0xff] }
 0x7ef   :  { %4964 = vmatprep.subr.bf16.mxu0 %v8505_v35 }
 0x7f2   :  { %4965 = vmatpush3.bf16.msra.mxu0 %v6288_v22  ;;  %v8556_v22 = vld [vmem:[#allocation5_spill] sm:$0xff] }
 0x7f3   :  { %4966 = vmatprep.subr.bf16.mxu0 %v8505_v35 }
 0x7f6   :  { %4967 = vmatpush3.bf16.msra.mxu0 %v6297_v28  ;;  %v6902_v28 = vld [vmem:[%s8308_s1 + $0xb8] sm:$0xff]  }
 0x7f7   :  { %4968 = vmatprep.subr.bf16.mxu0 %v8505_v35 }
 0x7fa   :  { %4969 = vmatpush3.bf16.msra.mxu0 %v6304_v29  ;;  %v3902_v29 = vld [vmem:[%s8309_s0 + $0x15] sm:$0x7f] }
 0x7fb   :  { %4970 = vmatprep.subr.bf16.mxu0 %v8505_v35 }
 0x7fe   :  { %4971 = vmatpush3.bf16.msra.mxu0 %v6311_v57  ;;  %v1880_v57 = vrot.slane %v3902_v29, %v5982_v34 }
 0x7ff   :  { %4972 = vmatprep.subr.bf16.mxu0 %v8505_v35 }
 0x802   :  { %4973 = vmatpush3.bf16.msra.mxu0 %v6318_v49  ;;  %v1888_v49 = vcombine.high %v1880_v57, %v1880_v57 }
 0x803   :  { %4974 = vmatprep.subr.bf16.mxu0 %v8505_v35 }
 0x806   :  { %4975 = vmatpush3.bf16.msra.mxu0 %v6325_v52  ;;  %v1910_v52 = vrot.slane %v1888_v49, %v5982_v34  ;;  %v8566_v49 = vld [vmem:[#allocation15_spill] sm:$0xff] }
 0x807   :  { %4976 = vmatprep.subr.bf16.mxu0 %v8505_v35 }
 0x808   :  { %v1920_v3 = vcombine.high %v1910_v52, %v1910_v52 }
 0x80a   :  { %4977 = vmatpush3.bf16.msra.mxu0 %v6332_v61  ;;  %v6912_v61 = vrot.slane %v1880_v57, %v5982_v34  ;;  %v8565_v57 = vld [vmem:[#allocation14_spill] sm:$0xff] }
 0x80b   :  { %4246 = vmatprep.subr.bf16.mxu0 %v6531_v20 }
 0x80c   :  { %v1918_v6 = vcombine.high %v6912_v61, %v6912_v61 }
 0x80d   :  { %4979 = vmatmul.mubr.bf16.vlgmr.msra.gmra.mrb[36].mxu0 %v6664_v17  ;;  %v1873_v17 = vcombine.high %v3902_v29, %v3902_v29  ;;  %v8564_v29 = vld [vmem:[#allocation13_spill] sm:$0xff] }
 0x80e   :  { %4247 = vmatpush3.bf16.msra.mxu0 %v6538_v24  ;;  %2002 = vmatprep.mubr.bf16.mxu0 %v1920_v3  ;;  %v8568_v3 = vld [vmem:[#allocation17_spill] sm:$0xff] }
 0x80f   :  { %4248 = vmatprep.subr.bf16.mxu0 %v6544_v27  ;;  %v1887_v38 = vrot.slane %v1873_v17, %v5982_v34  ;;  %v8570_v17 = vld [vmem:[#allocation19_spill] sm:$0xff] }
 0x811   :  { %v6927_v39 = vrot.slane %v1887_v38, %v5982_v34  ;;  %v1889_v41 = vcombine.high %v1887_v38, %v1887_v38  ;;  %v8571_v38 = vld [vmem:[#allocation20_spill] sm:$0xff] }
 0x812   :  { %4249 = vmatpush3.bf16.msra.mxu0 %v6550_v55 }
 0x813   :  { %4250 = vmatprep.subr.bf16.mxu0 %v6556_v23  ;;  %v1919_v42 = vcombine.high %v6927_v39, %v6927_v39  ;;  %v1917_v50 = vrot.slane %v1889_v41, %v5982_v34  ;;  %v7076_v41 = vld [vmem:[%s8311_s5 + $0x8] sm:$0xff]  }
 0x814   :  { %8580 = vst [vmem:[#allocation5_spill] sm:$0xff] %v7076_v41 }
 0x816   :  { %4251 = vmatpush3.bf16.msra.mxu0 %v6562_v56 }
 0x817   :  { %4252 = vmatprep.subr.bf16.mxu0 %v6568_v63 }
 0x81a   :  { %4253 = vmatpush3.bf16.msra.mxu0 %v6574_v21 }
 0x81b   :  { %4254 = vmatprep.subr.bf16.mxu0 %v6580_v4 }
 0x81e   :  { %4255 = vmatpush3.bf16.msra.mxu0 %v6586_v5 }
 0x81f   :  { %4256 = vmatprep.subr.bf16.mxu0 %v6592_v8 }
 0x822   :  { %4257 = vmatpush3.bf16.msra.mxu0 %v6598_v12 }
 0x823   :  { %4258 = vmatprep.subr.bf16.mxu0 %v8554_v53 }
 0x826   :  { %4259 = vmatpush3.bf16.msra.mxu0 %v8555_v62 }
 0x827   :  { %4260 = vmatprep.subr.bf16.mxu0 %v8556_v22 }
 0x82a   :  { %4261 = vmatpush3.bf16.msra.mxu0 %v6902_v28 }
 0x82b   :  { %5002 = vmatprep.subr.bf16.mxu0 %v8505_v35 }
 0x82d   :  { %2003 = vmatmul.mubr.bf16.vlgmr.msra.gmra.mrb[40].mxu0 %v1918_v6  ;;  %v8569_v6 = vld [vmem:[#allocation18_spill] sm:$0xff] }
 0x82e   :  { %5003 = vmatpush3.bf16.msra.mxu0 %v6919_v7  ;;  %5004 = vmatprep.mubr.msk.bf16.mxu0 %vm5753_vm0, %v8505_v35 }
 0x82f   :  { %5008 = vmatprep.subr.bf16.mxu0 %v8505_v35 }
 0x835   :  { %5005 = vmatmul.mubr.msk.bf16.vlgmr.msra.gmra.mrb[44].mxu0 %vm558_vm1, %v1919_v42  ;;  %v7029_v42 = vld [vmem:[%s8308_s1 + $0x168] sm:$0xff]  }
 0x836   :  { %5009 = vmatpush3.bf16.msra.mxu0 %v6935_v43  ;;  %5024 = vmatprep.mubr.msk.bf16.mxu0 %vm5753_vm0, %v8505_v35  ;;  %8573 = vst [vmem:[#allocation22_spill] sm:$0xff] %v7029_v42 }
 0x837   :  { %5010 = vmatprep.subr.bf16.mxu0 %v8505_v35 }
 0x83a   :  { %5011 = vmatpush3.bf16.msra.mxu0 %v6944_v13 }
 0x83b   :  { %5012 = vmatprep.subr.bf16.mxu0 %v8505_v35 }
 0x83e   :  { %5013 = vmatpush3.bf16.msra.mxu0 %v6951_v37 }
 0x83f   :  { %5014 = vmatprep.subr.bf16.mxu0 %v8505_v35 }
 0x842   :  { %5015 = vmatpush3.bf16.msra.mxu0 %v6958_v15 }
 0x843   :  { %5016 = vmatprep.subr.bf16.mxu0 %v8505_v35 }
 0x846   :  { %5017 = vmatpush3.bf16.msra.mxu0 %v6965_v25 }
 0x847   :  { %5018 = vmatprep.subr.bf16.mxu0 %v8505_v35 }
 0x84a   :  { %5019 = vmatpush3.bf16.msra.mxu0 %v6972_v30 }
 0x84b   :  { %5020 = vmatprep.subr.bf16.mxu0 %v8505_v35 }
 0x84e   :  { %5021 = vmatpush3.bf16.msra.mxu0 %v6979_v10 }
 0x84f   :  { %5022 = vmatprep.subr.bf16.mxu0 %v8505_v35 }
 0x852   :  { %5023 = vmatpush3.bf16.msra.mxu0 %v6986_v11 }
 0x853   :  { %5068 = vmatprep.subr.bf16.mxu0 %v8505_v35 }
 0x8e0   :  { %v1821_v14 = vpop.f32.mrb[36].mxu0 }
 0x8e1   :  { %v5434_v18 = vadd.f32 %v6419_v36, %v1821_v14  ;;  %v4980_v19 = vpop.f32.mrb[37].mxu0  ;;  %v8557_v36 = vld [vmem:[#allocation6_spill] sm:$0xff]  ;;  %v7035_v14 = vld [vmem:[%s8308_s1 + $0x128] sm:$0xff]  }
 0x8e2   :  { %v1824_v0 = vpop.f32.mrb[38].mxu0  ;;  %8574 = vst [vmem:[#allocation23_spill] sm:$0xff] %v7035_v14  ;;  %v7047_v19 = vld [vmem:[%s8308_s1 + $0x130] sm:$0xff]  }
 0x8e3   :  { %5569 = vtanh.f32 %v5434_v18  ;;  %v4981_v26 = vpop.f32.mrb[39].mxu0  ;;  %v7041_v18 = vld [vmem:[%s8308_s1 + $0x170] sm:$0xff]   ;;  %8576 = vst [vmem:[#allocation25_spill] sm:$0xff] %v7047_v19  ;;  %v7053_v0 = vld [vmem:[%s8308_s1 + $0x178] sm:$0xff]  }
 0x8e4   :  { %8575 = vst [vmem:[#allocation24_spill] sm:$0xff] %v7041_v18  ;;  %8577 = vst [vmem:[#allocation26_spill] sm:$0xff] %v7053_v0  ;;  %v7059_v26 = vld [vmem:[%s8308_s1 + $0x138] sm:$0xff]  }
 0x8e5   :  { %8578 = vst [vmem:[#allocation3_spill] sm:$0xff] %v7059_v26 }
 0x8ed   :  { %v5570_v31 = vpop.eup %5569 }
 0x8ee   :  { %v6991_v58 = vpack.c.bf16 %v5570_v31, %v5570_v31  ;;  %v7067_v31 = vld [vmem:[%s8311_s5] sm:$0xff]  }
 0x8ef   :  { %8579 = vst [vmem:[#allocation4_spill] sm:$0xff] %v7067_v31 }
 0x8f0   :  { %4999 = vmatmul.mubr.bf16.vlgmr.msra.gmra.mrb[40].mxu1 %v6991_v58 }
 0x8f1   :  { %4225 = vmatpush3.bf16.msra.mxu1 %v6670_v44  ;;  %1962 = vmatprep.mubr.bf16.mxu1 %v1910_v52  ;;  %v8567_v52 = vld [vmem:[#allocation16_spill] sm:$0xff] }
 0x8f2   :  { %4226 = vmatprep.subr.bf16.mxu1 %v6676_v46 }
 0x8f5   :  { %4227 = vmatpush3.bf16.msra.mxu1 %v6682_v48 }
 0x8f6   :  { %4228 = vmatprep.subr.bf16.mxu1 %v6688_v32 }
 0x8f9   :  { %4229 = vmatpush3.bf16.msra.mxu1 %v6694_v54 }
 0x8fa   :  { %4230 = vmatprep.subr.bf16.mxu1 %v6700_v9 }
 0x8fd   :  { %4231 = vmatpush3.bf16.msra.mxu1 %v6706_v40 }
 0x8fe   :  { %4232 = vmatprep.subr.bf16.mxu1 %v6712_v1 }
 0x901   :  { %4233 = vmatpush3.bf16.msra.mxu1 %v6718_v60 }
 0x902   :  { %4234 = vmatprep.subr.bf16.mxu1 %v8557_v36 }
 0x905   :  { %4235 = vmatpush3.bf16.msra.mxu1 %v8558_v16 }
 0x906   :  { %4236 = vmatprep.subr.bf16.mxu1 %v8559_v33 }
 0x909   :  { %4237 = vmatpush3.bf16.msra.mxu1 %v8560_v51 }
 0x90a   :  { %4238 = vmatprep.subr.bf16.mxu1 %v8561_v45 }
 0x90d   :  { %4239 = vmatpush3.bf16.msra.mxu1 %v8562_v47 }
 0x90e   :  { %4268 = vmatprep.subr.bf16.mxu1 %v8563_v2 }
 0x910   :  { %1963 = vmatmul.mubr.bf16.vlgmr.msra.gmra.mrb[44].mxu1 %v6912_v61  ;;  %v7023_v61 = vld [vmem:[%s8308_s1 + $0x120] sm:$0xff]  }
 0x911   :  { %4269 = vmatpush3.bf16.msra.mxu1 %v8564_v29  ;;  %2042 = vmatprep.mubr.bf16.mxu1 %v1917_v50  ;;  %8572 = vst [vmem:[#allocation21_spill] sm:$0xff] %v7023_v61  ;;  %v7090_v50 = vld [vmem:[%s8311_s5 + $0x18] sm:$0xff]  }
 0x912   :  { %4270 = vmatprep.subr.bf16.mxu1 %v8565_v57  ;;  %8582 = vst [vmem:[#allocation7_spill] sm:$0xff] %v7090_v50 }
 0x915   :  { %4271 = vmatpush3.bf16.msra.mxu1 %v8566_v49 }
 0x916   :  { %4272 = vmatprep.subr.bf16.mxu1 %v8567_v52 }
 0x919   :  { %4273 = vmatpush3.bf16.msra.mxu1 %v8568_v3 }
 0x91a   :  { %4274 = vmatprep.subr.bf16.mxu1 %v8569_v6 }
 0x91d   :  { %4275 = vmatpush3.bf16.msra.mxu1 %v8570_v17 }
 0x91e   :  { %4276 = vmatprep.subr.bf16.mxu1 %v8571_v38  ;;  %v8587_v38 = vld [vmem:[#allocation2_spill] sm:$0xff] }
 0x921   :  { %4277 = vmatpush3.bf16.msra.mxu1 %v7023_v61 }
 0x922   :  { %4278 = vmatprep.subr.bf16.mxu1 %v7029_v42 }
 0x925   :  { %4279 = vmatpush3.bf16.msra.mxu1 %v7035_v14 }
 0x926   :  { %4280 = vmatprep.subr.bf16.mxu1 %v7041_v18 }
 0x929   :  { %4281 = vmatpush3.bf16.msra.mxu1 %v7047_v19 }
 0x92a   :  { %4282 = vmatprep.subr.bf16.mxu1 %v7053_v0 }
 0x92d   :  { %4283 = vmatpush3.bf16.msra.mxu1 %v7059_v26 }
 0x92e   :  { %5028 = vmatprep.subr.bf16.mxu1 %v8505_v35 }
 0x930   :  { %2043 = vmatmul.mubr.bf16.vlgmr.msra.gmra.mrb[48].mxu1 %v6927_v39  ;;  %v7083_v39 = vld [vmem:[%s8311_s5 + $0x10] sm:$0xff]  }
 0x931   :  { %5029 = vmatpush3.bf16.msra.mxu1 %v7067_v31  ;;  %5044 = vmatprep.mubr.msk.bf16.mxu1 %vm5753_vm0, %v8505_v35  ;;  %8581 = vst [vmem:[#allocation6_spill] sm:$0xff] %v7083_v39 }
 0x932   :  { %5030 = vmatprep.subr.bf16.mxu1 %v8505_v35 }
 0x935   :  { %5031 = vmatpush3.bf16.msra.mxu1 %v7076_v41  ;;  %v7097_v41 = vld [vmem:[%s8311_s5 + $0x20] sm:$0xff]  }
 0x936   :  { %5032 = vmatprep.subr.bf16.mxu1 %v8505_v35  ;;  %8583 = vst [vmem:[#allocation8_spill] sm:$0xff] %v7097_v41 }
 0x939   :  { %5033 = vmatpush3.bf16.msra.mxu1 %v7083_v39  ;;  %v7104_v39 = vld [vmem:[%s8311_s5 + $0x28] sm:$0xff]  }
 0x93a   :  { %5034 = vmatprep.subr.bf16.mxu1 %v8505_v35  ;;  %8584 = vst [vmem:[#allocation9_spill] sm:$0xff] %v7104_v39 }
 0x93d   :  { %5035 = vmatpush3.bf16.msra.mxu1 %v7090_v50  ;;  %v7111_v50 = vld [vmem:[%s8311_s5 + $0x30] sm:$0xff]  }
 0x93e   :  { %5036 = vmatprep.subr.bf16.mxu1 %v8505_v35  ;;  %8585 = vst [vmem:[#allocation10_spill] sm:$0xff] %v7111_v50 }
 0x941   :  { %5037 = vmatpush3.bf16.msra.mxu1 %v7097_v41  ;;  %v7118_v41 = vld [vmem:[%s8311_s5 + $0x38] sm:$0xff]  }
 0x942   :  { %5038 = vmatprep.subr.bf16.mxu1 %v8505_v35  ;;  %8586 = vst [vmem:[#allocation11_spill] sm:$0xff] %v7118_v41 }
 0x945   :  { %5039 = vmatpush3.bf16.msra.mxu1 %v7104_v39  ;;  %v4262_v39 = vpop.f32.mrb[40].mxu0 }
 0x946   :  { %5040 = vmatprep.subr.bf16.mxu1 %v8505_v35  ;;  %v4263_v31 = vpop.f32.mrb[41].mxu0 }
 0x947   :  { %v4264_v26 = vadd.f32 %v4263_v31, %v4262_v39  ;;  %v4265_v0 = vpop.f32.mrb[42].mxu0 }
 0x948   :  { %v4266_v19 = vpop.f32.mrb[43].mxu0 }
 0x949   :  { %5041 = vmatpush3.bf16.msra.mxu1 %v7111_v50  ;;  %v2084_v18 = vpop.f32.mrb[44].mxu0 }
 0x94a   :  { %5042 = vmatprep.subr.bf16.mxu1 %v8505_v35  ;;  %v5006_v14 = vpop.f32.mrb[45].mxu0 }
 0x94b   :  { %v2087_v42 = vpop.f32.mrb[46].mxu0 }
 0x94c   :  { %v5007_v50 = vpop.f32.mrb[47].mxu0  ;;  %v7129_v42 = vld [vmem:[%s8312_s2] ss:$0 sm:$0xff] }
 0x94d   :  { %5043 = vmatpush3.bf16.msra.mxu1 %v7118_v41 }
 0x94e   :  { %5048 = vmatprep.subr.bf16.mxu1 %v8505_v35 }
 0x9c3   :  { %v1864_v61 = vpop.f32.mrb[40].mxu1 }
 0x9c4   :  { %v1865_v17 = vadd.f32 %v8587_v38, %v1864_v61  ;;  %v5000_v6 = vpop.f32.mrb[41].mxu1 }
 0x9c5   :  { %v1867_v3 = vpop.f32.mrb[42].mxu1 }
 0x9c6   :  { %3802 = vst [vmem:[%s8318_s10 + $0x4] sm:$0x3] %v1865_v17  ;;  %v5001_v41 = vpop.f32.mrb[43].mxu1 }
 0x9e3   :  { %v4240_v52 = vpop.f32.mrb[44].mxu1 }
 0x9e4   :  { %v4241_v49 = vpop.f32.mrb[45].mxu1 }
 0x9e5   :  { %v4242_v57 = vadd.f32 %v4241_v49, %v4240_v52  ;;  %v4243_v31 = vpop.f32.mrb[46].mxu1  ;;  %v7135_v49 = vld [vmem:[%s8314_s8] sm:$0xff]   ;;  %v7158_v52 = vld [vmem:[%s8314_s8 + $0x18] sm:$0xff]  }
 0x9e6   :  { %v4244_v0 = vpop.f32.mrb[47].mxu1  ;;  %v7179_v31 = vld [vmem:[%s8314_s8 + $0x30] sm:$0xff]  }
 0x9e7   :  { %v1965_v14 = vadd.f32 %v7129_v42, %v4242_v57  ;;  %v7144_v57 = vld [vmem:[%s8314_s8 + $0x8] sm:$0xff]   ;;  %v7186_v0 = vld [vmem:[%s8314_s8 + $0x38] sm:$0xff]  }
 0x9e9   :  { %v2005_v38 = vadd.f32 %v4264_v26, %v1965_v14  ;;  %v7172_v26 = vld [vmem:[%s8314_s8 + $0x28] sm:$0xff]  }
 0xa03   :  { %v4284_v6 = vpop.f32.mrb[48].mxu1 }
 0xa04   :  { %v4285_v3 = vpop.f32.mrb[49].mxu1 }
 0xa05   :  { %v4286_v61 = vadd.f32 %v4285_v3, %v4284_v6  ;;  %v4287_v19 = vpop.f32.mrb[50].mxu1 }
 0xa06   :  { %v4288_v39 = vpop.f32.mrb[51].mxu1 }
 0xa07   :  { %v2045_v17 = vadd.f32 %v4286_v61, %v2005_v38  ;;  %v7193_v38 = vld [vmem:[%s8315_s4] ss:$0 sm:$0xff] }
 0xa09   :  { %v2085_v41 = vadd.f32 %v2084_v18, %v2045_v17  ;;  %v7165_v18 = vld [vmem:[%s8314_s8 + $0x20] sm:$0xff]  }
 0xa0a   :  { %v7199_v17 = vld [vmem:[%s8313_s7] sm:$0xff]  }
 0xa0b   :  { %v2090_v50 = vmax.f32 %v2085_v41, 0.0  ;;  %v7215_v41 = vld [vmem:[%s8313_s7 + $0x10] sm:$0xff]  }
 0xa0d   :  { %v2091_v29 = vpack.c.bf16 %v2090_v50, %v2090_v50  ;;  %v7222_v50 = vld [vmem:[%s8313_s7 + $0x18] sm:$0xff]  }
 0xa0f   :  { %5025 = vmatmul.mubr.bf16.vlgmr.msra.gmra.mrb[48].mxu0 %v2091_v29  ;;  %v7151_v29 = vld [vmem:[%s8314_s8 + $0x10] sm:$0xff]  }
 0xa10   :  { %5069 = vmatpush3.bf16.msra.mxu0 %v7135_v49  ;;  %5084 = vmatprep.mubr.msk.bf16.mxu0 %vm5753_vm0, %v8505_v35 }
 0xa11   :  { %5070 = vmatprep.subr.bf16.mxu0 %v8505_v35 }
 0xa14   :  { %5071 = vmatpush3.bf16.msra.mxu0 %v7144_v57 }
 0xa15   :  { %5072 = vmatprep.subr.bf16.mxu0 %v8505_v35 }
 0xa18   :  { %5073 = vmatpush3.bf16.msra.mxu0 %v7151_v29 }
 0xa19   :  { %5074 = vmatprep.subr.bf16.mxu0 %v8505_v35 }
 0xa1c   :  { %5075 = vmatpush3.bf16.msra.mxu0 %v7158_v52 }
 0xa1d   :  { %5076 = vmatprep.subr.bf16.mxu0 %v8505_v35 }
 0xa20   :  { %5077 = vmatpush3.bf16.msra.mxu0 %v7165_v18 }
 0xa21   :  { %5078 = vmatprep.subr.bf16.mxu0 %v8505_v35 }
 0xa24   :  { %5079 = vmatpush3.bf16.msra.mxu0 %v7172_v26 }
 0xa25   :  { %5080 = vmatprep.subr.bf16.mxu0 %v8505_v35 }
 0xa28   :  { %5081 = vmatpush3.bf16.msra.mxu0 %v7179_v31 }
 0xa29   :  { %5082 = vmatprep.subr.bf16.mxu0 %v8505_v35 }
 0xa2c   :  { %5083 = vmatpush3.bf16.msra.mxu0 %v7186_v0 }
 0xa2d   :  { %4328 = vmatprep.subr.bf16.mxu0 %v6507_v59  ;;  %v7208_v59 = vld [vmem:[%s8313_s7 + $0x8] sm:$0xff]  }
 0xae2   :  { %v2126_v14 = vpop.f32.mrb[48].mxu0 }
 0xae3   :  { %v2127_v6 = vadd.f32 %v7193_v38, %v2126_v14  ;;  %v5026_v3 = vpop.f32.mrb[49].mxu0  ;;  %v7229_v14 = vld [vmem:[%s8313_s7 + $0x20] sm:$0xff]  }
 0xae4   :  { %v2129_v61 = vpop.f32.mrb[50].mxu0  ;;  %v7243_v3 = vld [vmem:[%s8313_s7 + $0x30] sm:$0xff]  }
 0xae5   :  { %v2132_v19 = vpack.c.bf16 %v2127_v6, %v2127_v6  ;;  %v5027_v39 = vpop.f32.mrb[51].mxu0  ;;  %v7236_v6 = vld [vmem:[%s8313_s7 + $0x28] sm:$0xff]   ;;  %v7250_v61 = vld [vmem:[%s8313_s7 + $0x38] sm:$0xff]  }
 0xae7   :  { %5045 = vmatmul.mubr.bf16.vlgmr.msra.gmra.mrb[52].mxu1 %v2132_v19 }
 0xae8   :  { %5049 = vmatpush3.bf16.msra.mxu1 %v7199_v17  ;;  %5064 = vmatprep.mubr.msk.bf16.mxu1 %vm5753_vm0, %v8505_v35 }
 0xae9   :  { %5050 = vmatprep.subr.bf16.mxu1 %v8505_v35 }
 0xaec   :  { %5051 = vmatpush3.bf16.msra.mxu1 %v7208_v59 }
 0xaed   :  { %5052 = vmatprep.subr.bf16.mxu1 %v8505_v35 }
 0xaf0   :  { %5053 = vmatpush3.bf16.msra.mxu1 %v7215_v41 }
 0xaf1   :  { %5054 = vmatprep.subr.bf16.mxu1 %v8505_v35 }
 0xaf4   :  { %5055 = vmatpush3.bf16.msra.mxu1 %v7222_v50 }
 0xaf5   :  { %5056 = vmatprep.subr.bf16.mxu1 %v8505_v35 }
 0xaf8   :  { %5057 = vmatpush3.bf16.msra.mxu1 %v7229_v14 }
 0xaf9   :  { %5058 = vmatprep.subr.bf16.mxu1 %v8505_v35 }
 0xafc   :  { %5059 = vmatpush3.bf16.msra.mxu1 %v7236_v6 }
 0xafd   :  { %5060 = vmatprep.subr.bf16.mxu1 %v8505_v35 }
 0xb00   :  { %5061 = vmatpush3.bf16.msra.mxu1 %v7243_v3 }
 0xb01   :  { %5062 = vmatprep.subr.bf16.mxu1 %v8505_v35 }
 0xb04   :  { %5063 = vmatpush3.bf16.msra.mxu1 %v7250_v61 }
 0xb05   :  { %4350 = vmatprep.subr.bf16.mxu1 %v6531_v20  ;;  %v3904_v20 = vld [vmem:[%s8309_s0 + $0x1c] sm:$0x7f] }
 0xb07   :  { %5065 = vmatmul.mubr.bf16.vlgmr.msra.gmra.mrb[52].mxu1 %v6991_v58 }
 0xb08   :  { %4351 = vmatpush3.bf16.msra.mxu1 %v6538_v24  ;;  %v2266_v24 = vrot.slane %v3904_v20, %v5982_v34 }
 0xb09   :  { %4352 = vmatprep.subr.bf16.mxu1 %v6544_v27 }
 0xb0a   :  { %v2274_v27 = vcombine.high %v2266_v24, %v2266_v24 }
 0xb0c   :  { %4353 = vmatpush3.bf16.msra.mxu1 %v6550_v55  ;;  %v2296_v55 = vrot.slane %v2274_v27, %v5982_v34  ;;  %v8603_v27 = vld [vmem:[#allocation4_spill] sm:$0xff] }
 0xb0d   :  { %4354 = vmatprep.subr.bf16.mxu1 %v6556_v23  ;;  %v2282_v23 = vrot.slane %v2266_v24, %v5982_v34  ;;  %v8602_v24 = vld [vmem:[#allocation3_spill] sm:$0xff] }
 0xb10   :  { %4355 = vmatpush3.bf16.msra.mxu1 %v6562_v56  ;;  %v2306_v56 = vcombine.high %v2296_v55, %v2296_v55 }
 0xb11   :  { %4356 = vmatprep.subr.bf16.mxu1 %v6568_v63  ;;  %v2304_v63 = vcombine.high %v2282_v23, %v2282_v23 }
 0xb12   :  { %2388 = vmatprep.mubr.bf16.mxu1 %v2306_v56  ;;  %v8606_v56 = vld [vmem:[#allocation7_spill] sm:$0xff] }
 0xb14   :  { %4357 = vmatpush3.bf16.msra.mxu1 %v6574_v21  ;;  %v2259_v21 = vcombine.high %v3904_v20, %v3904_v20 }
 0xb15   :  { %4358 = vmatprep.subr.bf16.mxu1 %v6580_v4 }
 0xb16   :  { %v2273_v4 = vrot.slane %v2259_v21, %v5982_v34  ;;  %v8608_v21 = vld [vmem:[#allocation9_spill] sm:$0xff] }
 0xb18   :  { %4359 = vmatpush3.bf16.msra.mxu1 %v6586_v5  ;;  %v7283_v5 = vrot.slane %v2273_v4, %v5982_v34 }
 0xb19   :  { %4360 = vmatprep.subr.bf16.mxu1 %v6592_v8 }
 0xb1a   :  { %v2305_v8 = vcombine.high %v7283_v5, %v7283_v5 }
 0xb1c   :  { %4361 = vmatpush3.bf16.msra.mxu1 %v6598_v12 }
 0xb1d   :  { %4362 = vmatprep.subr.bf16.mxu1 %v8554_v53  ;;  %v7309_v53 = vld [vmem:[%s8316_s6] ss:$0 sm:$0xff] }
 0xb20   :  { %4363 = vmatpush3.bf16.msra.mxu1 %v8555_v62 }
 0xb21   :  { %4364 = vmatprep.subr.bf16.mxu1 %v8556_v22 }
 0xb24   :  { %4365 = vmatpush3.bf16.msra.mxu1 %v6902_v28 }
 0xb25   :  { %5088 = vmatprep.subr.bf16.mxu1 %v8505_v35 }
 0xb27   :  { %2389 = vmatmul.mubr.bf16.vlgmr.msra.gmra.mrb[56].mxu1 %v2304_v63  ;;  %v8607_v63 = vld [vmem:[#allocation8_spill] sm:$0xff] }
 0xb28   :  { %5089 = vmatpush3.bf16.msra.mxu1 %v6919_v7  ;;  %5090 = vmatprep.mubr.msk.bf16.mxu1 %vm5753_vm0, %v8505_v35 }
 0xb29   :  { %5094 = vmatprep.subr.bf16.mxu1 %v8505_v35 }
 0xb2f   :  { %5091 = vmatmul.mubr.msk.bf16.vlgmr.msra.gmra.mrb[60].mxu1 %vm558_vm1, %v2305_v8 }
 0xb30   :  { %5095 = vmatpush3.bf16.msra.mxu1 %v6935_v43  ;;  %5110 = vmatprep.mubr.msk.bf16.mxu1 %vm5753_vm0, %v8505_v35 }
 0xb31   :  { %5096 = vmatprep.subr.bf16.mxu1 %v8505_v35 }
 0xb34   :  { %5097 = vmatpush3.bf16.msra.mxu1 %v6944_v13 }
 0xb35   :  { %5098 = vmatprep.subr.bf16.mxu1 %v8505_v35 }
 0xb38   :  { %5099 = vmatpush3.bf16.msra.mxu1 %v6951_v37 }
 0xb39   :  { %5100 = vmatprep.subr.bf16.mxu1 %v8505_v35 }
 0xb3c   :  { %5101 = vmatpush3.bf16.msra.mxu1 %v6958_v15 }
 0xb3d   :  { %5102 = vmatprep.subr.bf16.mxu1 %v8505_v35 }
 0xb40   :  { %5103 = vmatpush3.bf16.msra.mxu1 %v6965_v25 }
 0xb41   :  { %5104 = vmatprep.subr.bf16.mxu1 %v8505_v35 }
 0xb44   :  { %5105 = vmatpush3.bf16.msra.mxu1 %v6972_v30 }
 0xb45   :  { %5106 = vmatprep.subr.bf16.mxu1 %v8505_v35 }
 0xb48   :  { %5107 = vmatpush3.bf16.msra.mxu1 %v6979_v10 }
 0xb49   :  { %5108 = vmatprep.subr.bf16.mxu1 %v8505_v35 }
 0xb4c   :  { %5109 = vmatpush3.bf16.msra.mxu1 %v6986_v11 }
 0xb4d   :  { %5154 = vmatprep.subr.bf16.mxu1 %v8505_v35 }
 0xbda   :  { %v2207_v12 = vpop.f32.mrb[52].mxu1 }
 0xbdb   :  { %v5435_v62 = vadd.f32 %v7309_v53, %v2207_v12  ;;  %v5066_v22 = vpop.f32.mrb[53].mxu1 }
 0xbdc   :  { %v2210_v58 = vpop.f32.mrb[54].mxu1 }
 0xbdd   :  { %5571 = vtanh.f32 %v5435_v62  ;;  %v5067_v19 = vpop.f32.mrb[55].mxu1 }
 0xbe7   :  { %v5572_v39 = vpop.eup %5571 }
 0xbe8   :  { %v7312_v20 = vpack.c.bf16 %v5572_v39, %v5572_v39 }
 0xbea   :  { %5085 = vmatmul.mubr.bf16.vlgmr.msra.gmra.mrb[52].mxu0 %v7312_v20 }
 0xbeb   :  { %4329 = vmatpush3.bf16.msra.mxu0 %v6670_v44  ;;  %2348 = vmatprep.mubr.bf16.mxu0 %v2296_v55  ;;  %v2275_v44 = vcombine.high %v2273_v4, %v2273_v4  ;;  %v8604_v55 = vld [vmem:[#allocation5_spill] sm:$0xff]  ;;  %v8609_v4 = vld [vmem:[#allocation10_spill] sm:$0xff] }
 0xbec   :  { %4330 = vmatprep.subr.bf16.mxu0 %v6676_v46 }
 0xbed   :  { %v2303_v46 = vrot.slane %v2275_v44, %v5982_v34 }
 0xbef   :  { %4331 = vmatpush3.bf16.msra.mxu0 %v6682_v48  ;;  %v8588_v48 = vld [vmem:[#allocation13_spill] sm:$0xff] }
 0xbf0   :  { %4332 = vmatprep.subr.bf16.mxu0 %v6688_v32  ;;  %v8589_v32 = vld [vmem:[#allocation14_spill] sm:$0xff] }
 0xbf3   :  { %4333 = vmatpush3.bf16.msra.mxu0 %v6694_v54  ;;  %v8590_v54 = vld [vmem:[#allocation15_spill] sm:$0xff] }
 0xbf4   :  { %4334 = vmatprep.subr.bf16.mxu0 %v6700_v9  ;;  %v8591_v9 = vld [vmem:[#allocation16_spill] sm:$0xff] }
 0xbf7   :  { %4335 = vmatpush3.bf16.msra.mxu0 %v6706_v40  ;;  %v8592_v40 = vld [vmem:[#allocation17_spill] sm:$0xff] }
 0xbf8   :  { %4336 = vmatprep.subr.bf16.mxu0 %v6712_v1  ;;  %v8593_v1 = vld [vmem:[#allocation18_spill] sm:$0xff] }
 0xbfa   :  { %v4366_v8 = vpop.f32.mrb[56].mxu1 }
 0xbfb   :  { %4337 = vmatpush3.bf16.msra.mxu0 %v6718_v60  ;;  %v8594_v60 = vld [vmem:[#allocation19_spill] sm:$0xff]  ;;  %v4367_v12 = vpop.f32.mrb[57].mxu1 }
 0xbfc   :  { %4338 = vmatprep.subr.bf16.mxu0 %v8557_v36  ;;  %v8595_v36 = vld [vmem:[#allocation20_spill] sm:$0xff]  ;;  %v4368_v62 = vadd.f32 %v4367_v12, %v4366_v8  ;;  %v4369_v22 = vpop.f32.mrb[58].mxu1 }
 0xbfd   :  { %v4370_v58 = vpop.f32.mrb[59].mxu1 }
 0xbff   :  { %4339 = vmatpush3.bf16.msra.mxu0 %v8558_v16  ;;  %v8596_v16 = vld [vmem:[#allocation21_spill] sm:$0xff] }
 0xc00   :  { %4340 = vmatprep.subr.bf16.mxu0 %v8559_v33  ;;  %v8597_v33 = vld [vmem:[#allocation22_spill] sm:$0xff] }
 0xc02   :  { %v2470_v19 = vpop.f32.mrb[60].mxu1 }
 0xc03   :  { %4341 = vmatpush3.bf16.msra.mxu0 %v8560_v51  ;;  %v8598_v51 = vld [vmem:[#allocation23_spill] sm:$0xff]  ;;  %v5092_v39 = vpop.f32.mrb[61].mxu1 }
 0xc04   :  { %4342 = vmatprep.subr.bf16.mxu0 %v8561_v45  ;;  %v8599_v45 = vld [vmem:[#allocation24_spill] sm:$0xff]  ;;  %v2473_v44 = vpop.f32.mrb[62].mxu1 }
 0xc07   :  { %4343 = vmatpush3.bf16.msra.mxu0 %v8562_v47  ;;  %v8600_v47 = vld [vmem:[#allocation25_spill] sm:$0xff] }
 0xc08   :  { %4372 = vmatprep.subr.bf16.mxu0 %v8563_v2  ;;  %v8601_v2 = vld [vmem:[#allocation26_spill] sm:$0xff] }
 0xc0a   :  { %2349 = vmatmul.mubr.bf16.vlgmr.msra.gmra.mrb[56].mxu0 %v2282_v23  ;;  %v8605_v23 = vld [vmem:[#allocation6_spill] sm:$0xff] }
 0xc0b   :  { %4373 = vmatpush3.bf16.msra.mxu0 %v8588_v48  ;;  %2428 = vmatprep.mubr.bf16.mxu0 %v2303_v46  ;;  %v5093_v46 = vpop.f32.mrb[63].mxu1 }
 0xc0c   :  { %4374 = vmatprep.subr.bf16.mxu0 %v8589_v32  ;;  %v7370_v32 = vld [vmem:[%s8317_s9] ss:$0 sm:$0xff] }
 0xc0d   :  { %8611 = vst [vmem:[#allocation12_spill] sm:$0xff] %v7370_v32 }
 0xc0f   :  { %4375 = vmatpush3.bf16.msra.mxu0 %v8590_v54 }
 0xc10   :  { %4376 = vmatprep.subr.bf16.mxu0 %v8591_v9 }
 0xc13   :  { %4377 = vmatpush3.bf16.msra.mxu0 %v8592_v40 }
 0xc14   :  { %4378 = vmatprep.subr.bf16.mxu0 %v8593_v1 }
 0xc17   :  { %4379 = vmatpush3.bf16.msra.mxu0 %v8594_v60 }
 0xc18   :  { %4380 = vmatprep.subr.bf16.mxu0 %v8595_v36 }
 0xc1b   :  { %4381 = vmatpush3.bf16.msra.mxu0 %v8596_v16 }
 0xc1c   :  { %4382 = vmatprep.subr.bf16.mxu0 %v8597_v33 }
 0xc1f   :  { %4383 = vmatpush3.bf16.msra.mxu0 %v8598_v51 }
 0xc20   :  { %4384 = vmatprep.subr.bf16.mxu0 %v8599_v45 }
 0xc23   :  { %4385 = vmatpush3.bf16.msra.mxu0 %v8600_v47 }
 0xc24   :  { %4386 = vmatprep.subr.bf16.mxu0 %v8601_v2 }
 0xc27   :  { %4387 = vmatpush3.bf16.msra.mxu0 %v8602_v24 }
 0xc28   :  { %5114 = vmatprep.subr.bf16.mxu0 %v8505_v35 }
 0xc2a   :  { %2429 = vmatmul.mubr.bf16.vlgmr.msra.gmra.mrb[60].mxu0 %v7283_v5  ;;  %v8610_v5 = vld [vmem:[#allocation11_spill] sm:$0xff] }
 0xc2b   :  { %5115 = vmatpush3.bf16.msra.mxu0 %v8603_v27  ;;  %5130 = vmatprep.mubr.msk.bf16.mxu0 %vm5753_vm0, %v8505_v35 }
 0xc2c   :  { %5116 = vmatprep.subr.bf16.mxu0 %v8505_v35 }
 0xc2f   :  { %5117 = vmatpush3.bf16.msra.mxu0 %v8604_v55 }
 0xc30   :  { %5118 = vmatprep.subr.bf16.mxu0 %v8505_v35 }
 0xc33   :  { %5119 = vmatpush3.bf16.msra.mxu0 %v8605_v23 }
 0xc34   :  { %5120 = vmatprep.subr.bf16.mxu0 %v8505_v35 }
 0xc37   :  { %5121 = vmatpush3.bf16.msra.mxu0 %v8606_v56 }
 0xc38   :  { %5122 = vmatprep.subr.bf16.mxu0 %v8505_v35 }
 0xc3b   :  { %5123 = vmatpush3.bf16.msra.mxu0 %v8607_v63 }
 0xc3c   :  { %5124 = vmatprep.subr.bf16.mxu0 %v8505_v35 }
 0xc3f   :  { %5125 = vmatpush3.bf16.msra.mxu0 %v8608_v21 }
 0xc40   :  { %5126 = vmatprep.subr.bf16.mxu0 %v8505_v35 }
 0xc43   :  { %5127 = vmatpush3.bf16.msra.mxu0 %v8609_v4 }
 0xc44   :  { %5128 = vmatprep.subr.bf16.mxu0 %v8505_v35 }
 0xc47   :  { %5129 = vmatpush3.bf16.msra.mxu0 %v8610_v5 }
 0xc48   :  { %5134 = vmatprep.subr.bf16.mxu0 %v8505_v35 }
 0xcbd   :  { %v2250_v48 = vpop.f32.mrb[52].mxu0 }
 0xcbe   :  { %v2251_v54 = vadd.f32 %v7370_v32, %v2250_v48  ;;  %v5086_v9 = vpop.f32.mrb[53].mxu0 }
 0xcbf   :  { %v2253_v40 = vpop.f32.mrb[54].mxu0 }
 0xcc0   :  { %3803 = vst [vmem:[%s8318_s10 + $0x6] sm:$0x3] %v2251_v54  ;;  %v5087_v1 = vpop.f32.mrb[55].mxu0 }
 0xcc1   :  { %v7421_v1 = vld [vmem:[%s8308_s1 + $0xc0] sm:$0xff]  }
 0xcdd   :  { %v4344_v60 = vpop.f32.mrb[56].mxu0 }
 0xcde   :  { %v4345_v36 = vpop.f32.mrb[57].mxu0 }
 0xcdf   :  { %v4346_v8 = vadd.f32 %v4345_v36, %v4344_v60  ;;  %v4347_v12 = vpop.f32.mrb[58].mxu0  ;;  %v7428_v60 = vld [vmem:[%s8308_s1 + $0x80] sm:$0xff]   ;;  %v7434_v36 = vld [vmem:[%s8308_s1 + $0xc8] sm:$0xff]  }
 0xce0   :  { %v4348_v22 = vpop.f32.mrb[59].mxu0  ;;  %v7452_v12 = vld [vmem:[%s8308_s1 + $0x90] sm:$0xff]  }
 0xce1   :  { %v2351_v58 = vadd.f32 %v7129_v42, %v4346_v8  ;;  %v7440_v8 = vld [vmem:[%s8308_s1 + $0x88] sm:$0xff]   ;;  %v7458_v22 = vld [vmem:[%s8308_s1 + $0xd8] sm:$0xff]  }
 0xce3   :  { %v2391_v39 = vadd.f32 %v4368_v62, %v2351_v58  ;;  %v7464_v58 = vld [vmem:[%s8308_s1 + $0x98] sm:$0xff]  }
 0xcfd   :  { %v4388_v44 = vpop.f32.mrb[60].mxu0 }
 0xcfe   :  { %v4389_v46 = vpop.f32.mrb[61].mxu0 }
 0xcff   :  { %v4390_v5 = vadd.f32 %v4389_v46, %v4388_v44  ;;  %v4391_v4 = vpop.f32.mrb[62].mxu0  ;;  %v7476_v44 = vld [vmem:[%s8308_s1 + $0xa0] sm:$0xff]   ;;  %v7482_v46 = vld [vmem:[%s8308_s1 + $0xe8] sm:$0xff]  }
 0xd00   :  { %v4392_v48 = vpop.f32.mrb[63].mxu0 }
 0xd01   :  { %v2431_v9 = vadd.f32 %v4390_v5, %v2391_v39  ;;  %v7470_v39 = vld [vmem:[%s8308_s1 + $0xe0] sm:$0xff]   ;;  %v7488_v48 = vld [vmem:[%s8308_s1 + $0xa8] sm:$0xff]  }
 0xd03   :  { %v2471_v40 = vadd.f32 %v2470_v19, %v2431_v9  ;;  %v7494_v9 = vld [vmem:[%s8308_s1 + $0xf0] sm:$0xff]  }
 0xd04   :  { %8612 = vst [vmem:[#allocation2_spill] sm:$0xff] %v7494_v9 }
 0xd05   :  { %v2476_v32 = vmax.f32 %v2471_v40, 0.0  ;;  %v7500_v40 = vld [vmem:[%s8308_s1 + $0xb0] sm:$0xff]  }
 0xd06   :  { %8613 = vst [vmem:[#allocation13_spill] sm:$0xff] %v7500_v40 }
 0xd07   :  { %v2477_v21 = vpack.c.bf16 %v2476_v32, %v2476_v32 }
 0xd09   :  { %5111 = vmatmul.mubr.bf16.vlgmr.msra.gmra.mrb[64].mxu1 %v2477_v21  ;;  %v7397_v21 = vld [vmem:[%s8308_s1 + $0x40] sm:$0xff]  }
 0xd0a   :  { %5155 = vmatpush3.bf16.msra.mxu1 %v7135_v49  ;;  %5170 = vmatprep.mubr.msk.bf16.mxu1 %vm5753_vm0, %v8505_v35 }
 0xd0b   :  { %5156 = vmatprep.subr.bf16.mxu1 %v8505_v35 }
 0xd0e   :  { %5157 = vmatpush3.bf16.msra.mxu1 %v7144_v57 }
 0xd0f   :  { %5158 = vmatprep.subr.bf16.mxu1 %v8505_v35 }
 0xd12   :  { %5159 = vmatpush3.bf16.msra.mxu1 %v7151_v29 }
 0xd13   :  { %5160 = vmatprep.subr.bf16.mxu1 %v8505_v35 }
 0xd16   :  { %5161 = vmatpush3.bf16.msra.mxu1 %v7158_v52 }
 0xd17   :  { %5162 = vmatprep.subr.bf16.mxu1 %v8505_v35 }
 0xd1a   :  { %5163 = vmatpush3.bf16.msra.mxu1 %v7165_v18 }
 0xd1b   :  { %5164 = vmatprep.subr.bf16.mxu1 %v8505_v35 }
 0xd1e   :  { %5165 = vmatpush3.bf16.msra.mxu1 %v7172_v26 }
 0xd1f   :  { %5166 = vmatprep.subr.bf16.mxu1 %v8505_v35 }
 0xd22   :  { %5167 = vmatpush3.bf16.msra.mxu1 %v7179_v31 }
 0xd23   :  { %5168 = vmatprep.subr.bf16.mxu1 %v8505_v35 }
 0xd26   :  { %5169 = vmatpush3.bf16.msra.mxu1 %v7186_v0 }
 0xd27   :  { %4432 = vmatprep.subr.bf16.mxu1 %v7397_v21 }
 0xddc   :  { %v2512_v4 = vpop.f32.mrb[64].mxu1 }
 0xddd   :  { %v2513_v5 = vadd.f32 %v7193_v38, %v2512_v4  ;;  %v5112_v62 = vpop.f32.mrb[65].mxu1  ;;  %v7506_v4 = vld [vmem:[%s8308_s1 + $0xf8] sm:$0xff]  }
 0xdde   :  { %v2515_v19 = vpop.f32.mrb[66].mxu1  ;;  %8614 = vst [vmem:[#allocation14_spill] sm:$0xff] %v7506_v4 }
 0xddf   :  { %v2518_v32 = vpack.c.bf16 %v2513_v5, %v2513_v5  ;;  %v5113_v54 = vpop.f32.mrb[67].mxu1  ;;  %v3906_v5 = vld [vmem:[%s8309_s0 + $0x23] sm:$0x7f] }
 0xde0   :  { %v2652_v62 = vrot.slane %v3906_v5, %v5982_v34 }
 0xde1   :  { %5131 = vmatmul.mubr.bf16.vlgmr.msra.gmra.mrb[64].mxu0 %v2518_v32 }
 0xde2   :  { %5135 = vmatpush3.bf16.msra.mxu0 %v7199_v17  ;;  %5150 = vmatprep.mubr.msk.bf16.mxu0 %vm5753_vm0, %v8505_v35  ;;  %v2660_v19 = vcombine.high %v2652_v62, %v2652_v62  ;;  %v7517_v54 = vrot.slane %v2652_v62, %v5982_v34 }
 0xde3   :  { %5136 = vmatprep.subr.bf16.mxu0 %v8505_v35 }
 0xde4   :  { %v2682_v32 = vrot.slane %v2660_v19, %v5982_v34 }
 0xde6   :  { %5137 = vmatpush3.bf16.msra.mxu0 %v7208_v59 }
 0xde7   :  { %5138 = vmatprep.subr.bf16.mxu0 %v8505_v35 }
 0xdea   :  { %5139 = vmatpush3.bf16.msra.mxu0 %v7215_v41 }
 0xdeb   :  { %5140 = vmatprep.subr.bf16.mxu0 %v8505_v35 }
 0xdee   :  { %5141 = vmatpush3.bf16.msra.mxu0 %v7222_v50 }
 0xdef   :  { %5142 = vmatprep.subr.bf16.mxu0 %v8505_v35 }
 0xdf2   :  { %5143 = vmatpush3.bf16.msra.mxu0 %v7229_v14 }
 0xdf3   :  { %5144 = vmatprep.subr.bf16.mxu0 %v8505_v35 }
 0xdf6   :  { %5145 = vmatpush3.bf16.msra.mxu0 %v7236_v6 }
 0xdf7   :  { %5146 = vmatprep.subr.bf16.mxu0 %v8505_v35 }
 0xdfa   :  { %5147 = vmatpush3.bf16.msra.mxu0 %v7243_v3 }
 0xdfb   :  { %5148 = vmatprep.subr.bf16.mxu0 %v8505_v35 }
 0xdfe   :  { %5149 = vmatpush3.bf16.msra.mxu0 %v7250_v61 }
 0xdff   :  { %4454 = vmatprep.subr.bf16.mxu0 %v7421_v1 }
 0xe01   :  { %5151 = vmatmul.mubr.bf16.vlgmr.msra.gmra.mrb[64].mxu0 %v7312_v20  ;;  %v7446_v20 = vld [vmem:[%s8308_s1 + $0xd0] sm:$0xff]  }
 0xe02   :  { %4455 = vmatpush3.bf16.msra.mxu0 %v7428_v60 }
 0xe03   :  { %4456 = vmatprep.subr.bf16.mxu0 %v7434_v36 }
 0xe06   :  { %4457 = vmatpush3.bf16.msra.mxu0 %v7440_v8 }
 0xe07   :  { %4458 = vmatprep.subr.bf16.mxu0 %v7446_v20 }
 0xe0a   :  { %4459 = vmatpush3.bf16.msra.mxu0 %v7452_v12 }
 0xe0b   :  { %4460 = vmatprep.subr.bf16.mxu0 %v7458_v22 }
 0xe0e   :  { %4461 = vmatpush3.bf16.msra.mxu0 %v7464_v58 }
 0xe0f   :  { %4462 = vmatprep.subr.bf16.mxu0 %v7470_v39 }
 0xe12   :  { %4463 = vmatpush3.bf16.msra.mxu0 %v7476_v44 }
 0xe13   :  { %4464 = vmatprep.subr.bf16.mxu0 %v7482_v46 }
 0xe16   :  { %4465 = vmatpush3.bf16.msra.mxu0 %v7488_v48 }
 0xe17   :  { %4466 = vmatprep.subr.bf16.mxu0 %v7494_v9 }
 0xe1a   :  { %4467 = vmatpush3.bf16.msra.mxu0 %v7500_v40  ;;  %v2692_v40 = vcombine.high %v2682_v32, %v2682_v32 }
 0xe1b   :  { %4468 = vmatprep.subr.bf16.mxu0 %v7506_v4  ;;  %v2690_v4 = vcombine.high %v7517_v54, %v7517_v54 }
 0xe1c   :  { %2774 = vmatprep.mubr.bf16.mxu0 %v2692_v40 }
 0xe1e   :  { %4469 = vmatpush3.bf16.msra.mxu0 %v6902_v28  ;;  %v2645_v28 = vcombine.high %v3906_v5, %v3906_v5  ;;  %v7584_v5 = vld [vmem:[%s8308_s1 + $0x10] sm:$0xff]  }
 0xe1f   :  { %5174 = vmatprep.subr.bf16.mxu0 %v8505_v35 }
 0xe20   :  { %v7526_v9 = vrot.slane %v2645_v28, %v5982_v34  ;;  %v7596_v28 = vld [vmem:[%s8308_s1 + $0x18] sm:$0xff]  }
 0xe21   :  { %2775 = vmatmul.mubr.bf16.vlgmr.msra.gmra.mrb[68].mxu0 %v2690_v4  ;;  %v7578_v4 = vld [vmem:[%s8308_s1 + $0x50] sm:$0xff]  }
 0xe22   :  { %5175 = vmatpush3.bf16.msra.mxu0 %v6919_v7  ;;  %5176 = vmatprep.mubr.msk.bf16.mxu0 %vm5753_vm0, %v8505_v35  ;;  %v7530_v62 = vrot.slane %v7526_v9, %v5982_v34 }
 0xe23   :  { %5180 = vmatprep.subr.bf16.mxu0 %v8505_v35 }
 0xe24   :  { %v2691_v19 = vcombine.high %v7530_v62, %v7530_v62 }
 0xe29   :  { %5177 = vmatmul.mubr.msk.bf16.vlgmr.msra.gmra.mrb[72].mxu0 %vm558_vm1, %v2691_v19  ;;  %v7602_v19 = vld [vmem:[%s8308_s1 + $0x60] sm:$0xff]  }
 0xe2a   :  { %5181 = vmatpush3.bf16.msra.mxu0 %v6935_v43  ;;  %5196 = vmatprep.mubr.msk.bf16.mxu0 %vm5753_vm0, %v8505_v35 }
 0xe2b   :  { %5182 = vmatprep.subr.bf16.mxu0 %v8505_v35 }
 0xe2e   :  { %5183 = vmatpush3.bf16.msra.mxu0 %v6944_v13 }
 0xe2f   :  { %5184 = vmatprep.subr.bf16.mxu0 %v8505_v35 }
 0xe32   :  { %5185 = vmatpush3.bf16.msra.mxu0 %v6951_v37 }
 0xe33   :  { %5186 = vmatprep.subr.bf16.mxu0 %v8505_v35 }
 0xe36   :  { %5187 = vmatpush3.bf16.msra.mxu0 %v6958_v15 }
 0xe37   :  { %5188 = vmatprep.subr.bf16.mxu0 %v8505_v35 }
 0xe3a   :  { %5189 = vmatpush3.bf16.msra.mxu0 %v6965_v25 }
 0xe3b   :  { %5190 = vmatprep.subr.bf16.mxu0 %v8505_v35 }
 0xe3e   :  { %5191 = vmatpush3.bf16.msra.mxu0 %v6972_v30  ;;  %v7560_v30 = vld [vmem:[%s8308_s1] sm:$0xff]  }
 0xe3f   :  { %5192 = vmatprep.subr.bf16.mxu0 %v8505_v35 }
 0xe42   :  { %5193 = vmatpush3.bf16.msra.mxu0 %v6979_v10  ;;  %v7566_v10 = vld [vmem:[%s8308_s1 + $0x48] sm:$0xff]  }
 0xe43   :  { %5194 = vmatprep.subr.bf16.mxu0 %v8505_v35 }
 0xe46   :  { %5195 = vmatpush3.bf16.msra.mxu0 %v6986_v11  ;;  %v7572_v11 = vld [vmem:[%s8308_s1 + $0x8] sm:$0xff]  }
 0xe47   :  { %5240 = vmatprep.subr.bf16.mxu0 %v8505_v35 }
 0xed4   :  { %v2593_v7 = vpop.f32.mrb[64].mxu0 }
 0xed5   :  { %v5436_v43 = vadd.f32 %v7309_v53, %v2593_v7  ;;  %v5152_v13 = vpop.f32.mrb[65].mxu0  ;;  %v7608_v7 = vld [vmem:[%s8308_s1 + $0x20] sm:$0xff]  }
 0xed6   :  { %v2596_v37 = vpop.f32.mrb[66].mxu0  ;;  %v7620_v13 = vld [vmem:[%s8308_s1 + $0x28] sm:$0xff]  }
 0xed7   :  { %5573 = vtanh.f32 %v5436_v43  ;;  %v5153_v15 = vpop.f32.mrb[67].mxu0  ;;  %v7614_v43 = vld [vmem:[%s8308_s1 + $0x68] sm:$0xff]   ;;  %8616 = vst [vmem:[#allocation16_spill] sm:$0xff] %v7620_v13  ;;  %v7626_v37 = vld [vmem:[%s8308_s1 + $0x70] sm:$0xff]  }
 0xed8   :  { %8615 = vst [vmem:[#allocation15_spill] sm:$0xff] %v7614_v43  ;;  %8617 = vst [vmem:[#allocation17_spill] sm:$0xff] %v7626_v37  ;;  %v7632_v15 = vld [vmem:[%s8308_s1 + $0x30] sm:$0xff]  }
 0xed9   :  { %8618 = vst [vmem:[#allocation18_spill] sm:$0xff] %v7632_v15 }
 0xee1   :  { %v5574_v25 = vpop.eup %5573 }
 0xee2   :  { %v7554_v40 = vpack.c.bf16 %v5574_v25, %v5574_v25  ;;  %v2661_v25 = vcombine.high %v7526_v9, %v7526_v9  ;;  %v7653_v9 = vld [vmem:[%s8308_s1 + $0x140] sm:$0xff]  }
 0xee3   :  { %8621 = vst [vmem:[#allocation21_spill] sm:$0xff] %v7653_v9 }
 0xee4   :  { %5171 = vmatmul.mubr.bf16.vlgmr.msra.gmra.mrb[68].mxu1 %v7554_v40 }
 0xee5   :  { %4433 = vmatpush3.bf16.msra.mxu1 %v7560_v30  ;;  %2734 = vmatprep.mubr.bf16.mxu1 %v2682_v32  ;;  %v7590_v32 = vld [vmem:[%s8308_s1 + $0x58] sm:$0xff]  }
 0xee6   :  { %4434 = vmatprep.subr.bf16.mxu1 %v7566_v10 }
 0xee9   :  { %4435 = vmatpush3.bf16.msra.mxu1 %v7572_v11 }
 0xeea   :  { %4436 = vmatprep.subr.bf16.mxu1 %v7578_v4 }
 0xeed   :  { %4437 = vmatpush3.bf16.msra.mxu1 %v7584_v5 }
 0xeee   :  { %4438 = vmatprep.subr.bf16.mxu1 %v7590_v32 }
 0xef1   :  { %4439 = vmatpush3.bf16.msra.mxu1 %v7596_v28 }
 0xef2   :  { %4440 = vmatprep.subr.bf16.mxu1 %v7602_v19 }
 0xef5   :  { %4441 = vmatpush3.bf16.msra.mxu1 %v7608_v7 }
 0xef6   :  { %4442 = vmatprep.subr.bf16.mxu1 %v7614_v43  ;;  %v2689_v43 = vrot.slane %v2661_v25, %v5982_v34  ;;  %v7666_v25 = vld [vmem:[%s8308_s1 + $0x148] sm:$0xff]  }
 0xef7   :  { %8623 = vst [vmem:[#allocation23_spill] sm:$0xff] %v7666_v25 }
 0xef9   :  { %4443 = vmatpush3.bf16.msra.mxu1 %v7620_v13  ;;  %v7640_v13 = vld [vmem:[%s8308_s1 + $0x78] sm:$0xff]  }
 0xefa   :  { %4444 = vmatprep.subr.bf16.mxu1 %v7626_v37  ;;  %8619 = vst [vmem:[#allocation19_spill] sm:$0xff] %v7640_v13  ;;  %v7646_v37 = vld [vmem:[%s8308_s1 + $0x38] sm:$0xff]  }
 0xefb   :  { %8620 = vst [vmem:[#allocation20_spill] sm:$0xff] %v7646_v37 }
 0xefd   :  { %4445 = vmatpush3.bf16.msra.mxu1 %v7632_v15 }
 0xefe   :  { %4446 = vmatprep.subr.bf16.mxu1 %v7640_v13  ;;  %v7660_v13 = vld [vmem:[%s8308_s1 + $0x100] sm:$0xff]  }
 0xeff   :  { %8622 = vst [vmem:[#allocation22_spill] sm:$0xff] %v7660_v13 }
 0xf01   :  { %4447 = vmatpush3.bf16.msra.mxu1 %v7646_v37 }
 0xf02   :  { %4476 = vmatprep.subr.bf16.mxu1 %v7653_v9  ;;  %v7672_v9 = vld [vmem:[%s8308_s1 + $0x108] sm:$0xff]  }
 0xf03   :  { %8624 = vst [vmem:[#allocation24_spill] sm:$0xff] %v7672_v9 }
 0xf04   :  { %2735 = vmatmul.mubr.bf16.vlgmr.msra.gmra.mrb[72].mxu1 %v7517_v54  ;;  %v7678_v54 = vld [vmem:[%s8308_s1 + $0x150] sm:$0xff]  }
 0xf05   :  { %4477 = vmatpush3.bf16.msra.mxu1 %v7660_v13  ;;  %2814 = vmatprep.mubr.bf16.mxu1 %v2689_v43  ;;  %8625 = vst [vmem:[#allocation25_spill] sm:$0xff] %v7678_v54  ;;  %v7684_v43 = vld [vmem:[%s8308_s1 + $0x110] sm:$0xff]  }
 0xf06   :  { %4478 = vmatprep.subr.bf16.mxu1 %v7666_v25  ;;  %8626 = vst [vmem:[#allocation26_spill] sm:$0xff] %v7684_v43  ;;  %v7690_v25 = vld [vmem:[%s8308_s1 + $0x158] sm:$0xff]  }
 0xf07   :  { %8627 = vst [vmem:[#allocation3_spill] sm:$0xff] %v7690_v25 }
 0xf09   :  { %4479 = vmatpush3.bf16.msra.mxu1 %v7672_v9  ;;  %v7696_v9 = vld [vmem:[%s8308_s1 + $0x118] sm:$0xff]  }
 0xf0a   :  { %4480 = vmatprep.subr.bf16.mxu1 %v7678_v54  ;;  %8628 = vst [vmem:[#allocation4_spill] sm:$0xff] %v7696_v9  ;;  %v7702_v54 = vld [vmem:[%s8308_s1 + $0x160] sm:$0xff]  }
 0xf0b   :  { %8629 = vst [vmem:[#allocation5_spill] sm:$0xff] %v7702_v54 }
 0xf0d   :  { %4481 = vmatpush3.bf16.msra.mxu1 %v7684_v43 }
 0xf0e   :  { %4482 = vmatprep.subr.bf16.mxu1 %v7690_v25 }
 0xf11   :  { %4483 = vmatpush3.bf16.msra.mxu1 %v7696_v9 }
 0xf12   :  { %4484 = vmatprep.subr.bf16.mxu1 %v7702_v54 }
 0xf15   :  { %4485 = vmatpush3.bf16.msra.mxu1 %v8596_v16  ;;  %v8630_v16 = vld [vmem:[#allocation9_spill] sm:$0xff] }
 0xf16   :  { %4486 = vmatprep.subr.bf16.mxu1 %v8597_v33  ;;  %v8631_v33 = vld [vmem:[#allocation10_spill] sm:$0xff] }
 0xf19   :  { %4487 = vmatpush3.bf16.msra.mxu1 %v8598_v51  ;;  %v8632_v51 = vld [vmem:[#allocation11_spill] sm:$0xff] }
 0xf1a   :  { %4488 = vmatprep.subr.bf16.mxu1 %v8599_v45  ;;  %v4470_v45 = vpop.f32.mrb[68].mxu0 }
 0xf1d   :  { %4489 = vmatpush3.bf16.msra.mxu1 %v8600_v47  ;;  %v4471_v47 = vpop.f32.mrb[69].mxu0 }
 0xf1e   :  { %4490 = vmatprep.subr.bf16.mxu1 %v8601_v2  ;;  %v4472_v2 = vadd.f32 %v4471_v47, %v4470_v45 }
 0xf21   :  { %4491 = vmatpush3.bf16.msra.mxu1 %v8602_v24  ;;  %v4473_v24 = vpop.f32.mrb[70].mxu0 }
 0xf22   :  { %5200 = vmatprep.subr.bf16.mxu1 %v8505_v35 }
 0xf24   :  { %2815 = vmatmul.mubr.bf16.vlgmr.msra.gmra.mrb[76].mxu1 %v7530_v62 }
 0xf25   :  { %5201 = vmatpush3.bf16.msra.mxu1 %v8603_v27  ;;  %5216 = vmatprep.mubr.msk.bf16.mxu1 %vm5753_vm0, %v8505_v35  ;;  %v4474_v27 = vpop.f32.mrb[71].mxu0 }
 0xf26   :  { %5202 = vmatprep.subr.bf16.mxu1 %v8505_v35 }
 0xf29   :  { %5203 = vmatpush3.bf16.msra.mxu1 %v8604_v55  ;;  %v2856_v55 = vpop.f32.mrb[72].mxu0 }
 0xf2a   :  { %5204 = vmatprep.subr.bf16.mxu1 %v8505_v35 }
 0xf2d   :  { %5205 = vmatpush3.bf16.msra.mxu1 %v8605_v23  ;;  %v5178_v23 = vpop.f32.mrb[73].mxu0 }
 0xf2e   :  { %5206 = vmatprep.subr.bf16.mxu1 %v8505_v35 }
 0xf31   :  { %5207 = vmatpush3.bf16.msra.mxu1 %v8606_v56  ;;  %v2859_v56 = vpop.f32.mrb[74].mxu0 }
 0xf32   :  { %5208 = vmatprep.subr.bf16.mxu1 %v8505_v35 }
 0xf35   :  { %5209 = vmatpush3.bf16.msra.mxu1 %v8607_v63  ;;  %v5179_v63 = vpop.f32.mrb[75].mxu0 }
 0xf36   :  { %5210 = vmatprep.subr.bf16.mxu1 %v8505_v35 }
 0xf39   :  { %5211 = vmatpush3.bf16.msra.mxu1 %v8630_v16  ;;  %v8633_v16 = vld [vmem:[#allocation12_spill] sm:$0xff] }
 0xf3a   :  { %5212 = vmatprep.subr.bf16.mxu1 %v8505_v35 }
 0xf3d   :  { %5213 = vmatpush3.bf16.msra.mxu1 %v8631_v33 }
 0xf3e   :  { %5214 = vmatprep.subr.bf16.mxu1 %v8505_v35 }
 0xf41   :  { %5215 = vmatpush3.bf16.msra.mxu1 %v8632_v51 }
 0xf42   :  { %5220 = vmatprep.subr.bf16.mxu1 %v8505_v35 }
 0xfb7   :  { %v2636_v62 = vpop.f32.mrb[68].mxu1 }
 0xfb8   :  { %v2637_v54 = vadd.f32 %v8633_v16, %v2636_v62  ;;  %v5172_v9 = vpop.f32.mrb[69].mxu1 }
 0xfb9   :  { %v2639_v33 = vpop.f32.mrb[70].mxu1 }
 0xfba   :  { %3804 = vst [vmem:[%s8318_s10 + $0x8] sm:$0x3] %v2637_v54  ;;  %v5173_v51 = vpop.f32.mrb[71].mxu1  ;;  %v7834_v54 = vld [vmem:[%s8310_s3 + $0x8] sm:$0xff]  }
 0xfbb   :  { %v7869_v51 = vld [vmem:[%s8310_s3 + $0x30] sm:$0xff]  }
 0xfd7   :  { %v4448_v25 = vpop.f32.mrb[72].mxu1 }
 0xfd8   :  { %v4449_v43 = vpop.f32.mrb[73].mxu1 }
 0xfd9   :  { %v4450_v13 = vadd.f32 %v4449_v43, %v4448_v25  ;;  %v4451_v45 = vpop.f32.mrb[74].mxu1  ;;  %v7825_v25 = vld [vmem:[%s8310_s3] sm:$0xff]   ;;  %v7841_v43 = vld [vmem:[%s8310_s3 + $0x10] sm:$0xff]  }
 0xfda   :  { %v4452_v47 = vpop.f32.mrb[75].mxu1  ;;  %v7876_v45 = vld [vmem:[%s8310_s3 + $0x38] sm:$0xff]  }
 0xfdb   :  { %v2737_v24 = vadd.f32 %v7129_v42, %v4450_v13 }
 0xfdd   :  { %v2777_v27 = vadd.f32 %v4472_v2, %v2737_v24  ;;  %v7848_v2 = vld [vmem:[%s8310_s3 + $0x18] sm:$0xff]  }
 0xff7   :  { %v4492_v23 = vpop.f32.mrb[76].mxu1 }
 0xff8   :  { %v4493_v56 = vpop.f32.mrb[77].mxu1 }
 0xff9   :  { %v4494_v63 = vadd.f32 %v4493_v56, %v4492_v23  ;;  %v4495_v37 = vpop.f32.mrb[78].mxu1 }
 0xffa   :  { %v4496_v62 = vpop.f32.mrb[79].mxu1 }
 0xffb   :  { %v2817_v9 = vadd.f32 %v4494_v63, %v2777_v27 }
 0xffd   :  { %v2857_v33 = vadd.f32 %v2856_v55, %v2817_v9  ;;  %v7855_v55 = vld [vmem:[%s8310_s3 + $0x20] sm:$0xff]   ;;  %v8638_v9 = vld [vmem:[#allocation16_spill] sm:$0xff] }
 0xfff   :  { %v2862_v16 = vmax.f32 %v2857_v33, 0.0  ;;  %v8639_v33 = vld [vmem:[#allocation17_spill] sm:$0xff] }
0x1001   :  { %v2863_v15 = vpack.c.bf16 %v2862_v16, %v2862_v16  ;;  %v7862_v16 = vld [vmem:[%s8310_s3 + $0x28] sm:$0xff]  }
0x1003   :  { %5197 = vmatmul.mubr.bf16.vlgmr.msra.gmra.mrb[76].mxu0 %v2863_v15 }
0x1004   :  { %5241 = vmatpush3.bf16.msra.mxu0 %v7135_v49  ;;  %5256 = vmatprep.mubr.msk.bf16.mxu0 %vm5753_vm0, %v8505_v35 }
0x1005   :  { %5242 = vmatprep.subr.bf16.mxu0 %v8505_v35 }
0x1008   :  { %5243 = vmatpush3.bf16.msra.mxu0 %v7144_v57 }
0x1009   :  { %5244 = vmatprep.subr.bf16.mxu0 %v8505_v35 }
0x100c   :  { %5245 = vmatpush3.bf16.msra.mxu0 %v7151_v29 }
0x100d   :  { %5246 = vmatprep.subr.bf16.mxu0 %v8505_v35 }
0x1010   :  { %5247 = vmatpush3.bf16.msra.mxu0 %v7158_v52 }
0x1011   :  { %5248 = vmatprep.subr.bf16.mxu0 %v8505_v35 }
0x1014   :  { %5249 = vmatpush3.bf16.msra.mxu0 %v7165_v18 }
0x1015   :  { %5250 = vmatprep.subr.bf16.mxu0 %v8505_v35 }
0x1018   :  { %5251 = vmatpush3.bf16.msra.mxu0 %v7172_v26  ;;  %v8634_v26 = vld [vmem:[#allocation2_spill] sm:$0xff] }
0x1019   :  { %5252 = vmatprep.subr.bf16.mxu0 %v8505_v35 }
0x101c   :  { %5253 = vmatpush3.bf16.msra.mxu0 %v7179_v31  ;;  %v8635_v31 = vld [vmem:[#allocation13_spill] sm:$0xff] }
0x101d   :  { %5254 = vmatprep.subr.bf16.mxu0 %v8505_v35 }
0x1020   :  { %5255 = vmatpush3.bf16.msra.mxu0 %v7186_v0  ;;  %v8636_v0 = vld [vmem:[#allocation14_spill] sm:$0xff] }
0x1021   :  { %4536 = vmatprep.subr.bf16.mxu0 %v7397_v21 }
0x10d6   :  { %v2898_v42 = vpop.f32.mrb[76].mxu0 }
0x10d7   :  { %v2899_v49 = vadd.f32 %v7193_v38, %v2898_v42  ;;  %v5198_v57 = vpop.f32.mrb[77].mxu0  ;;  %v7792_v38 = vld [vmem:[%s8308_s1 + $0xb8] sm:$0xff]   ;;  %v8640_v42 = vld [vmem:[#allocation18_spill] sm:$0xff] }
0x10d8   :  { %v2901_v29 = vpop.f32.mrb[78].mxu0  ;;  %v8641_v57 = vld [vmem:[#allocation19_spill] sm:$0xff] }
0x10d9   :  { %v2904_v52 = vpack.c.bf16 %v2899_v49, %v2899_v49  ;;  %v5199_v18 = vpop.f32.mrb[79].mxu0  ;;  %v8642_v29 = vld [vmem:[#allocation20_spill] sm:$0xff] }
0x10da   :  { %v8643_v18 = vld [vmem:[#allocation21_spill] sm:$0xff] }
0x10db   :  { %5217 = vmatmul.mubr.bf16.vlgmr.msra.gmra.mrb[80].mxu1 %v2904_v52 }
0x10dc   :  { %5221 = vmatpush3.bf16.msra.mxu1 %v7199_v17  ;;  %5236 = vmatprep.mubr.msk.bf16.mxu1 %vm5753_vm0, %v8505_v35  ;;  %v3908_v17 = vld [vmem:[%s8309_s0 + $0x2a] sm:$0x7f] }
0x10dd   :  { %5222 = vmatprep.subr.bf16.mxu1 %v8505_v35 }
0x10e0   :  { %5223 = vmatpush3.bf16.msra.mxu1 %v7208_v59  ;;  %v3038_v59 = vrot.slane %v3908_v17, %v5982_v34 }
0x10e1   :  { %5224 = vmatprep.subr.bf16.mxu1 %v8505_v35 }
0x10e4   :  { %5225 = vmatpush3.bf16.msra.mxu1 %v7215_v41  ;;  %v3046_v41 = vcombine.high %v3038_v59, %v3038_v59 }
0x10e5   :  { %5226 = vmatprep.subr.bf16.mxu1 %v8505_v35 }
0x10e8   :  { %5227 = vmatpush3.bf16.msra.mxu1 %v7222_v50  ;;  %v3068_v50 = vrot.slane %v3046_v41, %v5982_v34  ;;  %v8646_v41 = vld [vmem:[#allocation24_spill] sm:$0xff] }
0x10e9   :  { %5228 = vmatprep.subr.bf16.mxu1 %v8505_v35 }
0x10ec   :  { %5229 = vmatpush3.bf16.msra.mxu1 %v7229_v14  ;;  %v7802_v14 = vrot.slane %v3038_v59, %v5982_v34  ;;  %v8645_v59 = vld [vmem:[#allocation23_spill] sm:$0xff] }
0x10ed   :  { %5230 = vmatprep.subr.bf16.mxu1 %v8505_v35 }
0x10f0   :  { %5231 = vmatpush3.bf16.msra.mxu1 %v7236_v6  ;;  %v3078_v6 = vcombine.high %v3068_v50, %v3068_v50 }
0x10f1   :  { %5232 = vmatprep.subr.bf16.mxu1 %v8505_v35 }
0x10f4   :  { %5233 = vmatpush3.bf16.msra.mxu1 %v7243_v3  ;;  %v3076_v3 = vcombine.high %v7802_v14, %v7802_v14 }
0x10f5   :  { %5234 = vmatprep.subr.bf16.mxu1 %v8505_v35 }
0x10f8   :  { %5235 = vmatpush3.bf16.msra.mxu1 %v7250_v61  ;;  %v7809_v61 = vld [vmem:[%s8308_s1 + $0x180] sm:$0xff]  }
0x10f9   :  { %4558 = vmatprep.subr.bf16.mxu1 %v7421_v1 }
0x10fb   :  { %5237 = vmatmul.mubr.bf16.vlgmr.msra.gmra.mrb[80].mxu1 %v7554_v40  ;;  %v3031_v40 = vcombine.high %v3908_v17, %v3908_v17  ;;  %v8644_v17 = vld [vmem:[#allocation22_spill] sm:$0xff] }
0x10fc   :  { %4559 = vmatpush3.bf16.msra.mxu1 %v7428_v60  ;;  %3160 = vmatprep.mubr.bf16.mxu1 %v3078_v6  ;;  %v8648_v6 = vld [vmem:[#allocation26_spill] sm:$0xff] }
0x10fd   :  { %4560 = vmatprep.subr.bf16.mxu1 %v7434_v36  ;;  %v3045_v13 = vrot.slane %v3031_v40, %v5982_v34  ;;  %v8650_v40 = vld [vmem:[#allocation4_spill] sm:$0xff] }
0x10ff   :  { %v7817_v37 = vrot.slane %v3045_v13, %v5982_v34  ;;  %v3047_v49 = vcombine.high %v3045_v13, %v3045_v13  ;;  %v8651_v13 = vld [vmem:[#allocation5_spill] sm:$0xff] }
0x1100   :  { %4561 = vmatpush3.bf16.msra.mxu1 %v7440_v8 }
0x1101   :  { %4562 = vmatprep.subr.bf16.mxu1 %v7446_v20  ;;  %v3077_v15 = vcombine.high %v7817_v37, %v7817_v37  ;;  %v3075_v52 = vrot.slane %v3047_v49, %v5982_v34  ;;  %v7966_v49 = vld [vmem:[%s8311_s5 + $0x8] sm:$0xff]  }
0x1102   :  { %8660 = vst [vmem:[#allocation14_spill] sm:$0xff] %v7966_v49 }
0x1104   :  { %4563 = vmatpush3.bf16.msra.mxu1 %v7452_v12 }
0x1105   :  { %4564 = vmatprep.subr.bf16.mxu1 %v7458_v22 }
0x1108   :  { %4565 = vmatpush3.bf16.msra.mxu1 %v7464_v58 }
0x1109   :  { %4566 = vmatprep.subr.bf16.mxu1 %v7470_v39 }
0x110c   :  { %4567 = vmatpush3.bf16.msra.mxu1 %v7476_v44 }
0x110d   :  { %4568 = vmatprep.subr.bf16.mxu1 %v7482_v46 }
0x1110   :  { %4569 = vmatpush3.bf16.msra.mxu1 %v7488_v48 }
0x1111   :  { %4570 = vmatprep.subr.bf16.mxu1 %v8634_v26 }
0x1114   :  { %4571 = vmatpush3.bf16.msra.mxu1 %v8635_v31 }
0x1115   :  { %4572 = vmatprep.subr.bf16.mxu1 %v8636_v0 }
0x1118   :  { %4573 = vmatpush3.bf16.msra.mxu1 %v7792_v38 }
0x1119   :  { %5260 = vmatprep.subr.bf16.mxu1 %v8505_v35 }
0x111b   :  { %3161 = vmatmul.mubr.bf16.vlgmr.msra.gmra.mrb[84].mxu1 %v3076_v3  ;;  %v8649_v3 = vld [vmem:[#allocation3_spill] sm:$0xff] }
0x111c   :  { %5261 = vmatpush3.bf16.msra.mxu1 %v7809_v61  ;;  %5262 = vmatprep.mubr.msk.bf16.mxu1 %vm5753_vm0, %v8505_v35 }
0x111d   :  { %5266 = vmatprep.subr.bf16.mxu1 %v8505_v35 }
0x1123   :  { %5263 = vmatmul.mubr.msk.bf16.vlgmr.msra.gmra.mrb[88].mxu1 %vm558_vm1, %v3077_v15  ;;  %v7919_v15 = vld [vmem:[%s8308_s1 + $0x168] sm:$0xff]  }
0x1124   :  { %5267 = vmatpush3.bf16.msra.mxu1 %v7825_v25  ;;  %5282 = vmatprep.mubr.msk.bf16.mxu1 %vm5753_vm0, %v8505_v35  ;;  %8653 = vst [vmem:[#allocation7_spill] sm:$0xff] %v7919_v15 }
0x1125   :  { %5268 = vmatprep.subr.bf16.mxu1 %v8505_v35 }
0x1128   :  { %5269 = vmatpush3.bf16.msra.mxu1 %v7834_v54 }
0x1129   :  { %5270 = vmatprep.subr.bf16.mxu1 %v8505_v35 }
0x112c   :  { %5271 = vmatpush3.bf16.msra.mxu1 %v7841_v43 }
0x112d   :  { %5272 = vmatprep.subr.bf16.mxu1 %v8505_v35 }
0x1130   :  { %5273 = vmatpush3.bf16.msra.mxu1 %v7848_v2 }
0x1131   :  { %5274 = vmatprep.subr.bf16.mxu1 %v8505_v35 }
0x1134   :  { %5275 = vmatpush3.bf16.msra.mxu1 %v7855_v55 }
0x1135   :  { %5276 = vmatprep.subr.bf16.mxu1 %v8505_v35 }
0x1138   :  { %5277 = vmatpush3.bf16.msra.mxu1 %v7862_v16 }
0x1139   :  { %5278 = vmatprep.subr.bf16.mxu1 %v8505_v35 }
0x113c   :  { %5279 = vmatpush3.bf16.msra.mxu1 %v7869_v51 }
0x113d   :  { %5280 = vmatprep.subr.bf16.mxu1 %v8505_v35 }
0x1140   :  { %5281 = vmatpush3.bf16.msra.mxu1 %v7876_v45 }
0x1141   :  { %5326 = vmatprep.subr.bf16.mxu1 %v8505_v35 }
0x11ce   :  { %v2979_v47 = vpop.f32.mrb[80].mxu1 }
0x11cf   :  { %v5437_v24 = vadd.f32 %v7309_v53, %v2979_v47  ;;  %v5238_v27 = vpop.f32.mrb[81].mxu1  ;;  %v8637_v53 = vld [vmem:[#allocation15_spill] sm:$0xff] }
0x11d0   :  { %v2982_v23 = vpop.f32.mrb[82].mxu1  ;;  %v7925_v47 = vld [vmem:[%s8308_s1 + $0x128] sm:$0xff]   ;;  %v7937_v27 = vld [vmem:[%s8308_s1 + $0x130] sm:$0xff]  }
0x11d1   :  { %5575 = vtanh.f32 %v5437_v24  ;;  %v5239_v56 = vpop.f32.mrb[83].mxu1  ;;  %8654 = vst [vmem:[#allocation8_spill] sm:$0xff] %v7925_v47  ;;  %v7931_v24 = vld [vmem:[%s8308_s1 + $0x170] sm:$0xff]   ;;  %8656 = vst [vmem:[#allocation10_spill] sm:$0xff] %v7937_v27  ;;  %v7943_v23 = vld [vmem:[%s8308_s1 + $0x178] sm:$0xff]  }
0x11d2   :  { %8655 = vst [vmem:[#allocation9_spill] sm:$0xff] %v7931_v24  ;;  %8657 = vst [vmem:[#allocation11_spill] sm:$0xff] %v7943_v23  ;;  %v7949_v56 = vld [vmem:[%s8308_s1 + $0x138] sm:$0xff]  }
0x11d3   :  { %8658 = vst [vmem:[#allocation2_spill] sm:$0xff] %v7949_v56 }
0x11db   :  { %v5576_v63 = vpop.eup %5575 }
0x11dc   :  { %v7881_v62 = vpack.c.bf16 %v5576_v63, %v5576_v63  ;;  %v7957_v63 = vld [vmem:[%s8311_s5] sm:$0xff]  }
0x11dd   :  { %8659 = vst [vmem:[#allocation13_spill] sm:$0xff] %v7957_v63 }
0x11de   :  { %5257 = vmatmul.mubr.bf16.vlgmr.msra.gmra.mrb[80].mxu0 %v7881_v62 }
0x11df   :  { %4537 = vmatpush3.bf16.msra.mxu0 %v7560_v30  ;;  %3120 = vmatprep.mubr.bf16.mxu0 %v3068_v50  ;;  %v8647_v50 = vld [vmem:[#allocation25_spill] sm:$0xff] }
0x11e0   :  { %4538 = vmatprep.subr.bf16.mxu0 %v7566_v10 }
0x11e3   :  { %4539 = vmatpush3.bf16.msra.mxu0 %v7572_v11 }
0x11e4   :  { %4540 = vmatprep.subr.bf16.mxu0 %v7578_v4 }
0x11e7   :  { %4541 = vmatpush3.bf16.msra.mxu0 %v7584_v5 }
0x11e8   :  { %4542 = vmatprep.subr.bf16.mxu0 %v7590_v32 }
0x11eb   :  { %4543 = vmatpush3.bf16.msra.mxu0 %v7596_v28 }
0x11ec   :  { %4544 = vmatprep.subr.bf16.mxu0 %v7602_v19 }
0x11ef   :  { %4545 = vmatpush3.bf16.msra.mxu0 %v7608_v7 }
0x11f0   :  { %4546 = vmatprep.subr.bf16.mxu0 %v8637_v53 }
0x11f3   :  { %4547 = vmatpush3.bf16.msra.mxu0 %v8638_v9 }
0x11f4   :  { %4548 = vmatprep.subr.bf16.mxu0 %v8639_v33 }
0x11f7   :  { %4549 = vmatpush3.bf16.msra.mxu0 %v8640_v42 }
0x11f8   :  { %4550 = vmatprep.subr.bf16.mxu0 %v8641_v57 }
0x11fb   :  { %4551 = vmatpush3.bf16.msra.mxu0 %v8642_v29 }
0x11fc   :  { %4580 = vmatprep.subr.bf16.mxu0 %v8643_v18 }
0x11fe   :  { %3121 = vmatmul.mubr.bf16.vlgmr.msra.gmra.mrb[84].mxu0 %v7802_v14  ;;  %v7913_v14 = vld [vmem:[%s8308_s1 + $0x120] sm:$0xff]  }
0x11ff   :  { %4581 = vmatpush3.bf16.msra.mxu0 %v8644_v17  ;;  %3200 = vmatprep.mubr.bf16.mxu0 %v3075_v52  ;;  %8652 = vst [vmem:[#allocation6_spill] sm:$0xff] %v7913_v14  ;;  %v7980_v52 = vld [vmem:[%s8311_s5 + $0x18] sm:$0xff]  }
0x1200   :  { %4582 = vmatprep.subr.bf16.mxu0 %v8645_v59  ;;  %8662 = vst [vmem:[#allocation16_spill] sm:$0xff] %v7980_v52 }
0x1203   :  { %4583 = vmatpush3.bf16.msra.mxu0 %v8646_v41 }
0x1204   :  { %4584 = vmatprep.subr.bf16.mxu0 %v8647_v50 }
0x1207   :  { %4585 = vmatpush3.bf16.msra.mxu0 %v8648_v6 }
0x1208   :  { %4586 = vmatprep.subr.bf16.mxu0 %v8649_v3 }
0x120b   :  { %4587 = vmatpush3.bf16.msra.mxu0 %v8650_v40 }
0x120c   :  { %4588 = vmatprep.subr.bf16.mxu0 %v8651_v13  ;;  %v8667_v13 = vld [vmem:[#allocation12_spill] sm:$0xff] }
0x120f   :  { %4589 = vmatpush3.bf16.msra.mxu0 %v7913_v14 }
0x1210   :  { %4590 = vmatprep.subr.bf16.mxu0 %v7919_v15 }
0x1213   :  { %4591 = vmatpush3.bf16.msra.mxu0 %v7925_v47 }
0x1214   :  { %4592 = vmatprep.subr.bf16.mxu0 %v7931_v24 }
0x1217   :  { %4593 = vmatpush3.bf16.msra.mxu0 %v7937_v27 }
0x1218   :  { %4594 = vmatprep.subr.bf16.mxu0 %v7943_v23 }
0x121b   :  { %4595 = vmatpush3.bf16.msra.mxu0 %v7949_v56 }
0x121c   :  { %5286 = vmatprep.subr.bf16.mxu0 %v8505_v35 }
0x121e   :  { %3201 = vmatmul.mubr.bf16.vlgmr.msra.gmra.mrb[88].mxu0 %v7817_v37  ;;  %v7973_v37 = vld [vmem:[%s8311_s5 + $0x10] sm:$0xff]  }
0x121f   :  { %5287 = vmatpush3.bf16.msra.mxu0 %v7957_v63  ;;  %5302 = vmatprep.mubr.msk.bf16.mxu0 %vm5753_vm0, %v8505_v35  ;;  %8661 = vst [vmem:[#allocation15_spill] sm:$0xff] %v7973_v37 }
0x1220   :  { %5288 = vmatprep.subr.bf16.mxu0 %v8505_v35 }
0x1223   :  { %5289 = vmatpush3.bf16.msra.mxu0 %v7966_v49  ;;  %v7987_v49 = vld [vmem:[%s8311_s5 + $0x20] sm:$0xff]  }
0x1224   :  { %5290 = vmatprep.subr.bf16.mxu0 %v8505_v35  ;;  %8663 = vst [vmem:[#allocation17_spill] sm:$0xff] %v7987_v49 }
0x1227   :  { %5291 = vmatpush3.bf16.msra.mxu0 %v7973_v37  ;;  %v7994_v37 = vld [vmem:[%s8311_s5 + $0x28] sm:$0xff]  }
0x1228   :  { %5292 = vmatprep.subr.bf16.mxu0 %v8505_v35  ;;  %8664 = vst [vmem:[#allocation18_spill] sm:$0xff] %v7994_v37 }
0x122b   :  { %5293 = vmatpush3.bf16.msra.mxu0 %v7980_v52  ;;  %v8001_v52 = vld [vmem:[%s8311_s5 + $0x30] sm:$0xff]  }
0x122c   :  { %5294 = vmatprep.subr.bf16.mxu0 %v8505_v35  ;;  %8665 = vst [vmem:[#allocation19_spill] sm:$0xff] %v8001_v52 }
0x122f   :  { %5295 = vmatpush3.bf16.msra.mxu0 %v7987_v49  ;;  %v8008_v49 = vld [vmem:[%s8311_s5 + $0x38] sm:$0xff]  }
0x1230   :  { %5296 = vmatprep.subr.bf16.mxu0 %v8505_v35  ;;  %8666 = vst [vmem:[#allocation20_spill] sm:$0xff] %v8008_v49 }
0x1233   :  { %5297 = vmatpush3.bf16.msra.mxu0 %v7994_v37  ;;  %v4574_v37 = vpop.f32.mrb[84].mxu1 }
0x1234   :  { %5298 = vmatprep.subr.bf16.mxu0 %v8505_v35  ;;  %v4575_v63 = vpop.f32.mrb[85].mxu1 }
0x1235   :  { %v4576_v56 = vadd.f32 %v4575_v63, %v4574_v37  ;;  %v4577_v23 = vpop.f32.mrb[86].mxu1 }
0x1236   :  { %v4578_v27 = vpop.f32.mrb[87].mxu1 }
0x1237   :  { %5299 = vmatpush3.bf16.msra.mxu0 %v8001_v52  ;;  %v3242_v24 = vpop.f32.mrb[88].mxu1 }
0x1238   :  { %5300 = vmatprep.subr.bf16.mxu0 %v8505_v35  ;;  %v5264_v47 = vpop.f32.mrb[89].mxu1 }
0x1239   :  { %v3245_v15 = vpop.f32.mrb[90].mxu1 }
0x123a   :  { %v5265_v52 = vpop.f32.mrb[91].mxu1  ;;  %v8019_v15 = vld [vmem:[%s8312_s2] ss:$0 sm:$0xff] }
0x123b   :  { %5301 = vmatpush3.bf16.msra.mxu0 %v8008_v49 }
0x123c   :  { %5306 = vmatprep.subr.bf16.mxu0 %v8505_v35 }
0x12b1   :  { %v3022_v14 = vpop.f32.mrb[80].mxu0 }
0x12b2   :  { %v3023_v40 = vadd.f32 %v8667_v13, %v3022_v14  ;;  %v5258_v3 = vpop.f32.mrb[81].mxu0 }
0x12b3   :  { %v3025_v6 = vpop.f32.mrb[82].mxu0 }
0x12b4   :  { %3805 = vst [vmem:[%s8318_s10 + $0xa] sm:$0x3] %v3023_v40  ;;  %v5259_v49 = vpop.f32.mrb[83].mxu0 }
0x12d1   :  { %v4552_v50 = vpop.f32.mrb[84].mxu0 }
0x12d2   :  { %v4553_v41 = vpop.f32.mrb[85].mxu0 }
0x12d3   :  { %v4554_v59 = vadd.f32 %v4553_v41, %v4552_v50  ;;  %v4555_v63 = vpop.f32.mrb[86].mxu0  ;;  %v8025_v41 = vld [vmem:[%s8314_s8] sm:$0xff]   ;;  %v8048_v50 = vld [vmem:[%s8314_s8 + $0x18] sm:$0xff]  }
0x12d4   :  { %v4556_v23 = vpop.f32.mrb[87].mxu0  ;;  %v8069_v63 = vld [vmem:[%s8314_s8 + $0x30] sm:$0xff]  }
0x12d5   :  { %v3123_v47 = vadd.f32 %v8019_v15, %v4554_v59  ;;  %v8034_v59 = vld [vmem:[%s8314_s8 + $0x8] sm:$0xff]   ;;  %v8076_v23 = vld [vmem:[%s8314_s8 + $0x38] sm:$0xff]  }
0x12d7   :  { %v3163_v13 = vadd.f32 %v4576_v56, %v3123_v47  ;;  %v8062_v56 = vld [vmem:[%s8314_s8 + $0x28] sm:$0xff]  }
0x12f1   :  { %v4596_v3 = vpop.f32.mrb[88].mxu0 }
0x12f2   :  { %v4597_v6 = vpop.f32.mrb[89].mxu0 }
0x12f3   :  { %v4598_v14 = vadd.f32 %v4597_v6, %v4596_v3  ;;  %v4599_v27 = vpop.f32.mrb[90].mxu0 }
0x12f4   :  { %v4600_v37 = vpop.f32.mrb[91].mxu0 }
0x12f5   :  { %v3203_v40 = vadd.f32 %v4598_v14, %v3163_v13  ;;  %v8083_v13 = vld [vmem:[%s8315_s4] ss:$0 sm:$0xff] }
0x12f7   :  { %v3243_v49 = vadd.f32 %v3242_v24, %v3203_v40  ;;  %v8055_v24 = vld [vmem:[%s8314_s8 + $0x20] sm:$0xff]  }
0x12f8   :  { %v8089_v40 = vld [vmem:[%s8313_s7] sm:$0xff]  }
0x12f9   :  { %v3248_v52 = vmax.f32 %v3243_v49, 0.0  ;;  %v8105_v49 = vld [vmem:[%s8313_s7 + $0x10] sm:$0xff]  }
0x12fb   :  { %v3249_v17 = vpack.c.bf16 %v3248_v52, %v3248_v52  ;;  %v8112_v52 = vld [vmem:[%s8313_s7 + $0x18] sm:$0xff]  }
0x12fd   :  { %5283 = vmatmul.mubr.bf16.vlgmr.msra.gmra.mrb[92].mxu1 %v3249_v17  ;;  %v8041_v17 = vld [vmem:[%s8314_s8 + $0x10] sm:$0xff]  }
0x12fe   :  { %5327 = vmatpush3.bf16.msra.mxu1 %v8025_v41  ;;  %5342 = vmatprep.mubr.msk.bf16.mxu1 %vm5753_vm0, %v8505_v35 }
0x12ff   :  { %5328 = vmatprep.subr.bf16.mxu1 %v8505_v35 }
0x1302   :  { %5329 = vmatpush3.bf16.msra.mxu1 %v8034_v59 }
0x1303   :  { %5330 = vmatprep.subr.bf16.mxu1 %v8505_v35 }
0x1306   :  { %5331 = vmatpush3.bf16.msra.mxu1 %v8041_v17 }
0x1307   :  { %5332 = vmatprep.subr.bf16.mxu1 %v8505_v35 }
0x130a   :  { %5333 = vmatpush3.bf16.msra.mxu1 %v8048_v50 }
0x130b   :  { %5334 = vmatprep.subr.bf16.mxu1 %v8505_v35 }
0x130e   :  { %5335 = vmatpush3.bf16.msra.mxu1 %v8055_v24 }
0x130f   :  { %5336 = vmatprep.subr.bf16.mxu1 %v8505_v35 }
0x1312   :  { %5337 = vmatpush3.bf16.msra.mxu1 %v8062_v56 }
0x1313   :  { %5338 = vmatprep.subr.bf16.mxu1 %v8505_v35 }
0x1316   :  { %5339 = vmatpush3.bf16.msra.mxu1 %v8069_v63 }
0x1317   :  { %5340 = vmatprep.subr.bf16.mxu1 %v8505_v35 }
0x131a   :  { %5341 = vmatpush3.bf16.msra.mxu1 %v8076_v23 }
0x131b   :  { %4640 = vmatprep.subr.bf16.mxu1 %v7397_v21  ;;  %v8098_v21 = vld [vmem:[%s8313_s7 + $0x8] sm:$0xff]  }
0x13d0   :  { %v3284_v47 = vpop.f32.mrb[92].mxu1 }
0x13d1   :  { %v3285_v3 = vadd.f32 %v8083_v13, %v3284_v47  ;;  %v5284_v6 = vpop.f32.mrb[93].mxu1  ;;  %v8119_v47 = vld [vmem:[%s8313_s7 + $0x20] sm:$0xff]  }
0x13d2   :  { %v3287_v14 = vpop.f32.mrb[94].mxu1  ;;  %v8133_v6 = vld [vmem:[%s8313_s7 + $0x30] sm:$0xff]  }
0x13d3   :  { %v3290_v27 = vpack.c.bf16 %v3285_v3, %v3285_v3  ;;  %v5285_v37 = vpop.f32.mrb[95].mxu1  ;;  %v8126_v3 = vld [vmem:[%s8313_s7 + $0x28] sm:$0xff]   ;;  %v8140_v14 = vld [vmem:[%s8313_s7 + $0x38] sm:$0xff]  }
0x13d5   :  { %5303 = vmatmul.mubr.bf16.vlgmr.msra.gmra.mrb[92].mxu0 %v3290_v27  ;;  %v8690_v27 = vld [vmem:[#allocation20_spill] sm:$0xff] }
0x13d6   :  { %5307 = vmatpush3.bf16.msra.mxu0 %v8089_v40  ;;  %5322 = vmatprep.mubr.msk.bf16.mxu0 %vm5753_vm0, %v8505_v35 }
0x13d7   :  { %5308 = vmatprep.subr.bf16.mxu0 %v8505_v35 }
0x13da   :  { %5309 = vmatpush3.bf16.msra.mxu0 %v8098_v21 }
0x13db   :  { %5310 = vmatprep.subr.bf16.mxu0 %v8505_v35 }
0x13de   :  { %5311 = vmatpush3.bf16.msra.mxu0 %v8105_v49 }
0x13df   :  { %5312 = vmatprep.subr.bf16.mxu0 %v8505_v35 }
0x13e2   :  { %5313 = vmatpush3.bf16.msra.mxu0 %v8112_v52 }
0x13e3   :  { %5314 = vmatprep.subr.bf16.mxu0 %v8505_v35 }
0x13e6   :  { %5315 = vmatpush3.bf16.msra.mxu0 %v8119_v47 }
0x13e7   :  { %5316 = vmatprep.subr.bf16.mxu0 %v8505_v35 }
0x13ea   :  { %5317 = vmatpush3.bf16.msra.mxu0 %v8126_v3 }
0x13eb   :  { %5318 = vmatprep.subr.bf16.mxu0 %v8505_v35 }
0x13ee   :  { %5319 = vmatpush3.bf16.msra.mxu0 %v8133_v6 }
0x13ef   :  { %5320 = vmatprep.subr.bf16.mxu0 %v8505_v35 }
0x13f2   :  { %5321 = vmatpush3.bf16.msra.mxu0 %v8140_v14 }
0x13f3   :  { %4662 = vmatprep.subr.bf16.mxu0 %v7421_v1  ;;  %v3910_v1 = vld [vmem:[%s8309_s0 + $0x31] sm:$0x7f] }
0x13f5   :  { %5323 = vmatmul.mubr.bf16.vlgmr.msra.gmra.mrb[92].mxu0 %v7881_v62  ;;  %v8682_v62 = vld [vmem:[#allocation2_spill] sm:$0xff] }
0x13f6   :  { %4663 = vmatpush3.bf16.msra.mxu0 %v7428_v60  ;;  %v3424_v60 = vrot.slane %v3910_v1, %v5982_v34 }
0x13f7   :  { %4664 = vmatprep.subr.bf16.mxu0 %v7434_v36 }
0x13f8   :  { %v3432_v36 = vcombine.high %v3424_v60, %v3424_v60 }
0x13fa   :  { %4665 = vmatpush3.bf16.msra.mxu0 %v7440_v8  ;;  %v3454_v8 = vrot.slane %v3432_v36, %v5982_v34 }
0x13fb   :  { %4666 = vmatprep.subr.bf16.mxu0 %v7446_v20  ;;  %v3440_v20 = vrot.slane %v3424_v60, %v5982_v34 }
0x13fe   :  { %4667 = vmatpush3.bf16.msra.mxu0 %v7452_v12  ;;  %v3464_v12 = vcombine.high %v3454_v8, %v3454_v8 }
0x13ff   :  { %4668 = vmatprep.subr.bf16.mxu0 %v7458_v22  ;;  %v3462_v22 = vcombine.high %v3440_v20, %v3440_v20 }
0x1400   :  { %3546 = vmatprep.mubr.bf16.mxu0 %v3464_v12 }
0x1402   :  { %4669 = vmatpush3.bf16.msra.mxu0 %v7464_v58  ;;  %v3417_v58 = vcombine.high %v3910_v1, %v3910_v1 }
0x1403   :  { %4670 = vmatprep.subr.bf16.mxu0 %v7470_v39 }
0x1404   :  { %v3431_v39 = vrot.slane %v3417_v58, %v5982_v34 }
0x1406   :  { %4671 = vmatpush3.bf16.msra.mxu0 %v7476_v44  ;;  %v8173_v44 = vrot.slane %v3431_v39, %v5982_v34 }
0x1407   :  { %4672 = vmatprep.subr.bf16.mxu0 %v7482_v46 }
0x1408   :  { %v3463_v46 = vcombine.high %v8173_v44, %v8173_v44 }
0x140a   :  { %4673 = vmatpush3.bf16.msra.mxu0 %v7488_v48 }
0x140b   :  { %4674 = vmatprep.subr.bf16.mxu0 %v8634_v26  ;;  %v8199_v26 = vld [vmem:[%s8316_s6] ss:$0 sm:$0xff] }
0x140e   :  { %4675 = vmatpush3.bf16.msra.mxu0 %v8635_v31 }
0x140f   :  { %4676 = vmatprep.subr.bf16.mxu0 %v8636_v0 }
0x1412   :  { %4677 = vmatpush3.bf16.msra.mxu0 %v7792_v38 }
0x1413   :  { %5346 = vmatprep.subr.bf16.mxu0 %v8505_v35 }
0x1415   :  { %3547 = vmatmul.mubr.bf16.vlgmr.msra.gmra.mrb[96].mxu0 %v3462_v22 }
0x1416   :  { %5347 = vmatpush3.bf16.msra.mxu0 %v7809_v61  ;;  %5348 = vmatprep.mubr.msk.bf16.mxu0 %vm5753_vm0, %v8505_v35 }
0x1417   :  { %5352 = vmatprep.subr.bf16.mxu0 %v8505_v35 }
0x141d   :  { %5349 = vmatmul.mubr.msk.bf16.vlgmr.msra.gmra.mrb[100].mxu0 %vm558_vm1, %v3463_v46 }
0x141e   :  { %5353 = vmatpush3.bf16.msra.mxu0 %v7825_v25  ;;  %5368 = vmatprep.mubr.msk.bf16.mxu0 %vm5753_vm0, %v8505_v35 }
0x141f   :  { %5354 = vmatprep.subr.bf16.mxu0 %v8505_v35 }
0x1422   :  { %5355 = vmatpush3.bf16.msra.mxu0 %v7834_v54 }
0x1423   :  { %5356 = vmatprep.subr.bf16.mxu0 %v8505_v35 }
0x1426   :  { %5357 = vmatpush3.bf16.msra.mxu0 %v7841_v43  ;;  %v8675_v43 = vld [vmem:[#allocation5_spill] sm:$0xff] }
0x1427   :  { %5358 = vmatprep.subr.bf16.mxu0 %v8505_v35 }
0x142a   :  { %5359 = vmatpush3.bf16.msra.mxu0 %v7848_v2  ;;  %v8677_v2 = vld [vmem:[#allocation7_spill] sm:$0xff] }
0x142b   :  { %5360 = vmatprep.subr.bf16.mxu0 %v8505_v35 }
0x142e   :  { %5361 = vmatpush3.bf16.msra.mxu0 %v7855_v55  ;;  %v8678_v55 = vld [vmem:[#allocation8_spill] sm:$0xff] }
0x142f   :  { %5362 = vmatprep.subr.bf16.mxu0 %v8505_v35 }
0x1432   :  { %5363 = vmatpush3.bf16.msra.mxu0 %v7862_v16  ;;  %v8679_v16 = vld [vmem:[#allocation9_spill] sm:$0xff] }
0x1433   :  { %5364 = vmatprep.subr.bf16.mxu0 %v8505_v35 }
0x1436   :  { %5365 = vmatpush3.bf16.msra.mxu0 %v7869_v51  ;;  %v8680_v51 = vld [vmem:[#allocation10_spill] sm:$0xff] }
0x1437   :  { %5366 = vmatprep.subr.bf16.mxu0 %v8505_v35 }
0x143a   :  { %5367 = vmatpush3.bf16.msra.mxu0 %v7876_v45  ;;  %v8681_v45 = vld [vmem:[#allocation11_spill] sm:$0xff] }
0x143b   :  { %5412 = vmatprep.subr.bf16.mxu0 %v8505_v35 }
0x14c8   :  { %v3365_v48 = vpop.f32.mrb[92].mxu0 }
0x14c9   :  { %v5438_v31 = vadd.f32 %v8199_v26, %v3365_v48  ;;  %v5324_v0 = vpop.f32.mrb[93].mxu0 }
0x14ca   :  { %v3368_v38 = vpop.f32.mrb[94].mxu0 }
0x14cb   :  { %5577 = vtanh.f32 %v5438_v31  ;;  %v5325_v61 = vpop.f32.mrb[95].mxu0 }
0x14d5   :  { %v5578_v25 = vpop.eup %5577 }
0x14d6   :  { %v8202_v54 = vpack.c.bf16 %v5578_v25, %v5578_v25 }
0x14d8   :  { %5343 = vmatmul.mubr.bf16.vlgmr.msra.gmra.mrb[96].mxu1 %v8202_v54 }
0x14d9   :  { %4641 = vmatpush3.bf16.msra.mxu1 %v7560_v30  ;;  %3506 = vmatprep.mubr.bf16.mxu1 %v3454_v8  ;;  %v3433_v30 = vcombine.high %v3431_v39, %v3431_v39 }
0x14da   :  { %4642 = vmatprep.subr.bf16.mxu1 %v7566_v10 }
0x14db   :  { %v3461_v10 = vrot.slane %v3433_v30, %v5982_v34  ;;  %v8676_v34 = vld [vmem:[#allocation6_spill] sm:$0xff] }
0x14dd   :  { %4643 = vmatpush3.bf16.msra.mxu1 %v7572_v11  ;;  %v8668_v11 = vld [vmem:[#allocation22_spill] sm:$0xff] }
0x14de   :  { %4644 = vmatprep.subr.bf16.mxu1 %v7578_v4  ;;  %v8669_v4 = vld [vmem:[#allocation23_spill] sm:$0xff] }
0x14e1   :  { %4645 = vmatpush3.bf16.msra.mxu1 %v7584_v5  ;;  %v8670_v5 = vld [vmem:[#allocation24_spill] sm:$0xff] }
0x14e2   :  { %4646 = vmatprep.subr.bf16.mxu1 %v7590_v32  ;;  %v8671_v32 = vld [vmem:[#allocation25_spill] sm:$0xff] }
0x14e5   :  { %4647 = vmatpush3.bf16.msra.mxu1 %v7596_v28  ;;  %v8672_v28 = vld [vmem:[#allocation26_spill] sm:$0xff] }
0x14e6   :  { %4648 = vmatprep.subr.bf16.mxu1 %v7602_v19  ;;  %v8673_v19 = vld [vmem:[#allocation3_spill] sm:$0xff] }
0x14e8   :  { %v4678_v37 = vpop.f32.mrb[96].mxu0 }
0x14e9   :  { %4649 = vmatpush3.bf16.msra.mxu1 %v7608_v7  ;;  %v8674_v7 = vld [vmem:[#allocation4_spill] sm:$0xff]  ;;  %v4679_v1 = vpop.f32.mrb[97].mxu0 }
0x14ea   :  { %4650 = vmatprep.subr.bf16.mxu1 %v8637_v53  ;;  %v8683_v53 = vld [vmem:[#allocation13_spill] sm:$0xff]  ;;  %v4680_v60 = vadd.f32 %v4679_v1, %v4678_v37  ;;  %v4681_v36 = vpop.f32.mrb[98].mxu0 }
0x14eb   :  { %v4682_v8 = vpop.f32.mrb[99].mxu0 }
0x14ed   :  { %4651 = vmatpush3.bf16.msra.mxu1 %v8638_v9  ;;  %v8684_v9 = vld [vmem:[#allocation14_spill] sm:$0xff] }
0x14ee   :  { %4652 = vmatprep.subr.bf16.mxu1 %v8639_v33  ;;  %v8685_v33 = vld [vmem:[#allocation15_spill] sm:$0xff] }
0x14f1   :  { %4653 = vmatpush3.bf16.msra.mxu1 %v8640_v42  ;;  %v8686_v42 = vld [vmem:[#allocation16_spill] sm:$0xff] }
0x14f2   :  { %4654 = vmatprep.subr.bf16.mxu1 %v8641_v57  ;;  %v8687_v57 = vld [vmem:[#allocation17_spill] sm:$0xff] }
0x14f5   :  { %4655 = vmatpush3.bf16.msra.mxu1 %v8642_v29  ;;  %v8688_v29 = vld [vmem:[#allocation18_spill] sm:$0xff] }
0x14f6   :  { %4684 = vmatprep.subr.bf16.mxu1 %v8643_v18  ;;  %v8689_v18 = vld [vmem:[#allocation19_spill] sm:$0xff] }
0x14f8   :  { %3507 = vmatmul.mubr.bf16.vlgmr.msra.gmra.mrb[100].mxu1 %v3440_v20  ;;  %v3628_v20 = vpop.f32.mrb[100].mxu0 }
0x14f9   :  { %4685 = vmatpush3.bf16.msra.mxu1 %v8668_v11  ;;  %3586 = vmatprep.mubr.bf16.mxu1 %v3461_v10  ;;  %v5350_v12 = vpop.f32.mrb[101].mxu0 }
0x14fa   :  { %4686 = vmatprep.subr.bf16.mxu1 %v8669_v4  ;;  %v3631_v22 = vpop.f32.mrb[102].mxu0 }
0x14fb   :  { %v5351_v58 = vpop.f32.mrb[103].mxu0 }
0x14fd   :  { %4687 = vmatpush3.bf16.msra.mxu1 %v8670_v5 }
0x14fe   :  { %4688 = vmatprep.subr.bf16.mxu1 %v8671_v32 }
0x1501   :  { %4689 = vmatpush3.bf16.msra.mxu1 %v8672_v28 }
0x1502   :  { %4690 = vmatprep.subr.bf16.mxu1 %v8673_v19 }
0x1505   :  { %4691 = vmatpush3.bf16.msra.mxu1 %v8674_v7 }
0x1506   :  { %4692 = vmatprep.subr.bf16.mxu1 %v8675_v43 }
0x1509   :  { %4693 = vmatpush3.bf16.msra.mxu1 %v8676_v34 }
0x150a   :  { %4694 = vmatprep.subr.bf16.mxu1 %v8677_v2 }
0x150d   :  { %4695 = vmatpush3.bf16.msra.mxu1 %v8678_v55 }
0x150e   :  { %4696 = vmatprep.subr.bf16.mxu1 %v8679_v16 }
0x1511   :  { %4697 = vmatpush3.bf16.msra.mxu1 %v8680_v51 }
0x1512   :  { %4698 = vmatprep.subr.bf16.mxu1 %v8681_v45 }
0x1515   :  { %4699 = vmatpush3.bf16.msra.mxu1 %v8682_v62 }
0x1516   :  { %5372 = vmatprep.subr.bf16.mxu1 %v8505_v35 }
0x1518   :  { %3587 = vmatmul.mubr.bf16.vlgmr.msra.gmra.mrb[104].mxu1 %v8173_v44  ;;  %v8260_v44 = vld [vmem:[%s8317_s9] ss:$0 sm:$0xff] }
0x1519   :  { %5373 = vmatpush3.bf16.msra.mxu1 %v8683_v53  ;;  %5388 = vmatprep.mubr.msk.bf16.mxu1 %vm5753_vm0, %v8505_v35 }
0x151a   :  { %5374 = vmatprep.subr.bf16.mxu1 %v8505_v35 }
0x151d   :  { %5375 = vmatpush3.bf16.msra.mxu1 %v8684_v9 }
0x151e   :  { %5376 = vmatprep.subr.bf16.mxu1 %v8505_v35 }
0x1521   :  { %5377 = vmatpush3.bf16.msra.mxu1 %v8685_v33 }
0x1522   :  { %5378 = vmatprep.subr.bf16.mxu1 %v8505_v35 }
0x1525   :  { %5379 = vmatpush3.bf16.msra.mxu1 %v8686_v42 }
0x1526   :  { %5380 = vmatprep.subr.bf16.mxu1 %v8505_v35 }
0x1529   :  { %5381 = vmatpush3.bf16.msra.mxu1 %v8687_v57 }
0x152a   :  { %5382 = vmatprep.subr.bf16.mxu1 %v8505_v35 }
0x152d   :  { %5383 = vmatpush3.bf16.msra.mxu1 %v8688_v29 }
0x152e   :  { %5384 = vmatprep.subr.bf16.mxu1 %v8505_v35 }
0x1531   :  { %5385 = vmatpush3.bf16.msra.mxu1 %v8689_v18 }
0x1532   :  { %5386 = vmatprep.subr.bf16.mxu1 %v8505_v35 }
0x1535   :  { %5387 = vmatpush3.bf16.msra.mxu1 %v8690_v27 }
0x1536   :  { %5392 = vmatprep.subr.bf16.mxu1 %v8505_v35 }
0x15ab   :  { %v3408_v39 = vpop.f32.mrb[96].mxu1 }
0x15ac   :  { %v3409_v46 = vadd.f32 %v8260_v44, %v3408_v39  ;;  %v5344_v48 = vpop.f32.mrb[97].mxu1 }
0x15ad   :  { %v3411_v31 = vpop.f32.mrb[98].mxu1 }
0x15ae   :  { %3806 = vst [vmem:[%s8318_s10 + $0xc] sm:$0x3] %v3409_v46  ;;  %v5345_v0 = vpop.f32.mrb[99].mxu1 }
0x15cb   :  { %v4656_v38 = vpop.f32.mrb[100].mxu1 }
0x15cc   :  { %v4657_v61 = vpop.f32.mrb[101].mxu1 }
0x15cd   :  { %v4658_v25 = vadd.f32 %v4657_v61, %v4656_v38  ;;  %v4659_v30 = vpop.f32.mrb[102].mxu1 }
0x15ce   :  { %v4660_v10 = vpop.f32.mrb[103].mxu1 }
0x15cf   :  { %v3509_v11 = vadd.f32 %v8019_v15, %v4658_v25 }
0x15d1   :  { %v3549_v4 = vadd.f32 %v4680_v60, %v3509_v11 }
0x15eb   :  { %v4700_v5 = vpop.f32.mrb[104].mxu1 }
0x15ec   :  { %v4701_v32 = vpop.f32.mrb[105].mxu1 }
0x15ed   :  { %v4702_v28 = vadd.f32 %v4701_v32, %v4700_v5  ;;  %v4703_v19 = vpop.f32.mrb[106].mxu1 }
0x15ee   :  { %v4704_v7 = vpop.f32.mrb[107].mxu1 }
0x15ef   :  { %v3589_v43 = vadd.f32 %v4702_v28, %v3549_v4 }
0x15f1   :  { %v3629_v34 = vadd.f32 %v3628_v20, %v3589_v43 }
0x15f3   :  { %v3634_v2 = vmax.f32 %v3629_v34, 0.0 }
0x15f5   :  { %v3635_v55 = vpack.c.bf16 %v3634_v2, %v3634_v2 }
0x15f7   :  { %5369 = vmatmul.mubr.bf16.vlgmr.msra.gmra.mrb[104].mxu0 %v3635_v55 }
0x15f8   :  { %5413 = vmatpush3.bf16.msra.mxu0 %v8025_v41  ;;  %5428 = vmatprep.mubr.msk.bf16.mxu0 %vm5753_vm0, %v8505_v35 }
0x15f9   :  { %5414 = vmatprep.subr.bf16.mxu0 %v8505_v35 }
0x15fc   :  { %5415 = vmatpush3.bf16.msra.mxu0 %v8034_v59 }
0x15fd   :  { %5416 = vmatprep.subr.bf16.mxu0 %v8505_v35 }
0x1600   :  { %5417 = vmatpush3.bf16.msra.mxu0 %v8041_v17 }
0x1601   :  { %5418 = vmatprep.subr.bf16.mxu0 %v8505_v35 }
0x1604   :  { %5419 = vmatpush3.bf16.msra.mxu0 %v8048_v50 }
0x1605   :  { %5420 = vmatprep.subr.bf16.mxu0 %v8505_v35 }
0x1608   :  { %5421 = vmatpush3.bf16.msra.mxu0 %v8055_v24 }
0x1609   :  { %5422 = vmatprep.subr.bf16.mxu0 %v8505_v35 }
0x160c   :  { %5423 = vmatpush3.bf16.msra.mxu0 %v8062_v56 }
0x160d   :  { %5424 = vmatprep.subr.bf16.mxu0 %v8505_v35 }
0x1610   :  { %5425 = vmatpush3.bf16.msra.mxu0 %v8069_v63 }
0x1611   :  { %5426 = vmatprep.subr.bf16.mxu0 %v8505_v35 }
0x1614   :  { %5427 = vmatpush3.bf16.msra.mxu0 %v8076_v23 }
0x16ca   :  { %v3670_v15 = vpop.f32.mrb[104].mxu0 }
0x16cb   :  { %v3671_v41 = vadd.f32 %v8083_v13, %v3670_v15  ;;  %v5370_v59 = vpop.f32.mrb[105].mxu0 }
0x16cc   :  { %v3673_v17 = vpop.f32.mrb[106].mxu0 }
0x16cd   :  { %v3676_v50 = vpack.c.bf16 %v3671_v41, %v3671_v41  ;;  %v5371_v16 = vpop.f32.mrb[107].mxu0 }
0x16cf   :  { %5389 = vmatmul.mubr.bf16.vlgmr.msra.gmra.mrb[108].mxu1 %v3676_v50 }
0x16d0   :  { %5393 = vmatpush3.bf16.msra.mxu1 %v8089_v40  ;;  %5408 = vmatprep.mubr.msk.bf16.mxu1 %vm5753_vm0, %v8505_v35 }
0x16d1   :  { %5394 = vmatprep.subr.bf16.mxu1 %v8505_v35 }
0x16d4   :  { %5395 = vmatpush3.bf16.msra.mxu1 %v8098_v21 }
0x16d5   :  { %5396 = vmatprep.subr.bf16.mxu1 %v8505_v35 }
0x16d8   :  { %5397 = vmatpush3.bf16.msra.mxu1 %v8105_v49 }
0x16d9   :  { %5398 = vmatprep.subr.bf16.mxu1 %v8505_v35 }
0x16dc   :  { %5399 = vmatpush3.bf16.msra.mxu1 %v8112_v52 }
0x16dd   :  { %5400 = vmatprep.subr.bf16.mxu1 %v8505_v35 }
0x16e0   :  { %5401 = vmatpush3.bf16.msra.mxu1 %v8119_v47 }
0x16e1   :  { %5402 = vmatprep.subr.bf16.mxu1 %v8505_v35 }
0x16e4   :  { %5403 = vmatpush3.bf16.msra.mxu1 %v8126_v3 }
0x16e5   :  { %5404 = vmatprep.subr.bf16.mxu1 %v8505_v35 }
0x16e8   :  { %5405 = vmatpush3.bf16.msra.mxu1 %v8133_v6 }
0x16e9   :  { %5406 = vmatprep.subr.bf16.mxu1 %v8505_v35 }
0x16ec   :  { %5407 = vmatpush3.bf16.msra.mxu1 %v8140_v14 }
0x16ef   :  { %5409 = vmatmul.mubr.bf16.vlgmr.msra.gmra.mrb[108].mxu1 %v8202_v54 }
0x17c2   :  { %v3751_v24 = vpop.f32.mrb[108].mxu1 }
0x17c3   :  { %v5439_v56 = vadd.f32 %v8199_v26, %v3751_v24  ;;  %v5410_v63 = vpop.f32.mrb[109].mxu1 }
0x17c4   :  { %v3754_v23 = vpop.f32.mrb[110].mxu1 }
0x17c5   :  { %5579 = vtanh.f32 %v5439_v56  ;;  %v5411_v13 = vpop.f32.mrb[111].mxu1 }
0x17cf   :  { %v5580_v40 = vpop.eup %5579 }
0x17d0   :  { %v3759_v21 = vpack.c.bf16 %v5580_v40, %v5580_v40 }
0x17d2   :  { %5429 = vmatmul.mubr.bf16.vlgmr.msra.gmra.mrb[108].mxu0 %v3759_v21 }
0x18a5   :  { %v3794_v49 = vpop.f32.mrb[108].mxu0 }
0x18a6   :  { %v3795_v52 = vadd.f32 %v8260_v44, %v3794_v49  ;;  %v5430_v47 = vpop.f32.mrb[109].mxu0 }
0x18a7   :  { %v3797_v3 = vpop.f32.mrb[110].mxu0 }
0x18a8   :  { %3807 = vst [vmem:[%s8318_s10 + $0xe] sm:$0x3] %v3795_v52  ;;  %v5431_v35 = vpop.f32.mrb[111].mxu0 }

</bundles_post_ra>
